<compile_context>
chip_gen: v5e
topology: v5e:2x2
jax: 0.10.0
libtpu: 0.0.40
codegen_flags: <defaults>
</compile_context>

<pallas_src>
import jax
import jax.numpy as jnp
from jax import lax
from jax.experimental import pallas as pl
from jax.experimental.pallas import tpu as pltpu

EPS = 3e-4          # nn.BatchNorm2d(depth, momentum=3e-4) -> eps = 3e-4 (positional)
PADH = 18           # row halo: covers dilations 6 / 12 / 18
PADW = 24           # column pad: >= 18 and a multiple of 8 (centre slice aligned)
LANE = 128
OFF_TAPS = tuple((ky, kx) for ky in range(3) for kx in range(3) if (ky, kx) != (1, 1))


def _cdiv(a, b):
    return (a + b - 1) // b


def _round_up(a, b):
    return _cdiv(a, b) * b


def _divisors(n):
    ds = set()
    i = 1
    while i * i <= n:
        if n % i == 0:
            ds.add(i)
            ds.add(n // i)
        i += 1
    return sorted(ds, reverse=True)


def _vmem_capacity_bytes():
    try:
        return int(pltpu.get_tpu_info().vmem_capacity_bytes)
    except Exception:
        return 64 << 20                     # conservative (v7x-sized) fallback


def _const_spec(shape):
    """Resident weight/parameter spec: constant index map, single-buffered."""
    rank = len(shape)
    return pl.BlockSpec(shape, lambda *_: (0,) * rank,
                        pipeline_mode=pl.Buffered(1))


def _pick_rows(total, bytes_per_row, budget):
    cands = [d for d in _divisors(total) if d % 8 == 0 or d == total]
    for d in cands:                                    # descending
        if d * bytes_per_row <= budget:
            return d
    return cands[-1]


def _pass_a_rows(H, W, Wp, Cp, Dp, isz, budget):
    legal = [th for th in _divisors(H) if (th * W) % 8 == 0 or th == H]
    for th in legal:                                   # descending
        halo = th + 2 * PADH
        tm = th * W
        foot = (3 * halo * Wp * Cp * isz               # 2 DMA buffers + loaded value
                + 2 * tm * 4 * Dp * isz                # double-buffered y output tile
                + 2 * tm * Cp * isz                    # centre slice + tap relayouts
                + tm * 4 * Dp * 4                      # f32 merged-centre GEMM result
                + 2 * tm * Dp * 4)                     # f32 branch accumulator
        if foot <= budget:
            return th
    return legal[-1]


def _pass_b_row_bytes(Dp, isz):
    return (2 * 4 * Dp * isz + 2 * 4 * Dp * 4 + 4 * Dp * isz + Dp * 4 + 2 * Dp * isz)


def _pass_c_row_bytes(Dp, NCp, isz):
    return (2 * Dp * isz + 2 * Dp * 4 + Dp * isz + 3 * NCp * 4)


# --------------------------- pass A: branch convolutions ---------------------------
def _make_pass_a_kernel(TH, W, Dp, HALO, HT, Hpp):
    TM = TH * W

    def kernel(x_hbm, wctr_ref, w2_ref, w3_ref, w4_ref,
               y_ref, bstats_ref, xsum_ref, xbuf, sem):
        n = pl.program_id(0)
        t = pl.program_id(1)
        slot = t % 2

        def halo_copy(tt, s):
            return pltpu.make_async_copy(
                x_hbm.at[pl.ds(n * Hpp + tt * TH, HALO)], xbuf.at[s], sem.at[s])

        # manual double-buffered halo DMA.  The chain is self-contained per sample
        # (prime at t==0, prefetch t+1 of the same sample) so the sample axis can
        # run "parallel" on v7x's two TensorCores.
        @pl.when(t == 0)
        def _():
            halo_copy(0, 0).start()

        halo_copy(t, slot).wait()

        @pl.when(t + 1 < HT)
        def _():
            halo_copy(t + 1, 1 - slot).start()

        xt = xbuf[slot]                                          # (HALO, Wp, Cp)
        Cp = xt.shape[-1]
        xc = xt[PADH:PADH + TH, PADW:PADW + W, :].reshape(TM, Cp)

        # 1x1 conv + the three shared-centre taps as one (TM, Cp) x (Cp, 4*Dp) GEMM
        yctr = jnp.dot(xc, wctr_ref[...], preferred_element_type=jnp.float32)

        sums, sqs = [], []
        for k, (w_ref, d) in enumerate(((None, 0), (w2_ref, 6),
                                        (w3_ref, 12), (w4_ref, 18))):
            yb = yctr[:, k * Dp:(k + 1) * Dp]
            if w_ref is not None:                                # 8 off-centre taps
                for i, (ky, kx) in enumerate(OFF_TAPS):
                    r0 = PADH + (ky - 1) * d
                    c0 = PADW + (kx - 1) * d
                    tap = xt[r0:r0 + TH, c0:c0 + W, :].reshape(TM, Cp)
                    yb = yb + jnp.dot(tap, w_ref[i],
                                      preferred_element_type=jnp.float32)
            # stash the pre-BN branch output for pass B (no recompute there)
            y_ref[:, k * Dp:(k + 1) * Dp] = yb.astype(y_ref.dtype)
            sums.append(jnp.sum(yb, axis=0, keepdims=True))
            sqs.append(jnp.sum(yb * yb, axis=0, keepdims=True))

        tile_stats = jnp.concatenate(sums + sqs, axis=0)         # (8, Dp) f32

        @pl.when(t == 0)
        def _():
            bstats_ref[...] = jnp.zeros_like(bstats_ref)
            xsum_ref[...] = jnp.zeros_like(xsum_ref)
        # TODO(synk): E[x^2]-E[x]^2 in f32 can cancel for very large M; switch the
        # per-sample partials to Welford merging if that regime matters.
        bstats_ref[...] += tile_stats
        xsum_ref[...] += jnp.sum(xc.astype(jnp.float32), axis=0, keepdims=True)

    return kernel


# ---------------- pass B: folded branch BN + ReLU, conv2, bn2 statistics -----------
def _pass_b_kernel(y_ref, sc_ref, sh_ref, wc2_ref, v5_ref, yc_ref, s2_ref):
    t = pl.program_id(1)
    ybn = jnp.maximum(
        y_ref[...].astype(jnp.float32) * sc_ref[...] + sh_ref[...], 0.0)
    acc = jnp.dot(ybn.astype(wc2_ref.dtype), wc2_ref[...],
                  preferred_element_type=jnp.float32) + v5_ref[...]
    yc_ref[...] = acc.astype(yc_ref.dtype)

    @pl.when(t == 0)
    def _():
        s2_ref[...] = jnp.zeros_like(s2_ref)
    s2_ref[...] += jnp.concatenate(
        [jnp.sum(acc, axis=0, keepdims=True),
         jnp.sum(acc * acc, axis=0, keepdims=True)], axis=0)


# ---------------------- pass C: folded bn2 + ReLU + conv3(+bias) -------------------
def _pass_c_kernel(yc_ref, sc2_ref, sh2_ref, wc3_ref, bc3_ref, out_ref):
    ycn = jnp.maximum(
        yc_ref[...].astype(jnp.float32) * sc2_ref[...] + sh2_ref[...], 0.0)
    out_ref[...] = (jnp.dot(ycn.astype(wc3_ref.dtype), wc3_ref[...],
                            preferred_element_type=jnp.float32) + bc3_ref[...])


def aspp_forward(x_nchw, p, compute_dtype=jnp.bfloat16):
    N, C, H, W = x_nchw.shape
    D = p['w1'].shape[1]
    NC = p['wc3'].shape[1]
    HW = H * W
    M = N * HW
    cdt = compute_dtype
    isz = jnp.dtype(cdt).itemsize

    Cp = _round_up(C, LANE)
    Dp = _round_up(D, LANE)
    NCp = _round_up(NC, LANE)
    D4 = 4 * Dp
    Wp = W + 2 * PADW
    Hpp = H + 2 * PADH

    # ---- per-generation VMEM budget (v7x 64 MiB, v5e/v6e 128 MiB) & tile sizes ----
    vmem_cap = _vmem_capacity_bytes()
    vmem_limit = int(min(max(32 << 20, vmem_cap - (16 << 20)), 100 << 20))
    margin = 2 << 20
    w_bytes_a = (Cp * D4 + 24 * Cp * Dp) * isz        # single-buffered resident weights
    w_bytes_b = D4 * Dp * isz + (2 * D4 + Dp) * 4
    w_bytes_c = Dp * NCp * isz + (2 * Dp + 2 * NCp) * 4
    budget_a = max(vmem_limit - w_bytes_a - margin, 4 << 20)
    budget_b = max(vmem_limit - w_bytes_b - margin, 4 << 20)
    budget_c = max(vmem_limit - w_bytes_c - margin, 4 << 20)

    TH = _pass_a_rows(H, W, Wp, Cp, Dp, isz, budget_a)
    HT = H // TH
    HALO = TH + 2 * PADH
    TM = TH * W
    TMB = _pick_rows(HW, _pass_b_row_bytes(Dp, isz), budget_b)
    TMC = _pick_rows(M, _pass_c_row_bytes(Dp, NCp, isz), budget_c)

    # ---- zero-padded NHWC input (one shared pad serves dilations 6/12/18) ----
    x_nhwc = jnp.transpose(x_nchw, (0, 2, 3, 1)).astype(jnp.float32)
    xp = jnp.zeros((N, Hpp, Wp, Cp), cdt)
    xp = xp.at[:, PADH:PADH + H, PADW:PADW + W, :C].set(x_nhwc.astype(cdt))
    xp = xp.reshape(N * Hpp, Wp, Cp)                  # flat row axis for the halo DMA

    # ---- lane-padded weights / BN parameters ----
    def pad2(w, r, c, dt):
        return jnp.zeros((r, c), dt).at[:w.shape[0], :w.shape[1]].set(w.astype(dt))

    def padv(v):                                      # (1, D) -> (1, Dp) f32
        return pad2(v, 1, Dp, jnp.float32)

    # merged 1x1-conv + centre-tap weights: columns [k*Dp, k*Dp+D) = branch k
    wctr = jnp.zeros((Cp, D4), cdt)
    wctr = wctr.at[:C, :D].set(p['w1'].astype(cdt))
    for k, name in enumerate(('w2', 'w3', 'w4'), start=1):
        wctr = wctr.at[:C, k * Dp:k * Dp + D].set(p[name][1, 1].astype(cdt))

    def pad_off(w):                                   # (3,3,C,D) -> (8, Cp, Dp)
        w_off = jnp.stack([w[ky, kx] for (ky, kx) in OFF_TAPS], axis=0)
        return jnp.zeros((8, Cp, Dp), cdt).at[:, :C, :D].set(w_off.astype(cdt))

    w2o, w3o, w4o = pad_off(p['w2']), pad_off(p['w3']), pad_off(p['w4'])
    w5p = pad2(p['w5'], Cp, Dp, jnp.float32)
    wc2cat = jnp.zeros((D4, Dp), cdt)                 # conv2 over concat(y1..y4)
    for k in range(4):
        wc2cat = wc2cat.at[k * Dp:k * Dp + D, :D].set(p['wc2'][k].astype(cdt))
    wc2_5 = pad2(p['wc2'][4], Dp, Dp, jnp.float32)    # conv2 block of pooled branch
    wc3p = pad2(p['wc3'], Dp, NCp, cdt)
    bc3p = pad2(p['bc3'], 1, NCp, jnp.float32)

    params_ab = pltpu.CompilerParams(
        dimension_semantics=("parallel", "arbitrary"),   # sample axis -> v7x megacore
        vmem_limit_bytes=vmem_limit)

    # ---- pass A: branch convs once, stash pre-BN outputs, BN / pooling statistics ----
    y_slab, bstats, xsum = pl.pallas_call(
        _make_pass_a_kernel(TH, W, Dp, HALO, HT, Hpp),
        grid=(N, HT),
        in_specs=[pl.BlockSpec(memory_space=pl.ANY),     # x stays in HBM; manual DMA
                  _const_spec((Cp, D4)),
                  _const_spec((8, Cp, Dp)),
                  _const_spec((8, Cp, Dp)),
                  _const_spec((8, Cp, Dp))],
        out_specs=[pl.BlockSpec((None, TM, D4), lambda n, t: (n, t, 0)),
                   pl.BlockSpec((None, 8, Dp), lambda n, t: (n, 0, 0)),
                   pl.BlockSpec((None, 1, Cp), lambda n, t: (n, 0, 0))],
        out_shape=(jax.ShapeDtypeStruct((N, HW, D4), cdt),
                   jax.ShapeDtypeStruct((N, 8, Dp), jnp.float32),
                   jax.ShapeDtypeStruct((N, 1, Cp), jnp.float32)),
        scratch_shapes=[pltpu.VMEM((2, HALO, Wp, Cp), cdt),
                        pltpu.SemaphoreType.DMA((2,))],
        compiler_params=params_ab,
    )(xp, wctr, w2o, w3o, w4o)

    # fold training-mode BatchNorm (biased variance) into per-channel scale/shift
    bsum = jnp.sum(bstats, axis=0)                       # (8, Dp) f32
    mean14 = bsum[0:4] / M
    var14 = jnp.maximum(bsum[4:8] / M - mean14 * mean14, 0.0)
    g14 = jnp.concatenate([padv(p['g1']), padv(p['g2']),
                           padv(p['g3']), padv(p['g4'])], axis=0)
    b14 = jnp.concatenate([padv(p['b1']), padv(p['b2']),
                           padv(p['b3']), padv(p['b4'])], axis=0)
    sc4 = g14 * lax.rsqrt(var14 + EPS)
    sh4 = b14 - mean14 * sc4
    sc14 = sc4.reshape(1, D4)
    sh14 = sh4.reshape(1, D4)

    # pooled branch ("bilinear upsample" of a 1x1 map == per-sample row broadcast):
    # tiny O(N*D) math done in the wrapper between passes.
    xg = xsum[:, 0, :] / float(HW)                       # (N, Cp)
    y5l = jnp.dot(xg, w5p)                               # (N, Dp)
    m5 = jnp.mean(y5l, axis=0, keepdims=True)
    v5 = jnp.mean((y5l - m5) ** 2, axis=0, keepdims=True)
    y5 = jnp.maximum((y5l - m5) * lax.rsqrt(v5 + EPS) * padv(p['g5'])
                     + padv(p['b5']), 0.0)
    v5c = jnp.dot(y5, wc2_5).reshape(N, 1, Dp)           # its conv2 contribution

    # ---- pass B: folded BN + ReLU, conv2 as ONE (.,4Dp)x(4Dp,Dp) GEMM, bn2 stats ----
    yc, s2 = pl.pallas_call(
        _pass_b_kernel,
        grid=(N, HW // TMB),
        in_specs=[pl.BlockSpec((None, TMB, D4), lambda n, t: (n, t, 0)),
                  _const_spec((1, D4)),
                  _const_spec((1, D4)),
                  _const_spec((D4, Dp)),
                  pl.BlockSpec((None, 1, Dp), lambda n, t: (n, 0, 0))],
        out_specs=[pl.BlockSpec((None, TMB, Dp), lambda n, t: (n, t, 0)),
                   pl.BlockSpec((None, 2, Dp), lambda n, t: (n, 0, 0))],
        out_shape=(jax.ShapeDtypeStruct((N, HW, Dp), cdt),
                   jax.ShapeDtypeStruct((N, 2, Dp), jnp.float32)),
        compiler_params=params_ab,
    )(y_slab, sc14, sh14, wc2cat, v5c)

    s2sum = jnp.sum(s2, axis=0)                          # (2, Dp)
    mean2 = s2sum[0:1] / M
    var2 = jnp.maximum(s2sum[1:2] / M - mean2 * mean2, 0.0)
    sc2 = padv(p['gc2']) * lax.rsqrt(var2 + EPS)
    sh2 = padv(p['bc2']) - mean2 * sc2

    # ---- pass C: folded bn2 + ReLU + conv3(+bias) on large lane-dense tiles ----
    out = pl.pallas_call(
        _pass_c_kernel,
        grid=(M // TMC,),
        in_specs=[pl.BlockSpec((TMC, Dp), lambda i: (i, 0)),
                  _const_spec((1, Dp)),
                  _const_spec((1, Dp)),
                  _const_spec((Dp, NCp)),
                  _const_spec((1, NCp))],
        out_specs=pl.BlockSpec((TMC, NCp), lambda i: (i, 0)),
        out_shape=jax.ShapeDtypeStruct((M, NCp), jnp.float32),
        compiler_params=pltpu.CompilerParams(
            dimension_semantics=("parallel",),
            vmem_limit_bytes=vmem_limit),
    )(yc.reshape(M, Dp), sc2, sh2, wc3p, bc3p)

    out = out[:, :NC].reshape(N, H, W, NC)
    return jnp.transpose(out, (0, 3, 1, 2))              # back to NCHW


def init_params(key, C, D, NC):
    ks = jax.random.split(key, 20)
    n = lambda k, s, sc=0.1: sc * jax.random.normal(k, s, jnp.float32)
    p = {
        'w1': n(ks[0], (C, D)),
        'w2': n(ks[1], (3, 3, C, D)),
        'w3': n(ks[2], (3, 3, C, D)),
        'w4': n(ks[3], (3, 3, C, D)),
        'w5': n(ks[4], (C, D)),
        'wc2': n(ks[5], (5, D, D)),
        'wc3': n(ks[6], (D, NC)),
        'bc3': n(ks[7], (1, NC)),
    }
    names = ['1', '2', '3', '4', '5', 'c2']
    for i, name in enumerate(names):
        p['g' + name] = 1.0 + n(ks[8 + 2 * i], (1, D))
        p['b' + name] = n(ks[9 + 2 * i], (1, D))
    return p


def aspp_reference(x_nchw, p):
    # pure-JAX reference (lax conv) for correctness checking
    x = jnp.transpose(x_nchw, (0, 2, 3, 1)).astype(jnp.float32)  # NHWC
    N, H, W, C = x.shape
    D = p['w1'].shape[1]

    def conv(inp, w_hwio, dil=1, pad=0):
        return lax.conv_general_dilated(
            inp, w_hwio, window_strides=(1, 1),
            padding=((pad, pad), (pad, pad)), rhs_dilation=(dil, dil),
            dimension_numbers=('NHWC', 'HWIO', 'NHWC'))

    def bn_relu(y, g, b):
        mean = jnp.mean(y, axis=(0, 1, 2), keepdims=True)
        var = jnp.mean((y - mean) ** 2, axis=(0, 1, 2), keepdims=True)
        return jnp.maximum((y - mean) * lax.rsqrt(var + EPS)
                           * g.reshape(1, 1, 1, -1) + b.reshape(1, 1, 1, -1), 0.0)

    y1 = bn_relu(conv(x, p['w1'].reshape(1, 1, C, D)), p['g1'], p['b1'])
    y2 = bn_relu(conv(x, p['w2'], 6, 6), p['g2'], p['b2'])
    y3 = bn_relu(conv(x, p['w3'], 12, 12), p['g3'], p['b3'])
    y4 = bn_relu(conv(x, p['w4'], 18, 18), p['g4'], p['b4'])
    xg = jnp.mean(x, axis=(1, 2), keepdims=True)
    y5 = bn_relu(conv(xg, p['w5'].reshape(1, 1, C, D)), p['g5'], p['b5'])
    y5 = jnp.broadcast_to(y5, (N, H, W, D))
    cat = jnp.concatenate([y1, y2, y3, y4, y5], axis=-1)
    yc = bn_relu(conv(cat, p['wc2'].reshape(1, 1, 5 * D, D)), p['gc2'], p['bc2'])
    out = conv(yc, p['wc3'].reshape(1, 1, D, -1)) + p['bc3'].reshape(1, 1, 1, -1)
    return jnp.transpose(out, (0, 3, 1, 2))


if __name__ == "__main__":
    key = jax.random.PRNGKey(0)
    kx, kp = jax.random.split(key)
    N, C, H, W = 2, 4, 16, 16
    depth, num_classes = 8, 5

    x = jax.random.normal(kx, (N, C, H, W), jnp.float32)
    params = init_params(kp, C, depth, num_classes)

    ref = jax.block_until_ready(aspp_reference(x, params))

    # f32 compute path: tight correctness gate against the pure-JAX reference
    out_f32 = jax.block_until_ready(aspp_forward(x, params, compute_dtype=jnp.float32))
    assert out_f32.shape == (N, num_classes, H, W)
    err_f32 = float(jnp.max(jnp.abs(out_f32 - ref)))
    assert err_f32 < 5e-3, f"f32 kernel/reference mismatch: {err_f32}"

    # bf16 compute path (default / performance): looser gate (bf16 rounding of
    # input, weights and the stashed intermediates)
    out_bf16 = jax.block_until_ready(aspp_forward(x, params))
    assert out_bf16.shape == (N, num_classes, H, W)
    err_bf16 = float(jnp.max(jnp.abs(out_bf16 - ref)))
    assert err_bf16 < 1.5e-1, f"bf16 kernel/reference mismatch: {err_bf16}"

    print("KERNEL_OK")
</pallas_src>

<mosaic_0001>
module attributes {stable_mosaic.version = 11 : i64} {
  func.func @kernel(%arg0: i32, %arg1: i32, %arg2: memref<104x64x128xf32, #tpu.memory_space<any>>, %arg3: memref<128x512xf32, #tpu.memory_space<vmem>>, %arg4: memref<8x128x128xf32, #tpu.memory_space<vmem>>, %arg5: memref<8x128x128xf32, #tpu.memory_space<vmem>>, %arg6: memref<8x128x128xf32, #tpu.memory_space<vmem>>, %arg7: memref<1x256x512xf32, #tpu.memory_space<vmem>>, %arg8: memref<1x8x128xf32, #tpu.memory_space<vmem>>, %arg9: memref<1x1x128xf32, #tpu.memory_space<vmem>>, %arg10: memref<2x52x64x128xf32, #tpu.memory_space<vmem>>, %arg11: memref<2x!tpu.dma_semaphore, #tpu.memory_space<semaphore_mem>>) attributes {dimension_semantics = [#tpu.dimension_semantics<parallel>, #tpu.dimension_semantics<arbitrary>], iteration_bounds = array<i64: 2, 1>, scalar_prefetch = 0 : i64, scratch_operands = 2 : i64, tpu.core_type = #tpu.core_type<tc>, window_params = [{}, {pipeline_mode = #tpu.pipeline_mode<synchronous>, transform_indices = @transform_1, window_bounds = array<i64: 128, 512>}, {pipeline_mode = #tpu.pipeline_mode<synchronous>, transform_indices = @transform_2, window_bounds = array<i64: 8, 128, 128>}, {pipeline_mode = #tpu.pipeline_mode<synchronous>, transform_indices = @transform_3, window_bounds = array<i64: 8, 128, 128>}, {pipeline_mode = #tpu.pipeline_mode<synchronous>, transform_indices = @transform_4, window_bounds = array<i64: 8, 128, 128>}, {transform_indices = @transform_5, window_bounds = array<i64: 1, 256, 512>}, {transform_indices = @transform_6, window_bounds = array<i64: 1, 8, 128>}, {transform_indices = @transform_7, window_bounds = array<i64: 1, 1, 128>}]} {
    %c2_i32 = arith.constant 2 : i32
    %c0_i32 = arith.constant 0 : i32
    %0 = arith.cmpi eq, %c2_i32, %c0_i32 : i32
    %c1_i32 = arith.constant 1 : i32
    %1 = arith.select %0, %c1_i32, %c2_i32 : i32
    %2 = arith.remsi %arg1, %1 : i32
    %c0_i32_0 = arith.constant 0 : i32
    %3 = arith.cmpi ne, %2, %c0_i32_0 : i32
    %c0_i32_1 = arith.constant 0 : i32
    %4 = arith.cmpi slt, %2, %c0_i32_1 : i32
    %c0_i32_2 = arith.constant 0 : i32
    %5 = arith.cmpi slt, %1, %c0_i32_2 : i32
    %6 = arith.xori %4, %5 : i1
    %7 = arith.andi %6, %3 : i1
    %8 = arith.addi %2, %1 : i32
    %9 = arith.select %7, %8, %2 : i32
    %c0_i32_3 = arith.constant 0 : i32
    %10 = arith.cmpi eq, %arg1, %c0_i32_3 : i32
    %11 = arith.extui %10 : i1 to i32
    %c0_i32_4 = arith.constant 0 : i32
    %12 = arith.cmpi ne, %11, %c0_i32_4 : i32
    scf.if %12 {
      %c52_i32_138 = arith.constant 52 : i32
      %230 = arith.muli %arg0, %c52_i32_138 : i32
      %c0_i32_139 = arith.constant 0 : i32
      %231 = arith.addi %230, %c0_i32_139 : i32
      %c0_i32_140 = arith.constant 0 : i32
      %c0_i32_141 = arith.constant 0 : i32
      %c0_i32_142 = arith.constant 0 : i32
      %c0_i32_143 = arith.constant 0 : i32
      %232 = tpu.memref_slice %arg2[%231, %c0_i32_142, %c0_i32_143] : memref<104x64x128xf32, #tpu.memory_space<any>> -> memref<52x64x128xf32, #tpu.memory_space<any>>
      %c0_i32_144 = arith.constant 0 : i32
      %c0_i32_145 = arith.constant 0 : i32
      %c0_i32_146 = arith.constant 0 : i32
      %233 = tpu.memref_slice %arg10[%c0_i32_140, %c0_i32_144, %c0_i32_145, %c0_i32_146] : memref<2x52x64x128xf32, #tpu.memory_space<vmem>> -> memref<1x52x64x128xf32, #tpu.memory_space<vmem>>
      %234 = tpu.memref_squeeze %233 : memref<1x52x64x128xf32, #tpu.memory_space<vmem>> -> memref<52x64x128xf32, #tpu.memory_space<vmem>>
      %235 = tpu.memref_slice %arg11[%c0_i32_141] : memref<2x!tpu.dma_semaphore, #tpu.memory_space<semaphore_mem>> -> memref<1x!tpu.dma_semaphore, #tpu.memory_space<semaphore_mem>>
      %236 = tpu.memref_squeeze %235 : memref<1x!tpu.dma_semaphore, #tpu.memory_space<semaphore_mem>> -> memref<!tpu.dma_semaphore, #tpu.memory_space<semaphore_mem>>
      tpu.enqueue_dma source(%232 : memref<52x64x128xf32, #tpu.memory_space<any>>) target(%234 : memref<52x64x128xf32, #tpu.memory_space<vmem>>) target_semaphore(%236 : memref<!tpu.dma_semaphore, #tpu.memory_space<semaphore_mem>>)
    } else {
    }
    %c52_i32 = arith.constant 52 : i32
    %13 = arith.muli %arg0, %c52_i32 : i32
    %c16_i32 = arith.constant 16 : i32
    %14 = arith.muli %arg1, %c16_i32 : i32
    %15 = arith.addi %13, %14 : i32
    %c0_i32_5 = arith.constant 0 : i32
    %c0_i32_6 = arith.constant 0 : i32
    %16 = tpu.memref_slice %arg2[%15, %c0_i32_5, %c0_i32_6] : memref<104x64x128xf32, #tpu.memory_space<any>> -> memref<52x64x128xf32, #tpu.memory_space<any>>
    %c0_i32_7 = arith.constant 0 : i32
    %c0_i32_8 = arith.constant 0 : i32
    %c0_i32_9 = arith.constant 0 : i32
    %17 = tpu.memref_slice %arg10[%9, %c0_i32_7, %c0_i32_8, %c0_i32_9] : memref<2x52x64x128xf32, #tpu.memory_space<vmem>> -> memref<1x52x64x128xf32, #tpu.memory_space<vmem>>
    %18 = tpu.memref_squeeze %17 : memref<1x52x64x128xf32, #tpu.memory_space<vmem>> -> memref<52x64x128xf32, #tpu.memory_space<vmem>>
    %19 = tpu.memref_slice %arg11[%9] : memref<2x!tpu.dma_semaphore, #tpu.memory_space<semaphore_mem>> -> memref<1x!tpu.dma_semaphore, #tpu.memory_space<semaphore_mem>>
    %20 = tpu.memref_squeeze %19 : memref<1x!tpu.dma_semaphore, #tpu.memory_space<semaphore_mem>> -> memref<!tpu.dma_semaphore, #tpu.memory_space<semaphore_mem>>
    tpu.wait_dma2 semaphore(%20 : memref<!tpu.dma_semaphore, #tpu.memory_space<semaphore_mem>>) src(%16 : memref<52x64x128xf32, #tpu.memory_space<any>>) dst(%18 : memref<52x64x128xf32, #tpu.memory_space<vmem>>)
    %c1_i32_10 = arith.constant 1 : i32
    %21 = arith.addi %arg1, %c1_i32_10 : i32
    %c1_i32_11 = arith.constant 1 : i32
    %22 = arith.cmpi slt, %21, %c1_i32_11 : i32
    %23 = arith.extui %22 : i1 to i32
    %c0_i32_12 = arith.constant 0 : i32
    %24 = arith.cmpi ne, %23, %c0_i32_12 : i32
    scf.if %24 {
      %c1_i32_138 = arith.constant 1 : i32
      %230 = arith.addi %arg1, %c1_i32_138 : i32
      %c1_i32_139 = arith.constant 1 : i32
      %231 = arith.subi %c1_i32_139, %9 : i32
      %c52_i32_140 = arith.constant 52 : i32
      %232 = arith.muli %arg0, %c52_i32_140 : i32
      %c16_i32_141 = arith.constant 16 : i32
      %233 = arith.muli %230, %c16_i32_141 : i32
      %234 = arith.addi %232, %233 : i32
      %c0_i32_142 = arith.constant 0 : i32
      %c0_i32_143 = arith.constant 0 : i32
      %235 = tpu.memref_slice %arg2[%234, %c0_i32_142, %c0_i32_143] : memref<104x64x128xf32, #tpu.memory_space<any>> -> memref<52x64x128xf32, #tpu.memory_space<any>>
      %c0_i32_144 = arith.constant 0 : i32
      %c0_i32_145 = arith.constant 0 : i32
      %c0_i32_146 = arith.constant 0 : i32
      %236 = tpu.memref_slice %arg10[%231, %c0_i32_144, %c0_i32_145, %c0_i32_146] : memref<2x52x64x128xf32, #tpu.memory_space<vmem>> -> memref<1x52x64x128xf32, #tpu.memory_space<vmem>>
      %237 = tpu.memref_squeeze %236 : memref<1x52x64x128xf32, #tpu.memory_space<vmem>> -> memref<52x64x128xf32, #tpu.memory_space<vmem>>
      %238 = tpu.memref_slice %arg11[%231] : memref<2x!tpu.dma_semaphore, #tpu.memory_space<semaphore_mem>> -> memref<1x!tpu.dma_semaphore, #tpu.memory_space<semaphore_mem>>
      %239 = tpu.memref_squeeze %238 : memref<1x!tpu.dma_semaphore, #tpu.memory_space<semaphore_mem>> -> memref<!tpu.dma_semaphore, #tpu.memory_space<semaphore_mem>>
      tpu.enqueue_dma source(%235 : memref<52x64x128xf32, #tpu.memory_space<any>>) target(%237 : memref<52x64x128xf32, #tpu.memory_space<vmem>>) target_semaphore(%239 : memref<!tpu.dma_semaphore, #tpu.memory_space<semaphore_mem>>)
    } else {
    }
    %25 = arith.index_cast %9 : i32 to index
    %c0 = arith.constant 0 : index
    %c0_13 = arith.constant 0 : index
    %c0_14 = arith.constant 0 : index
    %26 = vector.load %arg10[%25, %c0, %c0_13, %c0_14] : memref<2x52x64x128xf32, #tpu.memory_space<vmem>>, vector<1x52x64x128xf32>
    %27 = vector.shape_cast %26 : vector<1x52x64x128xf32> to vector<52x64x128xf32>
    %28 = vector.extract_strided_slice %27 {offsets = [18, 24, 0], sizes = [16, 16, 128], strides = [1, 1, 1]} : vector<52x64x128xf32> to vector<16x16x128xf32>
    %29 = vector.shape_cast %28 : vector<16x16x128xf32> to vector<256x128xf32>
    %c0_15 = arith.constant 0 : index
    %c0_16 = arith.constant 0 : index
    %30 = vector.load %arg3[%c0_15, %c0_16] : memref<128x512xf32, #tpu.memory_space<vmem>>, vector<128x512xf32>
    %cst = arith.constant dense<0.000000e+00> : vector<256x512xf32>
    %31 = tpu.matmul %29, %30, %cst {dimension_numbers = #tpu.dot_dimension_numbers<[1], [0], [0], [1], [0, 0, 1, 1], [], []>} : vector<256x128xf32>, vector<128x512xf32>, vector<256x512xf32> -> vector<256x512xf32>
    %32 = vector.extract_strided_slice %31 {offsets = [0, 0], sizes = [256, 128], strides = [1, 1]} : vector<256x512xf32> to vector<256x128xf32>
    %c0_17 = arith.constant 0 : index
    %c0_18 = arith.constant 0 : index
    %c0_19 = arith.constant 0 : index
    %33 = vector.load %arg7[%c0_17, %c0_18, %c0_19] : memref<1x256x512xf32, #tpu.memory_space<vmem>>, vector<1x256x128xf32>
    %34 = vector.shape_cast %33 : vector<1x256x128xf32> to vector<256x128xf32>
    %35 = vector.shape_cast %32 : vector<256x128xf32> to vector<1x256x128xf32>
    tpu.vector_store %arg7[%c0_17, %c0_18, %c0_19], %35 {strides = array<i32>} : memref<1x256x512xf32, #tpu.memory_space<vmem>>, vector<1x256x128xf32>,
    %cst_20 = arith.constant dense<0.000000e+00> : vector<128xf32>
    %36 = vector.multi_reduction <add>, %32, %cst_20 [0] : vector<256x128xf32> to vector<128xf32>
    %37 = vector.shape_cast %36 : vector<128xf32> to vector<1x128xf32>
    %38 = arith.mulf %32, %32 : vector<256x128xf32>
    %cst_21 = arith.constant dense<0.000000e+00> : vector<128xf32>
    %39 = vector.multi_reduction <add>, %38, %cst_21 [0] : vector<256x128xf32> to vector<128xf32>
    %40 = vector.shape_cast %39 : vector<128xf32> to vector<1x128xf32>
    %41 = vector.extract_strided_slice %31 {offsets = [0, 128], sizes = [256, 128], strides = [1, 1]} : vector<256x512xf32> to vector<256x128xf32>
    %42 = vector.extract_strided_slice %27 {offsets = [12, 18, 0], sizes = [16, 16, 128], strides = [1, 1, 1]} : vector<52x64x128xf32> to vector<16x16x128xf32>
    %43 = vector.shape_cast %42 : vector<16x16x128xf32> to vector<256x128xf32>
    %c0_22 = arith.constant 0 : index
    %c0_23 = arith.constant 0 : index
    %c0_24 = arith.constant 0 : index
    %44 = vector.load %arg4[%c0_22, %c0_23, %c0_24] : memref<8x128x128xf32, #tpu.memory_space<vmem>>, vector<1x128x128xf32>
    %45 = vector.shape_cast %44 : vector<1x128x128xf32> to vector<128x128xf32>
    %cst_25 = arith.constant dense<0.000000e+00> : vector<256x128xf32>
    %46 = tpu.matmul %43, %45, %cst_25 {dimension_numbers = #tpu.dot_dimension_numbers<[1], [0], [0], [1], [0, 0, 1, 1], [], []>} : vector<256x128xf32>, vector<128x128xf32>, vector<256x128xf32> -> vector<256x128xf32>
    %47 = arith.addf %41, %46 : vector<256x128xf32>
    %48 = vector.extract_strided_slice %27 {offsets = [12, 24, 0], sizes = [16, 16, 128], strides = [1, 1, 1]} : vector<52x64x128xf32> to vector<16x16x128xf32>
    %49 = vector.shape_cast %48 : vector<16x16x128xf32> to vector<256x128xf32>
    %c1 = arith.constant 1 : index
    %c0_26 = arith.constant 0 : index
    %c0_27 = arith.constant 0 : index
    %50 = vector.load %arg4[%c1, %c0_26, %c0_27] : memref<8x128x128xf32, #tpu.memory_space<vmem>>, vector<1x128x128xf32>
    %51 = vector.shape_cast %50 : vector<1x128x128xf32> to vector<128x128xf32>
    %cst_28 = arith.constant dense<0.000000e+00> : vector<256x128xf32>
    %52 = tpu.matmul %49, %51, %cst_28 {dimension_numbers = #tpu.dot_dimension_numbers<[1], [0], [0], [1], [0, 0, 1, 1], [], []>} : vector<256x128xf32>, vector<128x128xf32>, vector<256x128xf32> -> vector<256x128xf32>
    %53 = arith.addf %47, %52 : vector<256x128xf32>
    %54 = vector.extract_strided_slice %27 {offsets = [12, 30, 0], sizes = [16, 16, 128], strides = [1, 1, 1]} : vector<52x64x128xf32> to vector<16x16x128xf32>
    %55 = vector.shape_cast %54 : vector<16x16x128xf32> to vector<256x128xf32>
    %c2 = arith.constant 2 : index
    %c0_29 = arith.constant 0 : index
    %c0_30 = arith.constant 0 : index
    %56 = vector.load %arg4[%c2, %c0_29, %c0_30] : memref<8x128x128xf32, #tpu.memory_space<vmem>>, vector<1x128x128xf32>
    %57 = vector.shape_cast %56 : vector<1x128x128xf32> to vector<128x128xf32>
    %cst_31 = arith.constant dense<0.000000e+00> : vector<256x128xf32>
    %58 = tpu.matmul %55, %57, %cst_31 {dimension_numbers = #tpu.dot_dimension_numbers<[1], [0], [0], [1], [0, 0, 1, 1], [], []>} : vector<256x128xf32>, vector<128x128xf32>, vector<256x128xf32> -> vector<256x128xf32>
    %59 = arith.addf %53, %58 : vector<256x128xf32>
    %60 = vector.extract_strided_slice %27 {offsets = [18, 18, 0], sizes = [16, 16, 128], strides = [1, 1, 1]} : vector<52x64x128xf32> to vector<16x16x128xf32>
    %61 = vector.shape_cast %60 : vector<16x16x128xf32> to vector<256x128xf32>
    %c3 = arith.constant 3 : index
    %c0_32 = arith.constant 0 : index
    %c0_33 = arith.constant 0 : index
    %62 = vector.load %arg4[%c3, %c0_32, %c0_33] : memref<8x128x128xf32, #tpu.memory_space<vmem>>, vector<1x128x128xf32>
    %63 = vector.shape_cast %62 : vector<1x128x128xf32> to vector<128x128xf32>
    %cst_34 = arith.constant dense<0.000000e+00> : vector<256x128xf32>
    %64 = tpu.matmul %61, %63, %cst_34 {dimension_numbers = #tpu.dot_dimension_numbers<[1], [0], [0], [1], [0, 0, 1, 1], [], []>} : vector<256x128xf32>, vector<128x128xf32>, vector<256x128xf32> -> vector<256x128xf32>
    %65 = arith.addf %59, %64 : vector<256x128xf32>
    %66 = vector.extract_strided_slice %27 {offsets = [18, 30, 0], sizes = [16, 16, 128], strides = [1, 1, 1]} : vector<52x64x128xf32> to vector<16x16x128xf32>
    %67 = vector.shape_cast %66 : vector<16x16x128xf32> to vector<256x128xf32>
    %c4 = arith.constant 4 : index
    %c0_35 = arith.constant 0 : index
    %c0_36 = arith.constant 0 : index
    %68 = vector.load %arg4[%c4, %c0_35, %c0_36] : memref<8x128x128xf32, #tpu.memory_space<vmem>>, vector<1x128x128xf32>
    %69 = vector.shape_cast %68 : vector<1x128x128xf32> to vector<128x128xf32>
    %cst_37 = arith.constant dense<0.000000e+00> : vector<256x128xf32>
    %70 = tpu.matmul %67, %69, %cst_37 {dimension_numbers = #tpu.dot_dimension_numbers<[1], [0], [0], [1], [0, 0, 1, 1], [], []>} : vector<256x128xf32>, vector<128x128xf32>, vector<256x128xf32> -> vector<256x128xf32>
    %71 = arith.addf %65, %70 : vector<256x128xf32>
    %72 = vector.extract_strided_slice %27 {offsets = [24, 18, 0], sizes = [16, 16, 128], strides = [1, 1, 1]} : vector<52x64x128xf32> to vector<16x16x128xf32>
    %73 = vector.shape_cast %72 : vector<16x16x128xf32> to vector<256x128xf32>
    %c5 = arith.constant 5 : index
    %c0_38 = arith.constant 0 : index
    %c0_39 = arith.constant 0 : index
    %74 = vector.load %arg4[%c5, %c0_38, %c0_39] : memref<8x128x128xf32, #tpu.memory_space<vmem>>, vector<1x128x128xf32>
    %75 = vector.shape_cast %74 : vector<1x128x128xf32> to vector<128x128xf32>
    %cst_40 = arith.constant dense<0.000000e+00> : vector<256x128xf32>
    %76 = tpu.matmul %73, %75, %cst_40 {dimension_numbers = #tpu.dot_dimension_numbers<[1], [0], [0], [1], [0, 0, 1, 1], [], []>} : vector<256x128xf32>, vector<128x128xf32>, vector<256x128xf32> -> vector<256x128xf32>
    %77 = arith.addf %71, %76 : vector<256x128xf32>
    %78 = vector.extract_strided_slice %27 {offsets = [24, 24, 0], sizes = [16, 16, 128], strides = [1, 1, 1]} : vector<52x64x128xf32> to vector<16x16x128xf32>
    %79 = vector.shape_cast %78 : vector<16x16x128xf32> to vector<256x128xf32>
    %c6 = arith.constant 6 : index
    %c0_41 = arith.constant 0 : index
    %c0_42 = arith.constant 0 : index
    %80 = vector.load %arg4[%c6, %c0_41, %c0_42] : memref<8x128x128xf32, #tpu.memory_space<vmem>>, vector<1x128x128xf32>
    %81 = vector.shape_cast %80 : vector<1x128x128xf32> to vector<128x128xf32>
    %cst_43 = arith.constant dense<0.000000e+00> : vector<256x128xf32>
    %82 = tpu.matmul %79, %81, %cst_43 {dimension_numbers = #tpu.dot_dimension_numbers<[1], [0], [0], [1], [0, 0, 1, 1], [], []>} : vector<256x128xf32>, vector<128x128xf32>, vector<256x128xf32> -> vector<256x128xf32>
    %83 = arith.addf %77, %82 : vector<256x128xf32>
    %84 = vector.extract_strided_slice %27 {offsets = [24, 30, 0], sizes = [16, 16, 128], strides = [1, 1, 1]} : vector<52x64x128xf32> to vector<16x16x128xf32>
    %85 = vector.shape_cast %84 : vector<16x16x128xf32> to vector<256x128xf32>
    %c7 = arith.constant 7 : index
    %c0_44 = arith.constant 0 : index
    %c0_45 = arith.constant 0 : index
    %86 = vector.load %arg4[%c7, %c0_44, %c0_45] : memref<8x128x128xf32, #tpu.memory_space<vmem>>, vector<1x128x128xf32>
    %87 = vector.shape_cast %86 : vector<1x128x128xf32> to vector<128x128xf32>
    %cst_46 = arith.constant dense<0.000000e+00> : vector<256x128xf32>
    %88 = tpu.matmul %85, %87, %cst_46 {dimension_numbers = #tpu.dot_dimension_numbers<[1], [0], [0], [1], [0, 0, 1, 1], [], []>} : vector<256x128xf32>, vector<128x128xf32>, vector<256x128xf32> -> vector<256x128xf32>
    %89 = arith.addf %83, %88 : vector<256x128xf32>
    %c0_47 = arith.constant 0 : index
    %c0_48 = arith.constant 0 : index
    %c128 = arith.constant 128 : index
    %90 = vector.load %arg7[%c0_47, %c0_48, %c128] : memref<1x256x512xf32, #tpu.memory_space<vmem>>, vector<1x256x128xf32>
    %91 = vector.shape_cast %90 : vector<1x256x128xf32> to vector<256x128xf32>
    %92 = vector.shape_cast %89 : vector<256x128xf32> to vector<1x256x128xf32>
    tpu.vector_store %arg7[%c0_47, %c0_48, %c128], %92 {strides = array<i32>} : memref<1x256x512xf32, #tpu.memory_space<vmem>>, vector<1x256x128xf32>,
    %cst_49 = arith.constant dense<0.000000e+00> : vector<128xf32>
    %93 = vector.multi_reduction <add>, %89, %cst_49 [0] : vector<256x128xf32> to vector<128xf32>
    %94 = vector.shape_cast %93 : vector<128xf32> to vector<1x128xf32>
    %95 = arith.mulf %89, %89 : vector<256x128xf32>
    %cst_50 = arith.constant dense<0.000000e+00> : vector<128xf32>
    %96 = vector.multi_reduction <add>, %95, %cst_50 [0] : vector<256x128xf32> to vector<128xf32>
    %97 = vector.shape_cast %96 : vector<128xf32> to vector<1x128xf32>
    %98 = vector.extract_strided_slice %31 {offsets = [0, 256], sizes = [256, 128], strides = [1, 1]} : vector<256x512xf32> to vector<256x128xf32>
    %99 = vector.extract_strided_slice %27 {offsets = [6, 12, 0], sizes = [16, 16, 128], strides = [1, 1, 1]} : vector<52x64x128xf32> to vector<16x16x128xf32>
    %100 = vector.shape_cast %99 : vector<16x16x128xf32> to vector<256x128xf32>
    %c0_51 = arith.constant 0 : index
    %c0_52 = arith.constant 0 : index
    %c0_53 = arith.constant 0 : index
    %101 = vector.load %arg5[%c0_51, %c0_52, %c0_53] : memref<8x128x128xf32, #tpu.memory_space<vmem>>, vector<1x128x128xf32>
    %102 = vector.shape_cast %101 : vector<1x128x128xf32> to vector<128x128xf32>
    %cst_54 = arith.constant dense<0.000000e+00> : vector<256x128xf32>
    %103 = tpu.matmul %100, %102, %cst_54 {dimension_numbers = #tpu.dot_dimension_numbers<[1], [0], [0], [1], [0, 0, 1, 1], [], []>} : vector<256x128xf32>, vector<128x128xf32>, vector<256x128xf32> -> vector<256x128xf32>
    %104 = arith.addf %98, %103 : vector<256x128xf32>
    %105 = vector.extract_strided_slice %27 {offsets = [6, 24, 0], sizes = [16, 16, 128], strides = [1, 1, 1]} : vector<52x64x128xf32> to vector<16x16x128xf32>
    %106 = vector.shape_cast %105 : vector<16x16x128xf32> to vector<256x128xf32>
    %c1_55 = arith.constant 1 : index
    %c0_56 = arith.constant 0 : index
    %c0_57 = arith.constant 0 : index
    %107 = vector.load %arg5[%c1_55, %c0_56, %c0_57] : memref<8x128x128xf32, #tpu.memory_space<vmem>>, vector<1x128x128xf32>
    %108 = vector.shape_cast %107 : vector<1x128x128xf32> to vector<128x128xf32>
    %cst_58 = arith.constant dense<0.000000e+00> : vector<256x128xf32>
    %109 = tpu.matmul %106, %108, %cst_58 {dimension_numbers = #tpu.dot_dimension_numbers<[1], [0], [0], [1], [0, 0, 1, 1], [], []>} : vector<256x128xf32>, vector<128x128xf32>, vector<256x128xf32> -> vector<256x128xf32>
    %110 = arith.addf %104, %109 : vector<256x128xf32>
    %111 = vector.extract_strided_slice %27 {offsets = [6, 36, 0], sizes = [16, 16, 128], strides = [1, 1, 1]} : vector<52x64x128xf32> to vector<16x16x128xf32>
    %112 = vector.shape_cast %111 : vector<16x16x128xf32> to vector<256x128xf32>
    %c2_59 = arith.constant 2 : index
    %c0_60 = arith.constant 0 : index
    %c0_61 = arith.constant 0 : index
    %113 = vector.load %arg5[%c2_59, %c0_60, %c0_61] : memref<8x128x128xf32, #tpu.memory_space<vmem>>, vector<1x128x128xf32>
    %114 = vector.shape_cast %113 : vector<1x128x128xf32> to vector<128x128xf32>
    %cst_62 = arith.constant dense<0.000000e+00> : vector<256x128xf32>
    %115 = tpu.matmul %112, %114, %cst_62 {dimension_numbers = #tpu.dot_dimension_numbers<[1], [0], [0], [1], [0, 0, 1, 1], [], []>} : vector<256x128xf32>, vector<128x128xf32>, vector<256x128xf32> -> vector<256x128xf32>
    %116 = arith.addf %110, %115 : vector<256x128xf32>
    %117 = vector.extract_strided_slice %27 {offsets = [18, 12, 0], sizes = [16, 16, 128], strides = [1, 1, 1]} : vector<52x64x128xf32> to vector<16x16x128xf32>
    %118 = vector.shape_cast %117 : vector<16x16x128xf32> to vector<256x128xf32>
    %c3_63 = arith.constant 3 : index
    %c0_64 = arith.constant 0 : index
    %c0_65 = arith.constant 0 : index
    %119 = vector.load %arg5[%c3_63, %c0_64, %c0_65] : memref<8x128x128xf32, #tpu.memory_space<vmem>>, vector<1x128x128xf32>
    %120 = vector.shape_cast %119 : vector<1x128x128xf32> to vector<128x128xf32>
    %cst_66 = arith.constant dense<0.000000e+00> : vector<256x128xf32>
    %121 = tpu.matmul %118, %120, %cst_66 {dimension_numbers = #tpu.dot_dimension_numbers<[1], [0], [0], [1], [0, 0, 1, 1], [], []>} : vector<256x128xf32>, vector<128x128xf32>, vector<256x128xf32> -> vector<256x128xf32>
    %122 = arith.addf %116, %121 : vector<256x128xf32>
    %123 = vector.extract_strided_slice %27 {offsets = [18, 36, 0], sizes = [16, 16, 128], strides = [1, 1, 1]} : vector<52x64x128xf32> to vector<16x16x128xf32>
    %124 = vector.shape_cast %123 : vector<16x16x128xf32> to vector<256x128xf32>
    %c4_67 = arith.constant 4 : index
    %c0_68 = arith.constant 0 : index
    %c0_69 = arith.constant 0 : index
    %125 = vector.load %arg5[%c4_67, %c0_68, %c0_69] : memref<8x128x128xf32, #tpu.memory_space<vmem>>, vector<1x128x128xf32>
    %126 = vector.shape_cast %125 : vector<1x128x128xf32> to vector<128x128xf32>
    %cst_70 = arith.constant dense<0.000000e+00> : vector<256x128xf32>
    %127 = tpu.matmul %124, %126, %cst_70 {dimension_numbers = #tpu.dot_dimension_numbers<[1], [0], [0], [1], [0, 0, 1, 1], [], []>} : vector<256x128xf32>, vector<128x128xf32>, vector<256x128xf32> -> vector<256x128xf32>
    %128 = arith.addf %122, %127 : vector<256x128xf32>
    %129 = vector.extract_strided_slice %27 {offsets = [30, 12, 0], sizes = [16, 16, 128], strides = [1, 1, 1]} : vector<52x64x128xf32> to vector<16x16x128xf32>
    %130 = vector.shape_cast %129 : vector<16x16x128xf32> to vector<256x128xf32>
    %c5_71 = arith.constant 5 : index
    %c0_72 = arith.constant 0 : index
    %c0_73 = arith.constant 0 : index
    %131 = vector.load %arg5[%c5_71, %c0_72, %c0_73] : memref<8x128x128xf32, #tpu.memory_space<vmem>>, vector<1x128x128xf32>
    %132 = vector.shape_cast %131 : vector<1x128x128xf32> to vector<128x128xf32>
    %cst_74 = arith.constant dense<0.000000e+00> : vector<256x128xf32>
    %133 = tpu.matmul %130, %132, %cst_74 {dimension_numbers = #tpu.dot_dimension_numbers<[1], [0], [0], [1], [0, 0, 1, 1], [], []>} : vector<256x128xf32>, vector<128x128xf32>, vector<256x128xf32> -> vector<256x128xf32>
    %134 = arith.addf %128, %133 : vector<256x128xf32>
    %135 = vector.extract_strided_slice %27 {offsets = [30, 24, 0], sizes = [16, 16, 128], strides = [1, 1, 1]} : vector<52x64x128xf32> to vector<16x16x128xf32>
    %136 = vector.shape_cast %135 : vector<16x16x128xf32> to vector<256x128xf32>
    %c6_75 = arith.constant 6 : index
    %c0_76 = arith.constant 0 : index
    %c0_77 = arith.constant 0 : index
    %137 = vector.load %arg5[%c6_75, %c0_76, %c0_77] : memref<8x128x128xf32, #tpu.memory_space<vmem>>, vector<1x128x128xf32>
    %138 = vector.shape_cast %137 : vector<1x128x128xf32> to vector<128x128xf32>
    %cst_78 = arith.constant dense<0.000000e+00> : vector<256x128xf32>
    %139 = tpu.matmul %136, %138, %cst_78 {dimension_numbers = #tpu.dot_dimension_numbers<[1], [0], [0], [1], [0, 0, 1, 1], [], []>} : vector<256x128xf32>, vector<128x128xf32>, vector<256x128xf32> -> vector<256x128xf32>
    %140 = arith.addf %134, %139 : vector<256x128xf32>
    %141 = vector.extract_strided_slice %27 {offsets = [30, 36, 0], sizes = [16, 16, 128], strides = [1, 1, 1]} : vector<52x64x128xf32> to vector<16x16x128xf32>
    %142 = vector.shape_cast %141 : vector<16x16x128xf32> to vector<256x128xf32>
    %c7_79 = arith.constant 7 : index
    %c0_80 = arith.constant 0 : index
    %c0_81 = arith.constant 0 : index
    %143 = vector.load %arg5[%c7_79, %c0_80, %c0_81] : memref<8x128x128xf32, #tpu.memory_space<vmem>>, vector<1x128x128xf32>
    %144 = vector.shape_cast %143 : vector<1x128x128xf32> to vector<128x128xf32>
    %cst_82 = arith.constant dense<0.000000e+00> : vector<256x128xf32>
    %145 = tpu.matmul %142, %144, %cst_82 {dimension_numbers = #tpu.dot_dimension_numbers<[1], [0], [0], [1], [0, 0, 1, 1], [], []>} : vector<256x128xf32>, vector<128x128xf32>, vector<256x128xf32> -> vector<256x128xf32>
    %146 = arith.addf %140, %145 : vector<256x128xf32>
    %c0_83 = arith.constant 0 : index
    %c0_84 = arith.constant 0 : index
    %c256 = arith.constant 256 : index
    %147 = vector.load %arg7[%c0_83, %c0_84, %c256] : memref<1x256x512xf32, #tpu.memory_space<vmem>>, vector<1x256x128xf32>
    %148 = vector.shape_cast %147 : vector<1x256x128xf32> to vector<256x128xf32>
    %149 = vector.shape_cast %146 : vector<256x128xf32> to vector<1x256x128xf32>
    tpu.vector_store %arg7[%c0_83, %c0_84, %c256], %149 {strides = array<i32>} : memref<1x256x512xf32, #tpu.memory_space<vmem>>, vector<1x256x128xf32>,
    %cst_85 = arith.constant dense<0.000000e+00> : vector<128xf32>
    %150 = vector.multi_reduction <add>, %146, %cst_85 [0] : vector<256x128xf32> to vector<128xf32>
    %151 = vector.shape_cast %150 : vector<128xf32> to vector<1x128xf32>
    %152 = arith.mulf %146, %146 : vector<256x128xf32>
    %cst_86 = arith.constant dense<0.000000e+00> : vector<128xf32>
    %153 = vector.multi_reduction <add>, %152, %cst_86 [0] : vector<256x128xf32> to vector<128xf32>
    %154 = vector.shape_cast %153 : vector<128xf32> to vector<1x128xf32>
    %155 = vector.extract_strided_slice %31 {offsets = [0, 384], sizes = [256, 128], strides = [1, 1]} : vector<256x512xf32> to vector<256x128xf32>
    %156 = vector.extract_strided_slice %27 {offsets = [0, 6, 0], sizes = [16, 16, 128], strides = [1, 1, 1]} : vector<52x64x128xf32> to vector<16x16x128xf32>
    %157 = vector.shape_cast %156 : vector<16x16x128xf32> to vector<256x128xf32>
    %c0_87 = arith.constant 0 : index
    %c0_88 = arith.constant 0 : index
    %c0_89 = arith.constant 0 : index
    %158 = vector.load %arg6[%c0_87, %c0_88, %c0_89] : memref<8x128x128xf32, #tpu.memory_space<vmem>>, vector<1x128x128xf32>
    %159 = vector.shape_cast %158 : vector<1x128x128xf32> to vector<128x128xf32>
    %cst_90 = arith.constant dense<0.000000e+00> : vector<256x128xf32>
    %160 = tpu.matmul %157, %159, %cst_90 {dimension_numbers = #tpu.dot_dimension_numbers<[1], [0], [0], [1], [0, 0, 1, 1], [], []>} : vector<256x128xf32>, vector<128x128xf32>, vector<256x128xf32> -> vector<256x128xf32>
    %161 = arith.addf %155, %160 : vector<256x128xf32>
    %162 = vector.extract_strided_slice %27 {offsets = [0, 24, 0], sizes = [16, 16, 128], strides = [1, 1, 1]} : vector<52x64x128xf32> to vector<16x16x128xf32>
    %163 = vector.shape_cast %162 : vector<16x16x128xf32> to vector<256x128xf32>
    %c1_91 = arith.constant 1 : index
    %c0_92 = arith.constant 0 : index
    %c0_93 = arith.constant 0 : index
    %164 = vector.load %arg6[%c1_91, %c0_92, %c0_93] : memref<8x128x128xf32, #tpu.memory_space<vmem>>, vector<1x128x128xf32>
    %165 = vector.shape_cast %164 : vector<1x128x128xf32> to vector<128x128xf32>
    %cst_94 = arith.constant dense<0.000000e+00> : vector<256x128xf32>
    %166 = tpu.matmul %163, %165, %cst_94 {dimension_numbers = #tpu.dot_dimension_numbers<[1], [0], [0], [1], [0, 0, 1, 1], [], []>} : vector<256x128xf32>, vector<128x128xf32>, vector<256x128xf32> -> vector<256x128xf32>
    %167 = arith.addf %161, %166 : vector<256x128xf32>
    %168 = vector.extract_strided_slice %27 {offsets = [0, 42, 0], sizes = [16, 16, 128], strides = [1, 1, 1]} : vector<52x64x128xf32> to vector<16x16x128xf32>
    %169 = vector.shape_cast %168 : vector<16x16x128xf32> to vector<256x128xf32>
    %c2_95 = arith.constant 2 : index
    %c0_96 = arith.constant 0 : index
    %c0_97 = arith.constant 0 : index
    %170 = vector.load %arg6[%c2_95, %c0_96, %c0_97] : memref<8x128x128xf32, #tpu.memory_space<vmem>>, vector<1x128x128xf32>
    %171 = vector.shape_cast %170 : vector<1x128x128xf32> to vector<128x128xf32>
    %cst_98 = arith.constant dense<0.000000e+00> : vector<256x128xf32>
    %172 = tpu.matmul %169, %171, %cst_98 {dimension_numbers = #tpu.dot_dimension_numbers<[1], [0], [0], [1], [0, 0, 1, 1], [], []>} : vector<256x128xf32>, vector<128x128xf32>, vector<256x128xf32> -> vector<256x128xf32>
    %173 = arith.addf %167, %172 : vector<256x128xf32>
    %174 = vector.extract_strided_slice %27 {offsets = [18, 6, 0], sizes = [16, 16, 128], strides = [1, 1, 1]} : vector<52x64x128xf32> to vector<16x16x128xf32>
    %175 = vector.shape_cast %174 : vector<16x16x128xf32> to vector<256x128xf32>
    %c3_99 = arith.constant 3 : index
    %c0_100 = arith.constant 0 : index
    %c0_101 = arith.constant 0 : index
    %176 = vector.load %arg6[%c3_99, %c0_100, %c0_101] : memref<8x128x128xf32, #tpu.memory_space<vmem>>, vector<1x128x128xf32>
    %177 = vector.shape_cast %176 : vector<1x128x128xf32> to vector<128x128xf32>
    %cst_102 = arith.constant dense<0.000000e+00> : vector<256x128xf32>
    %178 = tpu.matmul %175, %177, %cst_102 {dimension_numbers = #tpu.dot_dimension_numbers<[1], [0], [0], [1], [0, 0, 1, 1], [], []>} : vector<256x128xf32>, vector<128x128xf32>, vector<256x128xf32> -> vector<256x128xf32>
    %179 = arith.addf %173, %178 : vector<256x128xf32>
    %180 = vector.extract_strided_slice %27 {offsets = [18, 42, 0], sizes = [16, 16, 128], strides = [1, 1, 1]} : vector<52x64x128xf32> to vector<16x16x128xf32>
    %181 = vector.shape_cast %180 : vector<16x16x128xf32> to vector<256x128xf32>
    %c4_103 = arith.constant 4 : index
    %c0_104 = arith.constant 0 : index
    %c0_105 = arith.constant 0 : index
    %182 = vector.load %arg6[%c4_103, %c0_104, %c0_105] : memref<8x128x128xf32, #tpu.memory_space<vmem>>, vector<1x128x128xf32>
    %183 = vector.shape_cast %182 : vector<1x128x128xf32> to vector<128x128xf32>
    %cst_106 = arith.constant dense<0.000000e+00> : vector<256x128xf32>
    %184 = tpu.matmul %181, %183, %cst_106 {dimension_numbers = #tpu.dot_dimension_numbers<[1], [0], [0], [1], [0, 0, 1, 1], [], []>} : vector<256x128xf32>, vector<128x128xf32>, vector<256x128xf32> -> vector<256x128xf32>
    %185 = arith.addf %179, %184 : vector<256x128xf32>
    %186 = vector.extract_strided_slice %27 {offsets = [36, 6, 0], sizes = [16, 16, 128], strides = [1, 1, 1]} : vector<52x64x128xf32> to vector<16x16x128xf32>
    %187 = vector.shape_cast %186 : vector<16x16x128xf32> to vector<256x128xf32>
    %c5_107 = arith.constant 5 : index
    %c0_108 = arith.constant 0 : index
    %c0_109 = arith.constant 0 : index
    %188 = vector.load %arg6[%c5_107, %c0_108, %c0_109] : memref<8x128x128xf32, #tpu.memory_space<vmem>>, vector<1x128x128xf32>
    %189 = vector.shape_cast %188 : vector<1x128x128xf32> to vector<128x128xf32>
    %cst_110 = arith.constant dense<0.000000e+00> : vector<256x128xf32>
    %190 = tpu.matmul %187, %189, %cst_110 {dimension_numbers = #tpu.dot_dimension_numbers<[1], [0], [0], [1], [0, 0, 1, 1], [], []>} : vector<256x128xf32>, vector<128x128xf32>, vector<256x128xf32> -> vector<256x128xf32>
    %191 = arith.addf %185, %190 : vector<256x128xf32>
    %192 = vector.extract_strided_slice %27 {offsets = [36, 24, 0], sizes = [16, 16, 128], strides = [1, 1, 1]} : vector<52x64x128xf32> to vector<16x16x128xf32>
    %193 = vector.shape_cast %192 : vector<16x16x128xf32> to vector<256x128xf32>
    %c6_111 = arith.constant 6 : index
    %c0_112 = arith.constant 0 : index
    %c0_113 = arith.constant 0 : index
    %194 = vector.load %arg6[%c6_111, %c0_112, %c0_113] : memref<8x128x128xf32, #tpu.memory_space<vmem>>, vector<1x128x128xf32>
    %195 = vector.shape_cast %194 : vector<1x128x128xf32> to vector<128x128xf32>
    %cst_114 = arith.constant dense<0.000000e+00> : vector<256x128xf32>
    %196 = tpu.matmul %193, %195, %cst_114 {dimension_numbers = #tpu.dot_dimension_numbers<[1], [0], [0], [1], [0, 0, 1, 1], [], []>} : vector<256x128xf32>, vector<128x128xf32>, vector<256x128xf32> -> vector<256x128xf32>
    %197 = arith.addf %191, %196 : vector<256x128xf32>
    %198 = vector.extract_strided_slice %27 {offsets = [36, 42, 0], sizes = [16, 16, 128], strides = [1, 1, 1]} : vector<52x64x128xf32> to vector<16x16x128xf32>
    %199 = vector.shape_cast %198 : vector<16x16x128xf32> to vector<256x128xf32>
    %c7_115 = arith.constant 7 : index
    %c0_116 = arith.constant 0 : index
    %c0_117 = arith.constant 0 : index
    %200 = vector.load %arg6[%c7_115, %c0_116, %c0_117] : memref<8x128x128xf32, #tpu.memory_space<vmem>>, vector<1x128x128xf32>
    %201 = vector.shape_cast %200 : vector<1x128x128xf32> to vector<128x128xf32>
    %cst_118 = arith.constant dense<0.000000e+00> : vector<256x128xf32>
    %202 = tpu.matmul %199, %201, %cst_118 {dimension_numbers = #tpu.dot_dimension_numbers<[1], [0], [0], [1], [0, 0, 1, 1], [], []>} : vector<256x128xf32>, vector<128x128xf32>, vector<256x128xf32> -> vector<256x128xf32>
    %203 = arith.addf %197, %202 : vector<256x128xf32>
    %c0_119 = arith.constant 0 : index
    %c0_120 = arith.constant 0 : index
    %c384 = arith.constant 384 : index
    %204 = vector.load %arg7[%c0_119, %c0_120, %c384] : memref<1x256x512xf32, #tpu.memory_space<vmem>>, vector<1x256x128xf32>
    %205 = vector.shape_cast %204 : vector<1x256x128xf32> to vector<256x128xf32>
    %206 = vector.shape_cast %203 : vector<256x128xf32> to vector<1x256x128xf32>
    tpu.vector_store %arg7[%c0_119, %c0_120, %c384], %206 {strides = array<i32>} : memref<1x256x512xf32, #tpu.memory_space<vmem>>, vector<1x256x128xf32>,
    %cst_121 = arith.constant dense<0.000000e+00> : vector<128xf32>
    %207 = vector.multi_reduction <add>, %203, %cst_121 [0] : vector<256x128xf32> to vector<128xf32>
    %208 = vector.shape_cast %207 : vector<128xf32> to vector<1x128xf32>
    %209 = arith.mulf %203, %203 : vector<256x128xf32>
    %cst_122 = arith.constant dense<0.000000e+00> : vector<128xf32>
    %210 = vector.multi_reduction <add>, %209, %cst_122 [0] : vector<256x128xf32> to vector<128xf32>
    %211 = vector.shape_cast %210 : vector<128xf32> to vector<1x128xf32>
    %212 = tpu.concatenate %37, %94, %151, %208, %40, %97, %154, %211 in 0 : vector<1x128xf32>, vector<1x128xf32>, vector<1x128xf32>, vector<1x128xf32>, vector<1x128xf32>, vector<1x128xf32>, vector<1x128xf32>, vector<1x128xf32> -> vector<8x128xf32>
    %c0_i32_123 = arith.constant 0 : i32
    %213 = arith.cmpi eq, %arg1, %c0_i32_123 : i32
    %214 = arith.extui %213 : i1 to i32
    %c0_i32_124 = arith.constant 0 : i32
    %215 = arith.cmpi ne, %214, %c0_i32_124 : i32
    scf.if %215 {
      %cst_138 = arith.constant 0.000000e+00 : f32
      %230 = vector.broadcast %cst_138 : f32 to vector<8x128xf32>
      %c0_139 = arith.constant 0 : index
      %c0_140 = arith.constant 0 : index
      %c0_141 = arith.constant 0 : index
      %231 = vector.load %arg8[%c0_139, %c0_140, %c0_141] : memref<1x8x128xf32, #tpu.memory_space<vmem>>, vector<1x8x128xf32>
      %232 = vector.shape_cast %231 : vector<1x8x128xf32> to vector<8x128xf32>
      %233 = vector.shape_cast %230 : vector<8x128xf32> to vector<1x8x128xf32>
      tpu.vector_store %arg8[%c0_139, %c0_140, %c0_141], %233 {strides = array<i32>} : memref<1x8x128xf32, #tpu.memory_space<vmem>>, vector<1x8x128xf32>,
      %cst_142 = arith.constant 0.000000e+00 : f32
      %234 = vector.broadcast %cst_142 : f32 to vector<1x128xf32>
      %c0_143 = arith.constant 0 : index
      %c0_144 = arith.constant 0 : index
      %c0_145 = arith.constant 0 : index
      %235 = vector.load %arg9[%c0_143, %c0_144, %c0_145] : memref<1x1x128xf32, #tpu.memory_space<vmem>>, vector<1x1x128xf32>
      %236 = vector.shape_cast %235 : vector<1x1x128xf32> to vector<1x128xf32>
      %237 = vector.shape_cast %234 : vector<1x128xf32> to vector<1x1x128xf32>
      tpu.vector_store %arg9[%c0_143, %c0_144, %c0_145], %237 {strides = array<i32>} : memref<1x1x128xf32, #tpu.memory_space<vmem>>, vector<1x1x128xf32>,
    } else {
    }
    %c0_125 = arith.constant 0 : index
    %c0_126 = arith.constant 0 : index
    %c0_127 = arith.constant 0 : index
    %216 = vector.load %arg8[%c0_125, %c0_126, %c0_127] : memref<1x8x128xf32, #tpu.memory_space<vmem>>, vector<1x8x128xf32>
    %217 = vector.shape_cast %216 : vector<1x8x128xf32> to vector<8x128xf32>
    %218 = arith.addf %217, %212 : vector<8x128xf32>
    %c0_128 = arith.constant 0 : index
    %c0_129 = arith.constant 0 : index
    %c0_130 = arith.constant 0 : index
    %219 = vector.load %arg8[%c0_128, %c0_129, %c0_130] : memref<1x8x128xf32, #tpu.memory_space<vmem>>, vector<1x8x128xf32>
    %220 = vector.shape_cast %219 : vector<1x8x128xf32> to vector<8x128xf32>
    %221 = vector.shape_cast %218 : vector<8x128xf32> to vector<1x8x128xf32>
    tpu.vector_store %arg8[%c0_128, %c0_129, %c0_130], %221 {strides = array<i32>} : memref<1x8x128xf32, #tpu.memory_space<vmem>>, vector<1x8x128xf32>,
    %c0_131 = arith.constant 0 : index
    %c0_132 = arith.constant 0 : index
    %c0_133 = arith.constant 0 : index
    %222 = vector.load %arg9[%c0_131, %c0_132, %c0_133] : memref<1x1x128xf32, #tpu.memory_space<vmem>>, vector<1x1x128xf32>
    %223 = vector.shape_cast %222 : vector<1x1x128xf32> to vector<1x128xf32>
    %cst_134 = arith.constant dense<0.000000e+00> : vector<128xf32>
    %224 = vector.multi_reduction <add>, %29, %cst_134 [0] : vector<256x128xf32> to vector<128xf32>
    %225 = vector.shape_cast %224 : vector<128xf32> to vector<1x128xf32>
    %226 = arith.addf %223, %225 : vector<1x128xf32>
    %c0_135 = arith.constant 0 : index
    %c0_136 = arith.constant 0 : index
    %c0_137 = arith.constant 0 : index
    %227 = vector.load %arg9[%c0_135, %c0_136, %c0_137] : memref<1x1x128xf32, #tpu.memory_space<vmem>>, vector<1x1x128xf32>
    %228 = vector.shape_cast %227 : vector<1x1x128xf32> to vector<1x128xf32>
    %229 = vector.shape_cast %226 : vector<1x128xf32> to vector<1x1x128xf32>
    tpu.vector_store %arg9[%c0_135, %c0_136, %c0_137], %229 {strides = array<i32>} : memref<1x1x128xf32, #tpu.memory_space<vmem>>, vector<1x1x128xf32>,
    return
  }
  func.func @transform_1(%arg0: i32, %arg1: i32) -> (i32, i32) {
    %c0_i32 = arith.constant 0 : i32
    %c0_i32_0 = arith.constant 0 : i32
    %c0_i32_1 = arith.constant 0 : i32
    return %c0_i32, %c0_i32_0 : i32, i32
  }
  func.func @transform_2(%arg0: i32, %arg1: i32) -> (i32, i32, i32) {
    %c0_i32 = arith.constant 0 : i32
    %c0_i32_0 = arith.constant 0 : i32
    %c0_i32_1 = arith.constant 0 : i32
    %c0_i32_2 = arith.constant 0 : i32
    return %c0_i32, %c0_i32_0, %c0_i32_1 : i32, i32, i32
  }
  func.func @transform_3(%arg0: i32, %arg1: i32) -> (i32, i32, i32) {
    %c0_i32 = arith.constant 0 : i32
    %c0_i32_0 = arith.constant 0 : i32
    %c0_i32_1 = arith.constant 0 : i32
    %c0_i32_2 = arith.constant 0 : i32
    return %c0_i32, %c0_i32_0, %c0_i32_1 : i32, i32, i32
  }
  func.func @transform_4(%arg0: i32, %arg1: i32) -> (i32, i32, i32) {
    %c0_i32 = arith.constant 0 : i32
    %c0_i32_0 = arith.constant 0 : i32
    %c0_i32_1 = arith.constant 0 : i32
    %c0_i32_2 = arith.constant 0 : i32
    return %c0_i32, %c0_i32_0, %c0_i32_1 : i32, i32, i32
  }
  func.func @transform_5(%arg0: i32, %arg1: i32) -> (i32, i32, i32) {
    %c0_i32 = arith.constant 0 : i32
    %c0_i32_0 = arith.constant 0 : i32
    return %arg0, %arg1, %c0_i32 : i32, i32, i32
  }
  func.func @transform_6(%arg0: i32, %arg1: i32) -> (i32, i32, i32) {
    %c0_i32 = arith.constant 0 : i32
    %c0_i32_0 = arith.constant 0 : i32
    %c0_i32_1 = arith.constant 0 : i32
    return %arg0, %c0_i32, %c0_i32_0 : i32, i32, i32
  }
  func.func @transform_7(%arg0: i32, %arg1: i32) -> (i32, i32, i32) {
    %c0_i32 = arith.constant 0 : i32
    %c0_i32_0 = arith.constant 0 : i32
    %c0_i32_1 = arith.constant 0 : i32
    return %arg0, %c0_i32, %c0_i32_0 : i32, i32, i32
  }
}

</mosaic_0001>

<bundles_post_ra>
// kernel: tpu_custom_call.1
= control target key start
LH: loop header
LB: loop body
LE: loop exit
PB: predicated region body
PF: predicated region fallthrough
CT: control target
= control target key end

     0   :  { %s11156_s0 = inlined_call_operand.hbm [shape: f32[104,64,128], index: 0, kind: input, shape index: {}]   ;;  %s11157_s1 = inlined_call_operand.hbm [shape: f32[128,512], index: 1, kind: input, shape index: {}]   ;;  %s11158_s2 = inlined_call_operand.hbm [shape: f32[8,128,128], index: 2, kind: input, shape index: {}]   ;;  %s11159_s3 = inlined_call_operand.hbm [shape: f32[8,128,128], index: 3, kind: input, shape index: {}]   ;;  %s11160_s4 = inlined_call_operand.hbm [shape: f32[8,128,128], index: 4, kind: input, shape index: {}]   ;;  %s11161_s5 = inlined_call_operand.hbm [shape: f32[2,256,512], index: 5, kind: output, shape index: {0}]   ;;  %s11162_s6 = inlined_call_operand.hbm [shape: f32[2,8,128], index: 6, kind: output, shape index: {1}]   ;;  %s11163_s7 = inlined_call_operand.hbm [shape: f32[2,1,128], index: 7, kind: output, shape index: {2}]  }
   0x1   :  { %11193 = sst [smem:[#allocation138_spill]] %s11158_s2 }
   0x2   :  { %13 = vsyncpa [#allocation5], 0 }
   0x3   :  { %14 = vsyncpa [#allocation8], 0 }
   0x4   :  { %15 = vsyncpa [#allocation11], 0 }
   0x5   :  { %16 = vsyncpa [#allocation6], 0 }
   0x6   :  { %18 = vsyncpa [#allocation6 + $0x1], 0 }
   0x7   :  { %19 = vsyncpa [#allocation14], 0 }
   0x8   :  { %21 = vsyncpa [#allocation14 + $0x1], 0  ;;  %s8987_s24 = smov 0   ;;  %s8989_s25 = smov 0  }
   0x9   :  { %s8991_s26 = smov 0   ;;  %s8993_s27 = smov 0  }
   0xa   :  { %s8995_s28 = smov 0   ;;  %s8997_s29 = smov 0  }
   0xb LB: > { %11194 = sst [smem:[#allocation28_spill]] %s8921_s26  ;;  %s9018_s30 = sadd.s32 4294967295, %s8933_s29   ;;  %s8933_s29 = sphi %s8997_s29, %s27_s29   ;;  %s8929_s28 = sphi %s8995_s28, %s11425_s28   ;;  %s8925_s27 = sphi %s8993_s27, %s11424_s27   ;;  %s8921_s26 = sphi %s8991_s26, %s11423_s26   ;;  %s8917_s25 = sphi %s8989_s25, %s11427_s25   ;;  %s8913_s24 = sphi %s8987_s24, %s11426_s24  }
   0xc   : > { %11195 = sst [smem:[#allocation29_spill]] %s8929_s28  ;;  %s11164_s8 = sadd.s32 4294967294, %s8933_s29  }
   0xd   : > { %s39_s9 = sadd.s32 1, %s8929_s28  ;;  %s132_s10 = sadd.s32 1, %s8921_s26 }
   0xe   : > { %p41_p0 = scmp.ge.s32.totalorder %s39_s9, 2  ;;  %p142_p1 = scmp.ne.s32.totalorder %s8921_s26, %s8917_s25 }
   0xf   : > { %p143_p2 = scmp.eq.s32.totalorder %s9018_s30, 1  ;;  %p148_p3 = scmp.ne.s32.totalorder %s8917_s25, %s8913_s24 }
  0x10   : > { %s11429_s9 = smov (%p41_p0, %s39_s9), 0  ;;  %p149_p5 = scmp.eq.s32.totalorder %s11164_s8, 1 }
  0x11   : > { %11196 = sst [smem:[#allocation30_spill]] %s11429_s9  ;;  %p9030_p4 = por %p143_p2, %p142_p1 }
  0x12   : > { %s127_s12 = ssub.s32 %s8929_s28, %s11429_s9  ;;  %p8071_p6 = scmp.ge.s32.totalorder %s8933_s29, 1 }
  0x13   : > { %p130_p7 = scmp.eq.s32.totalorder %s127_s12, 0  ;;  %p9039_p8 = por %p149_p5, %p148_p3 }
  0x14   : > { %p208_p9 = scmp.lt.s32.totalorder %s8933_s29, 3  ;;  %p8140_p11 = scmp.eq.s32.totalorder %s9018_s30, 0 }
  0x15   : > { %s11198_s13 = scalar_select %p9039_p8, 1, 0 }
  0x16   : > { %s9045_s14 = scalar_select %p130_p7, %s8921_s26, %s132_s10  }
  0x17   : > { %11199 = sst [smem:[#allocation31_spill]] %s11198_s13  ;;  %p9047_p10 = pnand %p8071_p6, %p208_p9 }
  0x18   : > { %11200 = sst [smem:[#allocation32_spill]] %s9045_s14  ;;  %s8935_s19 = smov [#allocation7]  }
  0x19   : > { %s11202_s2 = sld [smem:[#allocation138_spill]]  ;;  %p8117_p12 = pneg %p9047_p10 }
  0x1a   : > { %s235_s20 = sshll.u32 %s8935_s19, 4  ;;  %s8936_s22 = smov 128   ;;  %s236_s20 = int_to_ptr.vmem [resolvable:$true] %s235_s20 }
  0x1b   : > { %p9059_p13 = pnand %p8140_p11, %p8117_p12  ;;  %s8937_s23 = smov 8  }
  0x1c   : > { %s219_s16 = sshll.u32 %s11157_s1, 4  ;;  %s8938_s17 = smov [#allocation4]   ;;  %s220_s16 = int_to_ptr.hbm [resolvable:$true] %s219_s16 }
  0x1d   : > { %s221_s19 = sshll.u32 %s8938_s17, 4  ;;  %s247_s9 = sshll.u32 %s11159_s3, 4  ;;  %s222_s19 = int_to_ptr.vmem [resolvable:$true] %s221_s19  ;;  %s248_s9 = int_to_ptr.hbm [resolvable:$true] %s247_s9 }
  0x1e   : > { %s8939_s28 = smov 512   ;;  %s8940_s14 = smov 32  }
  0x1f   : > { %s233_s18 = sshll.u32 %s11202_s2, 4  ;;  %s8941_s26 = smov [#allocation9]   ;;  %s234_s18 = int_to_ptr.hbm [resolvable:$true] %s233_s18 }
  0x20   : > { %8123 = dma.hbm_to_vmem [thread:$0]  (!%p9059_p13), %s234_s18, 16384, %s236_s20, [#allocation8], %s8936_s22, %s8936_s22, %s8937_s23  }
  0x21   : > { %8120 = dma.hbm_to_vmem [thread:$0]  (!%p9059_p13), %s220_s16, 8192, %s222_s19, [#allocation5], %s8939_s28, %s8939_s28, %s8940_s14  }
  0x22   : > { %s249_s18 = sshll.u32 %s8941_s26, 4  ;;  %s261_s10 = sshll.u32 %s11160_s4, 4  ;;  %s250_s18 = int_to_ptr.vmem [resolvable:$true] %s249_s18  ;;  %s262_s10 = int_to_ptr.hbm [resolvable:$true] %s261_s10 }
  0x23   : > { %8126 = dma.hbm_to_vmem [thread:$0]  (!%p9059_p13), %s248_s9, 16384, %s250_s18, [#allocation8], %s8936_s22, %s8936_s22, %s8937_s23  }
  0x24   : > { %s8942_s12 = smov [#allocation10]   ;;  %279 = sbr.rel (%p9047_p10) target bundleno = 2050 (0x802), region = 36 }
  0x25   : > { %s263_s17 = sshll.u32 %s8942_s12, 4  ;;  %s264_s17 = int_to_ptr.vmem [resolvable:$true] %s263_s17 }
  0x26   : > { %8129 = dma.hbm_to_vmem [thread:$0]  (!%p9059_p13), %s262_s10, 16384, %s264_s17, [#allocation11], %s8936_s22, %s8936_s22, %s8937_s23  }
  0x29   : > { %8890 = dma.done.wait (%p8140_p11), [#allocation5], 8192  }
  0x2a   : > { %8892 = vsyncadd (%p8140_p11), [#allocation5], 4294959104 }
  0x2b   : > { %8894 = dma.done.wait (%p8140_p11), [#allocation8], 32768  }
  0x2c   : > { %8896 = vsyncadd (%p8140_p11), [#allocation8], 4294934528 }
  0x2d   : > { %8898 = dma.done.wait (%p8140_p11), [#allocation11], 16384  }
  0x2e   : > { %8900 = vsyncadd (%p8140_p11), [#allocation11], 4294950912  ;;  %s9095_s2 = sand.u32 1, %s8917_s25   ;;  %s8083_s26 = smul.u32 3328, %s8925_s27 }
  0x2f   : > { %s8081_s28 = sshll.u32 %s9095_s2, 10  ;;  %s8082_s8 = sshll.u32 %s9095_s2, 3 }
  0x30   : > { %s348_s14 = scalar_lea.hbm %s11156_s0, %s8083_s26  ;;  %s8943_s21 = smov [#allocation2]  }
  0x31   : > { %s356_s15 = sshll.u32 %s348_s14, 4  ;;  %s358_s22 = sshll.u32 %s8943_s21, 4  ;;  %s357_s15 = int_to_ptr.hbm [resolvable:$true] %s356_s15  ;;  %s359_s22 = int_to_ptr.vmem [resolvable:$true] %s358_s22 }
  0x32   : > { %s8757_s23 = sshra.s32 %s357_s15, 4  ;;  %s8761_s20 = scalar_lea.hbm %s11156_s0, 6656  ;;  %s8758_s23 = int_to_ptr.hbm [resolvable:$true] %s8757_s23 }
  0x33   : > { %s8759_s16 = scalar_lea.hbm %s8758_s23, 3328  ;;  %p8762_p1 = scmp.lt.s32.totalorder %s8758_s23, %s11156_s0 }
  0x34   : > { %p8760_p0 = scmp.ne.s32.totalorder %s8758_s23, %s8759_s16  ;;  %p8763_p2 = scmp.lt.s32.totalorder %s8761_s20, %s8759_s16 }
  0x36   : > { %p8764_p3 = por %p8763_p2, %p8762_p1 }
  0x38   : > { %p8765_p5 = pnand %p8764_p3, %p8760_p0 }
  0x3a   : > { %8768 = shalt.err (!%p8765_p5)  }
  0x3b   : > { %361 = dma.hbm_to_vmem [thread:$0]  %s357_s15, 53248, %s359_s22, [#allocation3] }
  0x3c   : > { %s9109_s17 = scalar_lea.vmem [#allocation12], %s8081_s28  ;;  %s9111_s26 = scalar_lea.vmem [#allocation13], %s8082_s8 }
  0x3d   : > { %s9114_s9 = scalar_lea.vmem [#allocation15], %s9095_s2 }
  0x3e   : > { %8901 = dma.done.wait [#allocation3], 53248 }
  0x3f   : > { %8902 = vsyncadd [#allocation3], 4294914048  ;;  %v864_v0 = vld [vmem:[#allocation4 + $0x1e0] sm:$0xff]  ;;  %v866_v1 = vld [vmem:[#allocation4 + $0x1f0] sm:$0xff]  ;;  %vm1506_vm0 = vcmask 1045504   ;;  %vm1958_vm1 = vcmask 1041408  }
  0x40   : > { %v860_v2 = vld [vmem:[#allocation4 + $0x1c0] sm:$0xff]  ;;  %868 = vmatpush.msra.mxu0 %v864_v0  ;;  %1094 = vmatpush.msra.mxu2 %v866_v1  ;;  %v865_v3 = vld [vmem:[#allocation4 + $0x1e8] sm:$0xff]  ;;  %v862_v4 = vld [vmem:[#allocation4 + $0x1d0] sm:$0xff]  ;;  %vm3425_vm2 = vcmask 1043456   ;;  %vm7768_vm3 = vcmask 1040384   ;;  %s8094_s28 = sshll.u32 %s8925_s27, 10 }
  0x41   : > { %v867_v5 = vld [vmem:[#allocation4 + $0x1f8] sm:$0xff]  ;;  %981 = vmatpush.msra.mxu1 %v865_v3  ;;  %v856_v6 = vld [vmem:[#allocation4 + $0x1a0] sm:$0xff]  ;;  %v861_v7 = vld [vmem:[#allocation4 + $0x1c8] sm:$0xff]  ;;  %s7851_s14 = scalar_lea.hbm %s11161_s5, %s8094_s28  ;;  %s7852_s15 = sshll.u32 %s9109_s17, 4  ;;  %s7853_s15 = int_to_ptr.vmem [resolvable:$true] %s7852_s15 }
  0x42   : > { %1207 = vmatpush.msra.mxu3 %v867_v5  ;;  %v858_v8 = vld [vmem:[#allocation4 + $0x1b0] sm:$0xff]  ;;  %869 = vmatpush.msra.mxu0 %v860_v2  ;;  %v863_v9 = vld [vmem:[#allocation4 + $0x1d8] sm:$0xff]  ;;  %v857_v10 = vld [vmem:[#allocation4 + $0x1a8] sm:$0xff]  ;;  %s7854_s21 = sshll.u32 %s7851_s14, 4  ;;  %s7828_s22 = scalar_lea.sflag [#allocation6], %s9095_s2  ;;  %s7855_s21 = int_to_ptr.hbm [resolvable:$true] %s7854_s21 }
  0x43   : > { %1095 = vmatpush.msra.mxu2 %v862_v4  ;;  %982 = vmatpush.msra.mxu1 %v861_v7  ;;  %v852_v11 = vld [vmem:[#allocation4 + $0x180] sm:$0xff]  ;;  %v854_v12 = vld [vmem:[#allocation4 + $0x190] sm:$0xff]  ;;  %v859_v13 = vld [vmem:[#allocation4 + $0x1b8] sm:$0xff]  ;;  %s8795_s23 = sshra.s32 %s7855_s21, 4  ;;  %s8801_s20 = scalar_lea.hbm %s11161_s5, 2048  ;;  %s8796_s23 = int_to_ptr.hbm [resolvable:$true] %s8795_s23 }
  0x44   : > { %1208 = vmatpush.msra.mxu3 %v863_v9  ;;  %870 = vmatpush.msra.mxu0 %v856_v6  ;;  %v853_v14 = vld [vmem:[#allocation4 + $0x188] sm:$0xff]  ;;  %v855_v15 = vld [vmem:[#allocation4 + $0x198] sm:$0xff]  ;;  %v848_v16 = vld [vmem:[#allocation4 + $0x160] sm:$0xff]  ;;  %s8797_s16 = scalar_lea.hbm %s8796_s23, 1024  ;;  %p8802_p10 = scmp.lt.s32.totalorder %s8796_s23, %s11161_s5 }
  0x45   : > { %1096 = vmatpush.msra.mxu2 %v858_v8  ;;  %983 = vmatpush.msra.mxu1 %v857_v10  ;;  %v850_v17 = vld [vmem:[#allocation4 + $0x170] sm:$0xff]  ;;  %v849_v18 = vld [vmem:[#allocation4 + $0x168] sm:$0xff]  ;;  %v851_v19 = vld [vmem:[#allocation4 + $0x178] sm:$0xff]  ;;  %p8798_p6 = scmp.ne.s32.totalorder %s8796_s23, %s8797_s16  ;;  %p8803_p11 = scmp.lt.s32.totalorder %s8801_s20, %s8797_s16 }
  0x46   : > { %1209 = vmatpush.msra.mxu3 %v859_v13  ;;  %871 = vmatpush.msra.mxu0 %v852_v11  ;;  %v844_v20 = vld [vmem:[#allocation4 + $0x140] sm:$0xff]  ;;  %v846_v21 = vld [vmem:[#allocation4 + $0x150] sm:$0xff]  ;;  %v845_v22 = vld [vmem:[#allocation4 + $0x148] sm:$0xff] }
  0x47   : > { %1097 = vmatpush.msra.mxu2 %v854_v12  ;;  %984 = vmatpush.msra.mxu1 %v853_v14  ;;  %v847_v23 = vld [vmem:[#allocation4 + $0x158] sm:$0xff]  ;;  %v840_v24 = vld [vmem:[#allocation4 + $0x120] sm:$0xff]  ;;  %v842_v25 = vld [vmem:[#allocation4 + $0x130] sm:$0xff]  ;;  %p8799_p7 = pnand %p8798_p6, %p9030_p4  ;;  %p8804_p12 = por %p8803_p11, %p8802_p10 }
  0x48   : > { %1210 = vmatpush.msra.mxu3 %v855_v15  ;;  %872 = vmatpush.msra.mxu0 %v848_v16  ;;  %v841_v26 = vld [vmem:[#allocation4 + $0x128] sm:$0xff]  ;;  %v843_v27 = vld [vmem:[#allocation4 + $0x138] sm:$0xff]  ;;  %v836_v28 = vld [vmem:[#allocation4 + $0x100] sm:$0xff] }
  0x49   : > { %1098 = vmatpush.msra.mxu2 %v850_v17  ;;  %985 = vmatpush.msra.mxu1 %v849_v18  ;;  %v838_v29 = vld [vmem:[#allocation4 + $0x110] sm:$0xff]  ;;  %v837_v30 = vld [vmem:[#allocation4 + $0x108] sm:$0xff]  ;;  %v839_v31 = vld [vmem:[#allocation4 + $0x118] sm:$0xff]  ;;  %p8800_p9 = pneg %p8799_p7 }
  0x4a   : > { %1211 = vmatpush.msra.mxu3 %v851_v19  ;;  %873 = vmatpush.msra.mxu0 %v844_v20  ;;  %v832_v32 = vld [vmem:[#allocation4 + $0xe0] sm:$0xff]  ;;  %v834_v33 = vld [vmem:[#allocation4 + $0xf0] sm:$0xff]  ;;  %v833_v34 = vld [vmem:[#allocation4 + $0xe8] sm:$0xff] }
  0x4b   : > { %1099 = vmatpush.msra.mxu2 %v846_v21  ;;  %986 = vmatpush.msra.mxu1 %v845_v22  ;;  %v835_v35 = vld [vmem:[#allocation4 + $0xf8] sm:$0xff]  ;;  %v828_v36 = vld [vmem:[#allocation4 + $0xc0] sm:$0xff]  ;;  %v830_v37 = vld [vmem:[#allocation4 + $0xd0] sm:$0xff]  ;;  %p8805_p13 = pnand %p8804_p12, %p8800_p9 }
  0x4c   : > { %1212 = vmatpush.msra.mxu3 %v847_v23  ;;  %874 = vmatpush.msra.mxu0 %v840_v24  ;;  %v829_v38 = vld [vmem:[#allocation4 + $0xc8] sm:$0xff]  ;;  %v831_v39 = vld [vmem:[#allocation4 + $0xd8] sm:$0xff]  ;;  %v824_v40 = vld [vmem:[#allocation4 + $0xa0] sm:$0xff] }
  0x4d   : > { %1100 = vmatpush.msra.mxu2 %v842_v25  ;;  %987 = vmatpush.msra.mxu1 %v841_v26  ;;  %v826_v41 = vld [vmem:[#allocation4 + $0xb0] sm:$0xff]  ;;  %v825_v42 = vld [vmem:[#allocation4 + $0xa8] sm:$0xff]  ;;  %v827_v43 = vld [vmem:[#allocation4 + $0xb8] sm:$0xff] }
  0x4e   : > { %1213 = vmatpush.msra.mxu3 %v843_v27  ;;  %875 = vmatpush.msra.mxu0 %v836_v28  ;;  %v820_v44 = vld [vmem:[#allocation4 + $0x80] sm:$0xff]  ;;  %v822_v45 = vld [vmem:[#allocation4 + $0x90] sm:$0xff]  ;;  %v821_v46 = vld [vmem:[#allocation4 + $0x88] sm:$0xff] }
  0x4f   : > { %1101 = vmatpush.msra.mxu2 %v838_v29  ;;  %988 = vmatpush.msra.mxu1 %v837_v30  ;;  %v823_v47 = vld [vmem:[#allocation4 + $0x98] sm:$0xff]  ;;  %v816_v48 = vld [vmem:[#allocation4 + $0x60] sm:$0xff]  ;;  %v818_v49 = vld [vmem:[#allocation4 + $0x70] sm:$0xff] }
  0x50   : > { %1214 = vmatpush.msra.mxu3 %v839_v31  ;;  %876 = vmatpush.msra.mxu0 %v832_v32  ;;  %v817_v50 = vld [vmem:[#allocation4 + $0x68] sm:$0xff]  ;;  %v819_v51 = vld [vmem:[#allocation4 + $0x78] sm:$0xff]  ;;  %v812_v52 = vld [vmem:[#allocation4 + $0x40] sm:$0xff] }
  0x51   : > { %1102 = vmatpush.msra.mxu2 %v834_v33  ;;  %989 = vmatpush.msra.mxu1 %v833_v34  ;;  %v814_v53 = vld [vmem:[#allocation4 + $0x50] sm:$0xff]  ;;  %v813_v54 = vld [vmem:[#allocation4 + $0x48] sm:$0xff]  ;;  %v815_v55 = vld [vmem:[#allocation4 + $0x58] sm:$0xff] }
  0x52   : > { %1215 = vmatpush.msra.mxu3 %v835_v35  ;;  %877 = vmatpush.msra.mxu0 %v828_v36  ;;  %v808_v56 = vld [vmem:[#allocation4 + $0x20] sm:$0xff]  ;;  %v810_v57 = vld [vmem:[#allocation4 + $0x30] sm:$0xff]  ;;  %v809_v58 = vld [vmem:[#allocation4 + $0x28] sm:$0xff] }
  0x53   : > { %1103 = vmatpush.msra.mxu2 %v830_v37  ;;  %990 = vmatpush.msra.mxu1 %v829_v38  ;;  %v811_v59 = vld [vmem:[#allocation4 + $0x38] sm:$0xff]  ;;  %v804_v60 = vld [vmem:[#allocation4] sm:$0xff]  ;;  %v806_v61 = vld [vmem:[#allocation4 + $0x10] sm:$0xff] }
  0x54   : > { %1216 = vmatpush.msra.mxu3 %v831_v39  ;;  %878 = vmatpush.msra.mxu0 %v824_v40  ;;  %v9116_v62 = vld [vmem:[#allocation2 + $0x498] sm:$0xff]  ;;  %v805_v0 = vld [vmem:[#allocation4 + $0x8] sm:$0xff]  ;;  %v2086_v5 = vld [vmem:[#allocation7 + $0x170] sm:$0xff] }
  0x55   : > { %1104 = vmatpush.msra.mxu2 %v826_v41  ;;  %991 = vmatpush.msra.mxu1 %v825_v42  ;;  %v2087_v63 = vld [vmem:[#allocation7 + $0x178] sm:$0xff]  ;;  %v1633_v6 = vld [vmem:[#allocation7 + $0x70] sm:$0xff]  ;;  %v2085_v9 = vld [vmem:[#allocation7 + $0x168] sm:$0xff] }
  0x56   : > { %1217 = vmatpush.msra.mxu3 %v827_v43  ;;  %879 = vmatpush.msra.mxu0 %v820_v44  ;;  %v807_v1 = vld [vmem:[#allocation4 + $0x18] sm:$0xff]  ;;  %v2308_v7 = vld [vmem:[#allocation7 + $0x1f0] sm:$0xff]  ;;  %v1632_v10 = vld [vmem:[#allocation7 + $0x68] sm:$0xff] }
  0x57   : > { %1105 = vmatpush.msra.mxu2 %v822_v45  ;;  %992 = vmatpush.msra.mxu1 %v821_v46  ;;  %v1634_v2 = vld [vmem:[#allocation7 + $0x78] sm:$0xff]  ;;  %v1795_v8 = vld [vmem:[#allocation7 + $0xf0] sm:$0xff]  ;;  %v9122_v11 = vld [vmem:[#allocation2 + $0x4a0] sm:$0xff] }
  0x58   : > { %1218 = vmatpush.msra.mxu3 %v823_v47  ;;  %880 = vmatpush.msra.mxu0 %v816_v48  ;;  %v2309_v3 = vld [vmem:[#allocation7 + $0x1f8] sm:$0xff]  ;;  %v2307_v12 = vld [vmem:[#allocation7 + $0x1e8] sm:$0xff]  ;;  %v2084_v15 = vld [vmem:[#allocation7 + $0x160] sm:$0xff] }
  0x59   : > { %1106 = vmatpush.msra.mxu2 %v818_v49  ;;  %993 = vmatpush.msra.mxu1 %v817_v50  ;;  %v1796_v4 = vld [vmem:[#allocation7 + $0xf8] sm:$0xff]  ;;  %v1794_v13 = vld [vmem:[#allocation7 + $0xe8] sm:$0xff]  ;;  %v1631_v16 = vld [vmem:[#allocation7 + $0x60] sm:$0xff] }
  0x5a   : > { %1219 = vmatpush.msra.mxu3 %v819_v51  ;;  %881 = vmatpush.msra.mxu0 %v812_v52  ;;  %v9128_v14 = vld [vmem:[#allocation2 + $0x4d8] sm:$0xff]  ;;  %v2306_v17 = vld [vmem:[#allocation7 + $0x1e0] sm:$0xff]  ;;  %v2082_v27 = vld [vmem:[#allocation7 + $0x150] sm:$0xff] }
  0x5b   : > { %1107 = vmatpush.msra.mxu2 %v814_v53  ;;  %994 = vmatpush.msra.mxu1 %v813_v54  ;;  %v1793_v18 = vld [vmem:[#allocation7 + $0xe0] sm:$0xff]  ;;  %v9140_v20 = vld [vmem:[#allocation2 + $0x518] sm:$0xff]  ;;  %v1629_v28 = vld [vmem:[#allocation7 + $0x50] sm:$0xff] }
  0x5c   : > { %1220 = vmatpush.msra.mxu3 %v815_v55  ;;  %882 = vmatpush.msra.mxu0 %v808_v56  ;;  %v9134_v19 = vld [vmem:[#allocation2 + $0x4e0] sm:$0xff]  ;;  %v2083_v21 = vld [vmem:[#allocation7 + $0x158] sm:$0xff]  ;;  %v2304_v29 = vld [vmem:[#allocation7 + $0x1d0] sm:$0xff] }
  0x5d   : > { %1108 = vmatpush.msra.mxu2 %v810_v57  ;;  %995 = vmatpush.msra.mxu1 %v809_v58  ;;  %v1630_v22 = vld [vmem:[#allocation7 + $0x58] sm:$0xff]  ;;  %v9146_v25 = vld [vmem:[#allocation2 + $0x520] sm:$0xff]  ;;  %v1791_v30 = vld [vmem:[#allocation7 + $0xd0] sm:$0xff] }
  0x5e   : > { %1221 = vmatpush.msra.mxu3 %v811_v59  ;;  %883 = vmatpush.msra.mxu0 %v804_v60  ;;  %v2305_v23 = vld [vmem:[#allocation7 + $0x1d8] sm:$0xff]  ;;  %v9158_v31 = vld [vmem:[#allocation2 + $0x560] sm:$0xff]  ;;  %v2081_v33 = vld [vmem:[#allocation7 + $0x148] sm:$0xff] }
  0x5f   : > { %1109 = vmatpush.msra.mxu2 %v806_v61  ;;  %884 = vmatmul.f32.vlgmr.msra.gmra.mxu0 %v9116_v62  ;;  %v1792_v24 = vld [vmem:[#allocation7 + $0xd8] sm:$0xff]  ;;  %v1628_v34 = vld [vmem:[#allocation7 + $0x48] sm:$0xff]  ;;  %v9170_v37 = vld [vmem:[#allocation2 + $0x5a0] sm:$0xff] }
  0x60   : > { %1110 = vmatmul.f32.vlgmr.msra.gmra.mxu2 %v9116_v62  ;;  %996 = vmatpush.msra.mxu1 %v805_v0  ;;  %v9152_v26 = vld [vmem:[#allocation2 + $0x558] sm:$0xff]  ;;  %v2303_v35 = vld [vmem:[#allocation7 + $0x1c8] sm:$0xff]  ;;  %v2080_v39 = vld [vmem:[#allocation7 + $0x140] sm:$0xff] }
  0x61   : > { %2088 = vmatpush.msrb.mxu2 %v2087_v63  ;;  %1222 = vmatpush.msra.mxu3 %v807_v1  ;;  %v9164_v32 = vld [vmem:[#allocation2 + $0x598] sm:$0xff]  ;;  %v1790_v36 = vld [vmem:[#allocation7 + $0xc8] sm:$0xff]  ;;  %v1627_v40 = vld [vmem:[#allocation7 + $0x40] sm:$0xff] }
  0x62   : > { %997 = vmatmul.f32.vlgmr.msra.gmra.mxu1 %v9116_v62  ;;  %1223 = vmatmul.f32.vlgmr.msra.gmra.mxu3 %v9116_v62  ;;  %v579_v38 = vld [vmem:[#allocation2 + $0x5d8] sm:$0xff]  ;;  %v2302_v41 = vld [vmem:[#allocation7 + $0x1c0] sm:$0xff]  ;;  %v2078_v51 = vld [vmem:[#allocation7 + $0x130] sm:$0xff] }
  0x63   : > { %1635 = vmatpush.msrb.mxu0 %v1634_v2  ;;  %2310 = vmatpush.msrb.mxu3 %v2309_v3  ;;  %v1789_v42 = vld [vmem:[#allocation7 + $0xc0] sm:$0xff]  ;;  %v587_v44 = vld [vmem:[#allocation2 + $0x618] sm:$0xff]  ;;  %v1625_v52 = vld [vmem:[#allocation7 + $0x30] sm:$0xff] }
  0x64   : > { %1797 = vmatpush.msrb.mxu1 %v1796_v4  ;;  %2089 = vmatpush.msrb.mxu2 %v2086_v5  ;;  %v580_v43 = vld [vmem:[#allocation2 + $0x5e0] sm:$0xff]  ;;  %v2079_v45 = vld [vmem:[#allocation7 + $0x138] sm:$0xff]  ;;  %v2300_v53 = vld [vmem:[#allocation7 + $0x1b0] sm:$0xff] }
  0x65   : > { %1636 = vmatpush.msrb.mxu0 %v1633_v6  ;;  %2311 = vmatpush.msrb.mxu3 %v2308_v7  ;;  %v1626_v46 = vld [vmem:[#allocation7 + $0x38] sm:$0xff]  ;;  %v588_v49 = vld [vmem:[#allocation2 + $0x620] sm:$0xff]  ;;  %v1787_v54 = vld [vmem:[#allocation7 + $0xb0] sm:$0xff] }
  0x66   : > { %1798 = vmatpush.msrb.mxu1 %v1795_v8  ;;  %2090 = vmatpush.msrb.mxu2 %v2085_v9  ;;  %v2301_v47 = vld [vmem:[#allocation7 + $0x1b8] sm:$0xff]  ;;  %v596_v55 = vld [vmem:[#allocation2 + $0x660] sm:$0xff]  ;;  %v2077_v59 = vld [vmem:[#allocation7 + $0x128] sm:$0xff] }
  0x67   : > { %1637 = vmatpush.msrb.mxu0 %v1632_v10  ;;  %2312 = vmatpush.msrb.mxu3 %v2307_v12  ;;  %v1788_v48 = vld [vmem:[#allocation7 + $0xb8] sm:$0xff]  ;;  %v1624_v61 = vld [vmem:[#allocation7 + $0x28] sm:$0xff]  ;;  %v604_v2 = vld [vmem:[#allocation2 + $0x6a0] sm:$0xff] }
  0x68   : > { %887 = vmatmul.f32.gmra.mxu0 %v9122_v11  ;;  %1113 = vmatmul.f32.gmra.mxu2 %v9122_v11  ;;  %v595_v50 = vld [vmem:[#allocation2 + $0x658] sm:$0xff]  ;;  %v2299_v63 = vld [vmem:[#allocation7 + $0x1a8] sm:$0xff]  ;;  %v2076_v10 = vld [vmem:[#allocation7 + $0x120] sm:$0xff] }
  0x69   : > { %1799 = vmatpush.msrb.mxu1 %v1794_v13  ;;  %2091 = vmatpush.msrb.mxu2 %v2084_v15  ;;  %v603_v57 = vld [vmem:[#allocation2 + $0x698] sm:$0xff]  ;;  %v1786_v0 = vld [vmem:[#allocation7 + $0xa8] sm:$0xff]  ;;  %v1623_v13 = vld [vmem:[#allocation7 + $0x20] sm:$0xff] }
  0x6a   : > { %1000 = vmatmul.f32.gmra.mxu1 %v9122_v11  ;;  %1226 = vmatmul.f32.gmra.mxu3 %v9122_v11  ;;  %v611_v7 = vld [vmem:[#allocation2 + $0x6d8] sm:$0xff]  ;;  %v2298_v15 = vld [vmem:[#allocation7 + $0x1a0] sm:$0xff] }
  0x6b   : > { %1638 = vmatpush.msrb.mxu0 %v1631_v16  ;;  %2313 = vmatpush.msrb.mxu3 %v2306_v17  ;;  %v1785_v16 = vld [vmem:[#allocation7 + $0xa0] sm:$0xff] }
  0x6c   : > { %1800 = vmatpush.msrb.mxu1 %v1793_v18  ;;  %2092 = vmatpush.msrb.mxu2 %v2083_v21  ;;  %v612_v18 = vld [vmem:[#allocation2 + $0x6e0] sm:$0xff] }
  0x6d   : > { %1639 = vmatpush.msrb.mxu0 %v1630_v22  ;;  %2314 = vmatpush.msrb.mxu3 %v2305_v23 }
  0x6e   : > { %1801 = vmatpush.msrb.mxu1 %v1792_v24  ;;  %2093 = vmatpush.msrb.mxu2 %v2082_v27  ;;  %v619_v27 = vld [vmem:[#allocation2 + $0x718] sm:$0xff] }
  0x6f   : > { %1640 = vmatpush.msrb.mxu0 %v1629_v28  ;;  %2315 = vmatpush.msrb.mxu3 %v2304_v29 }
  0x70   : > { %890 = vmatmul.f32.gmra.mxu0 %v9128_v14  ;;  %1116 = vmatmul.f32.gmra.mxu2 %v9128_v14 }
  0x71   : > { %1802 = vmatpush.msrb.mxu1 %v1791_v30  ;;  %2094 = vmatpush.msrb.mxu2 %v2081_v33  ;;  %v2075_v30 = vld [vmem:[#allocation7 + $0x118] sm:$0xff] }
  0x72   : > { %1003 = vmatmul.f32.gmra.mxu1 %v9128_v14  ;;  %1229 = vmatmul.f32.gmra.mxu3 %v9128_v14 }
  0x73   : > { %1641 = vmatpush.msrb.mxu0 %v1628_v34  ;;  %2316 = vmatpush.msrb.mxu3 %v2303_v35  ;;  %v1622_v34 = vld [vmem:[#allocation7 + $0x18] sm:$0xff] }
  0x74   : > { %1803 = vmatpush.msrb.mxu1 %v1790_v36  ;;  %2095 = vmatpush.msrb.mxu2 %v2080_v39  ;;  %v2297_v35 = vld [vmem:[#allocation7 + $0x198] sm:$0xff]  ;;  %v620_v39 = vld [vmem:[#allocation2 + $0x720] sm:$0xff] }
  0x75   : > { %1642 = vmatpush.msrb.mxu0 %v1627_v40  ;;  %2317 = vmatpush.msrb.mxu3 %v2302_v41  ;;  %v1784_v36 = vld [vmem:[#allocation7 + $0x98] sm:$0xff] }
  0x76   : > { %1804 = vmatpush.msrb.mxu1 %v1789_v42  ;;  %2096 = vmatpush.msrb.mxu2 %v2079_v45 }
  0x77   : > { %1643 = vmatpush.msrb.mxu0 %v1626_v46  ;;  %2318 = vmatpush.msrb.mxu3 %v2301_v47  ;;  %v2074_v47 = vld [vmem:[#allocation7 + $0x110] sm:$0xff] }
  0x78   : > { %893 = vmatmul.f32.gmra.mxu0 %v9134_v19  ;;  %1119 = vmatmul.f32.gmra.mxu2 %v9134_v19 }
  0x79   : > { %1805 = vmatpush.msrb.mxu1 %v1788_v48  ;;  %2097 = vmatpush.msrb.mxu2 %v2078_v51  ;;  %v1783_v51 = vld [vmem:[#allocation7 + $0x90] sm:$0xff] }
  0x7a   : > { %1006 = vmatmul.f32.gmra.mxu1 %v9134_v19  ;;  %1232 = vmatmul.f32.gmra.mxu3 %v9134_v19 }
  0x7b   : > { %1644 = vmatpush.msrb.mxu0 %v1625_v52  ;;  %2319 = vmatpush.msrb.mxu3 %v2300_v53  ;;  %v628_v53 = vld [vmem:[#allocation2 + $0x760] sm:$0xff] }
  0x7c   : > { %1806 = vmatpush.msrb.mxu1 %v1787_v54  ;;  %2098 = vmatpush.msrb.mxu2 %v2077_v59  ;;  %v635_v59 = vld [vmem:[#allocation2 + $0x798] sm:$0xff] }
  0x7d   : > { %1645 = vmatpush.msrb.mxu0 %v1624_v61  ;;  %2320 = vmatpush.msrb.mxu3 %v2299_v63 }
  0x7e   : > { %1807 = vmatpush.msrb.mxu1 %v1786_v0  ;;  %2099 = vmatpush.msrb.mxu2 %v2076_v10  ;;  %v2073_v0 = vld [vmem:[#allocation7 + $0x108] sm:$0xff] }
  0x7f   : > { %1646 = vmatpush.msrb.mxu0 %v1623_v13  ;;  %2321 = vmatpush.msrb.mxu3 %v2298_v15  ;;  %v636_v13 = vld [vmem:[#allocation2 + $0x7a0] sm:$0xff] }
  0x80   : > { %896 = vmatmul.f32.gmra.mxu0 %v9140_v20  ;;  %1122 = vmatmul.f32.gmra.mxu2 %v9140_v20 }
  0x81   : > { %1808 = vmatpush.msrb.mxu1 %v1785_v16  ;;  %2100 = vmatpush.msrb.mxu2 %v2075_v30 }
  0x82   : > { %1009 = vmatmul.f32.gmra.mxu1 %v9140_v20  ;;  %1235 = vmatmul.f32.gmra.mxu3 %v9140_v20 }
  0x83   : > { %1647 = vmatpush.msrb.mxu0 %v1622_v34  ;;  %2322 = vmatpush.msrb.mxu3 %v2297_v35  ;;  %v2072_v34 = vld [vmem:[#allocation7 + $0x100] sm:$0xff] }
  0x84   : > { %1809 = vmatpush.msrb.mxu1 %v1784_v36  ;;  %2101 = vmatpush.msrb.mxu2 %v2074_v47  ;;  %v1619_v36 = vld [vmem:[#allocation7] sm:$0xff] }
  0x86   : > { %1810 = vmatpush.msrb.mxu1 %v1783_v51  ;;  %2102 = vmatpush.msrb.mxu2 %v2073_v0 }
  0x88   : > { %899 = vmatmul.f32.gmra.mxu0 %v9146_v25  ;;  %1125 = vmatmul.f32.gmra.mxu2 %v9146_v25 }
  0x89   : > { %2103 = vmatpush.msrb.mxu2 %v2072_v34 }
  0x8a   : > { %1012 = vmatmul.f32.gmra.mxu1 %v9146_v25  ;;  %1238 = vmatmul.f32.gmra.mxu3 %v9146_v25 }
  0x90   : > { %902 = vmatmul.f32.gmra.mxu0 %v9152_v26  ;;  %1128 = vmatmul.f32.gmra.mxu2 %v9152_v26 }
  0x92   : > { %1015 = vmatmul.f32.gmra.mxu1 %v9152_v26  ;;  %1241 = vmatmul.f32.gmra.mxu3 %v9152_v26 }
  0x98   : > { %905 = vmatmul.f32.gmra.mxu0 %v9158_v31  ;;  %1131 = vmatmul.f32.gmra.mxu2 %v9158_v31 }
  0x9a   : > { %1018 = vmatmul.f32.gmra.mxu1 %v9158_v31  ;;  %1244 = vmatmul.f32.gmra.mxu3 %v9158_v31 }
  0xa0   : > { %908 = vmatmul.f32.gmra.mxu0 %v9164_v32  ;;  %1134 = vmatmul.f32.gmra.mxu2 %v9164_v32 }
  0xa2   : > { %1021 = vmatmul.f32.gmra.mxu1 %v9164_v32  ;;  %1247 = vmatmul.f32.gmra.mxu3 %v9164_v32 }
  0xa8   : > { %911 = vmatmul.f32.gmra.mxu0 %v9170_v37  ;;  %1137 = vmatmul.f32.gmra.mxu2 %v9170_v37 }
  0xaa   : > { %1024 = vmatmul.f32.gmra.mxu1 %v9170_v37  ;;  %1250 = vmatmul.f32.gmra.mxu3 %v9170_v37 }
  0xb0   : > { %914 = vmatmul.f32.gmra.mxu0 %v579_v38  ;;  %1140 = vmatmul.f32.gmra.mxu2 %v579_v38 }
  0xb2   : > { %1027 = vmatmul.f32.gmra.mxu1 %v579_v38  ;;  %1253 = vmatmul.f32.gmra.mxu3 %v579_v38 }
  0xb8   : > { %917 = vmatmul.f32.gmra.mxu0 %v580_v43  ;;  %1143 = vmatmul.f32.gmra.mxu2 %v580_v43 }
  0xba   : > { %1030 = vmatmul.f32.gmra.mxu1 %v580_v43  ;;  %1256 = vmatmul.f32.gmra.mxu3 %v580_v43 }
  0xc0   : > { %920 = vmatmul.f32.gmra.mxu0 %v587_v44  ;;  %1146 = vmatmul.f32.gmra.mxu2 %v587_v44 }
  0xc2   : > { %1033 = vmatmul.f32.gmra.mxu1 %v587_v44  ;;  %1259 = vmatmul.f32.gmra.mxu3 %v587_v44  ;;  %v627_v44 = vld [vmem:[#allocation2 + $0x758] sm:$0xff] }
  0xc8   : > { %923 = vmatmul.f32.gmra.mxu0 %v588_v49  ;;  %1149 = vmatmul.f32.gmra.mxu2 %v588_v49 }
  0xca   : > { %1036 = vmatmul.f32.gmra.mxu1 %v588_v49  ;;  %1262 = vmatmul.f32.gmra.mxu3 %v588_v49  ;;  %v1621_v49 = vld [vmem:[#allocation7 + $0x10] sm:$0xff] }
  0xcb   : > { %1648 = vmatpush.msrb.mxu0 %v1621_v49 }
  0xd0   : > { %926 = vmatmul.f32.gmra.mxu0 %v595_v50  ;;  %1152 = vmatmul.f32.gmra.mxu2 %v595_v50 }
  0xd2   : > { %1039 = vmatmul.f32.gmra.mxu1 %v595_v50  ;;  %1265 = vmatmul.f32.gmra.mxu3 %v595_v50  ;;  %v2296_v50 = vld [vmem:[#allocation7 + $0x190] sm:$0xff] }
  0xd3   : > { %2323 = vmatpush.msrb.mxu3 %v2296_v50 }
  0xd8   : > { %929 = vmatmul.f32.gmra.mxu0 %v596_v55  ;;  %1155 = vmatmul.f32.gmra.mxu2 %v596_v55 }
  0xda   : > { %1042 = vmatmul.f32.gmra.mxu1 %v596_v55  ;;  %1268 = vmatmul.f32.gmra.mxu3 %v596_v55 }
  0xdc   : > { %v885_v56 = vpop.f32.mrf.mxu0 }
  0xdd   : > { %1320 = vst [vmem:[%s9109_s17] sm:$0xff] %v885_v56 }
  0xdf   : > { %v9177_v58 = vpop.f32.mrf.mxu1 }
  0xe0   : > { %932 = vmatmul.f32.gmra.mxu0 %v603_v57  ;;  %1158 = vmatmul.f32.gmra.mxu2 %v603_v57 }
  0xe2   : > { %1045 = vmatmul.f32.gmra.mxu1 %v603_v57  ;;  %1271 = vmatmul.f32.gmra.mxu3 %v603_v57 }
  0xe3   : > { %v9179_v60 = vpop.f32.mrf.mxu2 }
  0xe4   : > { %11204 = vst [vmem:[#allocation33_spill] sm:$0xff] %v9179_v60  ;;  %v9515_v60 = vld [vmem:[#allocation2 + $0x660] sm:$0xff] }
  0xe5   : > { %v888_v1 = vpop.f32.mrf.mxu0  ;;  %v9182_v3 = vpop.f32.mrf.mxu3 }
  0xe6   : > { %1321 = vst [vmem:[%s9109_s17 + $0x20] sm:$0xff] %v888_v1 }
  0xe7   : > { %11205 = vst [vmem:[#allocation34_spill] sm:$0xff] %v9182_v3  ;;  %v9184_v4 = vpop.f32.mrf.mxu1  ;;  %v1545_v3 = vrot.slane %v9134_v19, 2 }
  0xe8   : > { %935 = vmatmul.f32.gmra.mxu0 %v604_v2  ;;  %1161 = vmatmul.f32.gmra.mxu2 %v604_v2 }
  0xea   : > { %1048 = vmatmul.f32.gmra.mxu1 %v604_v2  ;;  %1274 = vmatmul.f32.gmra.mxu3 %v604_v2  ;;  %v1620_v2 = vld [vmem:[#allocation7 + $0x8] sm:$0xff] }
  0xeb   : > { %v9186_v5 = vpop.f32.mrf.mxu2  ;;  %1649 = vmatpush.msrb.mxu0 %v1620_v2  ;;  %v2519_v2 = vld [vmem:[#allocation7 + $0x278] sm:$0xff] }
  0xec   : > { %11206 = vst [vmem:[#allocation35_spill] sm:$0xff] %v9186_v5 }
  0xed   : > { %v891_v6 = vpop.f32.mrf.mxu0  ;;  %v9189_v8 = vpop.f32.mrf.mxu3  ;;  %1650 = vmatpush.msrb.mxu0 %v1619_v36 }
  0xee   : > { %1322 = vst [vmem:[%s9109_s17 + $0x40] sm:$0xff] %v891_v6  ;;  %v2295_v6 = vld [vmem:[#allocation7 + $0x188] sm:$0xff] }
  0xef   : > { %11207 = vst [vmem:[#allocation36_spill] sm:$0xff] %v9189_v8  ;;  %v9191_v9 = vpop.f32.mrf.mxu1  ;;  %2324 = vmatpush.msrb.mxu3 %v2295_v6  ;;  %v3113_v6 = vld [vmem:[#allocation7 + $0x3f8] sm:$0xff]  ;;  %2520 = vmatpush.msra.mxu0 %v2519_v2  ;;  %v2740_v2 = vld [vmem:[#allocation7 + $0x2f0] sm:$0xff]  ;;  %v2900_v8 = vld [vmem:[#allocation7 + $0x360] sm:$0xff] }
  0xf0   : > { %938 = vmatmul.f32.gmra.mxu0 %v611_v7  ;;  %1164 = vmatmul.f32.gmra.mxu2 %v611_v7 }
  0xf2   : > { %1051 = vmatmul.f32.gmra.mxu1 %v611_v7  ;;  %1277 = vmatmul.f32.gmra.mxu3 %v611_v7  ;;  %v1782_v7 = vld [vmem:[#allocation7 + $0x88] sm:$0xff] }
  0xf3   : > { %v9193_v12 = vpop.f32.mrf.mxu2  ;;  %1811 = vmatpush.msrb.mxu1 %v1782_v7  ;;  %v2741_v7 = vld [vmem:[#allocation7 + $0x2f8] sm:$0xff] }
  0xf4   : > { %11208 = vst [vmem:[#allocation37_spill] sm:$0xff] %v9193_v12 }
  0xf5   : > { %v894_v17 = vpop.f32.mrf.mxu0  ;;  %v9196_v21 = vpop.f32.mrf.mxu3 }
  0xf6   : > { %1323 = vst [vmem:[%s9109_s17 + $0x60] sm:$0xff] %v894_v17 }
  0xf7   : > { %11209 = vst [vmem:[#allocation38_spill] sm:$0xff] %v9196_v21  ;;  %v9198_v22 = vpop.f32.mrf.mxu1 }
  0xf8   : > { %941 = vmatmul.f32.gmra.mxu0 %v612_v18  ;;  %1167 = vmatmul.f32.gmra.mxu2 %v612_v18 }
  0xfa   : > { %1054 = vmatmul.f32.gmra.mxu1 %v612_v18  ;;  %1280 = vmatmul.f32.gmra.mxu3 %v612_v18 }
  0xfb   : > { %v9200_v23 = vpop.f32.mrf.mxu2 }
  0xfc   : > { %11210 = vst [vmem:[#allocation39_spill] sm:$0xff] %v9200_v23  ;;  %v594_v23 = vld [vmem:[#allocation2 + $0x650] sm:$0xff] }
  0xfd   : > { %v897_v24 = vpop.f32.mrf.mxu0  ;;  %v9203_v28 = vpop.f32.mrf.mxu3 }
  0xfe   : > { %1324 = vst [vmem:[%s9109_s17 + $0x80] sm:$0xff] %v897_v24  ;;  %v643_v24 = vld [vmem:[#allocation2 + $0x7d8] sm:$0xff] }
  0xff   : > { %11211 = vst [vmem:[#allocation40_spill] sm:$0xff] %v9203_v28  ;;  %v9205_v29 = vpop.f32.mrf.mxu1  ;;  %v504_v28 = vld [vmem:[#allocation2 + $0x360] sm:$0xff] }
 0x100   : > { %944 = vmatmul.f32.gmra.mxu0 %v619_v27  ;;  %1170 = vmatmul.f32.gmra.mxu2 %v619_v27 }
 0x102   : > { %1057 = vmatmul.f32.gmra.mxu1 %v619_v27  ;;  %1283 = vmatmul.f32.gmra.mxu3 %v619_v27 }
 0x103   : > { %v9207_v33 = vpop.f32.mrf.mxu2 }
 0x104   : > { %11212 = vst [vmem:[#allocation41_spill] sm:$0xff] %v9207_v33 }
 0x105   : > { %v900_v38 = vpop.f32.mrf.mxu0  ;;  %v9210_v40 = vpop.f32.mrf.mxu3 }
 0x106   : > { %1325 = vst [vmem:[%s9109_s17 + $0xa0] sm:$0xff] %v900_v38  ;;  %v2294_v38 = vld [vmem:[#allocation7 + $0x180] sm:$0xff] }
 0x107   : > { %11213 = vst [vmem:[#allocation42_spill] sm:$0xff] %v9210_v40  ;;  %v9212_v41 = vpop.f32.mrf.mxu1  ;;  %2325 = vmatpush.msrb.mxu3 %v2294_v38  ;;  %v659_v38 = vld [vmem:[#allocation2 + $0x858] sm:$0xff]  ;;  %v1540_v40 = vrot.slane %v9122_v11, 2 }
 0x108   : > { %947 = vmatmul.f32.gmra.mxu0 %v620_v39  ;;  %1173 = vmatmul.f32.gmra.mxu2 %v620_v39 }
 0x109   : > { %3114 = vmatpush.msra.mxu3 %v3113_v6 }
 0x10a   : > { %1060 = vmatmul.f32.gmra.mxu1 %v620_v39  ;;  %1286 = vmatmul.f32.gmra.mxu3 %v620_v39  ;;  %v1781_v39 = vld [vmem:[#allocation7 + $0x80] sm:$0xff] }
 0x10b   : > { %v9214_v42 = vpop.f32.mrf.mxu2  ;;  %1812 = vmatpush.msrb.mxu1 %v1781_v39 }
 0x10c   : > { %11214 = vst [vmem:[#allocation43_spill] sm:$0xff] %v9214_v42  ;;  %v586_v42 = vld [vmem:[#allocation2 + $0x610] sm:$0xff] }
 0x10d   : > { %v903_v43 = vpop.f32.mrf.mxu0  ;;  %v9217_v45 = vpop.f32.mrf.mxu3  ;;  %2742 = vmatpush.msra.mxu1 %v2741_v7  ;;  %v660_v7 = vld [vmem:[#allocation2 + $0x860] sm:$0xff] }
 0x10e   : > { %1326 = vst [vmem:[%s9109_s17 + $0xc0] sm:$0xff] %v903_v43 }
 0x10f   : > { %11215 = vst [vmem:[#allocation44_spill] sm:$0xff] %v9217_v45  ;;  %v9219_v46 = vpop.f32.mrf.mxu1  ;;  %2743 = vmatpush.msra.mxu1 %v2740_v2  ;;  %v2901_v45 = vld [vmem:[#allocation7 + $0x368] sm:$0xff] }
 0x110   : > { %950 = vmatmul.f32.gmra.mxu0 %v627_v44  ;;  %1176 = vmatmul.f32.gmra.mxu2 %v627_v44 }
 0x112   : > { %1063 = vmatmul.f32.gmra.mxu1 %v627_v44  ;;  %1289 = vmatmul.f32.gmra.mxu3 %v627_v44  ;;  %v644_v44 = vld [vmem:[#allocation2 + $0x7e0] sm:$0xff] }
 0x113   : > { %v9221_v48 = vpop.f32.mrf.mxu2 }
 0x114   : > { %11216 = vst [vmem:[#allocation45_spill] sm:$0xff] %v9221_v48 }
 0x115   : > { %v906_v52 = vpop.f32.mrf.mxu0  ;;  %v9224_v54 = vpop.f32.mrf.mxu3 }
 0x116   : > { %1327 = vst [vmem:[%s9109_s17 + $0xe0] sm:$0xff] %v906_v52  ;;  %v651_v52 = vld [vmem:[#allocation2 + $0x818] sm:$0xff] }
 0x117   : > { %11217 = vst [vmem:[#allocation46_spill] sm:$0xff] %v9224_v54  ;;  %v9226_v55 = vpop.f32.mrf.mxu1 }
 0x118   : > { %953 = vmatmul.f32.gmra.mxu0 %v628_v53  ;;  %1179 = vmatmul.f32.gmra.mxu2 %v628_v53 }
 0x11a   : > { %1066 = vmatmul.f32.gmra.mxu1 %v628_v53  ;;  %1292 = vmatmul.f32.gmra.mxu3 %v628_v53 }
 0x11b   : > { %v9228_v56 = vpop.f32.mrf.mxu2 }
 0x11c   : > { %11218 = vst [vmem:[#allocation47_spill] sm:$0xff] %v9228_v56  ;;  %v8211_v56 = vld [vmem:[#allocation2 + $0x498] sm:$0xff] }
 0x11d   : > { %v909_v57 = vpop.f32.mrf.mxu0  ;;  %v9231_v61 = vpop.f32.mrf.mxu3 }
 0x11e   : > { %1328 = vst [vmem:[%s9109_s17 + $0x100] sm:$0xff] %v909_v57 }
 0x11f   : > { %11219 = vst [vmem:[#allocation48_spill] sm:$0xff] %v9231_v61  ;;  %v9233_v63 = vpop.f32.mrf.mxu1  ;;  %v497_v61 = vld [vmem:[#allocation2 + $0x328] sm:$0xff] }
 0x120   : > { %956 = vmatmul.f32.gmra.mxu0 %v635_v59  ;;  %1182 = vmatmul.f32.gmra.mxu2 %v635_v59 }
 0x122   : > { %1069 = vmatmul.f32.gmra.mxu1 %v635_v59  ;;  %1295 = vmatmul.f32.gmra.mxu3 %v635_v59  ;;  %v2903_v59 = vld [vmem:[#allocation7 + $0x378] sm:$0xff] }
 0x123   : > { %v9235_v1 = vpop.f32.mrf.mxu2  ;;  %2904 = vmatpush.msra.mxu2 %v2903_v59  ;;  %v3112_v59 = vld [vmem:[#allocation7 + $0x3f0] sm:$0xff] }
 0x124   : > { %11220 = vst [vmem:[#allocation49_spill] sm:$0xff] %v9235_v1  ;;  %3115 = vmatpush.msra.mxu3 %v3112_v59  ;;  %v9442_v1 = vld [vmem:[#allocation2 + $0x5e0] sm:$0xff] }
 0x125   : > { %v912_v10 = vpop.f32.mrf.mxu0  ;;  %v9238_v15 = vpop.f32.mrf.mxu3 }
 0x126   : > { %1329 = vst [vmem:[%s9109_s17 + $0x120] sm:$0xff] %v912_v10 }
 0x127   : > { %11221 = vst [vmem:[#allocation50_spill] sm:$0xff] %v9238_v15  ;;  %v9240_v16 = vpop.f32.mrf.mxu1 }
 0x128   : > { %959 = vmatmul.f32.gmra.mxu0 %v636_v13  ;;  %1185 = vmatmul.f32.gmra.mxu2 %v636_v13 }
 0x12a   : > { %1072 = vmatmul.f32.gmra.mxu1 %v636_v13  ;;  %1298 = vmatmul.f32.gmra.mxu3 %v636_v13  ;;  %v652_v13 = vld [vmem:[#allocation2 + $0x820] sm:$0xff] }
 0x12b   : > { %v9242_v17 = vpop.f32.mrf.mxu2 }
 0x12c   : > { %11222 = vst [vmem:[#allocation51_spill] sm:$0xff] %v9242_v17 }
 0x12d   : > { %v915_v18 = vpop.f32.mrf.mxu0  ;;  %v9245_v27 = vpop.f32.mrf.mxu3 }
 0x12e   : > { %1330 = vst [vmem:[%s9109_s17 + $0x140] sm:$0xff] %v915_v18 }
 0x12f   : > { %11223 = vst [vmem:[#allocation52_spill] sm:$0xff] %v9245_v27  ;;  %v9247_v30 = vpop.f32.mrf.mxu1 }
 0x130   : > { %962 = vmatmul.f32.gmra.mxu0 %v643_v24  ;;  %1188 = vmatmul.f32.gmra.mxu2 %v643_v24 }
 0x132   : > { %1075 = vmatmul.f32.gmra.mxu1 %v643_v24  ;;  %1301 = vmatmul.f32.gmra.mxu3 %v643_v24 }
 0x133   : > { %v9249_v35 = vpop.f32.mrf.mxu2 }
 0x134   : > { %11224 = vst [vmem:[#allocation53_spill] sm:$0xff] %v9249_v35 }
 0x135   : > { %v918_v43 = vpop.f32.mrf.mxu0  ;;  %v9252_v47 = vpop.f32.mrf.mxu3 }
 0x136   : > { %1331 = vst [vmem:[%s9109_s17 + $0x160] sm:$0xff] %v918_v43 }
 0x137   : > { %11225 = vst [vmem:[#allocation54_spill] sm:$0xff] %v9252_v47  ;;  %v9254_v49 = vpop.f32.mrf.mxu1 }
 0x138   : > { %965 = vmatmul.f32.gmra.mxu0 %v644_v44  ;;  %1191 = vmatmul.f32.gmra.mxu2 %v644_v44 }
 0x13a   : > { %1078 = vmatmul.f32.gmra.mxu1 %v644_v44  ;;  %1304 = vmatmul.f32.gmra.mxu3 %v644_v44  ;;  %v2902_v44 = vld [vmem:[#allocation7 + $0x370] sm:$0xff] }
 0x13b   : > { %v9256_v50 = vpop.f32.mrf.mxu2  ;;  %2905 = vmatpush.msra.mxu2 %v2902_v44 }
 0x13c   : > { %11226 = vst [vmem:[#allocation55_spill] sm:$0xff] %v9256_v50  ;;  %v533_v50 = vld [vmem:[#allocation2 + $0x460] sm:$0xff] }
 0x13d   : > { %v921_v51 = vpop.f32.mrf.mxu0  ;;  %v9259_v53 = vpop.f32.mrf.mxu3  ;;  %2906 = vmatpush.msra.mxu2 %v2901_v45 }
 0x13e   : > { %1332 = vst [vmem:[%s9109_s17 + $0x180] sm:$0xff] %v921_v51 }
 0x13f   : > { %11227 = vst [vmem:[#allocation56_spill] sm:$0xff] %v9259_v53  ;;  %v9261_v57 = vpop.f32.mrf.mxu1  ;;  %2907 = vmatpush.msra.mxu2 %v2900_v8 }
 0x140   : > { %968 = vmatmul.f32.gmra.mxu0 %v651_v52  ;;  %1194 = vmatmul.f32.gmra.mxu2 %v651_v52 }
 0x142   : > { %1081 = vmatmul.f32.gmra.mxu1 %v651_v52  ;;  %1307 = vmatmul.f32.gmra.mxu3 %v651_v52  ;;  %v2518_v52 = vld [vmem:[#allocation7 + $0x270] sm:$0xff] }
 0x143   : > { %v9263_v0 = vpop.f32.mrf.mxu2  ;;  %2521 = vmatpush.msra.mxu0 %v2518_v52  ;;  %v538_v52 = vld [vmem:[#allocation2 + $0x490] sm:$0xff] }
 0x144   : > { %11228 = vst [vmem:[#allocation57_spill] sm:$0xff] %v9263_v0  ;;  %v1537_v2 = vrot.slane %v538_v52, 2  ;;  %v1560_v0 = vrot.slane %v9170_v37, 2 }
 0x145   : > { %v924_v10 = vpop.f32.mrf.mxu0  ;;  %v9266_v18 = vpop.f32.mrf.mxu3 }
 0x146   : > { %1333 = vst [vmem:[%s9109_s17 + $0x1a0] sm:$0xff] %v924_v10 }
 0x147   : > { %11229 = vst [vmem:[#allocation58_spill] sm:$0xff] %v9266_v18  ;;  %v9268_v24 = vpop.f32.mrf.mxu1 }
 0x148   : > { %971 = vmatmul.f32.gmra.mxu0 %v652_v13  ;;  %1197 = vmatmul.f32.gmra.mxu2 %v652_v13 }
 0x14a   : > { %1084 = vmatmul.f32.gmra.mxu1 %v652_v13  ;;  %1310 = vmatmul.f32.gmra.mxu3 %v652_v13  ;;  %v494_v13 = vld [vmem:[#allocation2 + $0x310] sm:$0xff] }
 0x14b   : > { %v9270_v34 = vpop.f32.mrf.mxu2 }
 0x14c   : > { %11230 = vst [vmem:[#allocation59_spill] sm:$0xff] %v9270_v34  ;;  %v527_v34 = vld [vmem:[#allocation2 + $0x420] sm:$0xff] }
 0x14d   : > { %v927_v36 = vpop.f32.mrf.mxu0  ;;  %v9273_v39 = vpop.f32.mrf.mxu3 }
 0x14e   : > { %1334 = vst [vmem:[%s9109_s17 + $0x1c0] sm:$0xff] %v927_v36  ;;  %v495_v36 = vld [vmem:[#allocation2 + $0x318] sm:$0xff] }
 0x14f   : > { %11231 = vst [vmem:[#allocation60_spill] sm:$0xff] %v9273_v39  ;;  %v9275_v43 = vpop.f32.mrf.mxu1  ;;  %v496_v39 = vld [vmem:[#allocation2 + $0x320] sm:$0xff]  ;;  %v1508_v44 = vrot.slane %v495_v36, 2  ;;  %v1959_v53 = vrot.slane %v495_v36, 6 }
 0x150   : > { %974 = vmatmul.f32.gmra.mxu0 %v659_v38  ;;  %1200 = vmatmul.f32.gmra.mxu2 %v659_v38  ;;  %v1960_v47 = vrot.slane %v496_v39, 6  ;;  %v1510_v52 = vrot.slane %v496_v39, 2 }
 0x152   : > { %1087 = vmatmul.f32.gmra.mxu1 %v659_v38  ;;  %1313 = vmatmul.f32.gmra.mxu3 %v659_v38  ;;  %v1507_v38 = vrot.slane %v494_v13, 2  ;;  %v1961_v15 = vsel %vm1958_vm1, %v1959_v53, %v1960_v47 }
 0x153   : > { %v9277_v51 = vpop.f32.mrf.mxu2 }
 0x154   : > { %11232 = vst [vmem:[#allocation61_spill] sm:$0xff] %v9277_v51  ;;  %v1509_v27 = vsel %vm1506_vm0, %v1507_v38, %v1508_v44  ;;  %v3111_v38 = vld [vmem:[#allocation7 + $0x3e8] sm:$0xff]  ;;  %v1555_v51 = vrot.slane %v9158_v31, 2 }
 0x155   : > { %v930_v6 = vpop.f32.mrf.mxu0  ;;  %v9280_v10 = vpop.f32.mrf.mxu3  ;;  %3116 = vmatpush.msra.mxu3 %v3111_v38 }
 0x156   : > { %1335 = vst [vmem:[%s9109_s17 + $0x1e0] sm:$0xff] %v930_v6  ;;  %v1538_v6 = vrot.slane %v9116_v62, 2  ;;  %v1962_v62 = vrot.slane %v497_v61, 6  ;;  %v502_v61 = vld [vmem:[#allocation2 + $0x350] sm:$0xff] }
 0x157   : > { %11233 = vst [vmem:[#allocation62_spill] sm:$0xff] %v9280_v10  ;;  %v9282_v18 = vpop.f32.mrf.mxu1 }
 0x158   : > { %977 = vmatmul.f32.gmra.mxu0 %v660_v7  ;;  %1203 = vmatmul.f32.gmra.mxu2 %v660_v7  ;;  %v9309_v11 = vsel %vm1506_vm0, %v1538_v6, %v1540_v40 }
 0x15a   : > { %1090 = vmatmul.f32.gmra.mxu1 %v660_v7  ;;  %1316 = vmatmul.f32.gmra.mxu3 %v660_v7  ;;  %v9295_v7 = vsel %vm1506_vm0, %v1537_v2, %v1538_v6  ;;  %v1963_v2 = vsel %vm1958_vm1, %v1960_v47, %v1962_v62  ;;  %v546_v47 = vld [vmem:[#allocation2 + $0x4d0] sm:$0xff]  ;;  %v505_v6 = vld [vmem:[#allocation2 + $0x368] sm:$0xff] }
 0x15b   : > { %v9284_v59 = vpop.f32.mrf.mxu2  ;;  %v1542_v62 = vrot.slane %v546_v47, 2  ;;  %v1515_v47 = vrot.slane %v504_v28, 2 }
 0x15c   : > { %11234 = vst [vmem:[#allocation63_spill] sm:$0xff] %v9284_v59  ;;  %v520_v59 = vld [vmem:[#allocation2 + $0x3e0] sm:$0xff] }
 0x15d   : > { %v933_v10 = vpop.f32.mrf.mxu0  ;;  %v9290_v13 = vpop.f32.mrf.mxu3 }
 0x15e   : > { %1336 = vst [vmem:[%s9109_s17 + $0x200] sm:$0xff] %v933_v10  ;;  %v2517_v10 = vld [vmem:[#allocation7 + $0x268] sm:$0xff] }
 0x15f   : > { %11235 = vst [vmem:[#allocation64_spill] sm:$0xff] %v9290_v13  ;;  %v9292_v54 = vpop.f32.mrf.mxu1  ;;  %v2739_v13 = vld [vmem:[#allocation7 + $0x2e8] sm:$0xff]  ;;  %2522 = vmatpush.msra.mxu0 %v2517_v10  ;;  %v1512_v10 = vrot.slane %v502_v61, 2 }
 0x160   : > { %1651 = vmatmul.f32.vlgmr.msrb.gmra.mxu0 %v1509_v27  ;;  %2104 = vmatmul.f32.vlgmr.msrb.gmra.mxu2 %v1961_v15  ;;  %v1511_v27 = vsel %vm1506_vm0, %v1508_v44, %v1510_v52  ;;  %v1965_v52 = vrot.slane %v504_v28, 6 }
 0x161   : > { %2744 = vmatpush.msra.mxu1 %v2739_v13 }
 0x162   : > { %1813 = vmatmul.f32.vlgmr.msrb.gmra.mxu1 %v495_v36  ;;  %2326 = vmatmul.f32.vlgmr.msrb.gmra.mxu3 %v9295_v7  ;;  %v503_v36 = vld [vmem:[#allocation2 + $0x358] sm:$0xff] }
 0x163   : > { %v9298_v53 = vpop.f32.mrf.mxu2  ;;  %v1513_v38 = vrot.slane %v503_v36, 2  ;;  %v1964_v44 = vrot.slane %v503_v36, 6 }
 0x164   : > { %11236 = vst [vmem:[#allocation65_spill] sm:$0xff] %v9298_v53  ;;  %v1550_v53 = vrot.slane %v9146_v25, 2 }
 0x165   : > { %v936_v15 = vpop.f32.mrf.mxu0  ;;  %v9304_v45 = vpop.f32.mrf.mxu3 }
 0x166   : > { %1337 = vst [vmem:[%s9109_s17 + $0x220] sm:$0xff] %v936_v15  ;;  %v1543_v15 = vrot.slane %v9128_v14, 2  ;;  %v1967_v14 = vrot.slane %v505_v6, 6  ;;  %v511_v6 = vld [vmem:[#allocation2 + $0x398] sm:$0xff] }
 0x167   : > { %11237 = vst [vmem:[#allocation66_spill] sm:$0xff] %v9304_v45  ;;  %v9306_v21 = vpop.f32.mrf.mxu1 }
 0x168   : > { %1654 = vmatmul.f32.gmra.mxu0 %v1511_v27  ;;  %2107 = vmatmul.f32.gmra.mxu2 %v1963_v2  ;;  %v1514_v27 = vsel %vm1506_vm0, %v1512_v10, %v1513_v38  ;;  %v1966_v2 = vsel %vm1958_vm1, %v1964_v44, %v1965_v52  ;;  %v3110_v44 = vld [vmem:[#allocation7 + $0x3e0] sm:$0xff]  ;;  %v9337_v19 = vsel %vm1506_vm0, %v1543_v15, %v1545_v3 }
 0x169   : > { %3117 = vmatpush.msra.mxu3 %v3110_v44  ;;  %v1518_v44 = vrot.slane %v511_v6, 2 }
 0x16a   : > { %1816 = vmatmul.f32.gmra.mxu1 %v496_v39  ;;  %2329 = vmatmul.f32.gmra.mxu3 %v9309_v11  ;;  %v9323_v39 = vsel %vm1506_vm0, %v1542_v62, %v1543_v15  ;;  %v1516_v62 = vsel %vm1506_vm0, %v1513_v38, %v1515_v47  ;;  %v1969_v38 = vrot.slane %v511_v6, 6  ;;  %v513_v15 = vld [vmem:[#allocation2 + $0x3a8] sm:$0xff] }
 0x16b   : > { %v9312_v13 = vpop.f32.mrf.mxu2 }
 0x16c   : > { %11238 = vst [vmem:[#allocation67_spill] sm:$0xff] %v9312_v13  ;;  %v512_v13 = vld [vmem:[#allocation2 + $0x3a0] sm:$0xff] }
 0x16d   : > { %v939_v45 = vpop.f32.mrf.mxu0  ;;  %v9318_v40 = vpop.f32.mrf.mxu3  ;;  %v1970_v47 = vrot.slane %v512_v13, 6 }
 0x16e   : > { %1338 = vst [vmem:[%s9109_s17 + $0x240] sm:$0xff] %v939_v45  ;;  %v2516_v45 = vld [vmem:[#allocation7 + $0x260] sm:$0xff] }
 0x16f   : > { %11239 = vst [vmem:[#allocation68_spill] sm:$0xff] %v9318_v40  ;;  %v9320_v61 = vpop.f32.mrf.mxu1  ;;  %v2738_v40 = vld [vmem:[#allocation7 + $0x2e0] sm:$0xff]  ;;  %2523 = vmatpush.msra.mxu0 %v2516_v45 }
 0x170   : > { %1657 = vmatmul.f32.gmra.mxu0 %v1514_v27  ;;  %2110 = vmatmul.f32.gmra.mxu2 %v1966_v2  ;;  %v1968_v2 = vsel %vm1958_vm1, %v1965_v52, %v1967_v14  ;;  %v554_v52 = vld [vmem:[#allocation2 + $0x510] sm:$0xff] }
 0x171   : > { %2745 = vmatpush.msra.mxu1 %v2738_v40  ;;  %v1547_v14 = vrot.slane %v554_v52, 2  ;;  %v1520_v52 = vrot.slane %v512_v13, 2 }
 0x172   : > { %1819 = vmatmul.f32.gmra.mxu1 %v503_v36  ;;  %2332 = vmatmul.f32.gmra.mxu3 %v9323_v39  ;;  %v510_v36 = vld [vmem:[#allocation2 + $0x390] sm:$0xff] }
 0x173   : > { %v9326_v10 = vpop.f32.mrf.mxu2  ;;  %v1517_v45 = vrot.slane %v510_v36, 2 }
 0x174   : > { %11240 = vst [vmem:[#allocation69_spill] sm:$0xff] %v9326_v10 }
 0x175   : > { %v942_v27 = vpop.f32.mrf.mxu0  ;;  %v9332_v8 = vpop.f32.mrf.mxu3 }
 0x176   : > { %1339 = vst [vmem:[%s9109_s17 + $0x260] sm:$0xff] %v942_v27  ;;  %v1548_v27 = vrot.slane %v9140_v20, 2  ;;  %v1972_v20 = vrot.slane %v513_v15, 6  ;;  %v519_v15 = vld [vmem:[#allocation2 + $0x3d8] sm:$0xff] }
 0x177   : > { %11241 = vst [vmem:[#allocation70_spill] sm:$0xff] %v9332_v8  ;;  %v9334_v10 = vpop.f32.mrf.mxu1 }
 0x178   : > { %1660 = vmatmul.f32.gmra.mxu0 %v1516_v62  ;;  %2113 = vmatmul.f32.gmra.mxu2 %v1968_v2  ;;  %v1519_v62 = vsel %vm1506_vm0, %v1517_v45, %v1518_v44  ;;  %v1971_v2 = vsel %vm1958_vm1, %v1969_v38, %v1970_v47  ;;  %v3109_v38 = vld [vmem:[#allocation7 + $0x3d8] sm:$0xff]  ;;  %v9365_v25 = vsel %vm1506_vm0, %v1548_v27, %v1550_v53 }
 0x179   : > { %3118 = vmatpush.msra.mxu3 %v3109_v38  ;;  %v1523_v38 = vrot.slane %v519_v15, 2 }
 0x17a   : > { %1822 = vmatmul.f32.gmra.mxu1 %v504_v28  ;;  %2335 = vmatmul.f32.gmra.mxu3 %v9337_v19  ;;  %v9351_v28 = vsel %vm1506_vm0, %v1547_v14, %v1548_v27  ;;  %v1521_v14 = vsel %vm1506_vm0, %v1518_v44, %v1520_v52  ;;  %v1974_v44 = vrot.slane %v519_v15, 6  ;;  %v1975_v52 = vrot.slane %v520_v59, 6  ;;  %v521_v27 = vld [vmem:[#allocation2 + $0x3e8] sm:$0xff] }
 0x17b   : > { %v9340_v40 = vpop.f32.mrf.mxu2 }
 0x17c   : > { %11242 = vst [vmem:[#allocation71_spill] sm:$0xff] %v9340_v40  ;;  %v2899_v40 = vld [vmem:[#allocation7 + $0x358] sm:$0xff] }
 0x17d   : > { %v945_v8 = vpop.f32.mrf.mxu0  ;;  %v9346_v3 = vpop.f32.mrf.mxu3  ;;  %2908 = vmatpush.msra.mxu2 %v2899_v40 }
 0x17e   : > { %1340 = vst [vmem:[%s9109_s17 + $0x280] sm:$0xff] %v945_v8  ;;  %v2515_v8 = vld [vmem:[#allocation7 + $0x258] sm:$0xff] }
 0x17f   : > { %11243 = vst [vmem:[#allocation72_spill] sm:$0xff] %v9346_v3  ;;  %v9348_v36 = vpop.f32.mrf.mxu1  ;;  %v2737_v3 = vld [vmem:[#allocation7 + $0x2d8] sm:$0xff]  ;;  %2524 = vmatpush.msra.mxu0 %v2515_v8 }
 0x180   : > { %1663 = vmatmul.f32.gmra.mxu0 %v1519_v62  ;;  %2116 = vmatmul.f32.gmra.mxu2 %v1971_v2  ;;  %v1973_v2 = vsel %vm1958_vm1, %v1970_v47, %v1972_v20  ;;  %v562_v47 = vld [vmem:[#allocation2 + $0x550] sm:$0xff] }
 0x181   : > { %2746 = vmatpush.msra.mxu1 %v2737_v3  ;;  %v1552_v20 = vrot.slane %v562_v47, 2  ;;  %v1525_v47 = vrot.slane %v520_v59, 2 }
 0x182   : > { %1825 = vmatmul.f32.gmra.mxu1 %v511_v6  ;;  %2338 = vmatmul.f32.gmra.mxu3 %v9351_v28  ;;  %v518_v6 = vld [vmem:[#allocation2 + $0x3d0] sm:$0xff] }
 0x183   : > { %v9354_v45 = vpop.f32.mrf.mxu2  ;;  %v1522_v8 = vrot.slane %v518_v6, 2 }
 0x184   : > { %11244 = vst [vmem:[#allocation73_spill] sm:$0xff] %v9354_v45 }
 0x185   : > { %v948_v62 = vpop.f32.mrf.mxu0  ;;  %v9360_v40 = vpop.f32.mrf.mxu3 }
 0x186   : > { %1341 = vst [vmem:[%s9109_s17 + $0x2a0] sm:$0xff] %v948_v62  ;;  %v1553_v62 = vrot.slane %v9152_v26, 2  ;;  %v1977_v26 = vrot.slane %v521_v27, 6  ;;  %v526_v27 = vld [vmem:[#allocation2 + $0x418] sm:$0xff] }
 0x187   : > { %11245 = vst [vmem:[#allocation74_spill] sm:$0xff] %v9360_v40  ;;  %v9362_v45 = vpop.f32.mrf.mxu1 }
 0x188   : > { %11246 = vst [vmem:[#allocation75_spill] sm:$0xff] %v9362_v45  ;;  %1666 = vmatmul.f32.gmra.mxu0 %v1521_v14  ;;  %2119 = vmatmul.f32.gmra.mxu2 %v1973_v2  ;;  %v1524_v14 = vsel %vm1506_vm0, %v1522_v8, %v1523_v38  ;;  %v1976_v2 = vsel %vm1958_vm1, %v1974_v44, %v1975_v52  ;;  %v3108_v44 = vld [vmem:[#allocation7 + $0x3d0] sm:$0xff] }
 0x189   : > { %3119 = vmatpush.msra.mxu3 %v3108_v44  ;;  %v9393_v31 = vsel %vm1506_vm0, %v1553_v62, %v1555_v51  ;;  %v1528_v44 = vrot.slane %v526_v27, 2 }
 0x18a   : > { %1828 = vmatmul.f32.gmra.mxu1 %v512_v13  ;;  %2341 = vmatmul.f32.gmra.mxu3 %v9365_v25  ;;  %v9379_v13 = vsel %vm1506_vm0, %v1552_v20, %v1553_v62  ;;  %v1526_v20 = vsel %vm1506_vm0, %v1523_v38, %v1525_v47  ;;  %v1979_v38 = vrot.slane %v526_v27, 6  ;;  %v1980_v47 = vrot.slane %v527_v34, 6  ;;  %v528_v62 = vld [vmem:[#allocation2 + $0x428] sm:$0xff] }
 0x18b   : > { %v9368_v3 = vpop.f32.mrf.mxu2 }
 0x18c   : > { %11247 = vst [vmem:[#allocation76_spill] sm:$0xff] %v9368_v3  ;;  %v2898_v3 = vld [vmem:[#allocation7 + $0x350] sm:$0xff] }
 0x18d   : > { %v951_v40 = vpop.f32.mrf.mxu0  ;;  %v9374_v53 = vpop.f32.mrf.mxu3  ;;  %2909 = vmatpush.msra.mxu2 %v2898_v3 }
 0x18e   : > { %1342 = vst [vmem:[%s9109_s17 + $0x2c0] sm:$0xff] %v951_v40  ;;  %v2514_v40 = vld [vmem:[#allocation7 + $0x250] sm:$0xff] }
 0x18f   : > { %11248 = vst [vmem:[#allocation77_spill] sm:$0xff] %v9374_v53  ;;  %v9376_v6 = vpop.f32.mrf.mxu1  ;;  %v2736_v53 = vld [vmem:[#allocation7 + $0x2d0] sm:$0xff]  ;;  %2525 = vmatpush.msra.mxu0 %v2514_v40 }
 0x190   : > { %11249 = vst [vmem:[#allocation78_spill] sm:$0xff] %v9376_v6  ;;  %1669 = vmatmul.f32.gmra.mxu0 %v1524_v14  ;;  %2122 = vmatmul.f32.gmra.mxu2 %v1976_v2  ;;  %v1978_v2 = vsel %vm1958_vm1, %v1975_v52, %v1977_v26  ;;  %v570_v52 = vld [vmem:[#allocation2 + $0x590] sm:$0xff] }
 0x191   : > { %2747 = vmatpush.msra.mxu1 %v2736_v53  ;;  %v1557_v26 = vrot.slane %v570_v52, 2  ;;  %v1530_v52 = vrot.slane %v527_v34, 2 }
 0x192   : > { %1831 = vmatmul.f32.gmra.mxu1 %v519_v15  ;;  %2344 = vmatmul.f32.gmra.mxu3 %v9379_v13  ;;  %v525_v15 = vld [vmem:[#allocation2 + $0x410] sm:$0xff] }
 0x193   : > { %v9382_v8 = vpop.f32.mrf.mxu2  ;;  %v1527_v40 = vrot.slane %v525_v15, 2 }
 0x194   : > { %11250 = vst [vmem:[#allocation79_spill] sm:$0xff] %v9382_v8 }
 0x195   : > { %v954_v14 = vpop.f32.mrf.mxu0  ;;  %v9388_v3 = vpop.f32.mrf.mxu3 }
 0x196   : > { %1343 = vst [vmem:[%s9109_s17 + $0x2e0] sm:$0xff] %v954_v14  ;;  %v1558_v14 = vrot.slane %v9164_v32, 2  ;;  %v1982_v32 = vrot.slane %v528_v62, 6  ;;  %v532_v62 = vld [vmem:[#allocation2 + $0x458] sm:$0xff] }
 0x197   : > { %11251 = vst [vmem:[#allocation80_spill] sm:$0xff] %v9388_v3  ;;  %v9390_v8 = vpop.f32.mrf.mxu1 }
 0x198   : > { %11252 = vst [vmem:[#allocation81_spill] sm:$0xff] %v9390_v8  ;;  %1672 = vmatmul.f32.gmra.mxu0 %v1526_v20  ;;  %2125 = vmatmul.f32.gmra.mxu2 %v1978_v2  ;;  %v1529_v20 = vsel %vm1506_vm0, %v1527_v40, %v1528_v44  ;;  %v1981_v2 = vsel %vm1958_vm1, %v1979_v38, %v1980_v47  ;;  %v3107_v38 = vld [vmem:[#allocation7 + $0x3c8] sm:$0xff] }
 0x199   : > { %3120 = vmatpush.msra.mxu3 %v3107_v38  ;;  %v9421_v37 = vsel %vm1506_vm0, %v1558_v14, %v1560_v0  ;;  %v1533_v38 = vrot.slane %v532_v62, 2  ;;  %v2731_v8 = vld [vmem:[#allocation7 + $0x2a8] sm:$0xff] }
 0x19a   : > { %1834 = vmatmul.f32.gmra.mxu1 %v520_v59  ;;  %2347 = vmatmul.f32.gmra.mxu3 %v9393_v31  ;;  %v9407_v59 = vsel %vm1506_vm0, %v1557_v26, %v1558_v14  ;;  %v1531_v26 = vsel %vm1506_vm0, %v1528_v44, %v1530_v52  ;;  %v1984_v44 = vrot.slane %v532_v62, 6  ;;  %v1985_v52 = vrot.slane %v533_v50, 6 }
 0x19b   : > { %v9396_v53 = vpop.f32.mrf.mxu2 }
 0x19c   : > { %11253 = vst [vmem:[#allocation82_spill] sm:$0xff] %v9396_v53  ;;  %v2897_v53 = vld [vmem:[#allocation7 + $0x348] sm:$0xff]  ;;  %v1986_v0 = vsel %vm1958_vm1, %v1984_v44, %v1985_v52  ;;  %v2512_v44 = vld [vmem:[#allocation7 + $0x240] sm:$0xff] }
 0x19d   : > { %v957_v3 = vpop.f32.mrf.mxu0  ;;  %v9402_v51 = vpop.f32.mrf.mxu3  ;;  %2910 = vmatpush.msra.mxu2 %v2897_v53 }
 0x19e   : > { %1344 = vst [vmem:[%s9109_s17 + $0x300] sm:$0xff] %v957_v3  ;;  %v2513_v3 = vld [vmem:[#allocation7 + $0x248] sm:$0xff] }
 0x19f   : > { %11254 = vst [vmem:[#allocation83_spill] sm:$0xff] %v9402_v51  ;;  %v9404_v15 = vpop.f32.mrf.mxu1  ;;  %v2735_v51 = vld [vmem:[#allocation7 + $0x2c8] sm:$0xff]  ;;  %2526 = vmatpush.msra.mxu0 %v2513_v3 }
 0x1a0   : > { %11255 = vst [vmem:[#allocation84_spill] sm:$0xff] %v9404_v15  ;;  %1675 = vmatmul.f32.gmra.mxu0 %v1529_v20  ;;  %2128 = vmatmul.f32.gmra.mxu2 %v1981_v2  ;;  %v1983_v2 = vsel %vm1958_vm1, %v1980_v47, %v1982_v32  ;;  %v578_v47 = vld [vmem:[#allocation2 + $0x5d0] sm:$0xff]  ;;  %v3103_v15 = vld [vmem:[#allocation7 + $0x3a8] sm:$0xff] }
 0x1a1   : > { %2748 = vmatpush.msra.mxu1 %v2735_v51  ;;  %v1562_v32 = vrot.slane %v578_v47, 2  ;;  %v2896_v47 = vld [vmem:[#allocation7 + $0x340] sm:$0xff]  ;;  %2527 = vmatpush.msra.mxu0 %v2512_v44  ;;  %v1989_v44 = vrot.slane %v8211_v56, 6 }
 0x1a2   : > { %1837 = vmatmul.f32.gmra.mxu1 %v526_v27  ;;  %2350 = vmatmul.f32.gmra.mxu3 %v9407_v59  ;;  %v531_v27 = vld [vmem:[#allocation2 + $0x450] sm:$0xff] }
 0x1a3   : > { %v9410_v40 = vpop.f32.mrf.mxu2  ;;  %v1532_v3 = vrot.slane %v531_v27, 2  ;;  %v534_v27 = vld [vmem:[#allocation2 + $0x468] sm:$0xff]  ;;  %2911 = vmatpush.msra.mxu2 %v2896_v47 }
 0x1a4   : > { %11256 = vst [vmem:[#allocation85_spill] sm:$0xff] %v9410_v40  ;;  %v1987_v17 = vrot.slane %v534_v27, 6 }
 0x1a5   : > { %v960_v20 = vpop.f32.mrf.mxu0  ;;  %v9416_v53 = vpop.f32.mrf.mxu3 }
 0x1a6   : > { %1345 = vst [vmem:[%s9109_s17 + $0x320] sm:$0xff] %v960_v20  ;;  %v9426_v20 = vld [vmem:[#allocation2 + $0x5d8] sm:$0xff]  ;;  %v1988_v27 = vsel %vm1958_vm1, %v1985_v52, %v1987_v17 }
 0x1a7   : > { %11257 = vst [vmem:[#allocation86_spill] sm:$0xff] %v9416_v53  ;;  %v9418_v40 = vpop.f32.mrf.mxu1  ;;  %v1534_v53 = vsel %vm1506_vm0, %v1532_v3, %v1533_v38  ;;  %v9458_v52 = vld [vmem:[#allocation2 + $0x618] sm:$0xff] }
 0x1a8   : > { %11258 = vst [vmem:[#allocation87_spill] sm:$0xff] %v9418_v40  ;;  %1678 = vmatmul.f32.gmra.mxu0 %v1531_v26  ;;  %2131 = vmatmul.f32.gmra.mxu2 %v1983_v2  ;;  %v1563_v26 = vrot.slane %v9426_v20, 2 }
 0x1aa   : > { %1840 = vmatmul.f32.gmra.mxu1 %v527_v34  ;;  %2353 = vmatmul.f32.gmra.mxu3 %v9421_v37  ;;  %v9437_v34 = vsel %vm1506_vm0, %v1562_v32, %v1563_v26 }
 0x1ab   : > { %v9424_v51 = vpop.f32.mrf.mxu2 }
 0x1ac   : > { %11259 = vst [vmem:[#allocation88_spill] sm:$0xff] %v9424_v51  ;;  %v1535_v51 = vrot.slane %v533_v50, 2 }
 0x1ad   : > { %v963_v2 = vpop.f32.mrf.mxu0  ;;  %v9432_v14 = vpop.f32.mrf.mxu3 }
 0x1ae   : > { %1346 = vst [vmem:[%s9109_s17 + $0x340] sm:$0xff] %v963_v2  ;;  %v3106_v2 = vld [vmem:[#allocation7 + $0x3c0] sm:$0xff] }
 0x1af   : > { %11260 = vst [vmem:[#allocation89_spill] sm:$0xff] %v9432_v14  ;;  %v9434_v35 = vpop.f32.mrf.mxu1  ;;  %v2734_v14 = vld [vmem:[#allocation7 + $0x2c0] sm:$0xff]  ;;  %3121 = vmatpush.msra.mxu3 %v3106_v2 }
 0x1b0   : > { %11261 = vst [vmem:[#allocation90_spill] sm:$0xff] %v9434_v35  ;;  %1681 = vmatmul.f32.gmra.mxu0 %v1534_v53  ;;  %2134 = vmatmul.f32.gmra.mxu2 %v1986_v0  ;;  %v1565_v53 = vrot.slane %v9442_v1, 2  ;;  %v1536_v0 = vsel %vm1506_vm0, %v1533_v38, %v1535_v51  ;;  %v8212_v2 = vld [vmem:[#allocation2 + $0x4a0] sm:$0xff]  ;;  %v1567_v38 = vrot.slane %v586_v42, 2  ;;  %v1568_v51 = vrot.slane %v9458_v52, 2 }
 0x1b1   : > { %2749 = vmatpush.msra.mxu1 %v2734_v14  ;;  %v1990_v48 = vrot.slane %v8212_v2, 6 }
 0x1b2   : > { %1843 = vmatmul.f32.gmra.mxu1 %v532_v62  ;;  %2356 = vmatmul.f32.gmra.mxu3 %v9437_v34  ;;  %v9472_v42 = vsel %vm1506_vm0, %v1567_v38, %v1568_v51  ;;  %v2733_v38 = vld [vmem:[#allocation7 + $0x2b8] sm:$0xff] }
 0x1b3   : > { %v9440_v3 = vpop.f32.mrf.mxu2  ;;  %2750 = vmatpush.msra.mxu1 %v2733_v38  ;;  %v9496_v38 = vld [vmem:[#allocation2 + $0x658] sm:$0xff] }
 0x1b4   : > { %11262 = vst [vmem:[#allocation91_spill] sm:$0xff] %v9440_v3  ;;  %v9453_v3 = vsel %vm1506_vm0, %v1563_v26, %v1565_v53  ;;  %v541_v53 = vld [vmem:[#allocation2 + $0x4a8] sm:$0xff] }
 0x1b5   : > { %v966_v32 = vpop.f32.mrf.mxu0  ;;  %v9448_v62 = vpop.f32.mrf.mxu3 }
 0x1b6   : > { %1347 = vst [vmem:[%s9109_s17 + $0x360] sm:$0xff] %v966_v32  ;;  %v9462_v32 = vsel %vm1958_vm1, %v1989_v44, %v1990_v48  ;;  %v9477_v44 = vld [vmem:[#allocation2 + $0x620] sm:$0xff] }
 0x1b7   : > { %11263 = vst [vmem:[#allocation92_spill] sm:$0xff] %v9448_v62  ;;  %v9450_v47 = vpop.f32.mrf.mxu1  ;;  %v2511_v62 = vld [vmem:[#allocation7 + $0x238] sm:$0xff] }
 0x1b8   : > { %11264 = vst [vmem:[#allocation93_spill] sm:$0xff] %v9450_v47  ;;  %1684 = vmatmul.f32.gmra.mxu0 %v1536_v0  ;;  %2137 = vmatmul.f32.gmra.mxu2 %v1988_v27  ;;  %v602_v47 = vld [vmem:[#allocation2 + $0x690] sm:$0xff] }
 0x1b9   : > { %2528 = vmatpush.msra.mxu0 %v2511_v62 }
 0x1ba   : > { %1846 = vmatmul.f32.gmra.mxu1 %v533_v50  ;;  %2359 = vmatmul.f32.gmra.mxu3 %v9453_v3  ;;  %v1992_v50 = vrot.slane %v541_v53, 6 }
 0x1bb   : > { %v9456_v17 = vpop.f32.mrf.mxu2 }
 0x1bc   : > { %11265 = vst [vmem:[#allocation94_spill] sm:$0xff] %v9456_v17  ;;  %v3105_v17 = vld [vmem:[#allocation7 + $0x3b8] sm:$0xff]  ;;  %v9481_v33 = vsel %vm1958_vm1, %v1990_v48, %v1992_v50 }
 0x1bd   : > { %v969_v14 = vpop.f32.mrf.mxu0  ;;  %v9465_v26 = vpop.f32.mrf.mxu3  ;;  %3122 = vmatpush.msra.mxu3 %v3105_v17  ;;  %v8215_v48 = vld [vmem:[#allocation2 + $0x4d8] sm:$0xff] }
 0x1be   : > { %1348 = vst [vmem:[%s9109_s17 + $0x380] sm:$0xff] %v969_v14  ;;  %v1570_v14 = vrot.slane %v9477_v44, 2  ;;  %v1994_v50 = vrot.slane %v8215_v48, 6 }
 0x1bf   : > { %11266 = vst [vmem:[#allocation95_spill] sm:$0xff] %v9465_v26  ;;  %v9467_v0 = vpop.f32.mrf.mxu1  ;;  %v2895_v26 = vld [vmem:[#allocation7 + $0x338] sm:$0xff] }
 0x1c0   : > { %11267 = vst [vmem:[#allocation96_spill] sm:$0xff] %v9467_v0  ;;  %1687 = vmatmul.f32.gmra.mxu0 %v9295_v7  ;;  %2140 = vmatmul.f32.gmra.mxu2 %v9462_v32 }
 0x1c1   : > { %2912 = vmatpush.msra.mxu2 %v2895_v26  ;;  %v8216_v26 = vld [vmem:[#allocation2 + $0x4e0] sm:$0xff] }
 0x1c2   : > { %1849 = vmatmul.f32.gmra.mxu1 %v8211_v56  ;;  %2362 = vmatmul.f32.gmra.mxu3 %v9472_v42  ;;  %v1995_v62 = vrot.slane %v8216_v26, 6 }
 0x1c3   : > { %v9475_v27 = vpop.f32.mrf.mxu2 }
 0x1c4   : > { %11268 = vst [vmem:[#allocation97_spill] sm:$0xff] %v9475_v27  ;;  %v9491_v27 = vsel %vm1506_vm0, %v1568_v51, %v1570_v14  ;;  %v9500_v12 = vsel %vm1958_vm1, %v1994_v50, %v1995_v62  ;;  %v549_v14 = vld [vmem:[#allocation2 + $0x4e8] sm:$0xff]  ;;  %v2510_v50 = vld [vmem:[#allocation7 + $0x230] sm:$0xff] }
 0x1c5   : > { %v972_v7 = vpop.f32.mrf.mxu0  ;;  %v9484_v56 = vpop.f32.mrf.mxu3  ;;  %2529 = vmatpush.msra.mxu0 %v2510_v50  ;;  %v8219_v50 = vld [vmem:[#allocation2 + $0x518] sm:$0xff] }
 0x1c6   : > { %1349 = vst [vmem:[%s9109_s17 + $0x3a0] sm:$0xff] %v972_v7  ;;  %v1572_v7 = vrot.slane %v594_v23, 2 }
 0x1c7   : > { %11269 = vst [vmem:[#allocation98_spill] sm:$0xff] %v9484_v56  ;;  %v9486_v53 = vpop.f32.mrf.mxu1 }
 0x1c8   : > { %11270 = vst [vmem:[#allocation99_spill] sm:$0xff] %v9486_v53  ;;  %1690 = vmatmul.f32.gmra.mxu0 %v9309_v11  ;;  %2143 = vmatmul.f32.gmra.mxu2 %v9481_v33  ;;  %v1573_v11 = vrot.slane %v9496_v38, 2 }
 0x1ca   : > { %1852 = vmatmul.f32.gmra.mxu1 %v8212_v2  ;;  %2365 = vmatmul.f32.gmra.mxu3 %v9491_v27  ;;  %v9510_v23 = vsel %vm1506_vm0, %v1572_v7, %v1573_v11  ;;  %v2894_v2 = vld [vmem:[#allocation7 + $0x330] sm:$0xff] }
 0x1cb   : > { %v9494_v17 = vpop.f32.mrf.mxu2  ;;  %2913 = vmatpush.msra.mxu2 %v2894_v2 }
 0x1cc   : > { %11271 = vst [vmem:[#allocation100_spill] sm:$0xff] %v9494_v17  ;;  %v1997_v17 = vrot.slane %v549_v14, 6 }
 0x1cd   : > { %v975_v56 = vpop.f32.mrf.mxu0  ;;  %v9503_v51 = vpop.f32.mrf.mxu3 }
 0x1ce   : > { %1350 = vst [vmem:[%s9109_s17 + $0x3c0] sm:$0xff] %v975_v56  ;;  %v9519_v53 = vsel %vm1958_vm1, %v1995_v62, %v1997_v17  ;;  %v1577_v62 = vrot.slane %v602_v47, 2  ;;  %v9534_v17 = vld [vmem:[#allocation2 + $0x698] sm:$0xff] }
 0x1cf   : > { %11272 = vst [vmem:[#allocation101_spill] sm:$0xff] %v9503_v51  ;;  %v9505_v5 = vpop.f32.mrf.mxu1  ;;  %v3104_v51 = vld [vmem:[#allocation7 + $0x3b0] sm:$0xff] }
 0x1d0   : > { %11273 = vst [vmem:[#allocation102_spill] sm:$0xff] %v9505_v5  ;;  %1693 = vmatmul.f32.gmra.mxu0 %v9323_v39  ;;  %2146 = vmatmul.f32.gmra.mxu2 %v9500_v12  ;;  %v1575_v39 = vrot.slane %v9515_v60, 2  ;;  %v2732_v5 = vld [vmem:[#allocation7 + $0x2b0] sm:$0xff] }
 0x1d1   : > { %3123 = vmatpush.msra.mxu3 %v3104_v51  ;;  %2751 = vmatpush.msra.mxu1 %v2732_v5  ;;  %v1999_v51 = vrot.slane %v8219_v50, 6 }
 0x1d2   : > { %1855 = vmatmul.f32.gmra.mxu1 %v8215_v48  ;;  %2368 = vmatmul.f32.gmra.mxu3 %v9510_v23  ;;  %v9529_v2 = vsel %vm1506_vm0, %v1573_v11, %v1575_v39 }
 0x1d3   : > { %v9513_v56 = vpop.f32.mrf.mxu2  ;;  %3124 = vmatpush.msra.mxu3 %v3103_v15  ;;  %2752 = vmatpush.msra.mxu1 %v2731_v8  ;;  %v8223_v15 = vld [vmem:[#allocation2 + $0x558] sm:$0xff] }
 0x1d4   : > { %11274 = vst [vmem:[#allocation103_spill] sm:$0xff] %v9513_v56  ;;  %v8220_v56 = vld [vmem:[#allocation2 + $0x520] sm:$0xff] }
 0x1d5   : > { %v978_v7 = vpop.f32.mrf.mxu0  ;;  %v9522_v48 = vpop.f32.mrf.mxu3  ;;  %v2000_v0 = vrot.slane %v8220_v56, 6 }
 0x1d6   : > { %1351 = vst [vmem:[%s9109_s17 + $0x3e0] sm:$0xff] %v978_v7 }
 0x1d7   : > { %11275 = vst [vmem:[#allocation104_spill] sm:$0xff] %v9522_v48  ;;  %v9524_v14 = vpop.f32.mrf.mxu1  ;;  %v9538_v48 = vsel %vm1958_vm1, %v1999_v51, %v2000_v0 }
 0x1d8   : > { %11276 = vst [vmem:[#allocation105_spill] sm:$0xff] %v9524_v14  ;;  %1696 = vmatmul.f32.gmra.mxu0 %v9337_v19  ;;  %2149 = vmatmul.f32.gmra.mxu2 %v9519_v53  ;;  %v1578_v19 = vrot.slane %v9534_v17, 2  ;;  %v557_v14 = vld [vmem:[#allocation2 + $0x528] sm:$0xff] }
 0x1da   : > { %1858 = vmatmul.f32.gmra.mxu1 %v8216_v26  ;;  %2371 = vmatmul.f32.gmra.mxu3 %v9529_v2  ;;  %v9546_v47 = vsel %vm1506_vm0, %v1577_v62, %v1578_v19  ;;  %v2893_v26 = vld [vmem:[#allocation7 + $0x328] sm:$0xff] }
 0x1db   : > { %v9532_v5 = vpop.f32.mrf.mxu2  ;;  %2914 = vmatpush.msra.mxu2 %v2893_v26  ;;  %v8224_v26 = vld [vmem:[#allocation2 + $0x560] sm:$0xff] }
 0x1dc   : > { %11277 = vst [vmem:[#allocation106_spill] sm:$0xff] %v9532_v5  ;;  %v2002_v5 = vrot.slane %v557_v14, 6 }
 0x1dd   : > { %v1652_v7 = vpop.f32.mrf.mxu0  ;;  %v9540_v11 = vpop.f32.mrf.mxu3 }
 0x1de   : > { %11278 = vst [vmem:[#allocation107_spill] sm:$0xff] %v9540_v11  ;;  %v1748_v39 = vadd.f32 %v1652_v7, %v9177_v58  ;;  %v2509_v11 = vld [vmem:[#allocation7 + $0x228] sm:$0xff]  ;;  %v9549_v7 = vld [vmem:[#allocation2 + $0x6a0] sm:$0xff]  ;;  %v9553_v6 = vsel %vm1958_vm1, %v2000_v0, %v2002_v5  ;;  %v610_v0 = vld [vmem:[#allocation2 + $0x6d0] sm:$0xff] }
 0x1df   : > { %v1814_v35 = vpop.f32.mrf.mxu1  ;;  %2530 = vmatpush.msra.mxu0 %v2509_v11  ;;  %11279 = vst [vmem:[#allocation108_spill] sm:$0xff] %v9553_v6  ;;  %v2004_v11 = vrot.slane %v8223_v15, 6 }
 0x1e0   : > { %1699 = vmatmul.f32.gmra.mxu0 %v9351_v28  ;;  %2152 = vmatmul.f32.gmra.mxu2 %v9538_v48  ;;  %v1910_v40 = vadd.f32 %v1814_v35, %v1748_v39  ;;  %v1580_v28 = vrot.slane %v9549_v7, 2 }
 0x1e2   : > { %1861 = vmatmul.f32.gmra.mxu1 %v8219_v50  ;;  %2374 = vmatmul.f32.gmra.mxu3 %v9546_v47 }
 0x1e3   : > { %v2105_v51 = vpop.f32.mrf.mxu2 }
 0x1e4   : > { %v2201_v58 = vadd.f32 %v2105_v51, %v1910_v40  ;;  %v9561_v40 = vsel %vm1506_vm0, %v1578_v19, %v1580_v28  ;;  %v2005_v51 = vrot.slane %v8224_v26, 6 }
 0x1e5   : > { %v1655_v62 = vpop.f32.mrf.mxu0  ;;  %v2327_v14 = vpop.f32.mrf.mxu3 }
 0x1e6   : > { %v1749_v35 = vadd.f32 %v1655_v62, %v9184_v4  ;;  %v9556_v50 = vadd.f32 %v2327_v14, %v2201_v58  ;;  %v1582_v58 = vrot.slane %v610_v0, 2  ;;  %v9564_v62 = vld [vmem:[#allocation2 + $0x6d8] sm:$0xff]  ;;  %v9568_v19 = vsel %vm1958_vm1, %v2004_v11, %v2005_v51  ;;  %v2508_v11 = vld [vmem:[#allocation7 + $0x220] sm:$0xff] }
 0x1e7   : > { %v1817_v39 = vpop.f32.mrf.mxu1  ;;  %11281 = vst [vmem:[#allocation110_spill] sm:$0xff] %v9568_v19  ;;  %2531 = vmatpush.msra.mxu0 %v2508_v11  ;;  %v8228_v11 = vld [vmem:[#allocation2 + $0x5a0] sm:$0xff] }
 0x1e8   : > { %11280 = vst [vmem:[#allocation109_spill] sm:$0xff] %v9556_v50  ;;  %1702 = vmatmul.f32.gmra.mxu0 %v9365_v25  ;;  %2155 = vmatmul.f32.gmra.mxu2 %v9553_v6  ;;  %v1911_v5 = vadd.f32 %v1817_v39, %v1749_v35  ;;  %v1583_v25 = vrot.slane %v9564_v62, 2  ;;  %v565_v6 = vld [vmem:[#allocation2 + $0x568] sm:$0xff]  ;;  %v2892_v39 = vld [vmem:[#allocation7 + $0x320] sm:$0xff] }
 0x1e9   : > { %v2007_v0 = vrot.slane %v565_v6, 6  ;;  %2915 = vmatpush.msra.mxu2 %v2892_v39 }
 0x1ea   : > { %1864 = vmatmul.f32.gmra.mxu1 %v8220_v56  ;;  %2377 = vmatmul.f32.gmra.mxu3 %v9561_v40  ;;  %v9576_v35 = vsel %vm1506_vm0, %v1582_v58, %v1583_v25 }
 0x1eb   : > { %v2108_v4 = vpop.f32.mrf.mxu2 }
 0x1ec   : > { %v2202_v8 = vadd.f32 %v2108_v4, %v1911_v5  ;;  %v3102_v4 = vld [vmem:[#allocation7 + $0x3a0] sm:$0xff] }
 0x1ed   : > { %v1658_v14 = vpop.f32.mrf.mxu0  ;;  %v2330_v50 = vpop.f32.mrf.mxu3  ;;  %3125 = vmatpush.msra.mxu3 %v3102_v4  ;;  %v2010_v4 = vrot.slane %v8228_v11, 6 }
 0x1ee   : > { %v1750_v28 = vadd.f32 %v1658_v14, %v9191_v9  ;;  %v9571_v45 = vadd.f32 %v2330_v50, %v2202_v8  ;;  %v9579_v8 = vld [vmem:[#allocation2 + $0x6e0] sm:$0xff] }
 0x1ef   : > { %v1820_v56 = vpop.f32.mrf.mxu1  ;;  %v2730_v14 = vld [vmem:[#allocation7 + $0x2a0] sm:$0xff] }
 0x1f0   : > { %11282 = vst [vmem:[#allocation111_spill] sm:$0xff] %v9571_v45  ;;  %1705 = vmatmul.f32.gmra.mxu0 %v9379_v13  ;;  %2158 = vmatmul.f32.gmra.mxu2 %v9568_v19  ;;  %v1912_v5 = vadd.f32 %v1820_v56, %v1750_v28  ;;  %v1585_v13 = vrot.slane %v9579_v8, 2  ;;  %v9583_v45 = vsel %vm1958_vm1, %v2005_v51, %v2007_v0  ;;  %v618_v51 = vld [vmem:[#allocation2 + $0x710] sm:$0xff] }
 0x1f1   : > { %11283 = vst [vmem:[#allocation112_spill] sm:$0xff] %v9583_v45  ;;  %2753 = vmatpush.msra.mxu1 %v2730_v14  ;;  %v2251_v14 = vrot.slane %v618_v51, 2 }
 0x1f2   : > { %1867 = vmatmul.f32.gmra.mxu1 %v8223_v15  ;;  %2380 = vmatmul.f32.gmra.mxu3 %v9576_v35  ;;  %v9591_v39 = vsel %vm1506_vm0, %v1583_v25, %v1585_v13 }
 0x1f3   : > { %v2111_v9 = vpop.f32.mrf.mxu2 }
 0x1f4   : > { %v2203_v50 = vadd.f32 %v2111_v9, %v1912_v5  ;;  %v8227_v5 = vld [vmem:[#allocation2 + $0x598] sm:$0xff] }
 0x1f5   : > { %v1661_v58 = vpop.f32.mrf.mxu0  ;;  %v2333_v15 = vpop.f32.mrf.mxu3  ;;  %v2009_v9 = vrot.slane %v8227_v5, 6 }
 0x1f6   : > { %v1751_v6 = vadd.f32 %v1661_v58, %v9198_v22  ;;  %v9586_v28 = vadd.f32 %v2333_v15, %v2203_v50  ;;  %v9594_v58 = vld [vmem:[#allocation2 + $0x718] sm:$0xff] }
 0x1f7   : > { %v1823_v56 = vpop.f32.mrf.mxu1  ;;  %v9598_v25 = vsel %vm1958_vm1, %v2009_v9, %v2010_v4  ;;  %v2507_v9 = vld [vmem:[#allocation7 + $0x218] sm:$0xff] }
 0x1f8   : > { %11284 = vst [vmem:[#allocation113_spill] sm:$0xff] %v9586_v28  ;;  %1708 = vmatmul.f32.gmra.mxu0 %v9393_v31  ;;  %2161 = vmatmul.f32.gmra.mxu2 %v9583_v45  ;;  %v1913_v0 = vadd.f32 %v1823_v56, %v1751_v6  ;;  %v2252_v31 = vrot.slane %v9594_v58, 2  ;;  %v573_v45 = vld [vmem:[#allocation2 + $0x5a8] sm:$0xff]  ;;  %v2891_v56 = vld [vmem:[#allocation7 + $0x318] sm:$0xff] }
 0x1f9   : > { %v2012_v51 = vrot.slane %v573_v45, 6  ;;  %2916 = vmatpush.msra.mxu2 %v2891_v56  ;;  %2532 = vmatpush.msra.mxu0 %v2507_v9 }
 0x1fa   : > { %1870 = vmatmul.f32.gmra.mxu1 %v8224_v26  ;;  %2383 = vmatmul.f32.gmra.mxu3 %v9591_v39  ;;  %v9606_v6 = vsel %vm1506_vm0, %v2251_v14, %v2252_v31 }
 0x1fb   : > { %v2114_v22 = vpop.f32.mrf.mxu2 }
 0x1fc   : > { %v2204_v50 = vadd.f32 %v2114_v22, %v1913_v0  ;;  %v3101_v22 = vld [vmem:[#allocation7 + $0x398] sm:$0xff] }
 0x1fd   : > { %v1664_v15 = vpop.f32.mrf.mxu0  ;;  %v2336_v28 = vpop.f32.mrf.mxu3  ;;  %3126 = vmatpush.msra.mxu3 %v3101_v22 }
 0x1fe   : > { %v1752_v13 = vadd.f32 %v1664_v15, %v9205_v29  ;;  %v9601_v19 = vadd.f32 %v2336_v28, %v2204_v50  ;;  %v9609_v50 = vld [vmem:[#allocation2 + $0x720] sm:$0xff]  ;;  %v2729_v15 = vld [vmem:[#allocation7 + $0x298] sm:$0xff] }
 0x1ff   : > { %v1826_v26 = vpop.f32.mrf.mxu1  ;;  %2754 = vmatpush.msra.mxu1 %v2729_v15 }
 0x200   : > { %11285 = vst [vmem:[#allocation114_spill] sm:$0xff] %v9601_v19  ;;  %1711 = vmatmul.f32.gmra.mxu0 %v9407_v59  ;;  %2164 = vmatmul.f32.gmra.mxu2 %v9598_v25  ;;  %v1914_v0 = vadd.f32 %v1826_v26, %v1752_v13  ;;  %v2254_v59 = vrot.slane %v9609_v50, 2  ;;  %v9613_v19 = vsel %vm1958_vm1, %v2010_v4, %v2012_v51  ;;  %v626_v4 = vld [vmem:[#allocation2 + $0x750] sm:$0xff] }
 0x201   : > { %v2256_v22 = vrot.slane %v626_v4, 2 }
 0x202   : > { %1873 = vmatmul.f32.gmra.mxu1 %v8227_v5  ;;  %2386 = vmatmul.f32.gmra.mxu3 %v9606_v6  ;;  %v9621_v56 = vsel %vm1506_vm0, %v2252_v31, %v2254_v59 }
 0x203   : > { %v2117_v29 = vpop.f32.mrf.mxu2 }
 0x204   : > { %v2205_v28 = vadd.f32 %v2117_v29, %v1914_v0  ;;  %v2014_v0 = vrot.slane %v9426_v20, 6  ;;  %v2015_v29 = vrot.slane %v9442_v1, 6 }
 0x205   : > { %v1667_v14 = vpop.f32.mrf.mxu0  ;;  %v2339_v5 = vpop.f32.mrf.mxu3 }
 0x206   : > { %v1753_v45 = vadd.f32 %v1667_v14, %v9212_v41  ;;  %v9616_v13 = vadd.f32 %v2339_v5, %v2205_v28  ;;  %v9626_v28 = vld [vmem:[#allocation2 + $0x758] sm:$0xff]  ;;  %v9630_v31 = vsel %vm1958_vm1, %v2014_v0, %v2015_v29  ;;  %v581_v5 = vld [vmem:[#allocation2 + $0x5e8] sm:$0xff]  ;;  %v2506_v0 = vld [vmem:[#allocation7 + $0x210] sm:$0xff] }
 0x207   : > { %v1829_v26 = vpop.f32.mrf.mxu1  ;;  %v2017_v4 = vrot.slane %v581_v5, 6  ;;  %2533 = vmatpush.msra.mxu0 %v2506_v0  ;;  %v2020_v0 = vrot.slane %v9477_v44, 6 }
 0x208   : > { %11286 = vst [vmem:[#allocation115_spill] sm:$0xff] %v9616_v13  ;;  %1714 = vmatmul.f32.gmra.mxu0 %v9421_v37  ;;  %2167 = vmatmul.f32.gmra.mxu2 %v9613_v19  ;;  %v1915_v51 = vadd.f32 %v1829_v26, %v1753_v45  ;;  %v2257_v37 = vrot.slane %v9626_v28, 2  ;;  %v2890_v26 = vld [vmem:[#allocation7 + $0x310] sm:$0xff] }
 0x209   : > { %2917 = vmatpush.msra.mxu2 %v2890_v26  ;;  %v9646_v5 = vsel %vm1958_vm1, %v2015_v29, %v2017_v4  ;;  %v634_v29 = vld [vmem:[#allocation2 + $0x790] sm:$0xff] }
 0x20a   : > { %1876 = vmatmul.f32.gmra.mxu1 %v8228_v11  ;;  %2389 = vmatmul.f32.gmra.mxu3 %v9621_v56  ;;  %v9638_v45 = vsel %vm1506_vm0, %v2256_v22, %v2257_v37  ;;  %v2728_v22 = vld [vmem:[#allocation7 + $0x290] sm:$0xff] }
 0x20b   : > { %v2120_v41 = vpop.f32.mrf.mxu2  ;;  %2755 = vmatpush.msra.mxu1 %v2728_v22  ;;  %v9660_v22 = vld [vmem:[#allocation2 + $0x798] sm:$0xff] }
 0x20c   : > { %v2206_v9 = vadd.f32 %v2120_v41, %v1915_v51  ;;  %v3100_v41 = vld [vmem:[#allocation7 + $0x390] sm:$0xff] }
 0x20d   : > { %v1670_v15 = vpop.f32.mrf.mxu0  ;;  %v2342_v14 = vpop.f32.mrf.mxu3  ;;  %3127 = vmatpush.msra.mxu3 %v3100_v41 }
 0x20e   : > { %v1754_v59 = vadd.f32 %v1670_v15, %v9219_v46  ;;  %v9633_v13 = vadd.f32 %v2342_v14, %v2206_v9  ;;  %v9642_v15 = vld [vmem:[#allocation2 + $0x760] sm:$0xff] }
 0x20f   : > { %v1832_v11 = vpop.f32.mrf.mxu1 }
 0x210   : > { %11287 = vst [vmem:[#allocation116_spill] sm:$0xff] %v9633_v13  ;;  %1717 = vmatmul.f32.gmra.mxu0 %v9437_v34  ;;  %2170 = vmatmul.f32.gmra.mxu2 %v9630_v31  ;;  %v1916_v51 = vadd.f32 %v1832_v11, %v1754_v59  ;;  %v2259_v34 = vrot.slane %v9642_v15, 2 }
 0x212   : > { %1879 = vmatmul.f32.gmra.mxu1 %v9426_v20  ;;  %2392 = vmatmul.f32.gmra.mxu3 %v9638_v45 }
 0x213   : > { %v2123_v46 = vpop.f32.mrf.mxu2 }
 0x214   : > { %v2207_v9 = vadd.f32 %v2123_v46, %v1916_v51  ;;  %v9654_v51 = vsel %vm1506_vm0, %v2257_v37, %v2259_v34  ;;  %v2019_v46 = vrot.slane %v9458_v52, 6 }
 0x215   : > { %v1673_v14 = vpop.f32.mrf.mxu0  ;;  %v2345_v59 = vpop.f32.mrf.mxu3 }
 0x216   : > { %v1755_v20 = vadd.f32 %v1673_v14, %v9226_v55  ;;  %v9649_v11 = vadd.f32 %v2345_v59, %v2207_v9  ;;  %v2261_v9 = vrot.slane %v634_v29, 2  ;;  %v9664_v37 = vsel %vm1958_vm1, %v2019_v46, %v2020_v0  ;;  %v2889_v29 = vld [vmem:[#allocation7 + $0x308] sm:$0xff] }
 0x217   : > { %v1835_v26 = vpop.f32.mrf.mxu1  ;;  %2918 = vmatpush.msra.mxu2 %v2889_v29  ;;  %v2505_v46 = vld [vmem:[#allocation7 + $0x208] sm:$0xff] }
 0x218   : > { %11288 = vst [vmem:[#allocation117_spill] sm:$0xff] %v9649_v11  ;;  %1720 = vmatmul.f32.gmra.mxu0 %v9453_v3  ;;  %2173 = vmatmul.f32.gmra.mxu2 %v9646_v5  ;;  %v1917_v4 = vadd.f32 %v1835_v26, %v1755_v20  ;;  %v2262_v3 = vrot.slane %v9660_v22, 2  ;;  %v589_v11 = vld [vmem:[#allocation2 + $0x628] sm:$0xff] }
 0x219   : > { %2534 = vmatpush.msra.mxu0 %v2505_v46  ;;  %v2025_v46 = vrot.slane %v9515_v60, 6 }
 0x21a   : > { %1882 = vmatmul.f32.gmra.mxu1 %v9442_v1  ;;  %2395 = vmatmul.f32.gmra.mxu3 %v9654_v51  ;;  %v9672_v26 = vsel %vm1506_vm0, %v2261_v9, %v2262_v3  ;;  %v2727_v9 = vld [vmem:[#allocation7 + $0x288] sm:$0xff] }
 0x21b   : > { %v2126_v55 = vpop.f32.mrf.mxu2  ;;  %11290 = vst [vmem:[#allocation119_spill] sm:$0xff] %v9672_v26  ;;  %2756 = vmatpush.msra.mxu1 %v2727_v9 }
 0x21c   : > { %v2208_v41 = vadd.f32 %v2126_v55, %v1917_v4  ;;  %v2022_v4 = vrot.slane %v589_v11, 6 }
 0x21d   : > { %v1676_v14 = vpop.f32.mrf.mxu0  ;;  %v2348_v59 = vpop.f32.mrf.mxu3 }
 0x21e   : > { %v1756_v34 = vadd.f32 %v1676_v14, %v9233_v63  ;;  %v9667_v20 = vadd.f32 %v2348_v59, %v2208_v41  ;;  %v3099_v41 = vld [vmem:[#allocation7 + $0x388] sm:$0xff]  ;;  %v9676_v59 = vld [vmem:[#allocation2 + $0x7a0] sm:$0xff]  ;;  %v9680_v11 = vsel %vm1958_vm1, %v2020_v0, %v2022_v4  ;;  %v642_v0 = vld [vmem:[#allocation2 + $0x7d0] sm:$0xff] }
 0x21f   : > { %v1838_v1 = vpop.f32.mrf.mxu1  ;;  %11291 = vst [vmem:[#allocation120_spill] sm:$0xff] %v9676_v59  ;;  %3128 = vmatpush.msra.mxu3 %v3099_v41  ;;  %v2266_v41 = vrot.slane %v642_v0, 2 }
 0x220   : > { %11289 = vst [vmem:[#allocation118_spill] sm:$0xff] %v9667_v20  ;;  %1723 = vmatmul.f32.gmra.mxu0 %v9472_v42  ;;  %2176 = vmatmul.f32.gmra.mxu2 %v9664_v37  ;;  %v1918_v55 = vadd.f32 %v1838_v1, %v1756_v34  ;;  %v2264_v20 = vrot.slane %v9676_v59, 2  ;;  %v597_v59 = vld [vmem:[#allocation2 + $0x668] sm:$0xff] }
 0x222   : > { %1885 = vmatmul.f32.gmra.mxu1 %v9458_v52  ;;  %2398 = vmatmul.f32.gmra.mxu3 %v9672_v26 }
 0x223   : > { %v2129_v63 = vpop.f32.mrf.mxu2 }
 0x224   : > { %v2209_v14 = vadd.f32 %v2129_v63, %v1918_v55  ;;  %v9688_v55 = vsel %vm1506_vm0, %v2262_v3, %v2264_v20  ;;  %v2024_v63 = vrot.slane %v9496_v38, 6 }
 0x225   : > { %v1679_v13 = vpop.f32.mrf.mxu0  ;;  %v2351_v1 = vpop.f32.mrf.mxu3  ;;  %11293 = vst [vmem:[#allocation122_spill] sm:$0xff] %v9688_v55 }
 0x226   : > { %v1757_v34 = vadd.f32 %v1679_v13, %v9240_v16  ;;  %v9683_v29 = vadd.f32 %v2351_v1, %v2209_v14  ;;  %v9694_v14 = vld [vmem:[#allocation2 + $0x7d8] sm:$0xff]  ;;  %v9698_v3 = vsel %vm1958_vm1, %v2024_v63, %v2025_v46  ;;  %v2504_v63 = vld [vmem:[#allocation7 + $0x200] sm:$0xff] }
 0x227   : > { %v1841_v26 = vpop.f32.mrf.mxu1  ;;  %11294 = vst [vmem:[#allocation123_spill] sm:$0xff] %v9694_v14  ;;  %v2267_v9 = vrot.slane %v9694_v14, 2  ;;  %2535 = vmatpush.msra.mxu0 %v2504_v63  ;;  %v2030_v63 = vrot.slane %v9549_v7, 6 }
 0x228   : > { %11292 = vst [vmem:[#allocation121_spill] sm:$0xff] %v9683_v29  ;;  %1726 = vmatmul.f32.gmra.mxu0 %v9491_v27  ;;  %2179 = vmatmul.f32.gmra.mxu2 %v9680_v11  ;;  %v1919_v4 = vadd.f32 %v1841_v26, %v1757_v34 }
 0x229   : > { %v9706_v0 = vsel %vm1506_vm0, %v2266_v41, %v2267_v9  ;;  %v2726_v41 = vld [vmem:[#allocation7 + $0x280] sm:$0xff] }
 0x22a   : > { %1888 = vmatmul.f32.gmra.mxu1 %v9477_v44  ;;  %2401 = vmatmul.f32.gmra.mxu3 %v9688_v55  ;;  %11296 = vst [vmem:[#allocation125_spill] sm:$0xff] %v9706_v0 }
 0x22b   : > { %v2132_v16 = vpop.f32.mrf.mxu2  ;;  %2757 = vmatpush.msra.mxu1 %v2726_v41 }
 0x22c   : > { %v2210_v13 = vadd.f32 %v2132_v16, %v1919_v4  ;;  %v2888_v4 = vld [vmem:[#allocation7 + $0x300] sm:$0xff]  ;;  %v2027_v16 = vrot.slane %v597_v59, 6 }
 0x22d   : > { %v1682_v1 = vpop.f32.mrf.mxu0  ;;  %v2354_v29 = vpop.f32.mrf.mxu3  ;;  %2919 = vmatpush.msra.mxu2 %v2888_v4 }
 0x22e   : > { %v1758_v20 = vadd.f32 %v1682_v1, %v9247_v30  ;;  %v9701_v26 = vadd.f32 %v2354_v29, %v2210_v13  ;;  %v3098_v29 = vld [vmem:[#allocation7 + $0x380] sm:$0xff]  ;;  %v9714_v59 = vsel %vm1958_vm1, %v2025_v46, %v2027_v16  ;;  %v650_v46 = vld [vmem:[#allocation2 + $0x810] sm:$0xff] }
 0x22f   : > { %v1844_v34 = vpop.f32.mrf.mxu1  ;;  %v9710_v1 = vld [vmem:[#allocation2 + $0x7e0] sm:$0xff]  ;;  %3129 = vmatpush.msra.mxu3 %v3098_v29  ;;  %v2271_v29 = vrot.slane %v650_v46, 2 }
 0x230   : > { %11295 = vst [vmem:[#allocation124_spill] sm:$0xff] %v9701_v26  ;;  %1729 = vmatmul.f32.gmra.mxu0 %v9510_v23  ;;  %2182 = vmatmul.f32.gmra.mxu2 %v9698_v3  ;;  %v1920_v14 = vadd.f32 %v1844_v34, %v1758_v20  ;;  %v2269_v26 = vrot.slane %v9710_v1, 2 }
 0x231   : > { %11297 = vst [vmem:[#allocation126_spill] sm:$0xff] %v9710_v1  ;;  %v605_v1 = vld [vmem:[#allocation2 + $0x6a8] sm:$0xff] }
 0x232   : > { %1891 = vmatmul.f32.gmra.mxu1 %v9496_v38  ;;  %2404 = vmatmul.f32.gmra.mxu3 %v9706_v0 }
 0x233   : > { %v2135_v30 = vpop.f32.mrf.mxu2 }
 0x234   : > { %v2211_v13 = vadd.f32 %v2135_v30, %v1920_v14  ;;  %v9722_v14 = vsel %vm1506_vm0, %v2267_v9, %v2269_v26  ;;  %v2029_v30 = vrot.slane %v9534_v17, 6 }
 0x235   : > { %v1685_v55 = vpop.f32.mrf.mxu0  ;;  %v2357_v34 = vpop.f32.mrf.mxu3  ;;  %11299 = vst [vmem:[#allocation128_spill] sm:$0xff] %v9722_v14 }
 0x236   : > { %v1759_v20 = vadd.f32 %v1685_v55, %v9254_v49  ;;  %v9717_v4 = vadd.f32 %v2357_v34, %v2211_v13  ;;  %v9728_v13 = vld [vmem:[#allocation2 + $0x818] sm:$0xff]  ;;  %v9732_v9 = vsel %vm1958_vm1, %v2029_v30, %v2030_v63 }
 0x237   : > { %v1847_v0 = vpop.f32.mrf.mxu1  ;;  %11300 = vst [vmem:[#allocation129_spill] sm:$0xff] %v9728_v13  ;;  %v2272_v41 = vrot.slane %v9728_v13, 2  ;;  %v3553_v30 = vld [vmem:[#allocation9 + $0x78] sm:$0xff] }
 0x238   : > { %11298 = vst [vmem:[#allocation127_spill] sm:$0xff] %v9717_v4  ;;  %1732 = vmatmul.f32.gmra.mxu0 %v9529_v2  ;;  %2185 = vmatmul.f32.gmra.mxu2 %v9714_v59  ;;  %v1921_v16 = vadd.f32 %v1847_v0, %v1759_v20 }
 0x239   : > { %v9740_v46 = vsel %vm1506_vm0, %v2271_v29, %v2272_v41  ;;  %3554 = vmatpush.msrb.mxu0 %v3553_v30  ;;  %v3715_v29 = vld [vmem:[#allocation9 + $0xf8] sm:$0xff]  ;;  %v2035_v30 = vrot.slane %v9579_v8, 6 }
 0x23a   : > { %1894 = vmatmul.f32.gmra.mxu1 %v9515_v60  ;;  %2407 = vmatmul.f32.gmra.mxu3 %v9722_v14  ;;  %11302 = vst [vmem:[#allocation131_spill] sm:$0xff] %v9740_v46 }
 0x23b   : > { %v2138_v49 = vpop.f32.mrf.mxu2  ;;  %3716 = vmatpush.msrb.mxu1 %v3715_v29 }
 0x23c   : > { %v2212_v55 = vadd.f32 %v2138_v49, %v1921_v16  ;;  %v4017_v16 = vld [vmem:[#allocation9 + $0x178] sm:$0xff]  ;;  %v2032_v49 = vrot.slane %v605_v1, 6 }
 0x23d   : > { %v1688_v34 = vpop.f32.mrf.mxu0  ;;  %v2360_v4 = vpop.f32.mrf.mxu3  ;;  %4018 = vmatpush.msrb.mxu2 %v4017_v16 }
 0x23e   : > { %v1760_v26 = vadd.f32 %v1688_v34, %v9261_v57  ;;  %v9735_v0 = vadd.f32 %v2360_v4, %v2212_v55  ;;  %v4275_v4 = vld [vmem:[#allocation9 + $0x1f8] sm:$0xff]  ;;  %v9744_v34 = vld [vmem:[#allocation2 + $0x820] sm:$0xff]  ;;  %v9748_v1 = vsel %vm1958_vm1, %v2030_v63, %v2032_v49  ;;  %v658_v63 = vld [vmem:[#allocation2 + $0x850] sm:$0xff] }
 0x23f   : > { %v1850_v20 = vpop.f32.mrf.mxu1  ;;  %11303 = vst [vmem:[#allocation132_spill] sm:$0xff] %v9744_v34  ;;  %4276 = vmatpush.msrb.mxu3 %v4275_v4  ;;  %v2276_v4 = vrot.slane %v658_v63, 2 }
 0x240   : > { %11301 = vst [vmem:[#allocation130_spill] sm:$0xff] %v9735_v0  ;;  %1735 = vmatmul.f32.gmra.mxu0 %v9546_v47  ;;  %2188 = vmatmul.f32.gmra.mxu2 %v9732_v9  ;;  %v1922_v13 = vadd.f32 %v1850_v20, %v1760_v26  ;;  %v2274_v0 = vrot.slane %v9744_v34, 2  ;;  %v613_v34 = vld [vmem:[#allocation2 + $0x6e8] sm:$0xff] }
 0x242   : > { %1897 = vmatmul.f32.gmra.mxu1 %v9534_v17  ;;  %2410 = vmatmul.f32.gmra.mxu3 %v9740_v46 }
 0x243   : > { %v2141_v57 = vpop.f32.mrf.mxu2 }
 0x244   : > { %v2213_v55 = vadd.f32 %v2141_v57, %v1922_v13  ;;  %v9756_v13 = vsel %vm1506_vm0, %v2272_v41, %v2274_v0  ;;  %v2034_v57 = vrot.slane %v9564_v62, 6 }
 0x245   : > { %v1691_v14 = vpop.f32.mrf.mxu0  ;;  %v2363_v20 = vpop.f32.mrf.mxu3  ;;  %11305 = vst [vmem:[#allocation134_spill] sm:$0xff] %v9756_v13 }
 0x246   : > { %v1761_v26 = vadd.f32 %v1691_v14, %v9268_v24  ;;  %v9751_v16 = vadd.f32 %v2363_v20, %v2213_v55  ;;  %v9762_v55 = vld [vmem:[#allocation2 + $0x858] sm:$0xff]  ;;  %v9766_v41 = vsel %vm1958_vm1, %v2034_v57, %v2035_v30  ;;  %v3552_v57 = vld [vmem:[#allocation9 + $0x70] sm:$0xff] }
 0x247   : > { %v1853_v46 = vpop.f32.mrf.mxu1  ;;  %11306 = vst [vmem:[#allocation135_spill] sm:$0xff] %v9762_v55  ;;  %v2277_v29 = vrot.slane %v9762_v55, 2  ;;  %3555 = vmatpush.msrb.mxu0 %v3552_v57 }
 0x248   : > { %11304 = vst [vmem:[#allocation133_spill] sm:$0xff] %v9751_v16  ;;  %1738 = vmatmul.f32.gmra.mxu0 %v9561_v40  ;;  %2191 = vmatmul.f32.gmra.mxu2 %v9748_v1  ;;  %v1923_v49 = vadd.f32 %v1853_v46, %v1761_v26 }
 0x249   : > { %v9774_v63 = vsel %vm1506_vm0, %v2276_v4, %v2277_v29  ;;  %v3714_v4 = vld [vmem:[#allocation9 + $0xf0] sm:$0xff] }
 0x24a   : > { %1900 = vmatmul.f32.gmra.mxu1 %v9549_v7  ;;  %2413 = vmatmul.f32.gmra.mxu3 %v9756_v13  ;;  %11308 = vst [vmem:[#allocation137_spill] sm:$0xff] %v9774_v63 }
 0x24b   : > { %v2144_v24 = vpop.f32.mrf.mxu2  ;;  %3717 = vmatpush.msrb.mxu1 %v3714_v4  ;;  %v3551_v4 = vld [vmem:[#allocation9 + $0x68] sm:$0xff] }
 0x24c   : > { %v2214_v14 = vadd.f32 %v2144_v24, %v1923_v49  ;;  %v4016_v49 = vld [vmem:[#allocation9 + $0x170] sm:$0xff]  ;;  %v2037_v24 = vrot.slane %v613_v34, 6  ;;  %3556 = vmatpush.msrb.mxu0 %v3551_v4  ;;  %v4272_v4 = vld [vmem:[#allocation9 + $0x1e0] sm:$0xff] }
 0x24d   : > { %v1694_v20 = vpop.f32.mrf.mxu0  ;;  %v2366_v16 = vpop.f32.mrf.mxu3  ;;  %4019 = vmatpush.msrb.mxu2 %v4016_v49 }
 0x24e   : > { %v1762_v0 = vadd.f32 %v1694_v20, %v9275_v43  ;;  %v9769_v46 = vadd.f32 %v2366_v16, %v2214_v14  ;;  %v4274_v16 = vld [vmem:[#allocation9 + $0x1f0] sm:$0xff]  ;;  %v9778_v20 = vld [vmem:[#allocation2 + $0x860] sm:$0xff]  ;;  %v9782_v34 = vsel %vm1958_vm1, %v2035_v30, %v2037_v24 }
 0x24f   : > { %v1856_v26 = vpop.f32.mrf.mxu1  ;;  %4277 = vmatpush.msrb.mxu3 %v4274_v16 }
 0x250   : > { %11307 = vst [vmem:[#allocation136_spill] sm:$0xff] %v9769_v46  ;;  %1741 = vmatmul.f32.gmra.mxu0 %v9576_v35  ;;  %2194 = vmatmul.f32.gmra.mxu2 %v9766_v41  ;;  %v1924_v55 = vadd.f32 %v1856_v26, %v1762_v0  ;;  %v2279_v46 = vrot.slane %v9778_v20, 2 }
 0x252   : > { %1903 = vmatmul.f32.gmra.mxu1 %v9564_v62  ;;  %2416 = vmatmul.f32.gmra.mxu3 %v9774_v63 }
 0x253   : > { %v2147_v43 = vpop.f32.mrf.mxu2 }
 0x254   : > { %v2215_v14 = vadd.f32 %v2147_v43, %v1924_v55  ;;  %v9790_v55 = vsel %vm1506_vm0, %v2277_v29, %v2279_v46  ;;  %v4015_v29 = vld [vmem:[#allocation9 + $0x168] sm:$0xff] }
 0x255   : > { %v1697_v13 = vpop.f32.mrf.mxu0  ;;  %v2369_v26 = vpop.f32.mrf.mxu3  ;;  %4020 = vmatpush.msrb.mxu2 %v4015_v29 }
 0x256   : > { %v1763_v0 = vadd.f32 %v1697_v13, %v9282_v18  ;;  %v9785_v49 = vadd.f32 %v2369_v26, %v2215_v14 }
 0x257   : > { %v1859_v63 = vpop.f32.mrf.mxu1 }
 0x258   : > { %1744 = vmatmul.f32.gmra.mxu0 %v9591_v39  ;;  %2197 = vmatmul.f32.gmra.mxu2 %v9782_v34  ;;  %v1925_v43 = vadd.f32 %v1859_v63, %v1763_v0  ;;  %v4273_v0 = vld [vmem:[#allocation9 + $0x1e8] sm:$0xff] }
 0x259   : > { %4278 = vmatpush.msrb.mxu3 %v4273_v0 }
 0x25a   : > { %1906 = vmatmul.f32.gmra.mxu1 %v9579_v8  ;;  %2419 = vmatmul.f32.gmra.mxu3 %v9790_v55 }
 0x25b   : > { %v2150_v30 = vpop.f32.mrf.mxu2  ;;  %4279 = vmatpush.msrb.mxu3 %v4272_v4 }
 0x25c   : > { %v2216_v24 = vadd.f32 %v2150_v30, %v1925_v43 }
 0x25d   : > { %v1700_v57 = vpop.f32.mrf.mxu0  ;;  %v2372_v13 = vpop.f32.mrf.mxu3 }
 0x25e   : > { %v1764_v18 = vadd.f32 %v1700_v57, %v9292_v54  ;;  %v9795_v16 = vadd.f32 %v2372_v13, %v2216_v24  ;;  %v3713_v54 = vld [vmem:[#allocation9 + $0xe8] sm:$0xff] }
 0x25f   : > { %v1862_v14 = vpop.f32.mrf.mxu1  ;;  %3718 = vmatpush.msrb.mxu1 %v3713_v54 }
 0x260   : > { %2536 = vmatmul.f32.vlgmr.msra.gmra.mxu0 %v9462_v32  ;;  %2920 = vmatmul.f32.vlgmr.msra.gmra.mxu2 %v9458_v52  ;;  %v1926_v46 = vadd.f32 %v1862_v14, %v1764_v18 }
 0x262   : > { %2758 = vmatmul.f32.vlgmr.msra.gmra.mxu1 %v9472_v42  ;;  %3130 = vmatmul.f32.vlgmr.msra.gmra.mxu3 %v9664_v37 }
 0x263   : > { %v2153_v63 = vpop.f32.mrf.mxu2 }
 0x264   : > { %v2217_v26 = vadd.f32 %v2153_v63, %v1926_v46  ;;  %v3550_v63 = vld [vmem:[#allocation9 + $0x60] sm:$0xff] }
 0x265   : > { %v1703_v43 = vpop.f32.mrf.mxu0  ;;  %v2375_v30 = vpop.f32.mrf.mxu3  ;;  %3557 = vmatpush.msrb.mxu0 %v3550_v63  ;;  %v11310_v63 = vld [vmem:[#allocation108_spill] sm:$0xff] }
 0x266   : > { %v1765_v32 = vadd.f32 %v1703_v43, %v9306_v21  ;;  %v9802_v52 = vadd.f32 %v2375_v30, %v2217_v26 }
 0x267   : > { %v1865_v24 = vpop.f32.mrf.mxu1 }
 0x268   : > { %2539 = vmatmul.f32.gmra.mxu0 %v9481_v33  ;;  %2923 = vmatmul.f32.gmra.mxu2 %v9477_v44  ;;  %v1927_v42 = vadd.f32 %v1865_v24, %v1765_v32  ;;  %v4014_v33 = vld [vmem:[#allocation9 + $0x160] sm:$0xff] }
 0x269   : > { %4021 = vmatpush.msrb.mxu2 %v4014_v33  ;;  %v11309_v33 = vld [vmem:[#allocation75_spill] sm:$0xff] }
 0x26a   : > { %2761 = vmatmul.f32.gmra.mxu1 %v9491_v27  ;;  %3133 = vmatmul.f32.gmra.mxu3 %v9680_v11 }
 0x26b   : > { %v2156_v57 = vpop.f32.mrf.mxu2 }
 0x26c   : > { %v2218_v18 = vadd.f32 %v2156_v57, %v1927_v42 }
 0x26d   : > { %v1706_v13 = vpop.f32.mrf.mxu0  ;;  %v2378_v29 = vpop.f32.mrf.mxu3 }
 0x26e   : > { %v1766_v14 = vadd.f32 %v1706_v13, %v9320_v61  ;;  %v9809_v21 = vadd.f32 %v2378_v29, %v2218_v18  ;;  %v3712_v61 = vld [vmem:[#allocation9 + $0xe0] sm:$0xff]  ;;  %v3549_v13 = vld [vmem:[#allocation9 + $0x58] sm:$0xff] }
 0x26f   : > { %v1868_v46 = vpop.f32.mrf.mxu1  ;;  %3719 = vmatpush.msrb.mxu1 %v3712_v61  ;;  %3558 = vmatpush.msrb.mxu0 %v3549_v13 }
 0x270   : > { %2542 = vmatmul.f32.gmra.mxu0 %v9500_v12  ;;  %2926 = vmatmul.f32.gmra.mxu2 %v9496_v38  ;;  %v1928_v44 = vadd.f32 %v1868_v46, %v1766_v14  ;;  %v4271_v14 = vld [vmem:[#allocation9 + $0x1d8] sm:$0xff] }
 0x271   : > { %4280 = vmatpush.msrb.mxu3 %v4271_v14 }
 0x272   : > { %2764 = vmatmul.f32.gmra.mxu1 %v9510_v23  ;;  %3136 = vmatmul.f32.gmra.mxu3 %v9698_v3 }
 0x273   : > { %v2159_v27 = vpop.f32.mrf.mxu2 }
 0x274   : > { %v2219_v0 = vadd.f32 %v2159_v27, %v1928_v44 }
 0x275   : > { %v1709_v26 = vpop.f32.mrf.mxu0  ;;  %v2381_v54 = vpop.f32.mrf.mxu3 }
 0x276   : > { %v1767_v12 = vadd.f32 %v1709_v26, %v9334_v10  ;;  %v9816_v38 = vadd.f32 %v2381_v54, %v2219_v0  ;;  %v11311_v26 = vld [vmem:[#allocation78_spill] sm:$0xff] }
 0x277   : > { %v1871_v43 = vpop.f32.mrf.mxu1 }
 0x278   : > { %2545 = vmatmul.f32.gmra.mxu0 %v9519_v53  ;;  %2929 = vmatmul.f32.gmra.mxu2 %v9515_v60  ;;  %v1929_v23 = vadd.f32 %v1871_v43, %v1767_v12  ;;  %v4013_v53 = vld [vmem:[#allocation9 + $0x158] sm:$0xff] }
 0x279   : > { %4022 = vmatpush.msrb.mxu2 %v4013_v53 }
 0x27a   : > { %2767 = vmatmul.f32.gmra.mxu1 %v9529_v2  ;;  %3139 = vmatmul.f32.gmra.mxu3 %v9714_v59 }
 0x27b   : > { %v2162_v32 = vpop.f32.mrf.mxu2 }
 0x27c   : > { %v2220_v30 = vadd.f32 %v2162_v32, %v1929_v23  ;;  %v11312_v32 = vld [vmem:[#allocation110_spill] sm:$0xff] }
 0x27d   : > { %v1712_v24 = vpop.f32.mrf.mxu0  ;;  %v2384_v57 = vpop.f32.mrf.mxu3 }
 0x27e   : > { %v1768_v42 = vadd.f32 %v1712_v24, %v9348_v36  ;;  %v9823_v10 = vadd.f32 %v2384_v57, %v2220_v30  ;;  %v3711_v36 = vld [vmem:[#allocation9 + $0xd8] sm:$0xff]  ;;  %v4012_v30 = vld [vmem:[#allocation9 + $0x150] sm:$0xff] }
 0x27f   : > { %v1874_v18 = vpop.f32.mrf.mxu1  ;;  %3720 = vmatpush.msrb.mxu1 %v3711_v36  ;;  %4023 = vmatpush.msrb.mxu2 %v4012_v30  ;;  %v3548_v24 = vld [vmem:[#allocation9 + $0x50] sm:$0xff] }
 0x280   : > { %2548 = vmatmul.f32.gmra.mxu0 %v9538_v48  ;;  %2932 = vmatmul.f32.gmra.mxu2 %v9534_v17  ;;  %v1930_v60 = vadd.f32 %v1874_v18, %v1768_v42  ;;  %v4270_v42 = vld [vmem:[#allocation9 + $0x1d0] sm:$0xff] }
 0x281   : > { %3559 = vmatpush.msrb.mxu0 %v3548_v24  ;;  %4281 = vmatpush.msrb.mxu3 %v4270_v42  ;;  %v3710_v18 = vld [vmem:[#allocation9 + $0xd0] sm:$0xff] }
 0x282   : > { %2770 = vmatmul.f32.gmra.mxu1 %v9546_v47  ;;  %3142 = vmatmul.f32.gmra.mxu3 %v9732_v9 }
 0x283   : > { %v2165_v2 = vpop.f32.mrf.mxu2  ;;  %3721 = vmatpush.msrb.mxu1 %v3710_v18 }
 0x284   : > { %v2221_v29 = vadd.f32 %v2165_v2, %v1930_v60  ;;  %v11313_v60 = vld [vmem:[#allocation81_spill] sm:$0xff] }
 0x285   : > { %v1715_v46 = vpop.f32.mrf.mxu0  ;;  %v2387_v44 = vpop.f32.mrf.mxu3 }
 0x286   : > { %v1769_v48 = vadd.f32 %v1715_v46, %v11309_v33  ;;  %v9830_v17 = vadd.f32 %v2387_v44, %v2221_v29  ;;  %v11314_v29 = vld [vmem:[#allocation112_spill] sm:$0xff]  ;;  %v2461_v33 = vrot.slane %v9594_v58, 6 }
 0x287   : > { %v1877_v27 = vpop.f32.mrf.mxu1 }
 0x288   : > { %2551 = vmatmul.f32.gmra.mxu0 %v11310_v63  ;;  %2935 = vmatmul.f32.gmra.mxu2 %v9549_v7  ;;  %v1931_v47 = vadd.f32 %v1877_v27, %v1769_v48  ;;  %v2462_v48 = vrot.slane %v9609_v50, 6  ;;  %v11315_v27 = vld [vmem:[#allocation84_spill] sm:$0xff] }
 0x28a   : > { %2773 = vmatmul.f32.gmra.mxu1 %v9561_v40  ;;  %3145 = vmatmul.f32.gmra.mxu3 %v9748_v1 }
 0x28b   : > { %v2168_v4 = vpop.f32.mrf.mxu2 }
 0x28c   : > { %v2222_v0 = vadd.f32 %v2168_v4, %v1931_v47 }
 0x28d   : > { %v1718_v61 = vpop.f32.mrf.mxu0  ;;  %v2390_v54 = vpop.f32.mrf.mxu3 }
 0x28e   : > { %v1770_v12 = vadd.f32 %v1718_v61, %v11311_v26  ;;  %v9837_v43 = vadd.f32 %v2390_v54, %v2222_v0  ;;  %v621_v61 = vld [vmem:[#allocation2 + $0x728] sm:$0xff] }
 0x28f   : > { %v1880_v23 = vpop.f32.mrf.mxu1  ;;  %v3547_v54 = vld [vmem:[#allocation9 + $0x48] sm:$0xff]  ;;  %v2464_v30 = vrot.slane %v621_v61, 6 }
 0x290   : > { %2554 = vmatmul.f32.gmra.mxu0 %v11312_v32  ;;  %2938 = vmatmul.f32.gmra.mxu2 %v9564_v62  ;;  %v1932_v7 = vadd.f32 %v1880_v23, %v1770_v12  ;;  %v4269_v23 = vld [vmem:[#allocation9 + $0x1c8] sm:$0xff] }
 0x291   : > { %3560 = vmatpush.msrb.mxu0 %v3547_v54  ;;  %4282 = vmatpush.msrb.mxu3 %v4269_v23 }
 0x292   : > { %2776 = vmatmul.f32.gmra.mxu1 %v9576_v35  ;;  %3148 = vmatmul.f32.gmra.mxu3 %v9766_v41 }
 0x293   : > { %v2171_v40 = vpop.f32.mrf.mxu2 }
 0x294   : > { %v2223_v57 = vadd.f32 %v2171_v40, %v1932_v7  ;;  %v11316_v7 = vld [vmem:[#allocation87_spill] sm:$0xff] }
 0x295   : > { %v1721_v53 = vpop.f32.mrf.mxu0  ;;  %v2393_v13 = vpop.f32.mrf.mxu3 }
 0x296   : > { %v1771_v2 = vadd.f32 %v1721_v53, %v11313_v60  ;;  %v9844_v62 = vadd.f32 %v2393_v13, %v2223_v57  ;;  %v2467_v13 = vrot.slane %v9642_v15, 6 }
 0x297   : > { %v1883_v14 = vpop.f32.mrf.mxu1 }
 0x298   : > { %2557 = vmatmul.f32.gmra.mxu0 %v11314_v29  ;;  %2941 = vmatmul.f32.gmra.mxu2 %v9579_v8  ;;  %v1933_v35 = vadd.f32 %v1883_v14, %v1771_v2  ;;  %v9858_v8 = vsel %vm1958_vm1, %v2461_v33, %v2462_v48  ;;  %v2466_v2 = vrot.slane %v9626_v28, 6  ;;  %v11317_v29 = vld [vmem:[#allocation90_spill] sm:$0xff]  ;;  %v629_v33 = vld [vmem:[#allocation2 + $0x768] sm:$0xff] }
 0x29a   : > { %2779 = vmatmul.f32.gmra.mxu1 %v9591_v39  ;;  %3151 = vmatmul.f32.gmra.mxu3 %v9782_v34  ;;  %v4011_v39 = vld [vmem:[#allocation9 + $0x148] sm:$0xff] }
 0x29b   : > { %v2174_v36 = vpop.f32.mrf.mxu2  ;;  %4024 = vmatpush.msrb.mxu2 %v4011_v39  ;;  %v11318_v39 = vld [vmem:[#allocation93_spill] sm:$0xff] }
 0x29c   : > { %v2224_v46 = vadd.f32 %v2174_v36, %v1933_v35 }
 0x29d   : > { %v1724_v44 = vpop.f32.mrf.mxu0  ;;  %v2396_v47 = vpop.f32.mrf.mxu3 }
 0x29e   : > { %v1772_v63 = vadd.f32 %v1724_v44, %v11315_v27  ;;  %v9853_v4 = vadd.f32 %v2396_v47, %v2224_v46  ;;  %v4010_v46 = vld [vmem:[#allocation9 + $0x140] sm:$0xff] }
 0x29f   : > { %v1886_v0 = vpop.f32.mrf.mxu1  ;;  %4025 = vmatpush.msrb.mxu2 %v4010_v46  ;;  %v3546_v27 = vld [vmem:[#allocation9 + $0x40] sm:$0xff] }
 0x2a0   : > { %2560 = vmatmul.f32.gmra.mxu0 %v9598_v25  ;;  %2944 = vmatmul.f32.gmra.mxu2 %v9594_v58  ;;  %v1934_v26 = vadd.f32 %v1886_v0, %v1772_v63  ;;  %v3709_v25 = vld [vmem:[#allocation9 + $0xc8] sm:$0xff]  ;;  %v4268_v63 = vld [vmem:[#allocation9 + $0x1c0] sm:$0xff]  ;;  %v2469_v0 = vrot.slane %v629_v33, 6 }
 0x2a1   : > { %3722 = vmatpush.msrb.mxu1 %v3709_v25  ;;  %3561 = vmatpush.msrb.mxu0 %v3546_v27  ;;  %v2471_v25 = vrot.slane %v9660_v22, 6  ;;  %v11322_v46 = vld [vmem:[#allocation99_spill] sm:$0xff] }
 0x2a2   : > { %2782 = vmatmul.f32.gmra.mxu1 %v9606_v6  ;;  %3154 = vmatmul.f32.gmra.mxu3 %v9858_v8  ;;  %v9868_v6 = vsel %vm1958_vm1, %v2462_v48, %v2464_v30 }
 0x2a3   : > { %v2177_v12 = vpop.f32.mrf.mxu2  ;;  %4283 = vmatpush.msrb.mxu3 %v4268_v63 }
 0x2a4   : > { %v2225_v32 = vadd.f32 %v2177_v12, %v1934_v26 }
 0x2a5   : > { %v1727_v58 = vpop.f32.mrf.mxu0  ;;  %v2399_v24 = vpop.f32.mrf.mxu3 }
 0x2a6   : > { %v1773_v40 = vadd.f32 %v1727_v58, %v11316_v7  ;;  %v9863_v42 = vadd.f32 %v2399_v24, %v2225_v32  ;;  %v11319_v58 = vld [vmem:[#allocation120_spill] sm:$0xff] }
 0x2a7   : > { %v1889_v57 = vpop.f32.mrf.mxu1  ;;  %v2472_v7 = vrot.slane %v11319_v58, 6  ;;  %v11320_v24 = vld [vmem:[#allocation96_spill] sm:$0xff] }
 0x2a8   : > { %2563 = vmatmul.f32.gmra.mxu0 %v9613_v19  ;;  %2947 = vmatmul.f32.gmra.mxu2 %v9609_v50  ;;  %v1935_v18 = vadd.f32 %v1889_v57, %v1773_v40 }
 0x2aa   : > { %2785 = vmatmul.f32.gmra.mxu1 %v9621_v56  ;;  %3157 = vmatmul.f32.gmra.mxu3 %v9868_v6  ;;  %v9880_v56 = vsel %vm1958_vm1, %v2466_v2, %v2467_v13 }
 0x2ab   : > { %v2180_v53 = vpop.f32.mrf.mxu2 }
 0x2ac   : > { %v2226_v60 = vadd.f32 %v2180_v53, %v1935_v18  ;;  %v4009_v53 = vld [vmem:[#allocation9 + $0x138] sm:$0xff] }
 0x2ad   : > { %v1730_v14 = vpop.f32.mrf.mxu0  ;;  %v2402_v19 = vpop.f32.mrf.mxu3  ;;  %4026 = vmatpush.msrb.mxu2 %v4009_v53  ;;  %v3544_v53 = vld [vmem:[#allocation9 + $0x30] sm:$0xff] }
 0x2ae   : > { %v1774_v35 = vadd.f32 %v1730_v14, %v11317_v29  ;;  %v9875_v36 = vadd.f32 %v2402_v19, %v2226_v60  ;;  %v637_v60 = vld [vmem:[#allocation2 + $0x7a8] sm:$0xff]  ;;  %v3545_v29 = vld [vmem:[#allocation9 + $0x38] sm:$0xff] }
 0x2af   : > { %v1892_v50 = vpop.f32.mrf.mxu1  ;;  %3562 = vmatpush.msrb.mxu0 %v3545_v29  ;;  %v11328_v29 = vld [vmem:[#allocation105_spill] sm:$0xff] }
 0x2b0   : > { %2566 = vmatmul.f32.gmra.mxu0 %v9630_v31  ;;  %2950 = vmatmul.f32.gmra.mxu2 %v9626_v28  ;;  %v1936_v48 = vadd.f32 %v1892_v50, %v1774_v35  ;;  %v3708_v31 = vld [vmem:[#allocation9 + $0xc0] sm:$0xff]  ;;  %v4267_v35 = vld [vmem:[#allocation9 + $0x1b8] sm:$0xff]  ;;  %v2474_v50 = vrot.slane %v637_v60, 6  ;;  %v4266_v60 = vld [vmem:[#allocation9 + $0x1b0] sm:$0xff] }
 0x2b1   : > { %3723 = vmatpush.msrb.mxu1 %v3708_v31  ;;  %4284 = vmatpush.msrb.mxu3 %v4267_v35 }
 0x2b2   : > { %2788 = vmatmul.f32.gmra.mxu1 %v9638_v45  ;;  %3160 = vmatmul.f32.gmra.mxu3 %v9880_v56  ;;  %v9890_v45 = vsel %vm1958_vm1, %v2467_v13, %v2469_v0  ;;  %v11321_v13 = vld [vmem:[#allocation119_spill] sm:$0xff]  ;;  %v9912_v63 = vsel %vm1958_vm1, %v2472_v7, %v2474_v50  ;;  %v11323_v0 = vld [vmem:[#allocation122_spill] sm:$0xff] }
 0x2b3   : > { %v2183_v44 = vpop.f32.mrf.mxu2  ;;  %3563 = vmatpush.msrb.mxu0 %v3544_v53  ;;  %4285 = vmatpush.msrb.mxu3 %v4266_v60 }
 0x2b4   : > { %v2227_v47 = vadd.f32 %v2183_v44, %v1936_v48 }
 0x2b5   : > { %v1733_v28 = vpop.f32.mrf.mxu0  ;;  %v2405_v26 = vpop.f32.mrf.mxu3 }
 0x2b6   : > { %v1775_v61 = vadd.f32 %v1733_v28, %v11318_v39  ;;  %v9885_v12 = vadd.f32 %v2405_v26, %v2227_v47  ;;  %v11324_v39 = vld [vmem:[#allocation123_spill] sm:$0xff]  ;;  %v11325_v26 = vld [vmem:[#allocation126_spill] sm:$0xff] }
 0x2b7   : > { %v1895_v54 = vpop.f32.mrf.mxu1 }
 0x2b8   : > { %2569 = vmatmul.f32.gmra.mxu0 %v9646_v5  ;;  %2953 = vmatmul.f32.gmra.mxu2 %v9642_v15  ;;  %v1937_v23 = vadd.f32 %v1895_v54, %v1775_v61  ;;  %v2476_v61 = vrot.slane %v11324_v39, 6  ;;  %v2477_v54 = vrot.slane %v11325_v26, 6 }
 0x2ba   : > { %2791 = vmatmul.f32.gmra.mxu1 %v9654_v51  ;;  %3163 = vmatmul.f32.gmra.mxu3 %v9890_v45  ;;  %v9902_v51 = vsel %vm1958_vm1, %v2471_v25, %v2472_v7  ;;  %v9924_v7 = vsel %vm1958_vm1, %v2476_v61, %v2477_v54 }
 0x2bb   : > { %v2186_v32 = vpop.f32.mrf.mxu2 }
 0x2bc   : > { %v2228_v30 = vadd.f32 %v2186_v32, %v1937_v23  ;;  %v11326_v32 = vld [vmem:[#allocation102_spill] sm:$0xff] }
 0x2bd   : > { %v1736_v40 = vpop.f32.mrf.mxu0  ;;  %v2408_v5 = vpop.f32.mrf.mxu3 }
 0x2be   : > { %v1776_v57 = vadd.f32 %v1736_v40, %v11320_v24  ;;  %v9897_v18 = vadd.f32 %v2408_v5, %v2228_v30  ;;  %v645_v40 = vld [vmem:[#allocation2 + $0x7e8] sm:$0xff] }
 0x2bf   : > { %v1898_v15 = vpop.f32.mrf.mxu1 }
 0x2c0   : > { %2572 = vmatmul.f32.gmra.mxu0 %v9664_v37  ;;  %2956 = vmatmul.f32.gmra.mxu2 %v9660_v22  ;;  %v1938_v2 = vadd.f32 %v1898_v15, %v1776_v57  ;;  %v3707_v37 = vld [vmem:[#allocation9 + $0xb8] sm:$0xff]  ;;  %v4008_v15 = vld [vmem:[#allocation9 + $0x130] sm:$0xff] }
 0x2c1   : > { %3724 = vmatpush.msrb.mxu1 %v3707_v37  ;;  %v11327_v57 = vld [vmem:[#allocation125_spill] sm:$0xff]  ;;  %4027 = vmatpush.msrb.mxu2 %v4008_v15 }
 0x2c2   : > { %2794 = vmatmul.f32.gmra.mxu1 %v11321_v13  ;;  %3166 = vmatmul.f32.gmra.mxu3 %v9902_v51  ;;  %v2479_v13 = vrot.slane %v645_v40, 6 }
 0x2c3   : > { %v2189_v14 = vpop.f32.mrf.mxu2 }
 0x2c4   : > { %v2229_v19 = vadd.f32 %v2189_v14, %v1938_v2 }
 0x2c5   : > { %v1739_v22 = vpop.f32.mrf.mxu0  ;;  %v2411_v48 = vpop.f32.mrf.mxu3 }
 0x2c6   : > { %v1777_v33 = vadd.f32 %v1739_v22, %v11322_v46  ;;  %v9907_v44 = vadd.f32 %v2411_v48, %v2229_v19  ;;  %v9934_v22 = vsel %vm1958_vm1, %v2477_v54, %v2479_v13 }
 0x2c7   : > { %v1901_v27 = vpop.f32.mrf.mxu1 }
 0x2c8   : > { %2575 = vmatmul.f32.gmra.mxu0 %v9680_v11  ;;  %2959 = vmatmul.f32.gmra.mxu2 %v11319_v58  ;;  %v1939_v47 = vadd.f32 %v1901_v27, %v1777_v33  ;;  %v11329_v33 = vld [vmem:[#allocation128_spill] sm:$0xff] }
 0x2ca   : > { %2797 = vmatmul.f32.gmra.mxu1 %v11323_v0  ;;  %3169 = vmatmul.f32.gmra.mxu3 %v9912_v63 }
 0x2cb   : > { %v2192_v31 = vpop.f32.mrf.mxu2 }
 0x2cc   : > { %v2230_v28 = vadd.f32 %v2192_v31, %v1939_v47  ;;  %v11330_v47 = vld [vmem:[#allocation129_spill] sm:$0xff]  ;;  %v11331_v31 = vld [vmem:[#allocation132_spill] sm:$0xff] }
 0x2cd   : > { %v1742_v23 = vpop.f32.mrf.mxu0  ;;  %v2414_v11 = vpop.f32.mrf.mxu3  ;;  %v2481_v0 = vrot.slane %v11330_v47, 6 }
 0x2ce   : > { %v1778_v30 = vadd.f32 %v1742_v23, %v11326_v32  ;;  %v9919_v25 = vadd.f32 %v2414_v11, %v2230_v28  ;;  %v2482_v28 = vrot.slane %v11331_v31, 6  ;;  %v11332_v23 = vld [vmem:[#allocation109_spill] sm:$0xff] }
 0x2cf   : > { %v1904_v58 = vpop.f32.mrf.mxu1 }
 0x2d0   : > { %2578 = vmatmul.f32.gmra.mxu0 %v9698_v3  ;;  %2962 = vmatmul.f32.gmra.mxu2 %v11324_v39  ;;  %v1940_v24 = vadd.f32 %v1904_v58, %v1778_v30  ;;  %v3706_v3 = vld [vmem:[#allocation9 + $0xb0] sm:$0xff]  ;;  %v9946_v54 = vsel %vm1958_vm1, %v2481_v0, %v2482_v28  ;;  %v653_v30 = vld [vmem:[#allocation2 + $0x828] sm:$0xff] }
 0x2d1   : > { %3725 = vmatpush.msrb.mxu1 %v3706_v3  ;;  %v11333_v58 = vld [vmem:[#allocation131_spill] sm:$0xff]  ;;  %v2484_v53 = vrot.slane %v653_v30, 6 }
 0x2d2   : > { %2800 = vmatmul.f32.gmra.mxu1 %v11327_v57  ;;  %3172 = vmatmul.f32.gmra.mxu3 %v9924_v7  ;;  %v3543_v57 = vld [vmem:[#allocation9 + $0x28] sm:$0xff] }
 0x2d3   : > { %v2195_v5 = vpop.f32.mrf.mxu2  ;;  %3564 = vmatpush.msrb.mxu0 %v3543_v57 }
 0x2d4   : > { %v2231_v2 = vadd.f32 %v2195_v5, %v1940_v24  ;;  %v4007_v24 = vld [vmem:[#allocation9 + $0x128] sm:$0xff] }
 0x2d5   : > { %v1745_v14 = vpop.f32.mrf.mxu0  ;;  %v2417_v19 = vpop.f32.mrf.mxu3  ;;  %v4265_v5 = vld [vmem:[#allocation9 + $0x1a8] sm:$0xff]  ;;  %4028 = vmatpush.msrb.mxu2 %v4007_v24 }
 0x2d6   : > { %v1779_v35 = vadd.f32 %v1745_v14, %v11328_v29  ;;  %v9929_v50 = vadd.f32 %v2417_v19, %v2231_v2  ;;  %4286 = vmatpush.msrb.mxu3 %v4265_v5  ;;  %v11334_v2 = vld [vmem:[#allocation111_spill] sm:$0xff] }
 0x2d7   : > { %v1907_v37 = vpop.f32.mrf.mxu1  ;;  %v4006_v5 = vld [vmem:[#allocation9 + $0x120] sm:$0xff] }
 0x2d8   : > { %2581 = vmatmul.f32.gmra.mxu0 %v9714_v59  ;;  %2965 = vmatmul.f32.gmra.mxu2 %v11325_v26  ;;  %v1941_v46 = vadd.f32 %v1907_v37, %v1779_v35  ;;  %v9954_v35 = vsel %vm1958_vm1, %v2482_v28, %v2484_v53  ;;  %v11335_v37 = vld [vmem:[#allocation134_spill] sm:$0xff] }
 0x2d9   : > { %4029 = vmatpush.msrb.mxu2 %v4006_v5 }
 0x2da   : > { %2803 = vmatmul.f32.gmra.mxu1 %v11329_v33  ;;  %3175 = vmatmul.f32.gmra.mxu3 %v9934_v22 }
 0x2db   : > { %v2198_v48 = vpop.f32.mrf.mxu2 }
 0x2dc   : > { %v2232_v27 = vadd.f32 %v2198_v48, %v1941_v46  ;;  %v11336_v48 = vld [vmem:[#allocation135_spill] sm:$0xff] }
 0x2dd   : > { %v2537_v39 = vpop.f32.mrf.mxu0  ;;  %v2420_v61 = vpop.f32.mrf.mxu3 }
 0x2de   : > { %v2633_v59 = vadd.f32 %v2537_v39, %v11332_v23  ;;  %v9941_v32 = vadd.f32 %v2420_v61, %v2232_v27  ;;  %v2486_v27 = vrot.slane %v11336_v48, 6 }
 0x2df   : > { %v2759_v26 = vpop.f32.mrf.mxu1 }
 0x2e0   : > { %2584 = vmatmul.f32.gmra.mxu0 %v9732_v9  ;;  %2968 = vmatmul.f32.gmra.mxu2 %v11330_v47  ;;  %v2855_v11 = vadd.f32 %v2759_v26, %v2633_v59  ;;  %v3705_v9 = vld [vmem:[#allocation9 + $0xa8] sm:$0xff]  ;;  %v2487_v47 = vrot.slane %v9778_v20, 6 }
 0x2e1   : > { %3726 = vmatpush.msrb.mxu1 %v3705_v9 }
 0x2e2   : > { %2806 = vmatmul.f32.gmra.mxu1 %v11333_v58  ;;  %3178 = vmatmul.f32.gmra.mxu3 %v9946_v54  ;;  %v9965_v23 = vsel %vm1958_vm1, %v2486_v27, %v2487_v47 }
 0x2e3   : > { %v2921_v40 = vpop.f32.mrf.mxu2 }
 0x2e4   : > { %v3017_v15 = vadd.f32 %v2921_v40, %v2855_v11  ;;  %v661_v11 = vld [vmem:[#allocation2 + $0x868] sm:$0xff]  ;;  %v11338_v40 = vld [vmem:[#allocation137_spill] sm:$0xff] }
 0x2e5   : > { %v2540_v60 = vpop.f32.mrf.mxu0  ;;  %v3131_v3 = vpop.f32.mrf.mxu3  ;;  %v2489_v9 = vrot.slane %v661_v11, 6 }
 0x2e6   : > { %v2634_v13 = vadd.f32 %v2540_v60, %v11334_v2  ;;  %v3227_v14 = vadd.f32 %v3131_v3, %v3017_v15  ;;  %v3542_v15 = vld [vmem:[#allocation9 + $0x20] sm:$0xff] }
 0x2e7   : > { %v2762_v29 = vpop.f32.mrf.mxu1  ;;  %3565 = vmatpush.msrb.mxu0 %v3542_v15  ;;  %v3704_v60 = vld [vmem:[#allocation9 + $0xa0] sm:$0xff]  ;;  %v668_v15 = vld [vmem:[#allocation2 + $0x8a8] sm:$0xff] }
 0x2e8   : > { %2587 = vmatmul.f32.gmra.mxu0 %v9748_v1  ;;  %2971 = vmatmul.f32.gmra.mxu2 %v11331_v31  ;;  %3259 = vst [vmem:[%s9109_s17 + $0x8] sm:$0xff] %v3227_v14  ;;  %v2856_v19 = vadd.f32 %v2762_v29, %v2634_v13  ;;  %v11337_v1 = vld [vmem:[#allocation113_spill] sm:$0xff]  ;;  %v3328_v59 = vmul.f32 %v3227_v14, %v3227_v14  ;;  %v11339_v13 = vld [vmem:[#allocation114_spill] sm:$0xff] }
 0x2e9   : > { %3727 = vmatpush.msrb.mxu1 %v3704_v60 }
 0x2ea   : > { %2809 = vmatmul.f32.gmra.mxu1 %v11335_v37  ;;  %3181 = vmatmul.f32.gmra.mxu3 %v9954_v35  ;;  %v9974_v37 = vsel %vm1958_vm1, %v2487_v47, %v2489_v9 }
 0x2eb   : > { %v2924_v46 = vpop.f32.mrf.mxu2 }
 0x2ec   : > { %v3018_v33 = vadd.f32 %v2924_v46, %v2856_v19  ;;  %v666_v46 = vld [vmem:[#allocation2 + $0x898] sm:$0xff] }
 0x2ed   : > { %v2543_v0 = vpop.f32.mrf.mxu0  ;;  %v3134_v31 = vpop.f32.mrf.mxu3 }
 0x2ee   : > { %v2635_v39 = vadd.f32 %v2543_v0, %v11337_v1  ;;  %v3228_v61 = vadd.f32 %v3134_v31, %v3018_v33  ;;  %v665_v33 = vld [vmem:[#allocation2 + $0x890] sm:$0xff]  ;;  %v667_v0 = vld [vmem:[#allocation2 + $0x8a0] sm:$0xff] }
 0x2ef   : > { %v2765_v28 = vpop.f32.mrf.mxu1  ;;  %v3056_v47 = vrot.slane %v667_v0, 6  ;;  %v2686_v60 = vrot.slane %v667_v0, 2 }
 0x2f0   : > { %2590 = vmatmul.f32.gmra.mxu0 %v9766_v41  ;;  %2974 = vmatmul.f32.gmra.mxu2 %v11336_v48  ;;  %3260 = vst [vmem:[%s9109_s17 + $0x28] sm:$0xff] %v3228_v61  ;;  %v3291_v26 = vadd.f32 %v3228_v61, %v3227_v14  ;;  %v3329_v30 = vmul.f32 %v3228_v61, %v3228_v61  ;;  %v4264_v41 = vld [vmem:[#allocation9 + $0x1a0] sm:$0xff]  ;;  %v2684_v61 = vrot.slane %v666_v46, 2 }
 0x2f1   : > { %v2857_v58 = vadd.f32 %v2765_v28, %v2635_v39  ;;  %4287 = vmatpush.msrb.mxu3 %v4264_v41  ;;  %v3055_v28 = vrot.slane %v666_v46, 6 }
 0x2f2   : > { %2812 = vmatmul.f32.gmra.mxu1 %v11338_v40  ;;  %v3360_v24 = vadd.f32 %v3329_v30, %v3328_v59  ;;  %3184 = vmatmul.f32.gmra.mxu3 %v9965_v23  ;;  %v11340_v30 = vld [vmem:[#allocation115_spill] sm:$0xff] }
 0x2f3   : > { %v2927_v57 = vpop.f32.mrf.mxu2 }
 0x2f4   : > { %v3019_v53 = vadd.f32 %v2927_v57, %v2857_v58 }
 0x2f5   : > { %v2546_v2 = vpop.f32.mrf.mxu0  ;;  %v3137_v14 = vpop.f32.mrf.mxu3 }
 0x2f6   : > { %v2636_v3 = vadd.f32 %v2546_v2, %v11339_v13  ;;  %v3229_v29 = vadd.f32 %v3137_v14, %v3019_v53  ;;  %v4005_v2 = vld [vmem:[#allocation9 + $0x118] sm:$0xff] }
 0x2f7   : > { %v2768_v19 = vpop.f32.mrf.mxu1  ;;  %v3541_v13 = vld [vmem:[#allocation9 + $0x18] sm:$0xff]  ;;  %4030 = vmatpush.msrb.mxu2 %v4005_v2 }
 0x2f8   : > { %2593 = vmatmul.f32.gmra.mxu0 %v9782_v34  ;;  %2977 = vmatmul.f32.gmra.mxu2 %v9778_v20  ;;  %3261 = vst [vmem:[%s9109_s17 + $0x48] sm:$0xff] %v3229_v29  ;;  %v3292_v48 = vadd.f32 %v3291_v26, %v3229_v29  ;;  %v3330_v27 = vmul.f32 %v3229_v29, %v3229_v29  ;;  %v2683_v34 = vrot.slane %v665_v33, 2  ;;  %v3058_v29 = vrot.slane %v668_v15, 6 }
 0x2f9   : > { %v2858_v1 = vadd.f32 %v2768_v19, %v2636_v3  ;;  %v4263_v3 = vld [vmem:[#allocation9 + $0x198] sm:$0xff]  ;;  %3566 = vmatpush.msrb.mxu0 %v3541_v13  ;;  %v674_v13 = vld [vmem:[#allocation2 + $0x8e8] sm:$0xff] }
 0x2fa   : > { %2815 = vmatmul.f32.gmra.mxu1 %v9790_v55  ;;  %v3361_v39 = vadd.f32 %v3360_v24, %v3330_v27  ;;  %3187 = vmatmul.f32.gmra.mxu3 %v9974_v37  ;;  %v2685_v57 = vsel %vm1506_vm0, %v2683_v34, %v2684_v61  ;;  %v3057_v55 = vsel %vm1958_vm1, %v3055_v28, %v3056_v47  ;;  %v672_v34 = vld [vmem:[#allocation2 + $0x8d8] sm:$0xff] }
 0x2fb   : > { %v2930_v31 = vpop.f32.mrf.mxu2  ;;  %4288 = vmatpush.msrb.mxu3 %v4263_v3 }
 0x2fc   : > { %v3020_v20 = vadd.f32 %v2930_v31, %v2858_v1  ;;  %v3059_v31 = vsel %vm1958_vm1, %v3056_v47, %v3058_v29 }
 0x2fd   : > { %v2549_v59 = vpop.f32.mrf.mxu0  ;;  %v3140_v58 = vpop.f32.mrf.mxu3 }
 0x2fe   : > { %v2637_v11 = vadd.f32 %v2549_v59, %v11340_v30  ;;  %v3230_v26 = vadd.f32 %v3140_v58, %v3020_v20  ;;  %v671_v20 = vld [vmem:[#allocation2 + $0x8d0] sm:$0xff]  ;;  %v673_v30 = vld [vmem:[#allocation2 + $0x8e0] sm:$0xff] }
 0x2ff   : > { %v2771_v40 = vpop.f32.mrf.mxu1 }
 0x300   : > { %2596 = vmatmul.f32.gmra.mxu0 %v9858_v8  ;;  %2980 = vmatmul.f32.gmra.mxu2 %v666_v46  ;;  %3262 = vst [vmem:[%s9109_s17 + $0x68] sm:$0xff] %v3230_v26  ;;  %v3293_v24 = vadd.f32 %v3292_v48, %v3230_v26  ;;  %v3331_v5 = vmul.f32 %v3230_v26, %v3230_v26  ;;  %v3703_v8 = vld [vmem:[#allocation9 + $0x98] sm:$0xff]  ;;  %v11341_v46 = vld [vmem:[#allocation116_spill] sm:$0xff] }
 0x301   : > { %v2859_v41 = vadd.f32 %v2771_v40, %v2637_v11  ;;  %3728 = vmatpush.msrb.mxu1 %v3703_v8  ;;  %v2688_v40 = vrot.slane %v671_v20, 2  ;;  %v2691_v8 = vrot.slane %v673_v30, 2 }
 0x302   : > { %2818 = vmatmul.f32.gmra.mxu1 %v2685_v57  ;;  %v3362_v53 = vadd.f32 %v3361_v39, %v3331_v5  ;;  %3190 = vmatmul.f32.gmra.mxu3 %v3057_v55  ;;  %v2687_v39 = vsel %vm1506_vm0, %v2684_v61, %v2686_v60  ;;  %v2689_v57 = vrot.slane %v672_v34, 2  ;;  %v3060_v55 = vrot.slane %v672_v34, 6  ;;  %v11342_v5 = vld [vmem:[#allocation117_spill] sm:$0xff] }
 0x303   : > { %v2933_v9 = vpop.f32.mrf.mxu2 }
 0x304   : > { %v3021_v14 = vadd.f32 %v2933_v9, %v2859_v41 }
 0x305   : > { %v2552_v19 = vpop.f32.mrf.mxu0  ;;  %v3143_v48 = vpop.f32.mrf.mxu3 }
 0x306   : > { %v2638_v33 = vadd.f32 %v2552_v19, %v11341_v46  ;;  %v3231_v27 = vadd.f32 %v3143_v48, %v3021_v14  ;;  %v4004_v19 = vld [vmem:[#allocation9 + $0x110] sm:$0xff] }
 0x307   : > { %v2774_v1 = vpop.f32.mrf.mxu1  ;;  %v3540_v46 = vld [vmem:[#allocation9 + $0x10] sm:$0xff]  ;;  %4031 = vmatpush.msrb.mxu2 %v4004_v19 }
 0x308   : > { %2599 = vmatmul.f32.gmra.mxu0 %v9868_v6  ;;  %2983 = vmatmul.f32.gmra.mxu2 %v667_v0  ;;  %3263 = vst [vmem:[%s9109_s17 + $0x88] sm:$0xff] %v3231_v27  ;;  %v3294_v28 = vadd.f32 %v3293_v24, %v3231_v27  ;;  %v3332_v59 = vmul.f32 %v3231_v27, %v3231_v27  ;;  %v3061_v6 = vrot.slane %v673_v30, 6  ;;  %v3063_v27 = vrot.slane %v674_v13, 6 }
 0x309   : > { %v2860_v11 = vadd.f32 %v2774_v1, %v2638_v33  ;;  %v2690_v24 = vsel %vm1506_vm0, %v2688_v40, %v2689_v57  ;;  %v4262_v33 = vld [vmem:[#allocation9 + $0x190] sm:$0xff]  ;;  %3567 = vmatpush.msrb.mxu0 %v3540_v46 }
 0x30a   : > { %2821 = vmatmul.f32.gmra.mxu1 %v2687_v39  ;;  %v3363_v58 = vadd.f32 %v3362_v53, %v3332_v59  ;;  %3193 = vmatmul.f32.gmra.mxu3 %v3059_v31  ;;  %v3062_v53 = vsel %vm1958_vm1, %v3060_v55, %v3061_v6  ;;  %v11343_v39 = vld [vmem:[#allocation118_spill] sm:$0xff]  ;;  %v2692_v59 = vsel %vm1506_vm0, %v2689_v57, %v2691_v8  ;;  %v681_v8 = vld [vmem:[#allocation2 + $0x928] sm:$0xff] }
 0x30b   : > { %v2936_v26 = vpop.f32.mrf.mxu2  ;;  %4289 = vmatpush.msrb.mxu3 %v4262_v33  ;;  %v680_v55 = vld [vmem:[#allocation2 + $0x920] sm:$0xff] }
 0x30c   : > { %v3022_v61 = vadd.f32 %v2936_v26, %v2860_v11  ;;  %v3064_v11 = vsel %vm1958_vm1, %v3061_v6, %v3063_v27  ;;  %v678_v26 = vld [vmem:[#allocation2 + $0x910] sm:$0xff]  ;;  %v4003_v27 = vld [vmem:[#allocation9 + $0x108] sm:$0xff] }
 0x30d   : > { %v2555_v0 = vpop.f32.mrf.mxu0  ;;  %v3146_v15 = vpop.f32.mrf.mxu3  ;;  %4032 = vmatpush.msrb.mxu2 %v4003_v27 }
 0x30e   : > { %v2639_v47 = vadd.f32 %v2555_v0, %v11342_v5  ;;  %v3232_v41 = vadd.f32 %v3146_v15, %v3022_v61  ;;  %v2693_v15 = vrot.slane %v678_v26, 2 }
 0x30f   : > { %v2777_v9 = vpop.f32.mrf.mxu1 }
 0x310   : > { %2602 = vmatmul.f32.gmra.mxu0 %v9880_v56  ;;  %2986 = vmatmul.f32.gmra.mxu2 %v672_v34  ;;  %3264 = vst [vmem:[%s9109_s17 + $0xa8] sm:$0xff] %v3232_v41  ;;  %v3295_v60 = vadd.f32 %v3294_v28, %v3232_v41  ;;  %v3333_v2 = vmul.f32 %v3232_v41, %v3232_v41  ;;  %v3702_v56 = vld [vmem:[#allocation9 + $0x90] sm:$0xff] }
 0x311   : > { %v2861_v3 = vadd.f32 %v2777_v9, %v2639_v47  ;;  %3729 = vmatpush.msrb.mxu1 %v3702_v56  ;;  %v3539_v56 = vld [vmem:[#allocation9 + $0x8] sm:$0xff] }
 0x312   : > { %2824 = vmatmul.f32.gmra.mxu1 %v2690_v24  ;;  %v3364_v14 = vadd.f32 %v3363_v58, %v3333_v2  ;;  %3196 = vmatmul.f32.gmra.mxu3 %v3062_v53  ;;  %v679_v58 = vld [vmem:[#allocation2 + $0x918] sm:$0xff] }
 0x313   : > { %v2939_v29 = vpop.f32.mrf.mxu2  ;;  %v2694_v41 = vrot.slane %v679_v58, 2  ;;  %v3065_v9 = vrot.slane %v679_v58, 6  ;;  %v11344_v24 = vld [vmem:[#allocation121_spill] sm:$0xff]  ;;  %3568 = vmatpush.msrb.mxu0 %v3539_v56 }
 0x314   : > { %v3023_v48 = vadd.f32 %v2939_v29, %v2861_v3 }
 0x315   : > { %v2558_v1 = vpop.f32.mrf.mxu0  ;;  %v3149_v34 = vpop.f32.mrf.mxu3 }
 0x316   : > { %v2640_v31 = vadd.f32 %v2558_v1, %v11343_v39  ;;  %v3233_v20 = vadd.f32 %v3149_v34, %v3023_v48  ;;  %v2696_v48 = vrot.slane %v680_v55, 2  ;;  %v4261_v1 = vld [vmem:[#allocation9 + $0x188] sm:$0xff] }
 0x317   : > { %v2780_v28 = vpop.f32.mrf.mxu1  ;;  %4290 = vmatpush.msrb.mxu3 %v4261_v1  ;;  %v4002_v1 = vld [vmem:[#allocation9 + $0x100] sm:$0xff] }
 0x318   : > { %2605 = vmatmul.f32.gmra.mxu0 %v9890_v45  ;;  %2989 = vmatmul.f32.gmra.mxu2 %v673_v30  ;;  %3265 = vst [vmem:[%s9109_s17 + $0xc8] sm:$0xff] %v3233_v20  ;;  %v3296_v40 = vadd.f32 %v3295_v60, %v3233_v20  ;;  %v3334_v61 = vmul.f32 %v3233_v20, %v3233_v20  ;;  %v3066_v45 = vrot.slane %v680_v55, 6  ;;  %v11345_v20 = vld [vmem:[#allocation124_spill] sm:$0xff] }
 0x319   : > { %v2862_v0 = vadd.f32 %v2780_v28, %v2640_v31  ;;  %v2695_v60 = vsel %vm1506_vm0, %v2693_v15, %v2694_v41  ;;  %v3068_v31 = vrot.slane %v681_v8, 6  ;;  %v2697_v26 = vsel %vm1506_vm0, %v2694_v41, %v2696_v48  ;;  %v688_v15 = vld [vmem:[#allocation2 + $0x960] sm:$0xff]  ;;  %4033 = vmatpush.msrb.mxu2 %v4002_v1  ;;  %v4965_v1 = vld [vmem:[#allocation9 + $0x378] sm:$0xff] }
 0x31a   : > { %2827 = vmatmul.f32.gmra.mxu1 %v2692_v59  ;;  %v3365_v5 = vadd.f32 %v3364_v14, %v3334_v61  ;;  %3199 = vmatmul.f32.gmra.mxu3 %v3064_v11  ;;  %v3067_v3 = vsel %vm1958_vm1, %v3065_v9, %v3066_v45  ;;  %v687_v61 = vld [vmem:[#allocation2 + $0x958] sm:$0xff]  ;;  %v2701_v56 = vrot.slane %v688_v15, 2 }
 0x31b   : > { %v2942_v47 = vpop.f32.mrf.mxu2  ;;  %4966 = vmatpush.msra.mxu2 %v4965_v1 }
 0x31c   : > { %v3024_v57 = vadd.f32 %v2942_v47, %v2862_v0  ;;  %v686_v0 = vld [vmem:[#allocation2 + $0x950] sm:$0xff] }
 0x31d   : > { %v2561_v30 = vpop.f32.mrf.mxu0  ;;  %v3152_v53 = vpop.f32.mrf.mxu3 }
 0x31e   : > { %v2641_v6 = vadd.f32 %v2561_v30, %v11344_v24  ;;  %v3234_v2 = vadd.f32 %v3152_v53, %v3024_v57  ;;  %v2698_v24 = vrot.slane %v686_v0, 2  ;;  %v3070_v53 = vrot.slane %v687_v61, 6  ;;  %v695_v0 = vld [vmem:[#allocation2 + $0x998] sm:$0xff] }
 0x31f   : > { %v2783_v13 = vpop.f32.mrf.mxu1 }
 0x320   : > { %2608 = vmatmul.f32.gmra.mxu0 %v9902_v51  ;;  %2992 = vmatmul.f32.gmra.mxu2 %v679_v58  ;;  %3266 = vst [vmem:[%s9109_s17 + $0xe8] sm:$0xff] %v3234_v2  ;;  %v3297_v14 = vadd.f32 %v3296_v40, %v3234_v2  ;;  %v3335_v29 = vmul.f32 %v3234_v2, %v3234_v2  ;;  %v3701_v51 = vld [vmem:[#allocation9 + $0x88] sm:$0xff] }
 0x321   : > { %v2863_v19 = vadd.f32 %v2783_v13, %v2641_v6  ;;  %3730 = vmatpush.msrb.mxu1 %v3701_v51  ;;  %v3069_v40 = vsel %vm1958_vm1, %v3066_v45, %v3068_v31  ;;  %v2699_v6 = vrot.slane %v687_v61, 2  ;;  %v11346_v2 = vld [vmem:[#allocation127_spill] sm:$0xff] }
 0x322   : > { %2830 = vmatmul.f32.gmra.mxu1 %v2695_v60  ;;  %v3366_v46 = vadd.f32 %v3365_v5, %v3335_v29  ;;  %3202 = vmatmul.f32.gmra.mxu3 %v3067_v3  ;;  %v4260_v31 = vld [vmem:[#allocation9 + $0x180] sm:$0xff] }
 0x323   : > { %v2945_v33 = vpop.f32.mrf.mxu2  ;;  %4291 = vmatpush.msrb.mxu3 %v4260_v31  ;;  %v5235_v31 = vld [vmem:[#allocation9 + $0x3f8] sm:$0xff] }
 0x324   : > { %v3025_v39 = vadd.f32 %v2945_v33, %v2863_v19 }
 0x325   : > { %v2564_v34 = vpop.f32.mrf.mxu0  ;;  %v3155_v59 = vpop.f32.mrf.mxu3  ;;  %5236 = vmatpush.msra.mxu3 %v5235_v31  ;;  %v445_v31 = vld [vmem:[#allocation2 + $0x188] sm:$0xff] }
 0x326   : > { %v2642_v28 = vadd.f32 %v2564_v34, %v11345_v20  ;;  %v3235_v11 = vadd.f32 %v3155_v59, %v3025_v39  ;;  %v3538_v39 = vld [vmem:[#allocation9] sm:$0xff] }
 0x327   : > { %v2786_v58 = vpop.f32.mrf.mxu1  ;;  %3569 = vmatpush.msrb.mxu0 %v3538_v39  ;;  %v4533_v39 = vld [vmem:[#allocation9 + $0x278] sm:$0xff] }
 0x328   : > { %2611 = vmatmul.f32.gmra.mxu0 %v9912_v63  ;;  %2995 = vmatmul.f32.gmra.mxu2 %v680_v55  ;;  %3267 = vst [vmem:[%s9109_s17 + $0x108] sm:$0xff] %v3235_v11  ;;  %v3298_v5 = vadd.f32 %v3297_v14, %v3235_v11  ;;  %v3336_v47 = vmul.f32 %v3235_v11, %v3235_v11  ;;  %v3071_v63 = vrot.slane %v688_v15, 6 }
 0x329   : > { %v2864_v57 = vadd.f32 %v2786_v58, %v2642_v28  ;;  %v2700_v14 = vsel %vm1506_vm0, %v2698_v24, %v2699_v6  ;;  %v11347_v28 = vld [vmem:[#allocation130_spill] sm:$0xff]  ;;  %4534 = vmatpush.msra.mxu0 %v4533_v39 }
 0x32a   : > { %2833 = vmatmul.f32.gmra.mxu1 %v2697_v26  ;;  %v3367_v9 = vadd.f32 %v3366_v46, %v3336_v47  ;;  %3205 = vmatmul.f32.gmra.mxu3 %v3069_v40  ;;  %v3072_v29 = vsel %vm1958_vm1, %v3070_v53, %v3071_v63  ;;  %v689_v46 = vld [vmem:[#allocation2 + $0x968] sm:$0xff]  ;;  %v2702_v40 = vsel %vm1506_vm0, %v2699_v6, %v2701_v56 }
 0x32b   : > { %v2948_v30 = vpop.f32.mrf.mxu2  ;;  %v3073_v34 = vrot.slane %v689_v46, 6  ;;  %v697_v46 = vld [vmem:[#allocation2 + $0x9a8] sm:$0xff] }
 0x32c   : > { %v3026_v41 = vadd.f32 %v2948_v30, %v2864_v57 }
 0x32d   : > { %v2567_v55 = vpop.f32.mrf.mxu0  ;;  %v3158_v13 = vpop.f32.mrf.mxu3 }
 0x32e   : > { %v2643_v45 = vadd.f32 %v2567_v55, %v11346_v2  ;;  %v3236_v60 = vadd.f32 %v3158_v13, %v3026_v41  ;;  %v2704_v55 = vrot.slane %v695_v0, 2  ;;  %v3075_v2 = vrot.slane %v695_v0, 6 }
 0x32f   : > { %v2789_v3 = vpop.f32.mrf.mxu1 }
 0x330   : > { %2614 = vmatmul.f32.gmra.mxu0 %v9924_v7  ;;  %2998 = vmatmul.f32.gmra.mxu2 %v687_v61  ;;  %3268 = vst [vmem:[%s9109_s17 + $0x128] sm:$0xff] %v3236_v60  ;;  %v3299_v8 = vadd.f32 %v3298_v5, %v3236_v60  ;;  %v3337_v19 = vmul.f32 %v3236_v60, %v3236_v60  ;;  %v3700_v7 = vld [vmem:[#allocation9 + $0x80] sm:$0xff]  ;;  %v694_v5 = vld [vmem:[#allocation2 + $0x990] sm:$0xff] }
 0x331   : > { %v2865_v33 = vadd.f32 %v2789_v3, %v2643_v45  ;;  %3731 = vmatpush.msrb.mxu1 %v3700_v7  ;;  %v3074_v61 = vsel %vm1958_vm1, %v3071_v63, %v3073_v34  ;;  %v2703_v53 = vrot.slane %v694_v5, 2  ;;  %v11348_v45 = vld [vmem:[#allocation133_spill] sm:$0xff]  ;;  %v3078_v34 = vrot.slane %v697_v46, 6 }
 0x332   : > { %2836 = vmatmul.f32.gmra.mxu1 %v2700_v14  ;;  %v3368_v48 = vadd.f32 %v3367_v9, %v3337_v19  ;;  %3208 = vmatmul.f32.gmra.mxu3 %v3072_v29  ;;  %v696_v9 = vld [vmem:[#allocation2 + $0x9a0] sm:$0xff] }
 0x333   : > { %v2951_v27 = vpop.f32.mrf.mxu2  ;;  %v2705_v14 = vsel %vm1506_vm0, %v2703_v53, %v2704_v55  ;;  %v2706_v56 = vrot.slane %v696_v9, 2 }
 0x334   : > { %v3027_v51 = vadd.f32 %v2951_v27, %v2865_v33 }
 0x335   : > { %v2570_v20 = vpop.f32.mrf.mxu0  ;;  %v3161_v11 = vpop.f32.mrf.mxu3 }
 0x336   : > { %v2644_v59 = vadd.f32 %v2570_v20, %v11347_v28  ;;  %v3237_v58 = vadd.f32 %v3161_v11, %v3027_v51  ;;  %v11349_v20 = vld [vmem:[#allocation136_spill] sm:$0xff] }
 0x337   : > { %v2792_v26 = vpop.f32.mrf.mxu1 }
 0x338   : > { %2617 = vmatmul.f32.gmra.mxu0 %v9934_v22  ;;  %3001 = vmatmul.f32.gmra.mxu2 %v688_v15  ;;  %3269 = vst [vmem:[%s9109_s17 + $0x148] sm:$0xff] %v3237_v58  ;;  %v3300_v47 = vadd.f32 %v3299_v8, %v3237_v58  ;;  %v3338_v57 = vmul.f32 %v3237_v58, %v3237_v58  ;;  %v3076_v22 = vrot.slane %v696_v9, 6 }
 0x339   : > { %v2866_v30 = vadd.f32 %v2792_v26, %v2644_v59  ;;  %v2707_v26 = vsel %vm1506_vm0, %v2704_v55, %v2706_v56 }
 0x33a   : > { %2839 = vmatmul.f32.gmra.mxu1 %v2702_v40  ;;  %v3369_v24 = vadd.f32 %v3368_v48, %v3338_v57  ;;  %3211 = vmatmul.f32.gmra.mxu3 %v3074_v61  ;;  %v3077_v29 = vsel %vm1958_vm1, %v3075_v2, %v3076_v22  ;;  %v3079_v40 = vsel %vm1958_vm1, %v3076_v22, %v3078_v34  ;;  %v703_v61 = vld [vmem:[#allocation2 + $0x9d8] sm:$0xff]  ;;  %v704_v57 = vld [vmem:[#allocation2 + $0x9e0] sm:$0xff] }
 0x33b   : > { %v2954_v41 = vpop.f32.mrf.mxu2  ;;  %v3080_v2 = vrot.slane %v703_v61, 6 }
 0x33c   : > { %v3028_v6 = vadd.f32 %v2954_v41, %v2866_v30 }
 0x33d   : > { %v2573_v15 = vpop.f32.mrf.mxu0  ;;  %v3164_v13 = vpop.f32.mrf.mxu3 }
 0x33e   : > { %v2645_v63 = vadd.f32 %v2573_v15, %v11348_v45  ;;  %v3238_v60 = vadd.f32 %v3164_v13, %v3028_v6  ;;  %v2709_v6 = vrot.slane %v703_v61, 2 }
 0x33f   : > { %v2795_v3 = vpop.f32.mrf.mxu1 }
 0x340   : > { %2620 = vmatmul.f32.gmra.mxu0 %v9946_v54  ;;  %3004 = vmatmul.f32.gmra.mxu2 %v695_v0  ;;  %3270 = vst [vmem:[%s9109_s17 + $0x168] sm:$0xff] %v3238_v60  ;;  %v3301_v8 = vadd.f32 %v3300_v47, %v3238_v60  ;;  %v3339_v19 = vmul.f32 %v3238_v60, %v3238_v60  ;;  %v4803_v54 = vld [vmem:[#allocation9 + $0x2f8] sm:$0xff]  ;;  %v702_v0 = vld [vmem:[#allocation2 + $0x9d0] sm:$0xff] }
 0x341   : > { %v2867_v33 = vadd.f32 %v2795_v3, %v2645_v63  ;;  %4804 = vmatpush.msra.mxu1 %v4803_v54  ;;  %v2708_v53 = vrot.slane %v702_v0, 2 }
 0x342   : > { %2842 = vmatmul.f32.gmra.mxu1 %v2705_v14  ;;  %v3370_v48 = vadd.f32 %v3369_v24, %v3339_v19  ;;  %3214 = vmatmul.f32.gmra.mxu3 %v3077_v29  ;;  %v705_v29 = vld [vmem:[#allocation2 + $0x9e8] sm:$0xff] }
 0x343   : > { %v2957_v27 = vpop.f32.mrf.mxu2  ;;  %v2710_v13 = vsel %vm1506_vm0, %v2708_v53, %v2709_v6  ;;  %v3083_v1 = vrot.slane %v705_v29, 6  ;;  %v8241_v53 = vld [vmem:[#allocation2 + $0x490] sm:$0xff] }
 0x344   : > { %v3029_v51 = vadd.f32 %v2957_v27, %v2867_v33  ;;  %v4964_v33 = vld [vmem:[#allocation9 + $0x370] sm:$0xff] }
 0x345   : > { %v2576_v7 = vpop.f32.mrf.mxu0  ;;  %v3167_v59 = vpop.f32.mrf.mxu3  ;;  %v5234_v27 = vld [vmem:[#allocation9 + $0x3f0] sm:$0xff]  ;;  %4967 = vmatpush.msra.mxu2 %v4964_v33  ;;  %v4531_v33 = vld [vmem:[#allocation9 + $0x268] sm:$0xff] }
 0x346   : > { %v2646_v28 = vadd.f32 %v2576_v7, %v11349_v20  ;;  %v3239_v11 = vadd.f32 %v3167_v59, %v3029_v51  ;;  %v10034_v51 = vld [vmem:[#allocation2 + $0x190] sm:$0xff]  ;;  %5237 = vmatpush.msra.mxu3 %v5234_v27  ;;  %v10037_v7 = vld [vmem:[#allocation2 + $0x1a0] sm:$0xff]  ;;  %v449_v20 = vld [vmem:[#allocation2 + $0x1a8] sm:$0xff] }
 0x347   : > { %v2798_v58 = vpop.f32.mrf.mxu1 }
 0x348   : > { %2623 = vmatmul.f32.gmra.mxu0 %v9954_v35  ;;  %3007 = vmatmul.f32.gmra.mxu2 %v696_v9  ;;  %3271 = vst [vmem:[%s9109_s17 + $0x188] sm:$0xff] %v3239_v11  ;;  %v3302_v5 = vadd.f32 %v3301_v8, %v3239_v11  ;;  %v3340_v47 = vmul.f32 %v3239_v11, %v3239_v11  ;;  %v3081_v35 = vrot.slane %v704_v57, 6 }
 0x349   : > { %v2868_v30 = vadd.f32 %v2798_v58, %v2646_v28 }
 0x34a   : > { %2845 = vmatmul.f32.gmra.mxu1 %v2707_v26  ;;  %v3371_v24 = vadd.f32 %v3370_v48, %v3340_v47  ;;  %3217 = vmatmul.f32.gmra.mxu3 %v3079_v40  ;;  %v3082_v60 = vsel %vm1958_vm1, %v3080_v2, %v3081_v35  ;;  %v4532_v48 = vld [vmem:[#allocation9 + $0x270] sm:$0xff]  ;;  %v3084_v58 = vsel %vm1958_vm1, %v3081_v35, %v3083_v1  ;;  %v3426_v26 = vrot.slane %v445_v31, 4  ;;  %v537_v47 = vld [vmem:[#allocation2 + $0x488] sm:$0xff] }
 0x34b   : > { %v2960_v41 = vpop.f32.mrf.mxu2  ;;  %4535 = vmatpush.msra.mxu0 %v4532_v48  ;;  %v3427_v40 = vrot.slane %v10034_v51, 4  ;;  %v5233_v48 = vld [vmem:[#allocation9 + $0x3e8] sm:$0xff] }
 0x34c   : > { %v3030_v55 = vadd.f32 %v2960_v41, %v2868_v30  ;;  %5238 = vmatpush.msra.mxu3 %v5233_v48  ;;  %v5232_v48 = vld [vmem:[#allocation9 + $0x3e0] sm:$0xff] }
 0x34d   : > { %v2579_v9 = vpop.f32.mrf.mxu0  ;;  %v3170_v15 = vpop.f32.mrf.mxu3  ;;  %v3428_v2 = vsel %vm3425_vm2, %v3426_v26, %v3427_v40  ;;  %4536 = vmatpush.msra.mxu0 %v4531_v33  ;;  %v4530_v33 = vld [vmem:[#allocation9 + $0x260] sm:$0xff] }
 0x34e   : > { %v2647_v22 = vadd.f32 %v2579_v9, %v9785_v49  ;;  %v3240_v45 = vadd.f32 %v3170_v15, %v3030_v55  ;;  %v2711_v49 = vrot.slane %v704_v57, 2  ;;  %v450_v15 = vld [vmem:[#allocation2 + $0x1b0] sm:$0xff]  ;;  %5239 = vmatpush.msra.mxu3 %v5232_v48  ;;  %v5231_v48 = vld [vmem:[#allocation9 + $0x3d8] sm:$0xff] }
 0x34f   : > { %v2801_v63 = vpop.f32.mrf.mxu1  ;;  %4537 = vmatpush.msra.mxu0 %v4530_v33  ;;  %v4529_v33 = vld [vmem:[#allocation9 + $0x258] sm:$0xff] }
 0x350   : > { %2626 = vmatmul.f32.gmra.mxu0 %v9965_v23  ;;  %3010 = vmatmul.f32.gmra.mxu2 %v703_v61  ;;  %3272 = vst [vmem:[%s9109_s17 + $0x1a8] sm:$0xff] %v3240_v45  ;;  %v3303_v3 = vadd.f32 %v3302_v5, %v3240_v45  ;;  %v3341_v14 = vmul.f32 %v3240_v45, %v3240_v45  ;;  %v4802_v23 = vld [vmem:[#allocation9 + $0x2f0] sm:$0xff]  ;;  %v3890_v5 = vrot.slane %v449_v20, 4 }
 0x351   : > { %v2869_v8 = vadd.f32 %v2801_v63, %v2647_v22  ;;  %4805 = vmatpush.msra.mxu1 %v4802_v23  ;;  %v2712_v11 = vsel %vm1506_vm0, %v2709_v6, %v2711_v49  ;;  %v3487_v6 = vrot.slane %v8241_v53, 4  ;;  %v4963_v49 = vld [vmem:[#allocation9 + $0x368] sm:$0xff]  ;;  %4538 = vmatpush.msra.mxu0 %v4529_v33  ;;  %v4528_v33 = vld [vmem:[#allocation9 + $0x250] sm:$0xff] }
 0x352   : > { %2848 = vmatmul.f32.gmra.mxu1 %v2710_v13  ;;  %v3372_v19 = vadd.f32 %v3371_v24, %v3341_v14  ;;  %3220 = vmatmul.f32.gmra.mxu3 %v3082_v60  ;;  %v447_v13 = vld [vmem:[#allocation2 + $0x198] sm:$0xff]  ;;  %v4801_v23 = vld [vmem:[#allocation9 + $0x2e8] sm:$0xff] }
 0x353   : > { %v2963_v46 = vpop.f32.mrf.mxu2  ;;  %v3429_v29 = vrot.slane %v447_v13, 4  ;;  %4968 = vmatpush.msra.mxu2 %v4963_v49  ;;  %4806 = vmatpush.msra.mxu1 %v4801_v23  ;;  %v4962_v49 = vld [vmem:[#allocation9 + $0x360] sm:$0xff] }
 0x354   : > { %v3031_v56 = vadd.f32 %v2963_v46, %v2869_v8  ;;  %v3892_v8 = vrot.slane %v450_v15, 4  ;;  %v4800_v23 = vld [vmem:[#allocation9 + $0x2e0] sm:$0xff]  ;;  %5240 = vmatpush.msra.mxu3 %v5231_v48  ;;  %v5230_v48 = vld [vmem:[#allocation9 + $0x3d0] sm:$0xff]  ;;  %4539 = vmatpush.msra.mxu0 %v4528_v33  ;;  %v4527_v33 = vld [vmem:[#allocation9 + $0x248] sm:$0xff] }
 0x355   : > { %v2582_v39 = vpop.f32.mrf.mxu0  ;;  %v3173_v54 = vpop.f32.mrf.mxu3  ;;  %v3430_v31 = vsel %vm3425_vm2, %v3427_v40, %v3429_v29  ;;  %4969 = vmatpush.msra.mxu2 %v4962_v49  ;;  %4807 = vmatpush.msra.mxu1 %v4800_v23  ;;  %v4961_v49 = vld [vmem:[#allocation9 + $0x358] sm:$0xff] }
 0x356   : > { %v2648_v34 = vadd.f32 %v2582_v39, %v9795_v16  ;;  %v3241_v28 = vadd.f32 %v3173_v54, %v3031_v56  ;;  %v3889_v16 = vrot.slane %v10037_v7, 4  ;;  %v8242_v56 = vld [vmem:[#allocation2 + $0x498] sm:$0xff]  ;;  %v3893_v51 = vsel %vm3425_vm2, %v3890_v5, %v3892_v8  ;;  %v10055_v54 = vld [vmem:[#allocation2 + $0x1d0] sm:$0xff]  ;;  %5241 = vmatpush.msra.mxu3 %v5230_v48  ;;  %v5229_v48 = vld [vmem:[#allocation9 + $0x3c8] sm:$0xff]  ;;  %4540 = vmatpush.msra.mxu0 %v4527_v33 }
 0x357   : > { %v2804_v59 = vpop.f32.mrf.mxu1  ;;  %v3489_v1 = vrot.slane %v8242_v56, 4  ;;  %v8244_v56 = vld [vmem:[#allocation2 + $0x4d8] sm:$0xff]  ;;  %4970 = vmatpush.msra.mxu2 %v4961_v49  ;;  %v4960_v49 = vld [vmem:[#allocation9 + $0x350] sm:$0xff]  ;;  %v5228_v33 = vld [vmem:[#allocation9 + $0x3c0] sm:$0xff] }
 0x358   : > { %2629 = vmatmul.f32.gmra.mxu0 %v9974_v37  ;;  %3013 = vmatmul.f32.gmra.mxu2 %v704_v57  ;;  %3273 = vst [vmem:[%s9109_s17 + $0x1c8] sm:$0xff] %v3241_v28  ;;  %v3304_v61 = vadd.f32 %v3303_v3, %v3241_v28  ;;  %v3342_v0 = vmul.f32 %v3241_v28, %v3241_v28  ;;  %v3486_v57 = vrot.slane %v537_v47, 4  ;;  %v4799_v23 = vld [vmem:[#allocation9 + $0x2d8] sm:$0xff] }
 0x359   : > { %v2870_v30 = vadd.f32 %v2804_v59, %v2648_v34  ;;  %v3891_v35 = vsel %vm3425_vm2, %v3889_v16, %v3890_v5  ;;  %v453_v34 = vld [vmem:[#allocation2 + $0x1c8] sm:$0xff]  ;;  %v10058_v59 = vld [vmem:[#allocation2 + $0x1e0] sm:$0xff]  ;;  %v10061_v40 = vsel %vm3425_vm2, %v3487_v6, %v3489_v1  ;;  %v3494_v1 = vrot.slane %v8244_v56, 4  ;;  %v8246_v56 = vld [vmem:[#allocation2 + $0x518] sm:$0xff]  ;;  %4808 = vmatpush.msra.mxu1 %v4799_v23  ;;  %4971 = vmatpush.msra.mxu2 %v4960_v49 }
 0x35a   : > { %2851 = vmatmul.f32.gmra.mxu1 %v2712_v11  ;;  %v3373_v24 = vadd.f32 %v3372_v19, %v3342_v0  ;;  %3223 = vmatmul.f32.gmra.mxu3 %v3084_v58  ;;  %v10049_v60 = vsel %vm3425_vm2, %v3486_v57, %v3487_v6  ;;  %v457_v11 = vld [vmem:[#allocation2 + $0x1e8] sm:$0xff]  ;;  %v3432_v0 = vrot.slane %v10055_v54, 4  ;;  %v3894_v47 = vrot.slane %v10058_v59, 4  ;;  %v8243_v6 = vld [vmem:[#allocation2 + $0x4d0] sm:$0xff] }
 0x35b   : > { %v2966_v41 = vpop.f32.mrf.mxu2  ;;  %v10078_v54 = vld [vmem:[#allocation2 + $0x210] sm:$0xff]  ;;  %5242 = vmatpush.msra.mxu3 %v5229_v48 }
 0x35c   : > { %v3032_v37 = vadd.f32 %v2966_v41, %v2870_v30  ;;  %v545_v30 = vld [vmem:[#allocation2 + $0x4c8] sm:$0xff]  ;;  %v4798_v23 = vld [vmem:[#allocation9 + $0x2d0] sm:$0xff] }
 0x35d   : > { %v2585_v55 = vpop.f32.mrf.mxu0  ;;  %v3176_v22 = vpop.f32.mrf.mxu3  ;;  %v3491_v53 = vrot.slane %v545_v30, 4  ;;  %4809 = vmatpush.msra.mxu1 %v4798_v23  ;;  %v4797_v23 = vld [vmem:[#allocation9 + $0x2c8] sm:$0xff]  ;;  %5243 = vmatpush.msra.mxu3 %v5228_v33 }
 0x35e   : > { %v2649_v9 = vadd.f32 %v2585_v55, %v9802_v52  ;;  %v3242_v45 = vadd.f32 %v3176_v22, %v3032_v37  ;;  %v3492_v55 = vrot.slane %v8243_v6, 4 }
 0x35f   : > { %v2807_v63 = vpop.f32.mrf.mxu1  ;;  %4810 = vmatpush.msra.mxu1 %v4797_v23 }
 0x360   : > { %3570 = vmatmul.f32.vlgmr.msrb.gmra.mxu0 %v3428_v2  ;;  %4034 = vmatmul.f32.vlgmr.msrb.gmra.mxu2 %v3891_v35  ;;  %3274 = vst [vmem:[%s9109_s17 + $0x1e8] sm:$0xff] %v3242_v45  ;;  %v3305_v3 = vadd.f32 %v3304_v61, %v3242_v45  ;;  %v3343_v14 = vmul.f32 %v3242_v45, %v3242_v45  ;;  %v3431_v61 = vrot.slane %v453_v34, 4  ;;  %v458_v45 = vld [vmem:[#allocation2 + $0x1f0] sm:$0xff]  ;;  %v461_v34 = vld [vmem:[#allocation2 + $0x208] sm:$0xff] }
 0x361   : > { %v2871_v19 = vadd.f32 %v2807_v63, %v2649_v9 }
 0x362   : > { %3732 = vmatmul.f32.vlgmr.msrb.gmra.mxu1 %v447_v13  ;;  %v3374_v46 = vadd.f32 %v3373_v24, %v3343_v14  ;;  %4292 = vmatmul.f32.vlgmr.msrb.gmra.mxu3 %v10049_v60  ;;  %v3433_v35 = vsel %vm3425_vm2, %v3431_v61, %v3432_v0  ;;  %v455_v13 = vld [vmem:[#allocation2 + $0x1d8] sm:$0xff] }
 0x363   : > { %v2969_v52 = vpop.f32.mrf.mxu2  ;;  %v3434_v8 = vrot.slane %v455_v13, 4 }
 0x364   : > { %v3033_v27 = vadd.f32 %v2969_v52, %v2871_v19  ;;  %v3897_v19 = vrot.slane %v458_v45, 4 }
 0x365   : > { %v2588_v39 = vpop.f32.mrf.mxu0  ;;  %v3179_v28 = vpop.f32.mrf.mxu3 }
 0x366   : > { %v2650_v20 = vadd.f32 %v2588_v39, %v9809_v21  ;;  %v3243_v58 = vadd.f32 %v3179_v28, %v3033_v27  ;;  %v3895_v21 = vrot.slane %v457_v11, 4  ;;  %v10081_v11 = vld [vmem:[#allocation2 + $0x220] sm:$0xff] }
 0x367   : > { %v2810_v26 = vpop.f32.mrf.mxu1  ;;  %v3899_v30 = vrot.slane %v10081_v11, 4 }
 0x368   : > { %3573 = vmatmul.f32.gmra.mxu0 %v3430_v31  ;;  %4037 = vmatmul.f32.gmra.mxu2 %v3893_v51  ;;  %3275 = vst [vmem:[%s9109_s17 + $0x208] sm:$0xff] %v3243_v58  ;;  %v3306_v16 = vadd.f32 %v3305_v3, %v3243_v58  ;;  %v3344_v5 = vmul.f32 %v3243_v58, %v3243_v58  ;;  %v465_v58 = vld [vmem:[#allocation2 + $0x228] sm:$0xff] }
 0x369   : > { %v2872_v24 = vadd.f32 %v2810_v26, %v2650_v20  ;;  %v3896_v9 = vsel %vm3425_vm2, %v3894_v47, %v3895_v21  ;;  %v10072_v3 = vsel %vm3425_vm2, %v3491_v53, %v3492_v55  ;;  %v3435_v31 = vsel %vm3425_vm2, %v3432_v0, %v3434_v8 }
 0x36a   : > { %3735 = vmatmul.f32.gmra.mxu1 %v10037_v7  ;;  %v3375_v41 = vadd.f32 %v3374_v46, %v3344_v5  ;;  %4295 = vmatmul.f32.gmra.mxu3 %v10061_v40  ;;  %v3898_v51 = vsel %vm3425_vm2, %v3895_v21, %v3897_v19  ;;  %v10084_v0 = vsel %vm3425_vm2, %v3492_v55, %v3494_v1  ;;  %v3437_v5 = vrot.slane %v10078_v54, 4  ;;  %v8245_v55 = vld [vmem:[#allocation2 + $0x510] sm:$0xff] }
 0x36b   : > { %v2972_v37 = vpop.f32.mrf.mxu2  ;;  %v3499_v1 = vrot.slane %v8246_v56, 4  ;;  %v10101_v54 = vld [vmem:[#allocation2 + $0x250] sm:$0xff]  ;;  %v8248_v56 = vld [vmem:[#allocation2 + $0x558] sm:$0xff] }
 0x36c   : > { %v3034_v57 = vadd.f32 %v2972_v37, %v2872_v24  ;;  %v553_v24 = vld [vmem:[#allocation2 + $0x508] sm:$0xff] }
 0x36d   : > { %v2591_v2 = vpop.f32.mrf.mxu0  ;;  %v3182_v15 = vpop.f32.mrf.mxu3  ;;  %v3496_v6 = vrot.slane %v553_v24, 4 }
 0x36e   : > { %v2651_v22 = vadd.f32 %v2591_v2, %v9816_v38  ;;  %v3244_v63 = vadd.f32 %v3182_v15, %v3034_v57  ;;  %v3497_v2 = vrot.slane %v8245_v55, 4 }
 0x36f   : > { %v2813_v7 = vpop.f32.mrf.mxu1 }
 0x370   : > { %3576 = vmatmul.f32.gmra.mxu0 %v3433_v35  ;;  %4040 = vmatmul.f32.gmra.mxu2 %v3896_v9  ;;  %3276 = vst [vmem:[%s9109_s17 + $0x228] sm:$0xff] %v3244_v63  ;;  %v3307_v14 = vadd.f32 %v3306_v16, %v3244_v63  ;;  %v3345_v29 = vmul.f32 %v3244_v63, %v3244_v63  ;;  %v3436_v16 = vrot.slane %v461_v34, 4  ;;  %v466_v63 = vld [vmem:[#allocation2 + $0x230] sm:$0xff]  ;;  %v469_v34 = vld [vmem:[#allocation2 + $0x248] sm:$0xff] }
 0x371   : > { %v2873_v46 = vadd.f32 %v2813_v7, %v2651_v22 }
 0x372   : > { %3738 = vmatmul.f32.gmra.mxu1 %v455_v13  ;;  %v3376_v52 = vadd.f32 %v3375_v41, %v3345_v29  ;;  %4298 = vmatmul.f32.gmra.mxu3 %v10072_v3  ;;  %v3438_v9 = vsel %vm3425_vm2, %v3436_v16, %v3437_v5  ;;  %v463_v13 = vld [vmem:[#allocation2 + $0x218] sm:$0xff] }
 0x373   : > { %v2975_v38 = vpop.f32.mrf.mxu2  ;;  %v3439_v19 = vrot.slane %v463_v13, 4 }
 0x374   : > { %v3035_v27 = vadd.f32 %v2975_v38, %v2873_v46  ;;  %v3902_v46 = vrot.slane %v466_v63, 4 }
 0x375   : > { %v2594_v39 = vpop.f32.mrf.mxu0  ;;  %v3185_v28 = vpop.f32.mrf.mxu3 }
 0x376   : > { %v2652_v20 = vadd.f32 %v2594_v39, %v9823_v10  ;;  %v3245_v26 = vadd.f32 %v3185_v28, %v3035_v27  ;;  %v3900_v10 = vrot.slane %v465_v58, 4  ;;  %v10104_v58 = vld [vmem:[#allocation2 + $0x260] sm:$0xff] }
 0x377   : > { %v2816_v61 = vpop.f32.mrf.mxu1  ;;  %v3904_v24 = vrot.slane %v10104_v58, 4 }
 0x378   : > { %3579 = vmatmul.f32.gmra.mxu0 %v3435_v31  ;;  %4043 = vmatmul.f32.gmra.mxu2 %v3898_v51  ;;  %3277 = vst [vmem:[%s9109_s17 + $0x248] sm:$0xff] %v3245_v26  ;;  %v3308_v47 = vadd.f32 %v3307_v14, %v3245_v26  ;;  %v3346_v21 = vmul.f32 %v3245_v26, %v3245_v26  ;;  %v473_v26 = vld [vmem:[#allocation2 + $0x268] sm:$0xff] }
 0x379   : > { %v2874_v41 = vadd.f32 %v2816_v61, %v2652_v20  ;;  %v3901_v22 = vsel %vm3425_vm2, %v3899_v30, %v3900_v10  ;;  %v10095_v14 = vsel %vm3425_vm2, %v3496_v6, %v3497_v2  ;;  %v3440_v31 = vsel %vm3425_vm2, %v3437_v5, %v3439_v19 }
 0x37a   : > { %3741 = vmatmul.f32.gmra.mxu1 %v10058_v59  ;;  %v3377_v37 = vadd.f32 %v3376_v52, %v3346_v21  ;;  %4301 = vmatmul.f32.gmra.mxu3 %v10084_v0  ;;  %v3903_v51 = vsel %vm3425_vm2, %v3900_v10, %v3902_v46  ;;  %v10107_v5 = vsel %vm3425_vm2, %v3497_v2, %v3499_v1  ;;  %v3442_v21 = vrot.slane %v10101_v54, 4  ;;  %v8247_v2 = vld [vmem:[#allocation2 + $0x550] sm:$0xff] }
 0x37b   : > { %v2978_v57 = vpop.f32.mrf.mxu2  ;;  %v3504_v1 = vrot.slane %v8248_v56, 4  ;;  %v10124_v54 = vld [vmem:[#allocation2 + $0x290] sm:$0xff]  ;;  %v8250_v56 = vld [vmem:[#allocation2 + $0x598] sm:$0xff] }
 0x37c   : > { %v3036_v53 = vadd.f32 %v2978_v57, %v2874_v41  ;;  %v561_v41 = vld [vmem:[#allocation2 + $0x548] sm:$0xff] }
 0x37d   : > { %v2597_v35 = vpop.f32.mrf.mxu0  ;;  %v3188_v45 = vpop.f32.mrf.mxu3  ;;  %v3501_v55 = vrot.slane %v561_v41, 4 }
 0x37e   : > { %v2653_v15 = vadd.f32 %v2597_v35, %v9830_v17  ;;  %v3246_v7 = vadd.f32 %v3188_v45, %v3036_v53  ;;  %v3502_v35 = vrot.slane %v8247_v2, 4 }
 0x37f   : > { %v2819_v59 = vpop.f32.mrf.mxu1 }
 0x380   : > { %3582 = vmatmul.f32.gmra.mxu0 %v3438_v9  ;;  %4046 = vmatmul.f32.gmra.mxu2 %v3901_v22  ;;  %3278 = vst [vmem:[%s9109_s17 + $0x268] sm:$0xff] %v3246_v7  ;;  %v3309_v29 = vadd.f32 %v3308_v47, %v3246_v7  ;;  %v3347_v8 = vmul.f32 %v3246_v7, %v3246_v7  ;;  %v3441_v47 = vrot.slane %v469_v34, 4  ;;  %v474_v7 = vld [vmem:[#allocation2 + $0x270] sm:$0xff]  ;;  %v477_v34 = vld [vmem:[#allocation2 + $0x288] sm:$0xff] }
 0x381   : > { %v2875_v52 = vadd.f32 %v2819_v59, %v2653_v15 }
 0x382   : > { %3744 = vmatmul.f32.gmra.mxu1 %v463_v13  ;;  %v3378_v38 = vadd.f32 %v3377_v37, %v3347_v8  ;;  %4304 = vmatmul.f32.gmra.mxu3 %v10095_v14  ;;  %v3443_v22 = vsel %vm3425_vm2, %v3441_v47, %v3442_v21  ;;  %v471_v13 = vld [vmem:[#allocation2 + $0x258] sm:$0xff] }
 0x383   : > { %v2981_v17 = vpop.f32.mrf.mxu2  ;;  %v3444_v46 = vrot.slane %v471_v13, 4 }
 0x384   : > { %v3037_v27 = vadd.f32 %v2981_v17, %v2875_v52  ;;  %v3907_v52 = vrot.slane %v474_v7, 4 }
 0x385   : > { %v2600_v39 = vpop.f32.mrf.mxu0  ;;  %v3191_v28 = vpop.f32.mrf.mxu3 }
 0x386   : > { %v2654_v20 = vadd.f32 %v2600_v39, %v9837_v43  ;;  %v3247_v61 = vadd.f32 %v3191_v28, %v3037_v27  ;;  %v3905_v43 = vrot.slane %v473_v26, 4  ;;  %v10127_v26 = vld [vmem:[#allocation2 + $0x2a0] sm:$0xff] }
 0x387   : > { %v2822_v16 = vpop.f32.mrf.mxu1  ;;  %v3909_v41 = vrot.slane %v10127_v26, 4 }
 0x388   : > { %3585 = vmatmul.f32.gmra.mxu0 %v3440_v31  ;;  %4049 = vmatmul.f32.gmra.mxu2 %v3903_v51  ;;  %3279 = vst [vmem:[%s9109_s17 + $0x288] sm:$0xff] %v3247_v61  ;;  %v3310_v30 = vadd.f32 %v3309_v29, %v3247_v61  ;;  %v3348_v10 = vmul.f32 %v3247_v61, %v3247_v61  ;;  %v481_v61 = vld [vmem:[#allocation2 + $0x2a8] sm:$0xff] }
 0x389   : > { %v2876_v37 = vadd.f32 %v2822_v16, %v2654_v20  ;;  %v3906_v15 = vsel %vm3425_vm2, %v3904_v24, %v3905_v43  ;;  %v10118_v29 = vsel %vm3425_vm2, %v3501_v55, %v3502_v35  ;;  %v3445_v31 = vsel %vm3425_vm2, %v3442_v21, %v3444_v46 }
 0x38a   : > { %3747 = vmatmul.f32.gmra.mxu1 %v10081_v11  ;;  %v3379_v57 = vadd.f32 %v3378_v38, %v3348_v10  ;;  %4307 = vmatmul.f32.gmra.mxu3 %v10107_v5  ;;  %v3908_v51 = vsel %vm3425_vm2, %v3905_v43, %v3907_v52  ;;  %v10130_v21 = vsel %vm3425_vm2, %v3502_v35, %v3504_v1  ;;  %v3447_v10 = vrot.slane %v10124_v54, 4  ;;  %v8249_v35 = vld [vmem:[#allocation2 + $0x590] sm:$0xff] }
 0x38b   : > { %v2984_v53 = vpop.f32.mrf.mxu2  ;;  %v4178_v1 = vrot.slane %v8250_v56, 4  ;;  %v10144_v54 = vld [vmem:[#allocation2 + $0x2d0] sm:$0xff] }
 0x38c   : > { %v3038_v6 = vadd.f32 %v2984_v53, %v2876_v37  ;;  %v569_v37 = vld [vmem:[#allocation2 + $0x588] sm:$0xff] }
 0x38d   : > { %v2603_v9 = vpop.f32.mrf.mxu0  ;;  %v3194_v63 = vpop.f32.mrf.mxu3  ;;  %v4175_v2 = vrot.slane %v569_v37, 4 }
 0x38e   : > { %v2655_v45 = vadd.f32 %v2603_v9, %v9844_v62  ;;  %v3248_v59 = vadd.f32 %v3194_v63, %v3038_v6  ;;  %v4176_v9 = vrot.slane %v8249_v35, 4 }
 0x38f   : > { %v2825_v11 = vpop.f32.mrf.mxu1 }
 0x390   : > { %3588 = vmatmul.f32.gmra.mxu0 %v3443_v22  ;;  %4052 = vmatmul.f32.gmra.mxu2 %v3906_v15  ;;  %3280 = vst [vmem:[%s9109_s17 + $0x2a8] sm:$0xff] %v3248_v59  ;;  %v3311_v8 = vadd.f32 %v3310_v30, %v3248_v59  ;;  %v3349_v19 = vmul.f32 %v3248_v59, %v3248_v59  ;;  %v3446_v30 = vrot.slane %v477_v34, 4  ;;  %v482_v59 = vld [vmem:[#allocation2 + $0x2b0] sm:$0xff]  ;;  %v485_v34 = vld [vmem:[#allocation2 + $0x2c8] sm:$0xff] }
 0x391   : > { %v2877_v38 = vadd.f32 %v2825_v11, %v2655_v45 }
 0x392   : > { %3750 = vmatmul.f32.gmra.mxu1 %v471_v13  ;;  %v3380_v17 = vadd.f32 %v3379_v57, %v3349_v19  ;;  %4310 = vmatmul.f32.gmra.mxu3 %v10118_v29  ;;  %v3448_v15 = vsel %vm3425_vm2, %v3446_v30, %v3447_v10  ;;  %v479_v13 = vld [vmem:[#allocation2 + $0x298] sm:$0xff] }
 0x393   : > { %v2987_v62 = vpop.f32.mrf.mxu2  ;;  %v3449_v52 = vrot.slane %v479_v13, 4 }
 0x394   : > { %v3039_v27 = vadd.f32 %v2987_v62, %v2877_v38  ;;  %v3912_v38 = vrot.slane %v482_v59, 4 }
 0x395   : > { %v2606_v39 = vpop.f32.mrf.mxu0  ;;  %v3197_v28 = vpop.f32.mrf.mxu3 }
 0x396   : > { %v2656_v20 = vadd.f32 %v2606_v39, %v9853_v4  ;;  %v3249_v16 = vadd.f32 %v3197_v28, %v3039_v27  ;;  %v3910_v4 = vrot.slane %v481_v61, 4  ;;  %v10147_v61 = vld [vmem:[#allocation2 + $0x2e0] sm:$0xff] }
 0x397   : > { %v2828_v47 = vpop.f32.mrf.mxu1  ;;  %v3914_v37 = vrot.slane %v10147_v61, 4 }
 0x398   : > { %3591 = vmatmul.f32.gmra.mxu0 %v3445_v31  ;;  %4055 = vmatmul.f32.gmra.mxu2 %v3908_v51  ;;  %3281 = vst [vmem:[%s9109_s17 + $0x2c8] sm:$0xff] %v3249_v16  ;;  %v3312_v24 = vadd.f32 %v3311_v8, %v3249_v16  ;;  %v3350_v43 = vmul.f32 %v3249_v16, %v3249_v16  ;;  %v489_v16 = vld [vmem:[#allocation2 + $0x2e8] sm:$0xff] }
 0x399   : > { %v2878_v57 = vadd.f32 %v2828_v47, %v2656_v20  ;;  %v3911_v45 = vsel %vm3425_vm2, %v3909_v41, %v3910_v4  ;;  %v4177_v8 = vsel %vm3425_vm2, %v4175_v2, %v4176_v9  ;;  %v3450_v31 = vsel %vm3425_vm2, %v3447_v10, %v3449_v52 }
 0x39a   : > { %3753 = vmatmul.f32.gmra.mxu1 %v10104_v58  ;;  %v3381_v53 = vadd.f32 %v3380_v17, %v3350_v43  ;;  %4313 = vmatmul.f32.gmra.mxu3 %v10130_v21  ;;  %v3913_v51 = vsel %vm3425_vm2, %v3910_v4, %v3912_v38  ;;  %v4179_v10 = vsel %vm3425_vm2, %v4176_v9, %v4178_v1  ;;  %v3452_v43 = vrot.slane %v10144_v54, 4  ;;  %v8251_v9 = vld [vmem:[#allocation2 + $0x5d0] sm:$0xff]  ;;  %v4796_v1 = vld [vmem:[#allocation9 + $0x2c0] sm:$0xff] }
 0x39b   : > { %v2990_v6 = vpop.f32.mrf.mxu2  ;;  %4811 = vmatpush.msra.mxu1 %v4796_v1 }
 0x39c   : > { %v3040_v55 = vadd.f32 %v2990_v6, %v2878_v57  ;;  %v3915_v57 = vrot.slane %v489_v16, 4 }
 0x39d   : > { %v2609_v22 = vpop.f32.mrf.mxu0  ;;  %v3200_v7 = vpop.f32.mrf.mxu3 }
 0x39e   : > { %v2657_v63 = vadd.f32 %v2609_v22, %v9863_v42  ;;  %v3250_v11 = vadd.f32 %v3200_v7, %v3040_v55  ;;  %v4959_v42 = vld [vmem:[#allocation9 + $0x348] sm:$0xff]  ;;  %v4181_v22 = vrot.slane %v8251_v9, 4 }
 0x39f   : > { %v2831_v58 = vpop.f32.mrf.mxu1  ;;  %4972 = vmatpush.msra.mxu2 %v4959_v42  ;;  %v4526_v42 = vld [vmem:[#allocation9 + $0x240] sm:$0xff] }
 0x3a0   : > { %3594 = vmatmul.f32.gmra.mxu0 %v3448_v15  ;;  %4058 = vmatmul.f32.gmra.mxu2 %v3911_v45  ;;  %3282 = vst [vmem:[%s9109_s17 + $0x2e8] sm:$0xff] %v3250_v11  ;;  %v3313_v19 = vadd.f32 %v3312_v24, %v3250_v11  ;;  %v3351_v46 = vmul.f32 %v3250_v11, %v3250_v11  ;;  %v3451_v24 = vrot.slane %v485_v34, 4  ;;  %v490_v11 = vld [vmem:[#allocation2 + $0x2f0] sm:$0xff] }
 0x3a1   : > { %v2879_v17 = vadd.f32 %v2831_v58, %v2657_v63  ;;  %v3916_v63 = vsel %vm3425_vm2, %v3914_v37, %v3915_v57  ;;  %v3917_v38 = vrot.slane %v490_v11, 4  ;;  %4541 = vmatpush.msra.mxu0 %v4526_v42  ;;  %v8255_v37 = vld [vmem:[#allocation2 + $0x328] sm:$0xff] }
 0x3a2   : > { %3756 = vmatmul.f32.gmra.mxu1 %v479_v13  ;;  %v3382_v62 = vadd.f32 %v3381_v53, %v3351_v46  ;;  %4316 = vmatmul.f32.gmra.mxu3 %v4177_v8  ;;  %v3453_v45 = vsel %vm3425_vm2, %v3451_v24, %v3452_v43 }
 0x3a3   : > { %v2993_v49 = vpop.f32.mrf.mxu2 }
 0x3a4   : > { %v3041_v27 = vadd.f32 %v2993_v49, %v2879_v17 }
 0x3a5   : > { %v2612_v39 = vpop.f32.mrf.mxu0  ;;  %v3203_v28 = vpop.f32.mrf.mxu3 }
 0x3a6   : > { %v2658_v20 = vadd.f32 %v2612_v39, %v9875_v36  ;;  %v3251_v47 = vadd.f32 %v3203_v28, %v3041_v27  ;;  %v577_v36 = vld [vmem:[#allocation2 + $0x5c8] sm:$0xff]  ;;  %v8252_v27 = vld [vmem:[#allocation2 + $0x5d8] sm:$0xff] }
 0x3a7   : > { %v2834_v30 = vpop.f32.mrf.mxu1  ;;  %v4180_v35 = vrot.slane %v577_v36, 4  ;;  %v4183_v56 = vrot.slane %v8252_v27, 4  ;;  %v585_v36 = vld [vmem:[#allocation2 + $0x608] sm:$0xff] }
 0x3a8   : > { %3597 = vmatmul.f32.gmra.mxu0 %v3450_v31  ;;  %4061 = vmatmul.f32.gmra.mxu2 %v3913_v51  ;;  %3283 = vst [vmem:[%s9109_s17 + $0x308] sm:$0xff] %v3251_v47  ;;  %v3314_v41 = vadd.f32 %v3313_v19, %v3251_v47  ;;  %v3352_v4 = vmul.f32 %v3251_v47, %v3251_v47  ;;  %v493_v51 = vld [vmem:[#allocation2 + $0x308] sm:$0xff] }
 0x3a9   : > { %v2880_v53 = vadd.f32 %v2834_v30, %v2658_v20  ;;  %v4182_v8 = vsel %vm3425_vm2, %v4180_v35, %v4181_v22  ;;  %v3918_v31 = vsel %vm3425_vm2, %v3915_v57, %v3917_v38  ;;  %v4184_v16 = vsel %vm3425_vm2, %v4181_v22, %v4183_v56  ;;  %v8253_v30 = vld [vmem:[#allocation2 + $0x310] sm:$0xff] }
 0x3aa   : > { %3759 = vmatmul.f32.gmra.mxu1 %v10127_v26  ;;  %v3383_v6 = vadd.f32 %v3382_v62, %v3352_v4  ;;  %4319 = vmatmul.f32.gmra.mxu3 %v4179_v10  ;;  %v487_v26 = vld [vmem:[#allocation2 + $0x2d8] sm:$0xff]  ;;  %v3456_v47 = vrot.slane %v493_v51, 4  ;;  %v3457_v10 = vrot.slane %v8253_v30, 4  ;;  %v3920_v57 = vrot.slane %v8255_v37, 4  ;;  %v8256_v35 = vld [vmem:[#allocation2 + $0x610] sm:$0xff] }
 0x3ab   : > { %v2996_v55 = vpop.f32.mrf.mxu2  ;;  %v3454_v52 = vrot.slane %v487_v26, 4  ;;  %v4186_v9 = vrot.slane %v8256_v35, 4  ;;  %v8259_v51 = vld [vmem:[#allocation2 + $0x350] sm:$0xff] }
 0x3ac   : > { %v3042_v2 = vadd.f32 %v2996_v55, %v2880_v53  ;;  %v506_v35 = vld [vmem:[#allocation2 + $0x370] sm:$0xff] }
 0x3ad   : > { %v2615_v15 = vpop.f32.mrf.mxu0  ;;  %v3206_v59 = vpop.f32.mrf.mxu3  ;;  %v3455_v39 = vsel %vm3425_vm2, %v3452_v43, %v3454_v52 }
 0x3ae   : > { %v2659_v7 = vadd.f32 %v2615_v15, %v9885_v12  ;;  %v3252_v58 = vadd.f32 %v3206_v59, %v3042_v2  ;;  %v4958_v12 = vld [vmem:[#allocation9 + $0x340] sm:$0xff]  ;;  %v4185_v2 = vrot.slane %v585_v36, 4  ;;  %v3458_v15 = vsel %vm3425_vm2, %v3456_v47, %v3457_v10  ;;  %v498_v59 = vld [vmem:[#allocation2 + $0x330] sm:$0xff]  ;;  %v8261_v47 = vld [vmem:[#allocation2 + $0x368] sm:$0xff] }
 0x3af   : > { %v2837_v13 = vpop.f32.mrf.mxu1  ;;  %4973 = vmatpush.msra.mxu2 %v4958_v12  ;;  %v3925_v30 = vrot.slane %v8261_v47, 4  ;;  %v8267_v47 = vld [vmem:[#allocation2 + $0x3a8] sm:$0xff] }
 0x3b0   : > { %3600 = vmatmul.f32.gmra.mxu0 %v3453_v45  ;;  %4064 = vmatmul.f32.gmra.mxu2 %v3916_v63  ;;  %3284 = vst [vmem:[%s9109_s17 + $0x328] sm:$0xff] %v3252_v58  ;;  %v3315_v19 = vadd.f32 %v3314_v41, %v3252_v58  ;;  %v3353_v46 = vmul.f32 %v3252_v58, %v3252_v58  ;;  %v8254_v41 = vld [vmem:[#allocation2 + $0x320] sm:$0xff] }
 0x3b1   : > { %v2881_v17 = vadd.f32 %v2837_v13, %v2659_v7  ;;  %v3919_v4 = vrot.slane %v8254_v41, 4 }
 0x3b2   : > { %3762 = vmatmul.f32.gmra.mxu1 %v487_v26  ;;  %v3384_v62 = vadd.f32 %v3383_v6, %v3353_v46  ;;  %4322 = vmatmul.f32.gmra.mxu3 %v4182_v8  ;;  %v8257_v8 = vld [vmem:[#allocation2 + $0x318] sm:$0xff]  ;;  %v3922_v46 = vrot.slane %v498_v59, 4 }
 0x3b3   : > { %v2999_v49 = vpop.f32.mrf.mxu2  ;;  %v3921_v45 = vsel %vm3425_vm2, %v3919_v4, %v3920_v57 }
 0x3b4   : > { %v3043_v48 = vadd.f32 %v2999_v49, %v2881_v17  ;;  %v3923_v33 = vsel %vm3425_vm2, %v3920_v57, %v3922_v46  ;;  %v8262_v57 = vld [vmem:[#allocation2 + $0x650] sm:$0xff] }
 0x3b5   : > { %v2618_v23 = vpop.f32.mrf.mxu0  ;;  %v3209_v54 = vpop.f32.mrf.mxu3  ;;  %v4191_v36 = vrot.slane %v8262_v57, 4  ;;  %v4524_v46 = vld [vmem:[#allocation9 + $0x230] sm:$0xff] }
 0x3b6   : > { %v2660_v34 = vadd.f32 %v2618_v23, %v9897_v18  ;;  %v3253_v20 = vadd.f32 %v3209_v54, %v3043_v48  ;;  %v501_v48 = vld [vmem:[#allocation2 + $0x348] sm:$0xff] }
 0x3b7   : > { %v2840_v28 = vpop.f32.mrf.mxu1 }
 0x3b8   : > { %3603 = vmatmul.f32.gmra.mxu0 %v3455_v39  ;;  %4067 = vmatmul.f32.gmra.mxu2 %v3918_v31  ;;  %3285 = vst [vmem:[%s9109_s17 + $0x348] sm:$0xff] %v3253_v20  ;;  %v3316_v24 = vadd.f32 %v3315_v19, %v3253_v20  ;;  %v3354_v43 = vmul.f32 %v3253_v20, %v3253_v20  ;;  %v3459_v19 = vrot.slane %v8257_v8, 4  ;;  %v3461_v31 = vrot.slane %v501_v48, 4 }
 0x3b9   : > { %v2882_v53 = vadd.f32 %v2840_v28, %v2660_v34  ;;  %v3462_v34 = vrot.slane %v8259_v51, 4  ;;  %v10175_v28 = vld [vmem:[#allocation2 + $0x360] sm:$0xff] }
 0x3ba   : > { %3765 = vmatmul.f32.gmra.mxu1 %v10147_v61  ;;  %v3385_v18 = vadd.f32 %v3384_v62, %v3354_v43  ;;  %4325 = vmatmul.f32.gmra.mxu3 %v4184_v16  ;;  %v4187_v61 = vsel %vm3425_vm2, %v4185_v2, %v4186_v9  ;;  %v8258_v62 = vld [vmem:[#allocation2 + $0x618] sm:$0xff]  ;;  %v3460_v42 = vsel %vm3425_vm2, %v3457_v10, %v3459_v19  ;;  %v3924_v16 = vrot.slane %v10175_v28, 4 }
 0x3bb   : > { %v3002_v6 = vpop.f32.mrf.mxu2  ;;  %v4188_v49 = vrot.slane %v8258_v62, 4  ;;  %v4794_v62 = vld [vmem:[#allocation9 + $0x2b0] sm:$0xff] }
 0x3bc   : > { %v3044_v55 = vadd.f32 %v3002_v6, %v2882_v53  ;;  %v3926_v6 = vsel %vm3425_vm2, %v3924_v16, %v3925_v30 }
 0x3bd   : > { %v2621_v22 = vpop.f32.mrf.mxu0  ;;  %v3212_v7 = vpop.f32.mrf.mxu3  ;;  %v4189_v39 = vsel %vm3425_vm2, %v4186_v9, %v4188_v49 }
 0x3be   : > { %v2661_v63 = vadd.f32 %v2621_v22, %v9907_v44  ;;  %v3254_v11 = vadd.f32 %v3212_v7, %v3044_v55  ;;  %v4795_v7 = vld [vmem:[#allocation9 + $0x2b8] sm:$0xff] }
 0x3bf   : > { %v2843_v58 = vpop.f32.mrf.mxu1  ;;  %4812 = vmatpush.msra.mxu1 %v4795_v7 }
 0x3c0   : > { %3606 = vmatmul.f32.gmra.mxu0 %v3458_v15  ;;  %4070 = vmatmul.f32.gmra.mxu2 %v3921_v45  ;;  %3286 = vst [vmem:[%s9109_s17 + $0x368] sm:$0xff] %v3254_v11  ;;  %v3317_v13 = vadd.f32 %v3316_v24, %v3254_v11  ;;  %v3355_v26 = vmul.f32 %v3254_v11, %v3254_v11  ;;  %v4525_v15 = vld [vmem:[#allocation9 + $0x238] sm:$0xff] }
 0x3c1   : > { %v2883_v52 = vadd.f32 %v2843_v58, %v2661_v63  ;;  %v5227_v45 = vld [vmem:[#allocation9 + $0x3b8] sm:$0xff]  ;;  %4542 = vmatpush.msra.mxu0 %v4525_v15  ;;  %4813 = vmatpush.msra.mxu1 %v4794_v62 }
 0x3c2   : > { %3768 = vmatmul.f32.gmra.mxu1 %v8257_v8  ;;  %v3386_v38 = vadd.f32 %v3385_v18, %v3355_v26  ;;  %4328 = vmatmul.f32.gmra.mxu3 %v4187_v61  ;;  %v3463_v18 = vsel %vm3425_vm2, %v3461_v31, %v3462_v34  ;;  %v8263_v58 = vld [vmem:[#allocation2 + $0x358] sm:$0xff]  ;;  %v8265_v31 = vld [vmem:[#allocation2 + $0x390] sm:$0xff] }
 0x3c3   : > { %v3005_v17 = vpop.f32.mrf.mxu2  ;;  %v3464_v61 = vrot.slane %v8263_v58, 4  ;;  %5244 = vmatpush.msra.mxu3 %v5227_v45  ;;  %4543 = vmatpush.msra.mxu0 %v4524_v46  ;;  %v3467_v51 = vrot.slane %v8265_v31, 4  ;;  %v4793_v46 = vld [vmem:[#allocation9 + $0x2a8] sm:$0xff] }
 0x3c4   : > { %v3045_v44 = vadd.f32 %v3005_v17, %v2883_v52  ;;  %v5226_v52 = vld [vmem:[#allocation9 + $0x3b0] sm:$0xff]  ;;  %v8264_v17 = vld [vmem:[#allocation2 + $0x658] sm:$0xff]  ;;  %4814 = vmatpush.msra.mxu1 %v4793_v46  ;;  %v8273_v31 = vld [vmem:[#allocation2 + $0x3e8] sm:$0xff] }
 0x3c5   : > { %v2624_v12 = vpop.f32.mrf.mxu0  ;;  %v3215_v56 = vpop.f32.mrf.mxu3  ;;  %5245 = vmatpush.msra.mxu3 %v5226_v52 }
 0x3c6   : > { %v2662_v27 = vadd.f32 %v2624_v12, %v9919_v25  ;;  %v3255_v1 = vadd.f32 %v3215_v56, %v3045_v44  ;;  %v593_v25 = vld [vmem:[#allocation2 + $0x648] sm:$0xff]  ;;  %v4193_v44 = vrot.slane %v8264_v17, 4  ;;  %v3465_v12 = vsel %vm3425_vm2, %v3462_v34, %v3464_v61 }
 0x3c7   : > { %v2846_v23 = vpop.f32.mrf.mxu1  ;;  %v4190_v37 = vrot.slane %v593_v25, 4 }
 0x3c8   : > { %3609 = vmatmul.f32.gmra.mxu0 %v3460_v42  ;;  %4073 = vmatmul.f32.gmra.mxu2 %v3923_v33  ;;  %3287 = vst [vmem:[%s9109_s17 + $0x388] sm:$0xff] %v3255_v1  ;;  %v3318_v54 = vadd.f32 %v3317_v13, %v3255_v1  ;;  %v3356_v20 = vmul.f32 %v3255_v1, %v3255_v1  ;;  %v3927_v13 = vrot.slane %v506_v35, 4  ;;  %v509_v33 = vld [vmem:[#allocation2 + $0x388] sm:$0xff]  ;;  %v514_v35 = vld [vmem:[#allocation2 + $0x3b0] sm:$0xff] }
 0x3c9   : > { %v2884_v10 = vadd.f32 %v2846_v23, %v2662_v27  ;;  %v4192_v63 = vsel %vm3425_vm2, %v4190_v37, %v4191_v36  ;;  %v4194_v23 = vsel %vm3425_vm2, %v4191_v36, %v4193_v44  ;;  %v8268_v37 = vld [vmem:[#allocation2 + $0x690] sm:$0xff]  ;;  %v11353_v44 = vld [vmem:[#allocation35_spill] sm:$0xff] }
 0x3ca   : > { %3771 = vmatmul.f32.gmra.mxu1 %v8254_v41  ;;  %v3387_v24 = vadd.f32 %v3386_v38, %v3356_v20  ;;  %4331 = vmatmul.f32.gmra.mxu3 %v4189_v39  ;;  %v4957_v41 = vld [vmem:[#allocation9 + $0x338] sm:$0xff]  ;;  %v3928_v42 = vsel %vm3425_vm2, %v3925_v30, %v3927_v13  ;;  %v3466_v39 = vrot.slane %v509_v33, 4  ;;  %v10188_v20 = vld [vmem:[#allocation2 + $0x3a0] sm:$0xff]  ;;  %v3930_v30 = vrot.slane %v8267_v47, 4  ;;  %v4523_v13 = vld [vmem:[#allocation9 + $0x228] sm:$0xff] }
 0x3cb   : > { %v3008_v43 = vpop.f32.mrf.mxu2  ;;  %4974 = vmatpush.msra.mxu2 %v4957_v41  ;;  %v3929_v16 = vrot.slane %v10188_v20, 4  ;;  %v4196_v57 = vrot.slane %v8268_v37, 4  ;;  %v4955_v41 = vld [vmem:[#allocation9 + $0x328] sm:$0xff]  ;;  %4544 = vmatpush.msra.mxu0 %v4523_v13 }
 0x3cc   : > { %v3046_v4 = vadd.f32 %v3008_v43, %v2884_v10 }
 0x3cd   : > { %v2627_v53 = vpop.f32.mrf.mxu0  ;;  %v3218_v2 = vpop.f32.mrf.mxu3 }
 0x3ce   : > { %v2663_v55 = vadd.f32 %v2627_v53, %v9929_v50  ;;  %v3256_v9 = vadd.f32 %v3218_v2, %v3046_v4  ;;  %v4956_v50 = vld [vmem:[#allocation9 + $0x330] sm:$0xff]  ;;  %v3468_v53 = vsel %vm3425_vm2, %v3466_v39, %v3467_v51 }
 0x3cf   : > { %v2849_v22 = vpop.f32.mrf.mxu1  ;;  %4975 = vmatpush.msra.mxu2 %v4956_v50  ;;  %v5225_v50 = vld [vmem:[#allocation9 + $0x3a8] sm:$0xff] }
 0x3d0   : > { %3612 = vmatmul.f32.gmra.mxu0 %v3463_v18  ;;  %4076 = vmatmul.f32.gmra.mxu2 %v3926_v6  ;;  %3288 = vst [vmem:[%s9109_s17 + $0x3a8] sm:$0xff] %v3256_v9  ;;  %v3319_v59 = vadd.f32 %v3318_v54, %v3256_v9  ;;  %v3357_v11 = vmul.f32 %v3256_v9, %v3256_v9 }
 0x3d1   : > { %v2885_v26 = vadd.f32 %v2849_v22, %v2663_v55  ;;  %v3931_v18 = vsel %vm3425_vm2, %v3929_v16, %v3930_v30  ;;  %v11350_v55 = vld [vmem:[#allocation33_spill] sm:$0xff]  ;;  %4976 = vmatpush.msra.mxu2 %v4955_v41  ;;  %5246 = vmatpush.msra.mxu3 %v5225_v50  ;;  %v5224_v41 = vld [vmem:[#allocation9 + $0x3a0] sm:$0xff] }
 0x3d2   : > { %3774 = vmatmul.f32.gmra.mxu1 %v8263_v58  ;;  %v3388_v8 = vadd.f32 %v3387_v24, %v3357_v11  ;;  %4334 = vmatmul.f32.gmra.mxu3 %v4192_v63  ;;  %v8269_v63 = vld [vmem:[#allocation2 + $0x398] sm:$0xff]  ;;  %v11355_v50 = vld [vmem:[#allocation39_spill] sm:$0xff] }
 0x3d3   : > { %v3011_v19 = vpop.f32.mrf.mxu2  ;;  %v3469_v7 = vrot.slane %v8269_v63, 4  ;;  %5247 = vmatpush.msra.mxu3 %v5224_v41 }
 0x3d4   : > { %v3047_v38 = vadd.f32 %v3011_v19, %v2885_v26 }
 0x3d5   : > { %v2630_v49 = vpop.f32.mrf.mxu0  ;;  %v3221_v27 = vpop.f32.mrf.mxu3 }
 0x3d6   : > { %v2664_v48 = vadd.f32 %v2630_v49, %v9941_v32  ;;  %v3257_v56 = vadd.f32 %v3221_v27, %v3047_v38  ;;  %v601_v32 = vld [vmem:[#allocation2 + $0x688] sm:$0xff]  ;;  %v3470_v38 = vsel %vm3425_vm2, %v3467_v51, %v3469_v7  ;;  %v3935_v51 = vrot.slane %v8273_v31, 4 }
 0x3d7   : > { %v2852_v1 = vpop.f32.mrf.mxu1  ;;  %v4195_v4 = vrot.slane %v601_v32, 4  ;;  %v8274_v32 = vld [vmem:[#allocation2 + $0x6d0] sm:$0xff] }
 0x3d8   : > { %3615 = vmatmul.f32.gmra.mxu0 %v3465_v12  ;;  %4079 = vmatmul.f32.gmra.mxu2 %v3928_v42  ;;  %3289 = vst [vmem:[%s9109_s17 + $0x3c8] sm:$0xff] %v3257_v56  ;;  %v3320_v54 = vadd.f32 %v3319_v59, %v3257_v56  ;;  %v3358_v34 = vmul.f32 %v3257_v56, %v3257_v56  ;;  %v3932_v59 = vrot.slane %v514_v35, 4  ;;  %v517_v12 = vld [vmem:[#allocation2 + $0x3c8] sm:$0xff]  ;;  %v8271_v56 = vld [vmem:[#allocation2 + $0x3d0] sm:$0xff] }
 0x3d9   : > { %v2886_v25 = vadd.f32 %v2852_v1, %v2664_v48  ;;  %v3471_v27 = vrot.slane %v517_v12, 4  ;;  %v3472_v1 = vrot.slane %v8271_v56, 4 }
 0x3da   : > { %3777 = vmatmul.f32.gmra.mxu1 %v10175_v28  ;;  %v3389_v10 = vadd.f32 %v3388_v8, %v3358_v34  ;;  %4337 = vmatmul.f32.gmra.mxu3 %v4194_v23  ;;  %v4197_v28 = vsel %vm3425_vm2, %v4195_v4, %v4196_v57  ;;  %v8270_v8 = vld [vmem:[#allocation2 + $0x698] sm:$0xff]  ;;  %v3933_v17 = vsel %vm3425_vm2, %v3930_v30, %v3932_v59  ;;  %v8272_v23 = vld [vmem:[#allocation2 + $0x3e0] sm:$0xff] }
 0x3db   : > { %v3014_v24 = vpop.f32.mrf.mxu2  ;;  %v4198_v19 = vrot.slane %v8270_v8, 4  ;;  %v3934_v39 = vrot.slane %v8272_v23, 4  ;;  %v11354_v4 = vld [vmem:[#allocation37_spill] sm:$0xff]  ;;  %v4792_v59 = vld [vmem:[#allocation9 + $0x2a0] sm:$0xff] }
 0x3dc   : > { %v3048_v43 = vadd.f32 %v3014_v24, %v2886_v25  ;;  %v4201_v25 = vrot.slane %v8274_v32, 4  ;;  %v3473_v24 = vsel %vm3425_vm2, %v3471_v27, %v3472_v1  ;;  %4815 = vmatpush.msra.mxu1 %v4792_v59  ;;  %v617_v27 = vld [vmem:[#allocation2 + $0x708] sm:$0xff] }
 0x3dd   : > { %v3571_v36 = vpop.f32.mrf.mxu0  ;;  %v3224_v6 = vpop.f32.mrf.mxu3  ;;  %v4199_v48 = vsel %vm3425_vm2, %v4196_v57, %v4198_v19  ;;  %v524_v19 = vld [vmem:[#allocation2 + $0x408] sm:$0xff]  ;;  %v4205_v31 = vrot.slane %v617_v27, 4 }
 0x3de   : > { %v3667_v2 = vadd.f32 %v3571_v36, %v11350_v55  ;;  %v3258_v9 = vadd.f32 %v3224_v6, %v3048_v43  ;;  %v3936_v43 = vsel %vm3425_vm2, %v3934_v39, %v3935_v51  ;;  %v522_v36 = vld [vmem:[#allocation2 + $0x3f0] sm:$0xff]  ;;  %v4954_v6 = vld [vmem:[#allocation9 + $0x320] sm:$0xff]  ;;  %v8275_v55 = vld [vmem:[#allocation2 + $0x3d8] sm:$0xff] }
 0x3df   : > { %v3733_v22 = vpop.f32.mrf.mxu1  ;;  %v3937_v35 = vrot.slane %v522_v36, 4  ;;  %4977 = vmatpush.msra.mxu2 %v4954_v6  ;;  %v4521_v6 = vld [vmem:[#allocation9 + $0x218] sm:$0xff] }
 0x3e0   : > { %3618 = vmatmul.f32.gmra.mxu0 %v3468_v53  ;;  %4082 = vmatmul.f32.gmra.mxu2 %v3931_v18  ;;  %3290 = vst [vmem:[%s9109_s17 + $0x3e8] sm:$0xff] %v3258_v9  ;;  %v10197_v15 = vadd.f32 %v3320_v54, %v3258_v9  ;;  %v3359_v45 = vmul.f32 %v3258_v9, %v3258_v9  ;;  %v609_v54 = vld [vmem:[#allocation2 + $0x6c8] sm:$0xff] }
 0x3e1   : > { %v3829_v11 = vadd.f32 %v3733_v22, %v3667_v2  ;;  %v4200_v30 = vrot.slane %v609_v54, 4  ;;  %v3474_v2 = vrot.slane %v8275_v55, 4  ;;  %v3938_v13 = vsel %vm3425_vm2, %v3935_v51, %v3937_v35  ;;  %v8280_v51 = vld [vmem:[#allocation2 + $0x710] sm:$0xff]  ;;  %v8282_v35 = vld [vmem:[#allocation2 + $0x718] sm:$0xff] }
 0x3e2   : > { %11351 = vst [vmem:[#allocation75_spill] sm:$0xff] %v10197_v15  ;;  %3780 = vmatmul.f32.gmra.mxu1 %v8269_v63  ;;  %v10199_v58 = vadd.f32 %v3389_v10, %v3359_v45  ;;  %4340 = vmatmul.f32.gmra.mxu3 %v4197_v28  ;;  %v4522_v28 = vld [vmem:[#allocation9 + $0x220] sm:$0xff]  ;;  %v8276_v63 = vld [vmem:[#allocation2 + $0x6d8] sm:$0xff]  ;;  %v4206_v54 = vrot.slane %v8280_v51, 4 }
 0x3e3   : > { %v4035_v61 = vpop.f32.mrf.mxu2  ;;  %v4203_v7 = vrot.slane %v8276_v63, 4  ;;  %4545 = vmatpush.msra.mxu0 %v4522_v28  ;;  %v11357_v63 = vld [vmem:[#allocation43_spill] sm:$0xff] }
 0x3e4   : > { %11352 = vst [vmem:[#allocation108_spill] sm:$0xff] %v10199_v58  ;;  %v4131_v26 = vadd.f32 %v4035_v61, %v3829_v11  ;;  %v3475_v61 = vsel %vm3425_vm2, %v3472_v1, %v3474_v2 }
 0x3e5   : > { %v3574_v52 = vpop.f32.mrf.mxu0  ;;  %v4293_v49 = vpop.f32.mrf.mxu3  ;;  %4546 = vmatpush.msra.mxu0 %v4521_v6 }
 0x3e6   : > { %v3668_v62 = vadd.f32 %v3574_v52, %v11353_v44  ;;  %v10204_v42 = vadd.f32 %v4293_v49, %v4131_v26  ;;  %v8277_v44 = vld [vmem:[#allocation2 + $0x410] sm:$0xff]  ;;  %v8278_v49 = vld [vmem:[#allocation2 + $0x420] sm:$0xff] }
 0x3e7   : > { %v3736_v33 = vpop.f32.mrf.mxu1  ;;  %v3939_v12 = vrot.slane %v8278_v49, 4 }
 0x3e8   : > { %3621 = vmatmul.f32.gmra.mxu0 %v3470_v38  ;;  %4085 = vmatmul.f32.gmra.mxu2 %v3933_v17  ;;  %v3830_v34 = vadd.f32 %v3736_v33, %v3668_v62  ;;  %v4204_v38 = vsel %vm3425_vm2, %v4201_v25, %v4203_v7  ;;  %v3476_v17 = vrot.slane %v524_v19, 4  ;;  %v3477_v62 = vrot.slane %v8277_v44, 4  ;;  %v8279_v33 = vld [vmem:[#allocation2 + $0x428] sm:$0xff] }
 0x3ea   : > { %3783 = vmatmul.f32.gmra.mxu1 %v10188_v20  ;;  %4343 = vmatmul.f32.gmra.mxu3 %v4199_v48  ;;  %v4202_v20 = vsel %vm3425_vm2, %v4200_v30, %v4201_v25  ;;  %v3940_v48 = vrot.slane %v8279_v33, 4  ;;  %v11356_v30 = vld [vmem:[#allocation41_spill] sm:$0xff] }
 0x3eb   : > { %v4038_v16 = vpop.f32.mrf.mxu2 }
 0x3ec   : > { %v4132_v47 = vadd.f32 %v4038_v16, %v3830_v34  ;;  %v3478_v16 = vsel %vm3425_vm2, %v3476_v17, %v3477_v62  ;;  %v8285_v17 = vld [vmem:[#allocation2 + $0x468] sm:$0xff] }
 0x3ed   : > { %v3577_v10 = vpop.f32.mrf.mxu0  ;;  %v4296_v57 = vpop.f32.mrf.mxu3  ;;  %v3945_v44 = vrot.slane %v8285_v17, 4 }
 0x3ee   : > { %v3669_v37 = vadd.f32 %v3577_v10, %v11354_v4  ;;  %v10211_v53 = vadd.f32 %v4296_v57, %v4132_v47  ;;  %v3941_v47 = vsel %vm3425_vm2, %v3939_v12, %v3940_v48  ;;  %v529_v10 = vld [vmem:[#allocation2 + $0x430] sm:$0xff]  ;;  %v4953_v4 = vld [vmem:[#allocation9 + $0x318] sm:$0xff] }
 0x3ef   : > { %v3739_v18 = vpop.f32.mrf.mxu1  ;;  %v3942_v36 = vrot.slane %v529_v10, 4  ;;  %4978 = vmatpush.msra.mxu2 %v4953_v4  ;;  %v8287_v10 = vld [vmem:[#allocation2 + $0x458] sm:$0xff] }
 0x3f0   : > { %3624 = vmatmul.f32.gmra.mxu0 %v3473_v24  ;;  %4088 = vmatmul.f32.gmra.mxu2 %v3936_v43  ;;  %v3831_v9 = vadd.f32 %v3739_v18, %v3669_v37  ;;  %v8281_v37 = vld [vmem:[#allocation2 + $0x418] sm:$0xff] }
 0x3f1   : > { %v3479_v57 = vrot.slane %v8281_v37, 4 }
 0x3f2   : > { %3786 = vmatmul.f32.gmra.mxu1 %v8275_v55  ;;  %4346 = vmatmul.f32.gmra.mxu3 %v4202_v20  ;;  %v5223_v55 = vld [vmem:[#allocation9 + $0x398] sm:$0xff] }
 0x3f3   : > { %v4041_v22 = vpop.f32.mrf.mxu2  ;;  %5248 = vmatpush.msra.mxu3 %v5223_v55  ;;  %v3480_v41 = vsel %vm3425_vm2, %v3477_v62, %v3479_v57  ;;  %v625_v62 = vld [vmem:[#allocation2 + $0x748] sm:$0xff]  ;;  %v4520_v57 = vld [vmem:[#allocation9 + $0x210] sm:$0xff] }
 0x3f4   : > { %v4133_v45 = vadd.f32 %v4041_v22, %v3831_v9  ;;  %v4208_v9 = vrot.slane %v8282_v35, 4  ;;  %v4791_v22 = vld [vmem:[#allocation9 + $0x298] sm:$0xff]  ;;  %v4210_v27 = vrot.slane %v625_v62, 4  ;;  %4547 = vmatpush.msra.mxu0 %v4520_v57  ;;  %v4790_v55 = vld [vmem:[#allocation9 + $0x290] sm:$0xff] }
 0x3f5   : > { %v3580_v11 = vpop.f32.mrf.mxu0  ;;  %v4299_v8 = vpop.f32.mrf.mxu3  ;;  %4816 = vmatpush.msra.mxu1 %v4791_v22  ;;  %v11359_v22 = vld [vmem:[#allocation47_spill] sm:$0xff] }
 0x3f6   : > { %v3670_v26 = vadd.f32 %v3580_v11, %v11355_v50  ;;  %v10217_v46 = vadd.f32 %v4299_v8, %v4133_v45  ;;  %v3943_v45 = vsel %vm3425_vm2, %v3940_v48, %v3942_v36  ;;  %v530_v11 = vld [vmem:[#allocation2 + $0x448] sm:$0xff]  ;;  %v4209_v50 = vsel %vm3425_vm2, %v4206_v54, %v4208_v9  ;;  %v8283_v8 = vld [vmem:[#allocation2 + $0x450] sm:$0xff] }
 0x3f7   : > { %v3742_v52 = vpop.f32.mrf.mxu1  ;;  %v3482_v19 = vrot.slane %v8283_v8, 4  ;;  %v5222_v36 = vld [vmem:[#allocation9 + $0x390] sm:$0xff]  ;;  %4817 = vmatpush.msra.mxu1 %v4790_v55  ;;  %v8294_v55 = vld [vmem:[#allocation2 + $0x4e0] sm:$0xff] }
 0x3f8   : > { %3627 = vmatmul.f32.gmra.mxu0 %v3475_v61  ;;  %4091 = vmatmul.f32.gmra.mxu2 %v3938_v13  ;;  %v3832_v56 = vadd.f32 %v3742_v52, %v3670_v26  ;;  %v3481_v26 = vrot.slane %v530_v11, 4  ;;  %v8284_v52 = vld [vmem:[#allocation2 + $0x460] sm:$0xff] }
 0x3f9   : > { %5249 = vmatpush.msra.mxu3 %v5222_v36 }
 0x3fa   : > { %3789 = vmatmul.f32.gmra.mxu1 %v8272_v23  ;;  %4349 = vmatmul.f32.gmra.mxu3 %v4204_v38  ;;  %v4207_v23 = vsel %vm3425_vm2, %v4205_v31, %v4206_v54  ;;  %v3944_v38 = vrot.slane %v8284_v52, 4  ;;  %v3483_v31 = vsel %vm3425_vm2, %v3481_v26, %v3482_v19  ;;  %v11358_v54 = vld [vmem:[#allocation45_spill] sm:$0xff]  ;;  %v633_v26 = vld [vmem:[#allocation2 + $0x788] sm:$0xff] }
 0x3fb   : > { %v4044_v1 = vpop.f32.mrf.mxu2  ;;  %v4215_v17 = vrot.slane %v633_v26, 4  ;;  %v11362_v26 = vld [vmem:[#allocation53_spill] sm:$0xff] }
 0x3fc   : > { %v4134_v39 = vadd.f32 %v4044_v1, %v3832_v56  ;;  %v8286_v56 = vld [vmem:[#allocation2 + $0x750] sm:$0xff]  ;;  %v3946_v51 = vsel %vm3425_vm2, %v3944_v38, %v3945_v44 }
 0x3fd   : > { %v3583_v34 = vpop.f32.mrf.mxu0  ;;  %v4302_v25 = vpop.f32.mrf.mxu3  ;;  %v4211_v1 = vrot.slane %v8286_v56, 4 }
 0x3fe   : > { %v3671_v32 = vadd.f32 %v3583_v34, %v11356_v30  ;;  %v10223_v24 = vadd.f32 %v4302_v25, %v4134_v39  ;;  %v4952_v25 = vld [vmem:[#allocation9 + $0x310] sm:$0xff] }
 0x3ff   : > { %v3745_v43 = vpop.f32.mrf.mxu1  ;;  %4979 = vmatpush.msra.mxu2 %v4952_v25 }
 0x400   : > { %3630 = vmatmul.f32.gmra.mxu0 %v3478_v16  ;;  %4094 = vmatmul.f32.gmra.mxu2 %v3941_v47  ;;  %v3833_v18 = vadd.f32 %v3745_v43, %v3671_v32  ;;  %v535_v47 = vld [vmem:[#allocation2 + $0x470] sm:$0xff]  ;;  %v3484_v43 = vrot.slane %v8287_v10, 4 }
 0x402   : > { %3792 = vmatmul.f32.gmra.mxu1 %v8281_v37  ;;  %4352 = vmatmul.f32.gmra.mxu3 %v4207_v23  ;;  %v3947_v23 = vrot.slane %v535_v47, 4  ;;  %v3485_v35 = vsel %vm3425_vm2, %v3482_v19, %v3484_v43  ;;  %v4789_v43 = vld [vmem:[#allocation9 + $0x288] sm:$0xff] }
 0x403   : > { %v4047_v20 = vpop.f32.mrf.mxu2  ;;  %4818 = vmatpush.msra.mxu1 %v4789_v43 }
 0x404   : > { %v4135_v2 = vadd.f32 %v4047_v20, %v3833_v18  ;;  %v8288_v20 = vld [vmem:[#allocation2 + $0x758] sm:$0xff]  ;;  %v3948_v9 = vsel %vm3425_vm2, %v3945_v44, %v3947_v23  ;;  %v8291_v44 = vld [vmem:[#allocation2 + $0x790] sm:$0xff] }
 0x405   : > { %v3586_v28 = vpop.f32.mrf.mxu0  ;;  %v4305_v59 = vpop.f32.mrf.mxu3  ;;  %v4213_v6 = vrot.slane %v8288_v20, 4  ;;  %v4216_v62 = vrot.slane %v8291_v44, 4 }
 0x406   : > { %v3672_v7 = vadd.f32 %v3586_v28, %v11357_v63  ;;  %v10229_v61 = vadd.f32 %v4305_v59, %v4135_v2  ;;  %v8289_v59 = vld [vmem:[#allocation2 + $0x4a0] sm:$0xff] }
 0x407   : > { %v3748_v13 = vpop.f32.mrf.mxu1  ;;  %v3949_v11 = vrot.slane %v8289_v59, 4 }
 0x408   : > { %3633 = vmatmul.f32.gmra.mxu0 %v3480_v41  ;;  %4097 = vmatmul.f32.gmra.mxu2 %v3943_v45  ;;  %v3834_v12 = vadd.f32 %v3748_v13, %v3672_v7  ;;  %v4214_v7 = vsel %vm3425_vm2, %v4211_v1, %v4213_v6  ;;  %v8290_v13 = vld [vmem:[#allocation2 + $0x4a8] sm:$0xff] }
 0x40a   : > { %3795 = vmatmul.f32.gmra.mxu1 %v8278_v49  ;;  %4355 = vmatmul.f32.gmra.mxu3 %v4209_v50  ;;  %v4212_v49 = vsel %vm3425_vm2, %v4210_v27, %v4211_v1  ;;  %v3950_v50 = vrot.slane %v8290_v13, 4  ;;  %v542_v1 = vld [vmem:[#allocation2 + $0x4b0] sm:$0xff] }
 0x40b   : > { %v4050_v33 = vpop.f32.mrf.mxu2 }
 0x40c   : > { %v4136_v48 = vadd.f32 %v4050_v33, %v3834_v12  ;;  %v10245_v33 = vsel %vm3425_vm2, %v3949_v11, %v3950_v50  ;;  %v8296_v11 = vld [vmem:[#allocation2 + $0x7d0] sm:$0xff] }
 0x40d   : > { %v3589_v39 = vpop.f32.mrf.mxu0  ;;  %v4308_v16 = vpop.f32.mrf.mxu3  ;;  %v4221_v13 = vrot.slane %v8296_v11, 4  ;;  %v11364_v11 = vld [vmem:[#allocation57_spill] sm:$0xff] }
 0x40e   : > { %v3673_v34 = vadd.f32 %v3589_v39, %v11358_v54  ;;  %v10235_v30 = vadd.f32 %v4308_v16, %v4136_v48  ;;  %v11360_v48 = vld [vmem:[#allocation49_spill] sm:$0xff]  ;;  %v3952_v54 = vrot.slane %v542_v1, 4  ;;  %v4518_v1 = vld [vmem:[#allocation9 + $0x200] sm:$0xff] }
 0x40f   : > { %v3751_v32 = vpop.f32.mrf.mxu1  ;;  %v8292_v16 = vld [vmem:[#allocation2 + $0x498] sm:$0xff] }
 0x410   : > { %3636 = vmatmul.f32.gmra.mxu0 %v3483_v31  ;;  %4100 = vmatmul.f32.gmra.mxu2 %v3946_v51  ;;  %v3835_v4 = vadd.f32 %v3751_v32, %v3673_v34  ;;  %v4951_v51 = vld [vmem:[#allocation9 + $0x308] sm:$0xff] }
 0x411   : > { %4980 = vmatpush.msra.mxu2 %v4951_v51  ;;  %v4519_v32 = vld [vmem:[#allocation9 + $0x208] sm:$0xff] }
 0x412   : > { %3798 = vmatmul.f32.gmra.mxu1 %v8287_v10  ;;  %4358 = vmatmul.f32.gmra.mxu3 %v4212_v49  ;;  %v5221_v49 = vld [vmem:[#allocation9 + $0x388] sm:$0xff]  ;;  %v10256_v10 = vld [vmem:[#allocation2 + $0x798] sm:$0xff] }
 0x413   : > { %v4053_v37 = vpop.f32.mrf.mxu2  ;;  %4548 = vmatpush.msra.mxu0 %v4519_v32  ;;  %5250 = vmatpush.msra.mxu3 %v5221_v49  ;;  %v11363_v32 = vld [vmem:[#allocation55_spill] sm:$0xff] }
 0x414   : > { %v4137_v18 = vadd.f32 %v4053_v37, %v3835_v4  ;;  %v10260_v4 = vsel %vm3425_vm2, %v3950_v50, %v3952_v54  ;;  %v11361_v37 = vld [vmem:[#allocation51_spill] sm:$0xff]  ;;  %v10283_v54 = vld [vmem:[#allocation2 + $0x7d8] sm:$0xff] }
 0x415   : > { %v3592_v2 = vpop.f32.mrf.mxu0  ;;  %v4311_v41 = vpop.f32.mrf.mxu3  ;;  %4549 = vmatpush.msra.mxu0 %v4518_v1 }
 0x416   : > { %v3674_v28 = vadd.f32 %v3592_v2, %v11359_v22  ;;  %v10241_v45 = vadd.f32 %v4311_v41, %v4137_v18  ;;  %v3954_v2 = vrot.slane %v8294_v55, 4  ;;  %v641_v22 = vld [vmem:[#allocation2 + $0x7c8] sm:$0xff] }
 0x417   : > { %v3754_v63 = vpop.f32.mrf.mxu1 }
 0x418   : > { %3639 = vmatmul.f32.gmra.mxu0 %v3485_v35  ;;  %4103 = vmatmul.f32.gmra.mxu2 %v3948_v9  ;;  %v3836_v8 = vadd.f32 %v3754_v63, %v3674_v28  ;;  %v8295_v35 = vld [vmem:[#allocation2 + $0x4e8] sm:$0xff] }
 0x419   : > { %v3955_v9 = vrot.slane %v8295_v35, 4 }
 0x41a   : > { %3801 = vmatmul.f32.gmra.mxu1 %v8284_v52  ;;  %4361 = vmatmul.f32.gmra.mxu3 %v4214_v7  ;;  %v10253_v52 = vsel %vm3425_vm2, %v4215_v17, %v4216_v62  ;;  %v4220_v7 = vrot.slane %v641_v22, 4 }
 0x41b   : > { %v4056_v19 = vpop.f32.mrf.mxu2  ;;  %v10272_v50 = vsel %vm3425_vm2, %v3954_v2, %v3955_v9  ;;  %v649_v2 = vld [vmem:[#allocation2 + $0x808] sm:$0xff] }
 0x41c   : > { %v4138_v38 = vadd.f32 %v4056_v19, %v3836_v8 }
 0x41d   : > { %v3595_v12 = vpop.f32.mrf.mxu0  ;;  %v4314_v56 = vpop.f32.mrf.mxu3 }
 0x41e   : > { %v3675_v27 = vadd.f32 %v3595_v12, %v11360_v48  ;;  %v10248_v39 = vadd.f32 %v4314_v56, %v4138_v38  ;;  %v550_v38 = vld [vmem:[#allocation2 + $0x4f0] sm:$0xff] }
 0x41f   : > { %v3757_v31 = vpop.f32.mrf.mxu1  ;;  %v3957_v12 = vrot.slane %v550_v38, 4  ;;  %v6138_v38 = vld [vmem:[#allocation10 + $0x178] sm:$0xff] }
 0x420   : > { %3642 = vmatmul.f32.gmra.mxu0 %v10049_v60  ;;  %4106 = vmatmul.f32.gmra.mxu2 %v10245_v33  ;;  %v3837_v34 = vadd.f32 %v3757_v31, %v3675_v27  ;;  %v4218_v60 = vrot.slane %v10256_v10, 4  ;;  %v8297_v27 = vld [vmem:[#allocation2 + $0x4d8] sm:$0xff]  ;;  %v5220_v31 = vld [vmem:[#allocation9 + $0x380] sm:$0xff] }
 0x421   : > { %5251 = vmatpush.msra.mxu3 %v5220_v31  ;;  %v10310_v31 = vld [vmem:[#allocation2 + $0x818] sm:$0xff] }
 0x422   : > { %3804 = vmatmul.f32.gmra.mxu1 %v8292_v16  ;;  %4364 = vmatmul.f32.gmra.mxu3 %v10253_v52  ;;  %v10268_v6 = vsel %vm3425_vm2, %v4216_v62, %v4218_v60  ;;  %v4950_v62 = vld [vmem:[#allocation9 + $0x300] sm:$0xff] }
 0x423   : > { %v4059_v47 = vpop.f32.mrf.mxu2  ;;  %4981 = vmatpush.msra.mxu2 %v4950_v62 }
 0x424   : > { %v4139_v25 = vadd.f32 %v4059_v47, %v3837_v34  ;;  %v4788_v34 = vld [vmem:[#allocation9 + $0x280] sm:$0xff]  ;;  %v10287_v47 = vsel %vm3425_vm2, %v3955_v9, %v3957_v12  ;;  %v8302_v12 = vld [vmem:[#allocation2 + $0x518] sm:$0xff] }
 0x425   : > { %v3598_v23 = vpop.f32.mrf.mxu0  ;;  %v4317_v36 = vpop.f32.mrf.mxu3  ;;  %4819 = vmatpush.msra.mxu1 %v4788_v34  ;;  %6139 = vmatpush.msrb.mxu2 %v6138_v38  ;;  %v566_v38 = vld [vmem:[#allocation2 + $0x570] sm:$0xff] }
 0x426   : > { %v3676_v57 = vadd.f32 %v3598_v23, %v11361_v37  ;;  %v10263_v18 = vadd.f32 %v4317_v36, %v4139_v25  ;;  %v8299_v37 = vld [vmem:[#allocation2 + $0x520] sm:$0xff]  ;;  %v8300_v36 = vld [vmem:[#allocation2 + $0x528] sm:$0xff] }
 0x427   : > { %v3760_v20 = vpop.f32.mrf.mxu1 }
 0x428   : > { %3645 = vmatmul.f32.gmra.mxu0 %v10061_v40  ;;  %4109 = vmatmul.f32.gmra.mxu2 %v10260_v4  ;;  %v3838_v28 = vadd.f32 %v3760_v20, %v3676_v57  ;;  %v3959_v57 = vrot.slane %v8299_v37, 4  ;;  %v3960_v20 = vrot.slane %v8300_v36, 4  ;;  %v8304_v36 = vld [vmem:[#allocation2 + $0x560] sm:$0xff] }
 0x42a   : > { %3807 = vmatmul.f32.gmra.mxu1 %v8289_v59  ;;  %4367 = vmatmul.f32.gmra.mxu3 %v10268_v6  ;;  %v10280_v59 = vsel %vm3425_vm2, %v4220_v7, %v4221_v13  ;;  %v10299_v7 = vsel %vm3425_vm2, %v3959_v57, %v3960_v20 }
 0x42b   : > { %v4062_v41 = vpop.f32.mrf.mxu2 }
 0x42c   : > { %v4140_v63 = vadd.f32 %v4062_v41, %v3838_v28  ;;  %v4225_v28 = vrot.slane %v649_v2, 4  ;;  %v8301_v41 = vld [vmem:[#allocation2 + $0x810] sm:$0xff]  ;;  %v3964_v2 = vrot.slane %v8304_v36, 4 }
 0x42d   : > { %v3601_v40 = vpop.f32.mrf.mxu0  ;;  %v4320_v19 = vpop.f32.mrf.mxu3 }
 0x42e   : > { %v3677_v8 = vadd.f32 %v3601_v40, %v11362_v26  ;;  %v10275_v17 = vadd.f32 %v4320_v19, %v4140_v63  ;;  %v4226_v63 = vrot.slane %v8301_v41, 4  ;;  %v558_v26 = vld [vmem:[#allocation2 + $0x530] sm:$0xff] }
 0x42f   : > { %v3763_v44 = vpop.f32.mrf.mxu1 }
 0x430   : > { %3648 = vmatmul.f32.gmra.mxu0 %v10072_v3  ;;  %4112 = vmatmul.f32.gmra.mxu2 %v10272_v50  ;;  %v3839_v48 = vadd.f32 %v3763_v44, %v3677_v8  ;;  %v4223_v3 = vrot.slane %v10283_v54, 4  ;;  %v3962_v44 = vrot.slane %v558_v26, 4 }
 0x432   : > { %3810 = vmatmul.f32.gmra.mxu1 %v8297_v27  ;;  %4370 = vmatmul.f32.gmra.mxu3 %v10280_v59  ;;  %v10295_v23 = vsel %vm3425_vm2, %v4221_v13, %v4223_v3  ;;  %v5674_v27 = vld [vmem:[#allocation10 + $0x78] sm:$0xff]  ;;  %v10314_v34 = vsel %vm3425_vm2, %v3960_v20, %v3962_v44  ;;  %v657_v20 = vld [vmem:[#allocation2 + $0x848] sm:$0xff] }
 0x433   : > { %v4065_v56 = vpop.f32.mrf.mxu2  ;;  %5675 = vmatpush.msrb.mxu0 %v5674_v27 }
 0x434   : > { %v4141_v51 = vadd.f32 %v4065_v56, %v3839_v48  ;;  %v6428_v56 = vld [vmem:[#allocation10 + $0x1f8] sm:$0xff] }
 0x435   : > { %v3604_v16 = vpop.f32.mrf.mxu0  ;;  %v4323_v25 = vpop.f32.mrf.mxu3  ;;  %6429 = vmatpush.msrb.mxu3 %v6428_v56  ;;  %v8307_v56 = vld [vmem:[#allocation2 + $0x558] sm:$0xff] }
 0x436   : > { %v3678_v49 = vadd.f32 %v3604_v16, %v11363_v32  ;;  %v10290_v60 = vadd.f32 %v4323_v25, %v4141_v51  ;;  %v5836_v51 = vld [vmem:[#allocation10 + $0xf8] sm:$0xff]  ;;  %v11365_v16 = vld [vmem:[#allocation59_spill] sm:$0xff] }
 0x437   : > { %v3766_v43 = vpop.f32.mrf.mxu1  ;;  %5837 = vmatpush.msrb.mxu1 %v5836_v51  ;;  %v6427_v51 = vld [vmem:[#allocation10 + $0x1f0] sm:$0xff] }
 0x438   : > { %3651 = vmatmul.f32.gmra.mxu0 %v10084_v0  ;;  %4115 = vmatmul.f32.gmra.mxu2 %v10287_v47  ;;  %v3840_v35 = vadd.f32 %v3766_v43, %v3678_v49 }
 0x439   : > { %6430 = vmatpush.msrb.mxu3 %v6427_v51  ;;  %v5672_v51 = vld [vmem:[#allocation10 + $0x68] sm:$0xff] }
 0x43a   : > { %3813 = vmatmul.f32.gmra.mxu1 %v8294_v55  ;;  %4373 = vmatmul.f32.gmra.mxu3 %v10295_v23  ;;  %v10307_v55 = vsel %vm3425_vm2, %v4225_v28, %v4226_v63 }
 0x43b   : > { %v4068_v9 = vpop.f32.mrf.mxu2 }
 0x43c   : > { %v4142_v22 = vadd.f32 %v4068_v9, %v3840_v35  ;;  %v8305_v35 = vld [vmem:[#allocation2 + $0x568] sm:$0xff] }
 0x43d   : > { %v3607_v0 = vpop.f32.mrf.mxu0  ;;  %v4326_v40 = vpop.f32.mrf.mxu3  ;;  %v3965_v9 = vrot.slane %v8305_v35, 4 }
 0x43e   : > { %v3679_v13 = vadd.f32 %v3607_v0, %v11364_v11  ;;  %v10302_v8 = vadd.f32 %v4326_v40, %v4142_v22  ;;  %v4230_v0 = vrot.slane %v657_v20, 4  ;;  %v8306_v11 = vld [vmem:[#allocation2 + $0x850] sm:$0xff] }
 0x43f   : > { %v3769_v19 = vpop.f32.mrf.mxu1  ;;  %v10326_v40 = vsel %vm3425_vm2, %v3964_v2, %v3965_v9  ;;  %v11367_v2 = vld [vmem:[#allocation63_spill] sm:$0xff] }
 0x440   : > { %3654 = vmatmul.f32.gmra.mxu0 %v10095_v14  ;;  %4118 = vmatmul.f32.gmra.mxu2 %v10299_v7  ;;  %v3841_v62 = vadd.f32 %v3769_v19, %v3679_v13  ;;  %v4228_v14 = vrot.slane %v10310_v31, 4  ;;  %v4231_v13 = vrot.slane %v8306_v11, 4 }
 0x442   : > { %3816 = vmatmul.f32.gmra.mxu1 %v8302_v12  ;;  %4376 = vmatmul.f32.gmra.mxu3 %v10307_v55  ;;  %v10322_v57 = vsel %vm3425_vm2, %v4226_v63, %v4228_v14  ;;  %v11366_v63 = vld [vmem:[#allocation61_spill] sm:$0xff] }
 0x443   : > { %v4071_v48 = vpop.f32.mrf.mxu2  ;;  %v6137_v12 = vld [vmem:[#allocation10 + $0x170] sm:$0xff] }
 0x444   : > { %v4143_v1 = vadd.f32 %v4071_v48, %v3841_v62  ;;  %v3967_v48 = vrot.slane %v566_v38, 4  ;;  %6140 = vmatpush.msrb.mxu2 %v6137_v12  ;;  %v5673_v14 = vld [vmem:[#allocation10 + $0x70] sm:$0xff] }
 0x445   : > { %v3610_v3 = vpop.f32.mrf.mxu0  ;;  %v4329_v49 = vpop.f32.mrf.mxu3  ;;  %5676 = vmatpush.msrb.mxu0 %v5673_v14 }
 0x446   : > { %v3680_v32 = vadd.f32 %v3610_v3, %v11365_v16  ;;  %v10317_v25 = vadd.f32 %v4329_v49, %v4143_v1  ;;  %v10337_v16 = vld [vmem:[#allocation2 + $0x858] sm:$0xff] }
 0x447   : > { %v3772_v43 = vpop.f32.mrf.mxu1  ;;  %5677 = vmatpush.msrb.mxu0 %v5672_v51  ;;  %v5671_v51 = vld [vmem:[#allocation10 + $0x60] sm:$0xff] }
 0x448   : > { %3657 = vmatmul.f32.gmra.mxu0 %v10107_v5  ;;  %4121 = vmatmul.f32.gmra.mxu2 %v10314_v34  ;;  %v3842_v22 = vadd.f32 %v3772_v43, %v3680_v32  ;;  %v5835_v32 = vld [vmem:[#allocation10 + $0xf0] sm:$0xff]  ;;  %v10341_v43 = vsel %vm3425_vm2, %v3965_v9, %v3967_v48 }
 0x449   : > { %5838 = vmatpush.msrb.mxu1 %v5835_v32  ;;  %5678 = vmatpush.msrb.mxu0 %v5671_v51  ;;  %v6424_v51 = vld [vmem:[#allocation10 + $0x1d8] sm:$0xff] }
 0x44a   : > { %3819 = vmatmul.f32.gmra.mxu1 %v8299_v37  ;;  %4379 = vmatmul.f32.gmra.mxu3 %v10322_v57  ;;  %v10334_v37 = vsel %vm3425_vm2, %v4230_v0, %v4231_v13 }
 0x44b   : > { %v4074_v28 = vpop.f32.mrf.mxu2 }
 0x44c   : > { %v4144_v41 = vadd.f32 %v4074_v28, %v3842_v22 }
 0x44d   : > { %v3613_v5 = vpop.f32.mrf.mxu0  ;;  %v4332_v19 = vpop.f32.mrf.mxu3 }
 0x44e   : > { %v3681_v26 = vadd.f32 %v3613_v5, %v11366_v63  ;;  %v10329_v44 = vadd.f32 %v4332_v19, %v4144_v41  ;;  %v8309_v5 = vld [vmem:[#allocation2 + $0x7a0] sm:$0xff] }
 0x44f   : > { %v3775_v62 = vpop.f32.mrf.mxu1  ;;  %v4473_v63 = vrot.slane %v8309_v5, 4 }
 0x450   : > { %3660 = vmatmul.f32.gmra.mxu0 %v10118_v29  ;;  %4124 = vmatmul.f32.gmra.mxu2 %v10326_v40  ;;  %v3843_v27 = vadd.f32 %v3775_v62, %v3681_v26  ;;  %v4233_v29 = vrot.slane %v10337_v16, 4  ;;  %v8310_v26 = vld [vmem:[#allocation2 + $0x7a8] sm:$0xff]  ;;  %v11368_v62 = vld [vmem:[#allocation65_spill] sm:$0xff] }
 0x451   : > { %v4474_v19 = vrot.slane %v8310_v26, 4 }
 0x452   : > { %3822 = vmatmul.f32.gmra.mxu1 %v8307_v56  ;;  %4382 = vmatmul.f32.gmra.mxu3 %v10334_v37  ;;  %v10349_v41 = vsel %vm3425_vm2, %v4231_v13, %v4233_v29  ;;  %v6136_v13 = vld [vmem:[#allocation10 + $0x168] sm:$0xff]  ;;  %v638_v56 = vld [vmem:[#allocation2 + $0x7b0] sm:$0xff] }
 0x453   : > { %v4077_v1 = vpop.f32.mrf.mxu2  ;;  %6141 = vmatpush.msrb.mxu2 %v6136_v13  ;;  %v4476_v32 = vrot.slane %v638_v56, 4  ;;  %v646_v56 = vld [vmem:[#allocation2 + $0x7f0] sm:$0xff] }
 0x454   : > { %v4145_v3 = vadd.f32 %v4077_v1, %v3843_v27 }
 0x455   : > { %v3616_v49 = vpop.f32.mrf.mxu0  ;;  %v4335_v20 = vpop.f32.mrf.mxu3 }
 0x456   : > { %v3682_v35 = vadd.f32 %v3616_v49, %v11367_v2  ;;  %v10344_v22 = vadd.f32 %v4335_v20, %v4145_v3  ;;  %v6426_v3 = vld [vmem:[#allocation10 + $0x1e8] sm:$0xff] }
 0x457   : > { %v3778_v28 = vpop.f32.mrf.mxu1  ;;  %6431 = vmatpush.msrb.mxu3 %v6426_v3  ;;  %v11369_v49 = vld [vmem:[#allocation67_spill] sm:$0xff] }
 0x458   : > { %3663 = vmatmul.f32.gmra.mxu0 %v10130_v21  ;;  %4127 = vmatmul.f32.gmra.mxu2 %v10341_v43  ;;  %v3844_v0 = vadd.f32 %v3778_v28, %v3682_v35  ;;  %v6425_v3 = vld [vmem:[#allocation10 + $0x1e0] sm:$0xff] }
 0x459   : > { %6432 = vmatpush.msrb.mxu3 %v6425_v3 }
 0x45a   : > { %3825 = vmatmul.f32.gmra.mxu1 %v8304_v36  ;;  %4385 = vmatmul.f32.gmra.mxu3 %v10349_v41  ;;  %v10358_v36 = vsel %vm3425_vm2, %v4473_v63, %v4474_v19  ;;  %v8311_v63 = vld [vmem:[#allocation2 + $0x7e0] sm:$0xff] }
 0x45b   : > { %v4080_v9 = vpop.f32.mrf.mxu2  ;;  %v4478_v26 = vrot.slane %v8311_v63, 4  ;;  %6433 = vmatpush.msrb.mxu3 %v6424_v51 }
 0x45c   : > { %v4146_v11 = vadd.f32 %v4080_v9, %v3844_v0 }
 0x45d   : > { %v3619_v38 = vpop.f32.mrf.mxu0  ;;  %v4338_v48 = vpop.f32.mrf.mxu3 }
 0x45e   : > { %v3683_v12 = vadd.f32 %v3619_v38, %v11368_v62  ;;  %v10353_v21 = vadd.f32 %v4338_v48, %v4146_v11  ;;  %v8312_v38 = vld [vmem:[#allocation2 + $0x7e8] sm:$0xff]  ;;  %v11370_v48 = vld [vmem:[#allocation69_spill] sm:$0xff] }
 0x45f   : > { %v3781_v27 = vpop.f32.mrf.mxu1  ;;  %v4479_v62 = vrot.slane %v8312_v38, 4  ;;  %v8314_v38 = vld [vmem:[#allocation2 + $0x828] sm:$0xff] }
 0x460   : > { %4550 = vmatmul.f32.vlgmr.msra.gmra.mxu0 %v10245_v33  ;;  %4982 = vmatmul.f32.vlgmr.msra.gmra.mxu2 %v10256_v10  ;;  %v3845_v1 = vadd.f32 %v3781_v27, %v3683_v12  ;;  %v5834_v33 = vld [vmem:[#allocation10 + $0xe8] sm:$0xff] }
 0x461   : > { %5839 = vmatpush.msrb.mxu1 %v5834_v33  ;;  %v11371_v33 = vld [vmem:[#allocation71_spill] sm:$0xff] }
 0x462   : > { %4820 = vmatmul.f32.vlgmr.msra.gmra.mxu1 %v10253_v52  ;;  %5252 = vmatmul.f32.vlgmr.msra.gmra.mxu3 %v10358_v36  ;;  %v10367_v52 = vsel %vm3425_vm2, %v4474_v19, %v4476_v32  ;;  %v6135_v19 = vld [vmem:[#allocation10 + $0x160] sm:$0xff]  ;;  %v4481_v32 = vrot.slane %v646_v56, 4 }
 0x463   : > { %v4083_v14 = vpop.f32.mrf.mxu2  ;;  %6142 = vmatpush.msrb.mxu2 %v6135_v19  ;;  %v654_v19 = vld [vmem:[#allocation2 + $0x830] sm:$0xff] }
 0x464   : > { %v4147_v29 = vadd.f32 %v4083_v14, %v3845_v1 }
 0x465   : > { %v3622_v10 = vpop.f32.mrf.mxu0  ;;  %v4341_v35 = vpop.f32.mrf.mxu3 }
 0x466   : > { %v3684_v2 = vadd.f32 %v3622_v10, %v11369_v49  ;;  %v10363_v20 = vadd.f32 %v4341_v35, %v4147_v29 }
 0x467   : > { %v3784_v28 = vpop.f32.mrf.mxu1 }
 0x468   : > { %4553 = vmatmul.f32.gmra.mxu0 %v10260_v4  ;;  %4985 = vmatmul.f32.gmra.mxu2 %v8309_v5  ;;  %v3846_v0 = vadd.f32 %v3784_v28, %v3684_v2 }
 0x46a   : > { %4823 = vmatmul.f32.gmra.mxu1 %v10268_v6  ;;  %5255 = vmatmul.f32.gmra.mxu3 %v10367_v52  ;;  %v10377_v6 = vsel %vm3425_vm2, %v4478_v26, %v4479_v62 }
 0x46b   : > { %v4086_v9 = vpop.f32.mrf.mxu2 }
 0x46c   : > { %v4148_v11 = vadd.f32 %v4086_v9, %v3846_v0 }
 0x46d   : > { %v3625_v12 = vpop.f32.mrf.mxu0  ;;  %v4344_v13 = vpop.f32.mrf.mxu3 }
 0x46e   : > { %v3685_v27 = vadd.f32 %v3625_v12, %v11370_v48  ;;  %v10372_v4 = vadd.f32 %v4344_v13, %v4148_v11  ;;  %v8313_v11 = vld [vmem:[#allocation2 + $0x820] sm:$0xff]  ;;  %v4484_v12 = vrot.slane %v8314_v38, 4 }
 0x46f   : > { %v3787_v5 = vpop.f32.mrf.mxu1  ;;  %v4483_v26 = vrot.slane %v8313_v11, 4 }
 0x470   : > { %4556 = vmatmul.f32.gmra.mxu0 %v10272_v50  ;;  %4988 = vmatmul.f32.gmra.mxu2 %v10283_v54  ;;  %v3847_v1 = vadd.f32 %v3787_v5, %v3685_v27  ;;  %v5833_v50 = vld [vmem:[#allocation10 + $0xe0] sm:$0xff]  ;;  %v11372_v27 = vld [vmem:[#allocation73_spill] sm:$0xff] }
 0x471   : > { %5840 = vmatpush.msrb.mxu1 %v5833_v50 }
 0x472   : > { %4826 = vmatmul.f32.gmra.mxu1 %v10280_v59  ;;  %5258 = vmatmul.f32.gmra.mxu3 %v10377_v6  ;;  %v10386_v59 = vsel %vm3425_vm2, %v4479_v62, %v4481_v32  ;;  %v6134_v62 = vld [vmem:[#allocation10 + $0x158] sm:$0xff]  ;;  %v11373_v32 = vld [vmem:[#allocation76_spill] sm:$0xff] }
 0x473   : > { %v4089_v14 = vpop.f32.mrf.mxu2  ;;  %6143 = vmatpush.msrb.mxu2 %v6134_v62 }
 0x474   : > { %v4149_v29 = vadd.f32 %v4089_v14, %v3847_v1  ;;  %v5670_v14 = vld [vmem:[#allocation10 + $0x58] sm:$0xff] }
 0x475   : > { %v3628_v54 = vpop.f32.mrf.mxu0  ;;  %v4347_v49 = vpop.f32.mrf.mxu3  ;;  %5679 = vmatpush.msrb.mxu0 %v5670_v14 }
 0x476   : > { %v3686_v10 = vadd.f32 %v3628_v54, %v11371_v33  ;;  %v10382_v2 = vadd.f32 %v4347_v49, %v4149_v29  ;;  %v4486_v29 = vrot.slane %v654_v19, 4 }
 0x477   : > { %v3790_v35 = vpop.f32.mrf.mxu1 }
 0x478   : > { %4559 = vmatmul.f32.gmra.mxu0 %v10287_v47  ;;  %4991 = vmatmul.f32.gmra.mxu2 %v8311_v63  ;;  %v3848_v28 = vadd.f32 %v3790_v35, %v3686_v10 }
 0x47a   : > { %4829 = vmatmul.f32.gmra.mxu1 %v10295_v23  ;;  %5261 = vmatmul.f32.gmra.mxu3 %v10386_v59  ;;  %v10396_v23 = vsel %vm3425_vm2, %v4483_v26, %v4484_v12  ;;  %v8316_v26 = vld [vmem:[#allocation2 + $0x868] sm:$0xff] }
 0x47b   : > { %v4092_v0 = vpop.f32.mrf.mxu2  ;;  %v4489_v38 = vrot.slane %v8316_v26, 4 }
 0x47c   : > { %v4150_v9 = vadd.f32 %v4092_v0, %v3848_v28  ;;  %v8315_v0 = vld [vmem:[#allocation2 + $0x860] sm:$0xff] }
 0x47d   : > { %v3631_v48 = vpop.f32.mrf.mxu0  ;;  %v4350_v5 = vpop.f32.mrf.mxu3 }
 0x47e   : > { %v3687_v13 = vadd.f32 %v3631_v48, %v11372_v27  ;;  %v10391_v47 = vadd.f32 %v4350_v5, %v4150_v9  ;;  %v4488_v9 = vrot.slane %v8315_v0, 4  ;;  %v11374_v27 = vld [vmem:[#allocation79_spill] sm:$0xff] }
 0x47f   : > { %v3793_v63 = vpop.f32.mrf.mxu1 }
 0x480   : > { %4562 = vmatmul.f32.gmra.mxu0 %v10299_v7  ;;  %4994 = vmatmul.f32.gmra.mxu2 %v10310_v31  ;;  %v3849_v56 = vadd.f32 %v3793_v63, %v3687_v13  ;;  %v5832_v7 = vld [vmem:[#allocation10 + $0xd8] sm:$0xff]  ;;  %v662_v63 = vld [vmem:[#allocation2 + $0x870] sm:$0xff] }
 0x481   : > { %5841 = vmatpush.msrb.mxu1 %v5832_v7  ;;  %v4491_v51 = vrot.slane %v662_v63, 4  ;;  %v11376_v63 = vld [vmem:[#allocation85_spill] sm:$0xff] }
 0x482   : > { %4832 = vmatmul.f32.gmra.mxu1 %v10307_v55  ;;  %5264 = vmatmul.f32.gmra.mxu3 %v10396_v23  ;;  %v10405_v55 = vsel %vm3425_vm2, %v4484_v12, %v4486_v29  ;;  %v6133_v12 = vld [vmem:[#allocation10 + $0x150] sm:$0xff] }
 0x483   : > { %v4095_v1 = vpop.f32.mrf.mxu2  ;;  %6144 = vmatpush.msrb.mxu2 %v6133_v12 }
 0x484   : > { %v4151_v3 = vadd.f32 %v4095_v1, %v3849_v56  ;;  %v5669_v56 = vld [vmem:[#allocation10 + $0x50] sm:$0xff] }
 0x485   : > { %v3634_v31 = vpop.f32.mrf.mxu0  ;;  %v4353_v54 = vpop.f32.mrf.mxu3  ;;  %v6423_v1 = vld [vmem:[#allocation10 + $0x1d0] sm:$0xff]  ;;  %5680 = vmatpush.msrb.mxu0 %v5669_v56 }
 0x486   : > { %v3688_v50 = vadd.f32 %v3634_v31, %v11373_v32  ;;  %v10401_v33 = vadd.f32 %v4353_v54, %v4151_v3  ;;  %6434 = vmatpush.msrb.mxu3 %v6423_v1  ;;  %v11375_v3 = vld [vmem:[#allocation82_spill] sm:$0xff]  ;;  %v574_v56 = vld [vmem:[#allocation2 + $0x5b0] sm:$0xff] }
 0x487   : > { %v3796_v10 = vpop.f32.mrf.mxu1  ;;  %v8317_v54 = vld [vmem:[#allocation2 + $0x5a0] sm:$0xff] }
 0x488   : > { %4565 = vmatmul.f32.gmra.mxu0 %v10314_v34  ;;  %4997 = vmatmul.f32.gmra.mxu2 %v8313_v11  ;;  %v3850_v49 = vadd.f32 %v3796_v10, %v3688_v50  ;;  %v664_v50 = vld [vmem:[#allocation2 + $0x888] sm:$0xff]  ;;  %v4433_v10 = vrot.slane %v8317_v54, 4 }
 0x489   : > { %v4703_v26 = vrot.slane %v664_v50, 4  ;;  %v5668_v54 = vld [vmem:[#allocation10 + $0x48] sm:$0xff] }
 0x48a   : > { %4835 = vmatmul.f32.gmra.mxu1 %v10322_v57  ;;  %5267 = vmatmul.f32.gmra.mxu3 %v10405_v55  ;;  %v10415_v57 = vsel %vm3425_vm2, %v4488_v9, %v4489_v38 }
 0x48b   : > { %v4098_v35 = vpop.f32.mrf.mxu2  ;;  %5681 = vmatpush.msrb.mxu0 %v5668_v54 }
 0x48c   : > { %v4152_v28 = vadd.f32 %v4098_v35, %v3850_v49  ;;  %v8318_v49 = vld [vmem:[#allocation2 + $0x5a8] sm:$0xff] }
 0x48d   : > { %v3637_v48 = vpop.f32.mrf.mxu0  ;;  %v4356_v5 = vpop.f32.mrf.mxu3  ;;  %v4434_v35 = vrot.slane %v8318_v49, 4 }
 0x48e   : > { %v3689_v13 = vadd.f32 %v3637_v48, %v11374_v27  ;;  %v10410_v34 = vadd.f32 %v4356_v5, %v4152_v28  ;;  %v8319_v48 = vld [vmem:[#allocation2 + $0x890] sm:$0xff]  ;;  %v8321_v5 = vld [vmem:[#allocation2 + $0x8a8] sm:$0xff] }
 0x48f   : > { %v3799_v11 = vpop.f32.mrf.mxu1  ;;  %v4704_v27 = vrot.slane %v8319_v48, 4  ;;  %v4435_v12 = vsel %vm3425_vm2, %v4433_v10, %v4434_v35  ;;  %v6422_v10 = vld [vmem:[#allocation10 + $0x1c8] sm:$0xff] }
 0x490   : > { %4568 = vmatmul.f32.gmra.mxu0 %v10326_v40  ;;  %5000 = vmatmul.f32.gmra.mxu2 %v10337_v16  ;;  %v3851_v62 = vadd.f32 %v3799_v11, %v3689_v13  ;;  %v5831_v40 = vld [vmem:[#allocation10 + $0xd0] sm:$0xff] }
 0x491   : > { %5842 = vmatpush.msrb.mxu1 %v5831_v40  ;;  %6435 = vmatpush.msrb.mxu3 %v6422_v10  ;;  %v11378_v10 = vld [vmem:[#allocation91_spill] sm:$0xff] }
 0x492   : > { %4838 = vmatmul.f32.gmra.mxu1 %v10334_v37  ;;  %5270 = vmatmul.f32.gmra.mxu3 %v10415_v57  ;;  %v10424_v37 = vsel %vm3425_vm2, %v4489_v38, %v4491_v51  ;;  %v5136_v38 = vrot.slane %v8321_v5, 4  ;;  %v8322_v51 = vld [vmem:[#allocation2 + $0x898] sm:$0xff] }
 0x493   : > { %v4101_v19 = vpop.f32.mrf.mxu2  ;;  %v4706_v50 = vrot.slane %v8322_v51, 4 }
 0x494   : > { %v4153_v14 = vadd.f32 %v4101_v19, %v3851_v62 }
 0x495   : > { %v3640_v16 = vpop.f32.mrf.mxu0  ;;  %v4359_v7 = vpop.f32.mrf.mxu3 }
 0x496   : > { %v3690_v29 = vadd.f32 %v3640_v16, %v11375_v3  ;;  %v10420_v31 = vadd.f32 %v4359_v7, %v4153_v14  ;;  %v4705_v14 = vsel %vm3425_vm2, %v4703_v26, %v4704_v27  ;;  %v6132_v16 = vld [vmem:[#allocation10 + $0x148] sm:$0xff]  ;;  %v4436_v3 = vrot.slane %v574_v56, 4  ;;  %v8323_v56 = vld [vmem:[#allocation2 + $0x5e0] sm:$0xff] }
 0x497   : > { %v3802_v32 = vpop.f32.mrf.mxu1  ;;  %6145 = vmatpush.msrb.mxu2 %v6132_v16 }
 0x498   : > { %4571 = vmatmul.f32.gmra.mxu0 %v10341_v43  ;;  %5003 = vmatmul.f32.gmra.mxu2 %v8315_v0  ;;  %v3852_v28 = vadd.f32 %v3802_v32, %v3690_v29  ;;  %v8320_v43 = vld [vmem:[#allocation2 + $0x8a0] sm:$0xff]  ;;  %v669_v29 = vld [vmem:[#allocation2 + $0x8b0] sm:$0xff]  ;;  %v4437_v48 = vsel %vm3425_vm2, %v4434_v35, %v4436_v3 }
 0x499   : > { %v5135_v0 = vrot.slane %v8320_v43, 4  ;;  %v8325_v3 = vld [vmem:[#allocation2 + $0x8d0] sm:$0xff] }
 0x49a   : > { %4841 = vmatmul.f32.gmra.mxu1 %v10349_v41  ;;  %5273 = vmatmul.f32.gmra.mxu3 %v10424_v37 }
 0x49b   : > { %v4104_v9 = vpop.f32.mrf.mxu2  ;;  %v5137_v40 = vsel %vm3425_vm2, %v5135_v0, %v5136_v38 }
 0x49c   : > { %v4154_v13 = vadd.f32 %v4104_v9, %v3852_v28  ;;  %v5138_v28 = vrot.slane %v669_v29, 4  ;;  %v5830_v9 = vld [vmem:[#allocation10 + $0xc8] sm:$0xff]  ;;  %v4709_v29 = vrot.slane %v8325_v3, 4 }
 0x49d   : > { %v3643_v11 = vpop.f32.mrf.mxu0  ;;  %v4362_v19 = vpop.f32.mrf.mxu3  ;;  %5843 = vmatpush.msrb.mxu1 %v5830_v9  ;;  %v582_v9 = vld [vmem:[#allocation2 + $0x5f0] sm:$0xff] }
 0x49e   : > { %v3691_v62 = vadd.f32 %v3643_v11, %v11376_v63  ;;  %v10430_v1 = vadd.f32 %v4362_v19, %v4154_v13  ;;  %v11377_v13 = vld [vmem:[#allocation88_spill] sm:$0xff]  ;;  %v4707_v63 = vsel %vm3425_vm2, %v4704_v27, %v4706_v50 }
 0x49f   : > { %v3805_v41 = vpop.f32.mrf.mxu1  ;;  %v670_v19 = vld [vmem:[#allocation2 + $0x8c8] sm:$0xff] }
 0x4a0   : > { %4574 = vmatmul.f32.gmra.mxu0 %v4435_v12  ;;  %5006 = vmatmul.f32.gmra.mxu2 %v8322_v51  ;;  %v3853_v7 = vadd.f32 %v3805_v41, %v3691_v62  ;;  %v5139_v62 = vsel %vm3425_vm2, %v5136_v38, %v5138_v28  ;;  %v4438_v41 = vrot.slane %v8323_v56, 4  ;;  %v4708_v16 = vrot.slane %v670_v19, 4  ;;  %v8327_v27 = vld [vmem:[#allocation2 + $0x8e8] sm:$0xff] }
 0x4a1   : > { %v5141_v50 = vrot.slane %v8327_v27, 4 }
 0x4a2   : > { %4844 = vmatmul.f32.gmra.mxu1 %v4705_v14  ;;  %5276 = vmatmul.f32.gmra.mxu3 %v5137_v40  ;;  %v8324_v14 = vld [vmem:[#allocation2 + $0x5e8] sm:$0xff] }
 0x4a3   : > { %v4107_v32 = vpop.f32.mrf.mxu2  ;;  %v4439_v51 = vrot.slane %v8324_v14, 4  ;;  %v5667_v14 = vld [vmem:[#allocation10 + $0x40] sm:$0xff] }
 0x4a4   : > { %v4155_v49 = vadd.f32 %v4107_v32, %v3853_v7  ;;  %v8326_v32 = vld [vmem:[#allocation2 + $0x8e0] sm:$0xff]  ;;  %5682 = vmatpush.msrb.mxu0 %v5667_v14 }
 0x4a5   : > { %v3646_v26 = vpop.f32.mrf.mxu0  ;;  %v4365_v5 = vpop.f32.mrf.mxu3  ;;  %v5140_v54 = vrot.slane %v8326_v32, 4  ;;  %v4440_v38 = vsel %vm3425_vm2, %v4438_v41, %v4439_v51 }
 0x4a6   : > { %v3692_v0 = vadd.f32 %v3646_v26, %v11377_v13  ;;  %v10436_v11 = vadd.f32 %v4365_v5, %v4155_v49  ;;  %v4710_v13 = vsel %vm3425_vm2, %v4708_v16, %v4709_v29  ;;  %v5829_v16 = vld [vmem:[#allocation10 + $0xc0] sm:$0xff] }
 0x4a7   : > { %v3808_v12 = vpop.f32.mrf.mxu1  ;;  %v5142_v5 = vsel %vm3425_vm2, %v5140_v54, %v5141_v50  ;;  %5844 = vmatpush.msrb.mxu1 %v5829_v16  ;;  %v11379_v54 = vld [vmem:[#allocation94_spill] sm:$0xff] }
 0x4a8   : > { %4577 = vmatmul.f32.gmra.mxu0 %v4437_v48  ;;  %5009 = vmatmul.f32.gmra.mxu2 %v8320_v43  ;;  %v3854_v40 = vadd.f32 %v3808_v12, %v3692_v0  ;;  %v8328_v0 = vld [vmem:[#allocation2 + $0x8d8] sm:$0xff]  ;;  %v6131_v12 = vld [vmem:[#allocation10 + $0x140] sm:$0xff] }
 0x4a9   : > { %6146 = vmatpush.msrb.mxu2 %v6131_v12  ;;  %v4711_v41 = vrot.slane %v8328_v0, 4 }
 0x4aa   : > { %4847 = vmatmul.f32.gmra.mxu1 %v4707_v63  ;;  %5279 = vmatmul.f32.gmra.mxu3 %v5139_v62  ;;  %v4441_v63 = vrot.slane %v582_v9, 4  ;;  %v675_v62 = vld [vmem:[#allocation2 + $0x8f0] sm:$0xff] }
 0x4ab   : > { %v4110_v35 = vpop.f32.mrf.mxu2  ;;  %v5143_v3 = vrot.slane %v675_v62, 4 }
 0x4ac   : > { %v4156_v7 = vadd.f32 %v4110_v35, %v3854_v40  ;;  %v6421_v40 = vld [vmem:[#allocation10 + $0x1c0] sm:$0xff]  ;;  %v4442_v27 = vsel %vm3425_vm2, %v4439_v51, %v4441_v63 }
 0x4ad   : > { %v3649_v43 = vpop.f32.mrf.mxu0  ;;  %v4368_v28 = vpop.f32.mrf.mxu3  ;;  %6436 = vmatpush.msrb.mxu3 %v6421_v40  ;;  %v5144_v9 = vsel %vm3425_vm2, %v5141_v50, %v5143_v3  ;;  %v8332_v40 = vld [vmem:[#allocation2 + $0x920] sm:$0xff]  ;;  %v11380_v3 = vld [vmem:[#allocation97_spill] sm:$0xff] }
 0x4ae   : > { %v3693_v49 = vadd.f32 %v3649_v43, %v11378_v10  ;;  %v10442_v26 = vadd.f32 %v4368_v28, %v4156_v7  ;;  %v4712_v28 = vsel %vm3425_vm2, %v4709_v29, %v4711_v41  ;;  %v8333_v29 = vld [vmem:[#allocation2 + $0x928] sm:$0xff] }
 0x4af   : > { %v3811_v48 = vpop.f32.mrf.mxu1  ;;  %v5146_v41 = vrot.slane %v8333_v29, 4 }
 0x4b0   : > { %4580 = vmatmul.f32.gmra.mxu0 %v4440_v38  ;;  %5012 = vmatmul.f32.gmra.mxu2 %v8328_v0  ;;  %v3855_v19 = vadd.f32 %v3811_v48, %v3693_v49  ;;  %v677_v48 = vld [vmem:[#allocation2 + $0x908] sm:$0xff] }
 0x4b1   : > { %v4713_v63 = vrot.slane %v677_v48, 4 }
 0x4b2   : > { %4850 = vmatmul.f32.gmra.mxu1 %v4710_v13  ;;  %5282 = vmatmul.f32.gmra.mxu3 %v5142_v5  ;;  %v8329_v13 = vld [vmem:[#allocation2 + $0x620] sm:$0xff]  ;;  %v8330_v5 = vld [vmem:[#allocation2 + $0x628] sm:$0xff] }
 0x4b3   : > { %v4113_v56 = vpop.f32.mrf.mxu2  ;;  %v4443_v0 = vrot.slane %v8329_v13, 4  ;;  %v4444_v12 = vrot.slane %v8330_v5, 4  ;;  %v682_v13 = vld [vmem:[#allocation2 + $0x930] sm:$0xff] }
 0x4b4   : > { %v4157_v35 = vadd.f32 %v4113_v56, %v3855_v19  ;;  %v8331_v19 = vld [vmem:[#allocation2 + $0x910] sm:$0xff]  ;;  %v5148_v29 = vrot.slane %v682_v13, 4  ;;  %v8336_v13 = vld [vmem:[#allocation2 + $0x668] sm:$0xff] }
 0x4b5   : > { %v3652_v7 = vpop.f32.mrf.mxu0  ;;  %v4371_v38 = vpop.f32.mrf.mxu3  ;;  %v4714_v56 = vrot.slane %v8331_v19, 4  ;;  %v4445_v50 = vsel %vm3425_vm2, %v4443_v0, %v4444_v12  ;;  %v6420_v19 = vld [vmem:[#allocation10 + $0x1b8] sm:$0xff] }
 0x4b6   : > { %v3694_v43 = vadd.f32 %v3652_v7, %v11379_v54  ;;  %v10448_v10 = vadd.f32 %v4371_v38, %v4157_v35  ;;  %v5145_v35 = vrot.slane %v8332_v40, 4  ;;  %6437 = vmatpush.msrb.mxu3 %v6420_v19 }
 0x4b7   : > { %v3814_v49 = vpop.f32.mrf.mxu1  ;;  %v4715_v38 = vsel %vm3425_vm2, %v4713_v63, %v4714_v56  ;;  %v5828_v63 = vld [vmem:[#allocation10 + $0xb8] sm:$0xff] }
 0x4b8   : > { %4583 = vmatmul.f32.gmra.mxu0 %v4442_v27  ;;  %5015 = vmatmul.f32.gmra.mxu2 %v8326_v32  ;;  %v3856_v62 = vadd.f32 %v3814_v49, %v3694_v43  ;;  %v590_v27 = vld [vmem:[#allocation2 + $0x630] sm:$0xff]  ;;  %v8334_v49 = vld [vmem:[#allocation2 + $0x918] sm:$0xff] }
 0x4b9   : > { %v4446_v48 = vrot.slane %v590_v27, 4  ;;  %5845 = vmatpush.msrb.mxu1 %v5828_v63  ;;  %v8338_v63 = vld [vmem:[#allocation2 + $0x960] sm:$0xff] }
 0x4ba   : > { %4853 = vmatmul.f32.gmra.mxu1 %v4712_v28  ;;  %5285 = vmatmul.f32.gmra.mxu3 %v5144_v9  ;;  %v5147_v28 = vsel %vm3425_vm2, %v5145_v35, %v5146_v41  ;;  %v6130_v9 = vld [vmem:[#allocation10 + $0x138] sm:$0xff]  ;;  %v11381_v35 = vld [vmem:[#allocation100_spill] sm:$0xff] }
 0x4bb   : > { %v4116_v51 = vpop.f32.mrf.mxu2  ;;  %6147 = vmatpush.msrb.mxu2 %v6130_v9 }
 0x4bc   : > { %v4158_v14 = vadd.f32 %v4116_v51, %v3856_v62  ;;  %v4716_v62 = vrot.slane %v8334_v49, 4  ;;  %v5666_v51 = vld [vmem:[#allocation10 + $0x38] sm:$0xff] }
 0x4bd   : > { %v3655_v32 = vpop.f32.mrf.mxu0  ;;  %v4374_v7 = vpop.f32.mrf.mxu3  ;;  %5683 = vmatpush.msrb.mxu0 %v5666_v51  ;;  %v8337_v51 = vld [vmem:[#allocation2 + $0x950] sm:$0xff] }
 0x4be   : > { %v3695_v16 = vadd.f32 %v3655_v32, %v11380_v3  ;;  %v10454_v54 = vadd.f32 %v4374_v7, %v4158_v14  ;;  %v4719_v19 = vrot.slane %v8337_v51, 4  ;;  %v6129_v51 = vld [vmem:[#allocation10 + $0x130] sm:$0xff] }
 0x4bf   : > { %v3817_v43 = vpop.f32.mrf.mxu1  ;;  %6148 = vmatpush.msrb.mxu2 %v6129_v51  ;;  %v8342_v51 = vld [vmem:[#allocation2 + $0x6a8] sm:$0xff] }
 0x4c0   : > { %4586 = vmatmul.f32.gmra.mxu0 %v4445_v50  ;;  %5018 = vmatmul.f32.gmra.mxu2 %v8334_v49  ;;  %v3857_v5 = vadd.f32 %v3817_v43, %v3695_v16  ;;  %v4447_v50 = vsel %vm3425_vm2, %v4444_v12, %v4446_v48  ;;  %v4717_v43 = vsel %vm3425_vm2, %v4714_v56, %v4716_v62  ;;  %v685_v49 = vld [vmem:[#allocation2 + $0x948] sm:$0xff] }
 0x4c1   : > { %v4718_v48 = vrot.slane %v685_v49, 4  ;;  %v8339_v56 = vld [vmem:[#allocation2 + $0x968] sm:$0xff] }
 0x4c2   : > { %4856 = vmatmul.f32.gmra.mxu1 %v4715_v38  ;;  %5288 = vmatmul.f32.gmra.mxu3 %v5147_v28  ;;  %v5149_v38 = vsel %vm3425_vm2, %v5146_v41, %v5148_v29  ;;  %v8335_v28 = vld [vmem:[#allocation2 + $0x660] sm:$0xff]  ;;  %v5151_v62 = vrot.slane %v8339_v56, 4  ;;  %v5665_v56 = vld [vmem:[#allocation10 + $0x30] sm:$0xff] }
 0x4c3   : > { %v4119_v0 = vpop.f32.mrf.mxu2  ;;  %v4448_v9 = vrot.slane %v8335_v28, 4  ;;  %v11382_v29 = vld [vmem:[#allocation103_spill] sm:$0xff]  ;;  %5684 = vmatpush.msrb.mxu0 %v5665_v56  ;;  %v4454_v56 = vrot.slane %v8342_v51, 4 }
 0x4c4   : > { %v4159_v14 = vadd.f32 %v4119_v0, %v3857_v5  ;;  %v4449_v5 = vrot.slane %v8336_v13, 4  ;;  %v690_v13 = vld [vmem:[#allocation2 + $0x970] sm:$0xff] }
 0x4c5   : > { %v3658_v32 = vpop.f32.mrf.mxu0  ;;  %v4377_v7 = vpop.f32.mrf.mxu3 }
 0x4c6   : > { %v3696_v3 = vadd.f32 %v3658_v32, %v11381_v35  ;;  %v10460_v27 = vadd.f32 %v4377_v7, %v4159_v14  ;;  %v5150_v32 = vrot.slane %v8338_v63, 4  ;;  %v4450_v41 = vsel %vm3425_vm2, %v4448_v9, %v4449_v5  ;;  %v598_v7 = vld [vmem:[#allocation2 + $0x670] sm:$0xff] }
 0x4c7   : > { %v3820_v16 = vpop.f32.mrf.mxu1  ;;  %v4451_v49 = vrot.slane %v598_v7, 4 }
 0x4c8   : > { %4589 = vmatmul.f32.gmra.mxu0 %v4447_v50  ;;  %5021 = vmatmul.f32.gmra.mxu2 %v8332_v40  ;;  %v3858_v0 = vadd.f32 %v3820_v16, %v3696_v3  ;;  %v4720_v16 = vsel %vm3425_vm2, %v4718_v48, %v4719_v19  ;;  %v5827_v48 = vld [vmem:[#allocation10 + $0xb0] sm:$0xff] }
 0x4c9   : > { %5846 = vmatpush.msrb.mxu1 %v5827_v48  ;;  %v8343_v48 = vld [vmem:[#allocation2 + $0x990] sm:$0xff] }
 0x4ca   : > { %4859 = vmatmul.f32.gmra.mxu1 %v4717_v43  ;;  %5291 = vmatmul.f32.gmra.mxu3 %v5149_v38  ;;  %v8340_v43 = vld [vmem:[#allocation2 + $0x958] sm:$0xff]  ;;  %v5152_v38 = vsel %vm3425_vm2, %v5150_v32, %v5151_v62 }
 0x4cb   : > { %v4122_v12 = vpop.f32.mrf.mxu2  ;;  %v11383_v32 = vld [vmem:[#allocation106_spill] sm:$0xff] }
 0x4cc   : > { %v4160_v14 = vadd.f32 %v4122_v12, %v3858_v0  ;;  %v4721_v12 = vrot.slane %v8340_v43, 4 }
 0x4cd   : > { %v3661_v40 = vpop.f32.mrf.mxu0  ;;  %v4380_v35 = vpop.f32.mrf.mxu3 }
 0x4ce   : > { %v3697_v50 = vadd.f32 %v3661_v40, %v11382_v29  ;;  %v10466_v28 = vadd.f32 %v4380_v35, %v4160_v14  ;;  %v6419_v40 = vld [vmem:[#allocation10 + $0x1b0] sm:$0xff]  ;;  %v5153_v29 = vrot.slane %v690_v13, 4  ;;  %v4452_v35 = vsel %vm3425_vm2, %v4449_v5, %v4451_v49  ;;  %v693_v13 = vld [vmem:[#allocation2 + $0x988] sm:$0xff] }
 0x4cf   : > { %v3823_v3 = vpop.f32.mrf.mxu1  ;;  %6438 = vmatpush.msrb.mxu3 %v6419_v40  ;;  %v4723_v40 = vrot.slane %v693_v13, 4 }
 0x4d0   : > { %4592 = vmatmul.f32.gmra.mxu0 %v4450_v41  ;;  %5024 = vmatmul.f32.gmra.mxu2 %v8340_v43  ;;  %v3859_v0 = vadd.f32 %v3823_v3, %v3697_v50  ;;  %v4722_v43 = vsel %vm3425_vm2, %v4719_v19, %v4721_v12  ;;  %v8345_v19 = vld [vmem:[#allocation2 + $0x9a8] sm:$0xff] }
 0x4d1   : > { %v5156_v12 = vrot.slane %v8345_v19, 4  ;;  %v6128_v19 = vld [vmem:[#allocation10 + $0x128] sm:$0xff] }
 0x4d2   : > { %4862 = vmatmul.f32.gmra.mxu1 %v4720_v16  ;;  %5294 = vmatmul.f32.gmra.mxu3 %v5152_v38  ;;  %v5154_v38 = vsel %vm3425_vm2, %v5151_v62, %v5153_v29 }
 0x4d3   : > { %v4125_v9 = vpop.f32.mrf.mxu2  ;;  %6149 = vmatpush.msrb.mxu2 %v6128_v19 }
 0x4d4   : > { %v4161_v14 = vadd.f32 %v4125_v9, %v3859_v0  ;;  %v8341_v0 = vld [vmem:[#allocation2 + $0x6a0] sm:$0xff] }
 0x4d5   : > { %v3664_v41 = vpop.f32.mrf.mxu0  ;;  %v4383_v50 = vpop.f32.mrf.mxu3  ;;  %v4453_v9 = vrot.slane %v8341_v0, 4  ;;  %v606_v0 = vld [vmem:[#allocation2 + $0x6b0] sm:$0xff] }
 0x4d6   : > { %v3698_v7 = vadd.f32 %v3664_v41, %v11383_v32  ;;  %v10472_v3 = vadd.f32 %v4383_v50, %v4161_v14  ;;  %v4724_v14 = vrot.slane %v8343_v48, 4  ;;  %v8344_v32 = vld [vmem:[#allocation2 + $0x9a0] sm:$0xff]  ;;  %v4456_v13 = vrot.slane %v606_v0, 4 }
 0x4d7   : > { %v3826_v16 = vpop.f32.mrf.mxu1  ;;  %v5155_v50 = vrot.slane %v8344_v32, 4  ;;  %v4455_v62 = vsel %vm3425_vm2, %v4453_v9, %v4454_v56 }
 0x4d8   : > { %4595 = vmatmul.f32.gmra.mxu0 %v4452_v35  ;;  %5027 = vmatmul.f32.gmra.mxu2 %v8338_v63  ;;  %v3860_v5 = vadd.f32 %v3826_v16, %v3698_v7  ;;  %v4725_v16 = vsel %vm3425_vm2, %v4723_v40, %v4724_v14  ;;  %v5826_v40 = vld [vmem:[#allocation10 + $0xa8] sm:$0xff]  ;;  %v4457_v58 = vsel %vm3425_vm2, %v4454_v56, %v4456_v13 }
 0x4d9   : > { %5847 = vmatpush.msrb.mxu1 %v5826_v40  ;;  %v8350_v40 = vld [vmem:[#allocation2 + $0x9e0] sm:$0xff] }
 0x4da   : > { %4865 = vmatmul.f32.gmra.mxu1 %v4722_v43  ;;  %5297 = vmatmul.f32.gmra.mxu3 %v5154_v38  ;;  %v8346_v43 = vld [vmem:[#allocation2 + $0x998] sm:$0xff]  ;;  %v5157_v38 = vsel %vm3425_vm2, %v5155_v50, %v5156_v12 }
 0x4db   : > { %v4128_v49 = vpop.f32.mrf.mxu2  ;;  %v4726_v48 = vrot.slane %v8346_v43, 4 }
 0x4dc   : > { %v4162_v41 = vadd.f32 %v4128_v49, %v3860_v5  ;;  %v698_v5 = vld [vmem:[#allocation2 + $0x9b0] sm:$0xff] }
 0x4dd   : > { %v4551_v63 = vpop.f32.mrf.mxu0  ;;  %v4386_v29 = vpop.f32.mrf.mxu3 }
 0x4de   : > { %v4647_v35 = vadd.f32 %v4551_v63, %v10204_v42  ;;  %v10478_v51 = vadd.f32 %v4386_v29, %v4162_v41  ;;  %v5664_v42 = vld [vmem:[#allocation10 + $0x28] sm:$0xff]  ;;  %v5158_v29 = vrot.slane %v698_v5, 4  ;;  %v8347_v5 = vld [vmem:[#allocation2 + $0x6e0] sm:$0xff] }
 0x4df   : > { %v4821_v7 = vpop.f32.mrf.mxu1  ;;  %v6418_v63 = vld [vmem:[#allocation10 + $0x1a8] sm:$0xff]  ;;  %5685 = vmatpush.msrb.mxu0 %v5664_v42  ;;  %v8349_v42 = vld [vmem:[#allocation2 + $0x9d0] sm:$0xff] }
 0x4e0   : > { %11384 = vst [vmem:[#allocation78_spill] sm:$0xff] %v10478_v51  ;;  %4598 = vmatmul.f32.gmra.mxu0 %v4455_v62  ;;  %5030 = vmatmul.f32.gmra.mxu2 %v8346_v43  ;;  %v4917_v49 = vadd.f32 %v4821_v7, %v4647_v35  ;;  %v5159_v43 = vsel %vm3425_vm2, %v5156_v12, %v5158_v29 }
 0x4e1   : > { %6439 = vmatpush.msrb.mxu3 %v6418_v63  ;;  %v4729_v63 = vrot.slane %v8349_v42, 4  ;;  %v706_v42 = vld [vmem:[#allocation2 + $0x9f0] sm:$0xff] }
 0x4e2   : > { %4868 = vmatmul.f32.gmra.mxu1 %v4725_v16  ;;  %5300 = vmatmul.f32.gmra.mxu3 %v5157_v38  ;;  %v4727_v16 = vsel %vm3425_vm2, %v4724_v14, %v4726_v48  ;;  %v701_v38 = vld [vmem:[#allocation2 + $0x9c8] sm:$0xff]  ;;  %v5160_v14 = vrot.slane %v8350_v40, 4  ;;  %v5163_v51 = vrot.slane %v706_v42, 4 }
 0x4e3   : > { %v4983_v9 = vpop.f32.mrf.mxu2 }
 0x4e4   : > { %v5079_v41 = vadd.f32 %v4983_v9, %v4917_v49  ;;  %v4458_v49 = vrot.slane %v8347_v5, 4  ;;  %v8348_v9 = vld [vmem:[#allocation2 + $0x6e8] sm:$0xff] }
 0x4e5   : > { %v4554_v62 = vpop.f32.mrf.mxu0  ;;  %v5253_v35 = vpop.f32.mrf.mxu3  ;;  %v4459_v19 = vrot.slane %v8348_v9, 4 }
 0x4e6   : > { %v4648_v50 = vadd.f32 %v4554_v62, %v10211_v53  ;;  %v5349_v0 = vadd.f32 %v5253_v35, %v5079_v41  ;;  %v4728_v53 = vrot.slane %v701_v38, 4  ;;  %v614_v35 = vld [vmem:[#allocation2 + $0x6f0] sm:$0xff] }
 0x4e7   : > { %v4824_v7 = vpop.f32.mrf.mxu1  ;;  %v4460_v48 = vsel %vm3425_vm2, %v4458_v49, %v4459_v19 }
 0x4e8   : > { %4601 = vmatmul.f32.gmra.mxu0 %v4457_v58  ;;  %5033 = vmatmul.f32.gmra.mxu2 %v8344_v32  ;;  %5381 = vst [vmem:[%s9109_s17 + $0x10] sm:$0xff] %v5349_v0  ;;  %v4918_v56 = vadd.f32 %v4824_v7, %v4648_v50  ;;  %v8351_v58 = vld [vmem:[#allocation2 + $0x9e8] sm:$0xff]  ;;  %v5450_v5 = vmul.f32 %v5349_v0, %v5349_v0 }
 0x4e9   : > { %v5161_v32 = vrot.slane %v8351_v58, 4 }
 0x4ea   : > { %4871 = vmatmul.f32.gmra.mxu1 %v4727_v16  ;;  %5303 = vmatmul.f32.gmra.mxu3 %v5159_v43  ;;  %v4730_v16 = vsel %vm3425_vm2, %v4728_v53, %v4729_v63  ;;  %v8352_v43 = vld [vmem:[#allocation2 + $0x9d8] sm:$0xff]  ;;  %v6417_v53 = vld [vmem:[#allocation10 + $0x1a0] sm:$0xff] }
 0x4eb   : > { %v4986_v13 = vpop.f32.mrf.mxu2  ;;  %v5162_v38 = vsel %vm3425_vm2, %v5160_v14, %v5161_v32  ;;  %v5825_v14 = vld [vmem:[#allocation10 + $0xa0] sm:$0xff]  ;;  %6440 = vmatpush.msrb.mxu3 %v6417_v53 }
 0x4ec   : > { %v5080_v41 = vadd.f32 %v4986_v13, %v4918_v56  ;;  %v4461_v13 = vrot.slane %v614_v35, 4  ;;  %5848 = vmatpush.msrb.mxu1 %v5825_v14  ;;  %v711_v14 = vld [vmem:[#allocation2 + $0xa18] sm:$0xff] }
 0x4ed   : > { %v4557_v12 = vpop.f32.mrf.mxu0  ;;  %v5256_v62 = vpop.f32.mrf.mxu3 }
 0x4ee   : > { %v4649_v29 = vadd.f32 %v4557_v12, %v10217_v46  ;;  %v5350_v50 = vadd.f32 %v5256_v62, %v5080_v41  ;;  %v4731_v41 = vrot.slane %v8352_v43, 4  ;;  %v6127_v12 = vld [vmem:[#allocation10 + $0x120] sm:$0xff] }
 0x4ef   : > { %v4827_v7 = vpop.f32.mrf.mxu1  ;;  %v5663_v62 = vld [vmem:[#allocation10 + $0x20] sm:$0xff]  ;;  %6150 = vmatpush.msrb.mxu2 %v6127_v12 }
 0x4f0   : > { %4604 = vmatmul.f32.gmra.mxu0 %v4460_v48  ;;  %5036 = vmatmul.f32.gmra.mxu2 %v8352_v43  ;;  %5382 = vst [vmem:[%s9109_s17 + $0x30] sm:$0xff] %v5350_v50  ;;  %v5413_v9 = vadd.f32 %v5350_v50, %v5349_v0  ;;  %v5451_v56 = vmul.f32 %v5350_v50, %v5350_v50  ;;  %v712_v12 = vld [vmem:[#allocation2 + $0xa20] sm:$0xff] }
 0x4f1   : > { %v4919_v49 = vadd.f32 %v4827_v7, %v4649_v29  ;;  %5686 = vmatpush.msrb.mxu0 %v5663_v62  ;;  %v4462_v0 = vsel %vm3425_vm2, %v4459_v19, %v4461_v13  ;;  %v5164_v43 = vsel %vm3425_vm2, %v5161_v32, %v5163_v51  ;;  %v8354_v13 = vld [vmem:[#allocation2 + $0x728] sm:$0xff]  ;;  %v5165_v32 = vrot.slane %v712_v12, 4 }
 0x4f2   : > { %4874 = vmatmul.f32.gmra.mxu1 %v4730_v16  ;;  %v5482_v46 = vadd.f32 %v5451_v56, %v5450_v5  ;;  %5306 = vmatmul.f32.gmra.mxu3 %v5162_v38  ;;  %v4732_v16 = vsel %vm3425_vm2, %v4729_v63, %v4731_v41  ;;  %v709_v38 = vld [vmem:[#allocation2 + $0xa08] sm:$0xff]  ;;  %v710_v5 = vld [vmem:[#allocation2 + $0xa10] sm:$0xff] }
 0x4f3   : > { %v4989_v58 = vpop.f32.mrf.mxu2  ;;  %v4733_v41 = vrot.slane %v709_v38, 4 }
 0x4f4   : > { %v5081_v48 = vadd.f32 %v4989_v58, %v4919_v49  ;;  %v8353_v49 = vld [vmem:[#allocation2 + $0x720] sm:$0xff]  ;;  %v4464_v58 = vrot.slane %v8354_v13, 4  ;;  %v4736_v13 = vrot.slane %v711_v14, 4 }
 0x4f5   : > { %v4560_v15 = vpop.f32.mrf.mxu0  ;;  %v5259_v35 = vpop.f32.mrf.mxu3  ;;  %v4463_v19 = vrot.slane %v8353_v49, 4 }
 0x4f6   : > { %v4650_v29 = vadd.f32 %v4560_v15, %v10223_v24  ;;  %v5351_v50 = vadd.f32 %v5259_v35, %v5081_v48  ;;  %v713_v15 = vld [vmem:[#allocation2 + $0xa28] sm:$0xff] }
 0x4f7   : > { %v4830_v7 = vpop.f32.mrf.mxu1  ;;  %v5166_v53 = vrot.slane %v713_v15, 4  ;;  %v6126_v15 = vld [vmem:[#allocation10 + $0x118] sm:$0xff] }
 0x4f8   : > { %4607 = vmatmul.f32.gmra.mxu0 %v4462_v0  ;;  %5039 = vmatmul.f32.gmra.mxu2 %v8350_v40  ;;  %5383 = vst [vmem:[%s9109_s17 + $0x50] sm:$0xff] %v5351_v50  ;;  %v5414_v56 = vadd.f32 %v5413_v9, %v5351_v50  ;;  %v5452_v42 = vmul.f32 %v5351_v50, %v5351_v50  ;;  %v4734_v40 = vrot.slane %v710_v5, 4  ;;  %v622_v50 = vld [vmem:[#allocation2 + $0x730] sm:$0xff] }
 0x4f9   : > { %v4920_v24 = vadd.f32 %v4830_v7, %v4650_v29  ;;  %v4465_v9 = vsel %vm3425_vm2, %v4463_v19, %v4464_v58  ;;  %v5167_v7 = vsel %vm3425_vm2, %v5165_v32, %v5166_v53  ;;  %v4466_v38 = vrot.slane %v622_v50, 4  ;;  %v714_v5 = vld [vmem:[#allocation2 + $0xa30] sm:$0xff]  ;;  %6151 = vmatpush.msrb.mxu2 %v6126_v15  ;;  %v5824_v32 = vld [vmem:[#allocation10 + $0x98] sm:$0xff] }
 0x4fa   : > { %4877 = vmatmul.f32.gmra.mxu1 %v4732_v16  ;;  %v5483_v62 = vadd.f32 %v5482_v46, %v5452_v42  ;;  %5309 = vmatmul.f32.gmra.mxu3 %v5164_v43  ;;  %v4735_v46 = vsel %vm3425_vm2, %v4733_v41, %v4734_v40  ;;  %v5168_v41 = vrot.slane %v714_v5, 4 }
 0x4fb   : > { %v4992_v63 = vpop.f32.mrf.mxu2  ;;  %5849 = vmatpush.msrb.mxu1 %v5824_v32 }
 0x4fc   : > { %v5082_v51 = vadd.f32 %v4992_v63, %v4920_v24  ;;  %v5662_v24 = vld [vmem:[#allocation10 + $0x18] sm:$0xff]  ;;  %v5169_v50 = vsel %vm3425_vm2, %v5166_v53, %v5168_v41 }
 0x4fd   : > { %v4563_v48 = vpop.f32.mrf.mxu0  ;;  %v5262_v35 = vpop.f32.mrf.mxu3  ;;  %v6416_v63 = vld [vmem:[#allocation10 + $0x198] sm:$0xff]  ;;  %5687 = vmatpush.msrb.mxu0 %v5662_v24 }
 0x4fe   : > { %v4651_v0 = vadd.f32 %v4563_v48, %v10229_v61  ;;  %v5352_v49 = vadd.f32 %v5262_v35, %v5082_v51  ;;  %6441 = vmatpush.msrb.mxu3 %v6416_v63  ;;  %v4737_v35 = vsel %vm3425_vm2, %v4734_v40, %v4736_v13  ;;  %v719_v41 = vld [vmem:[#allocation2 + $0xa58] sm:$0xff] }
 0x4ff   : > { %v4833_v29 = vpop.f32.mrf.mxu1 }
 0x500   : > { %4610 = vmatmul.f32.gmra.mxu0 %v4465_v9  ;;  %5042 = vmatmul.f32.gmra.mxu2 %v711_v14  ;;  %5384 = vst [vmem:[%s9109_s17 + $0x70] sm:$0xff] %v5352_v49  ;;  %v5415_v16 = vadd.f32 %v5414_v56, %v5352_v49  ;;  %v5453_v43 = vmul.f32 %v5352_v49, %v5352_v49  ;;  %v717_v49 = vld [vmem:[#allocation2 + $0xa48] sm:$0xff] }
 0x501   : > { %v4921_v42 = vadd.f32 %v4833_v29, %v4651_v0  ;;  %v4467_v56 = vsel %vm3425_vm2, %v4464_v58, %v4466_v38  ;;  %v718_v29 = vld [vmem:[#allocation2 + $0xa50] sm:$0xff]  ;;  %v8356_v38 = vld [vmem:[#allocation2 + $0x768] sm:$0xff]  ;;  %v4738_v13 = vrot.slane %v717_v49, 4 }
 0x502   : > { %4880 = vmatmul.f32.gmra.mxu1 %v4735_v46  ;;  %v5484_v19 = vadd.f32 %v5483_v62, %v5453_v43  ;;  %5312 = vmatmul.f32.gmra.mxu3 %v5167_v7  ;;  %v8355_v43 = vld [vmem:[#allocation2 + $0x760] sm:$0xff]  ;;  %v4469_v5 = vrot.slane %v8356_v38, 4  ;;  %v722_v49 = vld [vmem:[#allocation2 + $0xa70] sm:$0xff] }
 0x503   : > { %v4995_v61 = vpop.f32.mrf.mxu2  ;;  %v4468_v58 = vrot.slane %v8355_v43, 4  ;;  %v4741_v43 = vrot.slane %v719_v41, 4  ;;  %v5661_v38 = vld [vmem:[#allocation10 + $0x10] sm:$0xff] }
 0x504   : > { %v5083_v51 = vadd.f32 %v4995_v61, %v4921_v42  ;;  %v720_v42 = vld [vmem:[#allocation2 + $0xa60] sm:$0xff]  ;;  %5688 = vmatpush.msrb.mxu0 %v5661_v38 }
 0x505   : > { %v4566_v48 = vpop.f32.mrf.mxu0  ;;  %v5265_v62 = vpop.f32.mrf.mxu3  ;;  %v5170_v24 = vrot.slane %v720_v42, 4 }
 0x506   : > { %v4652_v9 = vadd.f32 %v4566_v48, %v10235_v30  ;;  %v5353_v14 = vadd.f32 %v5265_v62, %v5083_v51  ;;  %v721_v30 = vld [vmem:[#allocation2 + $0xa68] sm:$0xff] }
 0x507   : > { %v4836_v0 = vpop.f32.mrf.mxu1  ;;  %v5171_v63 = vrot.slane %v721_v30, 4  ;;  %v6415_v30 = vld [vmem:[#allocation10 + $0x190] sm:$0xff] }
 0x508   : > { %4613 = vmatmul.f32.gmra.mxu0 %v4467_v56  ;;  %5045 = vmatmul.f32.gmra.mxu2 %v712_v12  ;;  %5385 = vst [vmem:[%s9109_s17 + $0x90] sm:$0xff] %v5353_v14  ;;  %v5416_v46 = vadd.f32 %v5415_v16, %v5353_v14  ;;  %v5454_v7 = vmul.f32 %v5353_v14, %v5353_v14  ;;  %v4739_v12 = vrot.slane %v718_v29, 4  ;;  %v630_v56 = vld [vmem:[#allocation2 + $0x770] sm:$0xff] }
 0x509   : > { %v4922_v61 = vadd.f32 %v4836_v0, %v4652_v9  ;;  %v4470_v16 = vsel %vm3425_vm2, %v4468_v58, %v4469_v5  ;;  %v5172_v14 = vsel %vm3425_vm2, %v5170_v24, %v5171_v63  ;;  %v6125_v58 = vld [vmem:[#allocation10 + $0x110] sm:$0xff]  ;;  %6442 = vmatpush.msrb.mxu3 %v6415_v30 }
 0x50a   : > { %4883 = vmatmul.f32.gmra.mxu1 %v4737_v35  ;;  %v5485_v15 = vadd.f32 %v5484_v19, %v5454_v7  ;;  %5315 = vmatmul.f32.gmra.mxu3 %v5169_v50  ;;  %v4740_v19 = vsel %vm3425_vm2, %v4738_v13, %v4739_v12  ;;  %v4471_v50 = vrot.slane %v630_v56, 4  ;;  %v5823_v13 = vld [vmem:[#allocation10 + $0x90] sm:$0xff] }
 0x50b   : > { %v4998_v40 = vpop.f32.mrf.mxu2  ;;  %6152 = vmatpush.msrb.mxu2 %v6125_v58  ;;  %5850 = vmatpush.msrb.mxu1 %v5823_v13  ;;  %v726_v56 = vld [vmem:[#allocation2 + $0xa90] sm:$0xff] }
 0x50c   : > { %v5084_v53 = vadd.f32 %v4998_v40, %v4922_v61  ;;  %v5173_v40 = vrot.slane %v722_v49, 4  ;;  %v4744_v49 = vrot.slane %v726_v56, 4  ;;  %v730_v13 = vld [vmem:[#allocation2 + $0xab0] sm:$0xff] }
 0x50d   : > { %v4569_v51 = vpop.f32.mrf.mxu0  ;;  %v5268_v48 = vpop.f32.mrf.mxu3 }
 0x50e   : > { %v4653_v32 = vadd.f32 %v4569_v51, %v10241_v45  ;;  %v5354_v62 = vadd.f32 %v5268_v48, %v5084_v53  ;;  %v725_v48 = vld [vmem:[#allocation2 + $0xa88] sm:$0xff] }
 0x50f   : > { %v4839_v9 = vpop.f32.mrf.mxu1 }
 0x510   : > { %4616 = vmatmul.f32.gmra.mxu0 %v4470_v16  ;;  %5048 = vmatmul.f32.gmra.mxu2 %v719_v41  ;;  %5386 = vst [vmem:[%s9109_s17 + $0xb0] sm:$0xff] %v5354_v62  ;;  %v5417_v0 = vadd.f32 %v5416_v46, %v5354_v62  ;;  %v5455_v35 = vmul.f32 %v5354_v62, %v5354_v62 }
 0x511   : > { %v4923_v29 = vadd.f32 %v4839_v9, %v4653_v32  ;;  %v4472_v46 = vsel %vm3425_vm2, %v4469_v5, %v4471_v50  ;;  %v4742_v41 = vsel %vm3425_vm2, %v4739_v12, %v4741_v43  ;;  %v5174_v32 = vsel %vm3425_vm2, %v5171_v63, %v5173_v40  ;;  %v729_v5 = vld [vmem:[#allocation2 + $0xaa8] sm:$0xff]  ;;  %v727_v63 = vld [vmem:[#allocation2 + $0xa98] sm:$0xff] }
 0x512   : > { %4886 = vmatmul.f32.gmra.mxu1 %v4740_v19  ;;  %v5486_v7 = vadd.f32 %v5485_v15, %v5455_v35  ;;  %5318 = vmatmul.f32.gmra.mxu3 %v5172_v14  ;;  %v728_v19 = vld [vmem:[#allocation2 + $0xaa0] sm:$0xff]  ;;  %v4743_v50 = vrot.slane %v725_v48, 4 }
 0x513   : > { %v5001_v45 = vpop.f32.mrf.mxu2 }
 0x514   : > { %v5085_v61 = vadd.f32 %v5001_v45, %v4923_v29  ;;  %v5175_v29 = vrot.slane %v728_v19, 4  ;;  %v4745_v30 = vsel %vm3425_vm2, %v4743_v50, %v4744_v49  ;;  %v734_v50 = vld [vmem:[#allocation2 + $0xad0] sm:$0xff] }
 0x515   : > { %v4572_v53 = vpop.f32.mrf.mxu0  ;;  %v5271_v15 = vpop.f32.mrf.mxu3 }
 0x516   : > { %v4654_v24 = vadd.f32 %v4572_v53, %v10248_v39  ;;  %v5355_v51 = vadd.f32 %v5271_v15, %v5085_v61  ;;  %v6124_v15 = vld [vmem:[#allocation10 + $0x108] sm:$0xff] }
 0x517   : > { %v4842_v16 = vpop.f32.mrf.mxu1  ;;  %6153 = vmatpush.msrb.mxu2 %v6124_v15  ;;  %v738_v15 = vld [vmem:[#allocation2 + $0xaf0] sm:$0xff] }
 0x518   : > { %4619 = vmatmul.f32.gmra.mxu0 %v4472_v46  ;;  %5051 = vmatmul.f32.gmra.mxu2 %v720_v42  ;;  %5387 = vst [vmem:[%s9109_s17 + $0xd0] sm:$0xff] %v5355_v51  ;;  %v5418_v62 = vadd.f32 %v5417_v0, %v5355_v51  ;;  %v5456_v9 = vmul.f32 %v5355_v51, %v5355_v51  ;;  %v5176_v42 = vrot.slane %v729_v5, 4  ;;  %v5660_v51 = vld [vmem:[#allocation10 + $0x8] sm:$0xff] }
 0x519   : > { %v4924_v14 = vadd.f32 %v4842_v16, %v4654_v24  ;;  %v4746_v24 = vrot.slane %v727_v63, 4  ;;  %v6414_v16 = vld [vmem:[#allocation10 + $0x188] sm:$0xff]  ;;  %5689 = vmatpush.msrb.mxu0 %v5660_v51 }
 0x51a   : > { %4889 = vmatmul.f32.gmra.mxu1 %v4742_v41  ;;  %v5487_v35 = vadd.f32 %v5486_v7, %v5456_v9  ;;  %5321 = vmatmul.f32.gmra.mxu3 %v5174_v32  ;;  %v5177_v7 = vsel %vm3425_vm2, %v5175_v29, %v5176_v42  ;;  %v5178_v32 = vrot.slane %v730_v13, 4 }
 0x51b   : > { %v5004_v39 = vpop.f32.mrf.mxu2  ;;  %6443 = vmatpush.msrb.mxu3 %v6414_v16 }
 0x51c   : > { %v5086_v12 = vadd.f32 %v5004_v39, %v4924_v14  ;;  %v4747_v14 = vsel %vm3425_vm2, %v4744_v49, %v4746_v24  ;;  %v733_v39 = vld [vmem:[#allocation2 + $0xac8] sm:$0xff]  ;;  %v4749_v49 = vrot.slane %v734_v50, 4 }
 0x51d   : > { %v4575_v43 = vpop.f32.mrf.mxu0  ;;  %v5274_v58 = vpop.f32.mrf.mxu3 }
 0x51e   : > { %v4655_v45 = vadd.f32 %v4575_v43, %v10263_v18  ;;  %v5356_v0 = vadd.f32 %v5274_v58, %v5086_v12  ;;  %v736_v43 = vld [vmem:[#allocation2 + $0xae0] sm:$0xff] }
 0x51f   : > { %v4845_v38 = vpop.f32.mrf.mxu1 }
 0x520   : > { %4622 = vmatmul.f32.gmra.mxu0 %v10358_v36  ;;  %5054 = vmatmul.f32.gmra.mxu2 %v727_v63  ;;  %5388 = vst [vmem:[%s9109_s17 + $0xf0] sm:$0xff] %v5356_v0  ;;  %v5419_v61 = vadd.f32 %v5418_v62, %v5356_v0  ;;  %v5457_v40 = vmul.f32 %v5356_v0, %v5356_v0  ;;  %v5822_v36 = vld [vmem:[#allocation10 + $0x88] sm:$0xff]  ;;  %v4748_v0 = vrot.slane %v733_v39, 4 }
 0x521   : > { %v4925_v53 = vadd.f32 %v4845_v38, %v4655_v45  ;;  %5851 = vmatpush.msrb.mxu1 %v5822_v36  ;;  %v737_v63 = vld [vmem:[#allocation2 + $0xae8] sm:$0xff]  ;;  %v5659_v36 = vld [vmem:[#allocation10] sm:$0xff] }
 0x522   : > { %4892 = vmatmul.f32.gmra.mxu1 %v4745_v30  ;;  %v5488_v46 = vadd.f32 %v5487_v35, %v5457_v40  ;;  %5324 = vmatmul.f32.gmra.mxu3 %v5177_v7  ;;  %v5179_v35 = vsel %vm3425_vm2, %v5176_v42, %v5178_v32  ;;  %v735_v42 = vld [vmem:[#allocation2 + $0xad8] sm:$0xff]  ;;  %v6123_v32 = vld [vmem:[#allocation10 + $0x100] sm:$0xff] }
 0x523   : > { %v5007_v18 = vpop.f32.mrf.mxu2  ;;  %6154 = vmatpush.msrb.mxu2 %v6123_v32  ;;  %5690 = vmatpush.msrb.mxu0 %v5659_v36  ;;  %v7182_v32 = vld [vmem:[#allocation10 + $0x378] sm:$0xff] }
 0x524   : > { %v5087_v41 = vadd.f32 %v5007_v18, %v4925_v53  ;;  %v4750_v53 = vsel %vm3425_vm2, %v4748_v0, %v4749_v49  ;;  %v745_v0 = vld [vmem:[#allocation2 + $0xb28] sm:$0xff]  ;;  %v6718_v36 = vld [vmem:[#allocation10 + $0x278] sm:$0xff] }
 0x525   : > { %v4578_v48 = vpop.f32.mrf.mxu0  ;;  %v5277_v62 = vpop.f32.mrf.mxu3  ;;  %7183 = vmatpush.msra.mxu2 %v7182_v32  ;;  %6719 = vmatpush.msra.mxu0 %v6718_v36 }
 0x526   : > { %v4656_v56 = vadd.f32 %v4578_v48, %v10275_v17  ;;  %v5357_v9 = vadd.f32 %v5277_v62, %v5087_v41  ;;  %v4751_v41 = vrot.slane %v735_v42, 4  ;;  %v6413_v48 = vld [vmem:[#allocation10 + $0x180] sm:$0xff]  ;;  %v5183_v62 = vrot.slane %v738_v15, 4 }
 0x527   : > { %v4848_v5 = vpop.f32.mrf.mxu1  ;;  %6444 = vmatpush.msrb.mxu3 %v6413_v48  ;;  %v7484_v48 = vld [vmem:[#allocation10 + $0x3f8] sm:$0xff] }
 0x528   : > { %4625 = vmatmul.f32.gmra.mxu0 %v10367_v52  ;;  %5057 = vmatmul.f32.gmra.mxu2 %v728_v19  ;;  %5389 = vst [vmem:[%s9109_s17 + $0x110] sm:$0xff] %v5357_v9  ;;  %v5420_v12 = vadd.f32 %v5419_v61, %v5357_v9  ;;  %v5458_v29 = vmul.f32 %v5357_v9, %v5357_v9  ;;  %v5180_v52 = vrot.slane %v736_v43, 4  ;;  %v5181_v19 = vrot.slane %v737_v63, 4  ;;  %v742_v63 = vld [vmem:[#allocation2 + $0xb10] sm:$0xff] }
 0x529   : > { %v4926_v45 = vadd.f32 %v4848_v5, %v4656_v56  ;;  %v4752_v50 = vsel %vm3425_vm2, %v4749_v49, %v4751_v41  ;;  %v4754_v49 = vrot.slane %v742_v63, 4  ;;  %7485 = vmatpush.msra.mxu3 %v7484_v48  ;;  %v396_v48 = vld [vmem:[#allocation2] sm:$0xff] }
 0x52a   : > { %4895 = vmatmul.f32.gmra.mxu1 %v4747_v14  ;;  %v5489_v17 = vadd.f32 %v5488_v46, %v5458_v29  ;;  %5327 = vmatmul.f32.gmra.mxu3 %v5179_v35  ;;  %v5182_v46 = vsel %vm3425_vm2, %v5180_v52, %v5181_v19  ;;  %v741_v29 = vld [vmem:[#allocation2 + $0xb08] sm:$0xff] }
 0x52b   : > { %v5010_v58 = vpop.f32.mrf.mxu2 }
 0x52c   : > { %v5088_v38 = vadd.f32 %v5010_v58, %v4926_v45  ;;  %v744_v58 = vld [vmem:[#allocation2 + $0xb20] sm:$0xff] }
 0x52d   : > { %v4581_v30 = vpop.f32.mrf.mxu0  ;;  %v5280_v40 = vpop.f32.mrf.mxu3 }
 0x52e   : > { %v4657_v7 = vadd.f32 %v4581_v30, %v10290_v60  ;;  %v5358_v61 = vadd.f32 %v5280_v40, %v5088_v38  ;;  %v4753_v30 = vrot.slane %v741_v29, 4  ;;  %v750_v29 = vld [vmem:[#allocation2 + $0xb50] sm:$0xff] }
 0x52f   : > { %v4851_v13 = vpop.f32.mrf.mxu1 }
 0x530   : > { %4628 = vmatmul.f32.gmra.mxu0 %v10377_v6  ;;  %5060 = vmatmul.f32.gmra.mxu2 %v735_v42  ;;  %5390 = vst [vmem:[%s9109_s17 + $0x130] sm:$0xff] %v5358_v61  ;;  %v5421_v24 = vadd.f32 %v5420_v12, %v5358_v61  ;;  %v5459_v18 = vmul.f32 %v5358_v61, %v5358_v61  ;;  %v5821_v6 = vld [vmem:[#allocation10 + $0x80] sm:$0xff] }
 0x531   : > { %v4927_v51 = vadd.f32 %v4851_v13, %v4657_v7  ;;  %5852 = vmatpush.msrb.mxu1 %v5821_v6  ;;  %v5184_v12 = vsel %vm3425_vm2, %v5181_v19, %v5183_v62  ;;  %v743_v19 = vld [vmem:[#allocation2 + $0xb18] sm:$0xff] }
 0x532   : > { %4898 = vmatmul.f32.gmra.mxu1 %v4750_v53  ;;  %v5490_v16 = vadd.f32 %v5489_v17, %v5459_v18  ;;  %5330 = vmatmul.f32.gmra.mxu3 %v5182_v46  ;;  %v4755_v46 = vsel %vm3425_vm2, %v4753_v30, %v4754_v49  ;;  %v4759_v30 = vrot.slane %v750_v29, 4 }
 0x533   : > { %v5013_v60 = vpop.f32.mrf.mxu2 }
 0x534   : > { %v5089_v56 = vadd.f32 %v5013_v60, %v4927_v51  ;;  %v746_v51 = vld [vmem:[#allocation2 + $0xb30] sm:$0xff]  ;;  %v4756_v60 = vrot.slane %v743_v19, 4 }
 0x535   : > { %v4584_v9 = vpop.f32.mrf.mxu0  ;;  %v5283_v14 = vpop.f32.mrf.mxu3  ;;  %v5188_v62 = vrot.slane %v746_v51, 4 }
 0x536   : > { %v4658_v5 = vadd.f32 %v4584_v9, %v10302_v8  ;;  %v5359_v35 = vadd.f32 %v5283_v14, %v5089_v56 }
 0x537   : > { %v4854_v39 = vpop.f32.mrf.mxu1 }
 0x538   : > { %4631 = vmatmul.f32.gmra.mxu0 %v10386_v59  ;;  %5063 = vmatmul.f32.gmra.mxu2 %v736_v43  ;;  %5391 = vst [vmem:[%s9109_s17 + $0x150] sm:$0xff] %v5359_v35  ;;  %v5422_v45 = vadd.f32 %v5421_v24, %v5359_v35  ;;  %v5460_v17 = vmul.f32 %v5359_v35, %v5359_v35  ;;  %v5185_v59 = vrot.slane %v744_v58, 4  ;;  %v5186_v43 = vrot.slane %v745_v0, 4  ;;  %v753_v0 = vld [vmem:[#allocation2 + $0xb68] sm:$0xff] }
 0x539   : > { %v4928_v38 = vadd.f32 %v4854_v39, %v4658_v5  ;;  %v4757_v39 = vsel %vm3425_vm2, %v4754_v49, %v4756_v60  ;;  %v7483_v60 = vld [vmem:[#allocation10 + $0x3f0] sm:$0xff] }
 0x53a   : > { %4901 = vmatmul.f32.gmra.mxu1 %v4752_v50  ;;  %v5491_v8 = vadd.f32 %v5490_v16, %v5460_v17  ;;  %5333 = vmatmul.f32.gmra.mxu3 %v5184_v12  ;;  %v5187_v24 = vsel %vm3425_vm2, %v5185_v59, %v5186_v43  ;;  %v5189_v50 = vsel %vm3425_vm2, %v5186_v43, %v5188_v62  ;;  %v749_v12 = vld [vmem:[#allocation2 + $0xb48] sm:$0xff]  ;;  %v752_v17 = vld [vmem:[#allocation2 + $0xb60] sm:$0xff]  ;;  %v751_v59 = vld [vmem:[#allocation2 + $0xb58] sm:$0xff] }
 0x53b   : > { %v5016_v52 = vpop.f32.mrf.mxu2  ;;  %v4761_v51 = vrot.slane %v751_v59, 4  ;;  %7486 = vmatpush.msra.mxu3 %v7483_v60 }
 0x53c   : > { %v5090_v42 = vadd.f32 %v5016_v52, %v4928_v38  ;;  %v4758_v52 = vrot.slane %v749_v12, 4 }
 0x53d   : > { %v4587_v7 = vpop.f32.mrf.mxu0  ;;  %v5286_v61 = vpop.f32.mrf.mxu3 }
 0x53e   : > { %v4659_v40 = vadd.f32 %v4587_v7, %v10317_v25  ;;  %v5360_v13 = vadd.f32 %v5286_v61, %v5090_v42  ;;  %v4760_v61 = vsel %vm3425_vm2, %v4758_v52, %v4759_v30 }
 0x53f   : > { %v4857_v53 = vpop.f32.mrf.mxu1 }
 0x540   : > { %4634 = vmatmul.f32.gmra.mxu0 %v10396_v23  ;;  %5066 = vmatmul.f32.gmra.mxu2 %v743_v19  ;;  %5392 = vst [vmem:[%s9109_s17 + $0x170] sm:$0xff] %v5360_v13  ;;  %v5423_v18 = vadd.f32 %v5422_v45, %v5360_v13  ;;  %v5461_v15 = vmul.f32 %v5360_v13, %v5360_v13  ;;  %v7020_v23 = vld [vmem:[#allocation10 + $0x2f8] sm:$0xff] }
 0x541   : > { %v4929_v16 = vadd.f32 %v4857_v53, %v4659_v40  ;;  %7021 = vmatpush.msra.mxu1 %v7020_v23 }
 0x542   : > { %4904 = vmatmul.f32.gmra.mxu1 %v4755_v46  ;;  %v5492_v41 = vadd.f32 %v5491_v8, %v5461_v15  ;;  %5336 = vmatmul.f32.gmra.mxu3 %v5187_v24  ;;  %v754_v24 = vld [vmem:[#allocation2 + $0xb70] sm:$0xff] }
 0x543   : > { %v5019_v25 = vpop.f32.mrf.mxu2  ;;  %v5193_v32 = vrot.slane %v754_v24, 4 }
 0x544   : > { %v5091_v56 = vadd.f32 %v5019_v25, %v4929_v16  ;;  %v7181_v16 = vld [vmem:[#allocation10 + $0x370] sm:$0xff] }
 0x545   : > { %v4590_v6 = vpop.f32.mrf.mxu0  ;;  %v5289_v5 = vpop.f32.mrf.mxu3  ;;  %7184 = vmatpush.msra.mxu2 %v7181_v16  ;;  %v6716_v16 = vld [vmem:[#allocation10 + $0x268] sm:$0xff] }
 0x546   : > { %v4660_v9 = vadd.f32 %v4590_v6, %v10329_v44  ;;  %v5361_v14 = vadd.f32 %v5289_v5, %v5091_v56  ;;  %v10552_v56 = vld [vmem:[#allocation2 + $0x8] sm:$0xff] }
 0x547   : > { %v4860_v35 = vpop.f32.mrf.mxu1  ;;  %v401_v6 = vld [vmem:[#allocation2 + $0x28] sm:$0xff]  ;;  %v5548_v12 = vrot.slane %v10552_v56, 6 }
 0x548   : > { %4637 = vmatmul.f32.gmra.mxu0 %v10405_v55  ;;  %5069 = vmatmul.f32.gmra.mxu2 %v744_v58  ;;  %5393 = vst [vmem:[%s9109_s17 + $0x190] sm:$0xff] %v5361_v14  ;;  %v5424_v63 = vadd.f32 %v5423_v18, %v5361_v14  ;;  %v5462_v45 = vmul.f32 %v5361_v14, %v5361_v14  ;;  %v5190_v55 = vrot.slane %v752_v17, 4  ;;  %v5191_v58 = vrot.slane %v753_v0, 4  ;;  %v536_v0 = vld [vmem:[#allocation2 + $0x480] sm:$0xff] }
 0x549   : > { %v4930_v38 = vadd.f32 %v4860_v35, %v4660_v9  ;;  %v402_v9 = vld [vmem:[#allocation2 + $0x30] sm:$0xff]  ;;  %v4762_v35 = vsel %vm3425_vm2, %v4759_v30, %v4761_v51  ;;  %v6300_v30 = vrot.slane %v536_v0, 6 }
 0x54a   : > { %4907 = vmatmul.f32.gmra.mxu1 %v4757_v39  ;;  %v5493_v44 = vadd.f32 %v5492_v41, %v5462_v45  ;;  %5339 = vmatmul.f32.gmra.mxu3 %v5189_v50  ;;  %v5192_v13 = vsel %vm3425_vm2, %v5190_v55, %v5191_v58  ;;  %v6717_v41 = vld [vmem:[#allocation10 + $0x270] sm:$0xff]  ;;  %v5194_v39 = vsel %vm3425_vm2, %v5191_v58, %v5193_v32  ;;  %v5547_v50 = vrot.slane %v396_v48, 6 }
 0x54b   : > { %v5022_v8 = vpop.f32.mrf.mxu2  ;;  %6720 = vmatpush.msra.mxu0 %v6717_v41  ;;  %v6010_v45 = vrot.slane %v401_v6, 2  ;;  %v7482_v41 = vld [vmem:[#allocation10 + $0x3e8] sm:$0xff] }
 0x54c   : > { %v5092_v49 = vadd.f32 %v5022_v8, %v4930_v38  ;;  %v5549_v55 = vsel %vm1958_vm1, %v5547_v50, %v5548_v12  ;;  %7487 = vmatpush.msra.mxu3 %v7482_v41  ;;  %v400_v50 = vld [vmem:[#allocation2 + $0x20] sm:$0xff] }
 0x54d   : > { %v4593_v42 = vpop.f32.mrf.mxu0  ;;  %v5292_v7 = vpop.f32.mrf.mxu3  ;;  %6721 = vmatpush.msra.mxu0 %v6716_v16  ;;  %v6715_v16 = vld [vmem:[#allocation10 + $0x260] sm:$0xff] }
 0x54e   : > { %v4661_v43 = vadd.f32 %v4593_v42, %v10344_v22  ;;  %v5362_v19 = vadd.f32 %v5292_v7, %v5092_v49  ;;  %v403_v7 = vld [vmem:[#allocation2 + $0x38] sm:$0xff]  ;;  %v7481_v41 = vld [vmem:[#allocation10 + $0x3e0] sm:$0xff] }
 0x54f   : > { %v4863_v40 = vpop.f32.mrf.mxu1  ;;  %6722 = vmatpush.msra.mxu0 %v6715_v16  ;;  %7488 = vmatpush.msra.mxu3 %v7481_v41  ;;  %v8362_v41 = vld [vmem:[#allocation2 + $0x510] sm:$0xff] }
 0x550   : > { %4640 = vmatmul.f32.gmra.mxu0 %v10415_v57  ;;  %5072 = vmatmul.f32.gmra.mxu2 %v751_v59  ;;  %5394 = vst [vmem:[%s9109_s17 + $0x1b0] sm:$0xff] %v5362_v19  ;;  %v5425_v53 = vadd.f32 %v5424_v63, %v5362_v19  ;;  %v5463_v46 = vmul.f32 %v5362_v19, %v5362_v19  ;;  %v7019_v57 = vld [vmem:[#allocation10 + $0x2f0] sm:$0xff] }
 0x551   : > { %v4931_v18 = vadd.f32 %v4863_v40, %v4661_v43  ;;  %7022 = vmatpush.msra.mxu1 %v7019_v57  ;;  %v398_v43 = vld [vmem:[#allocation2 + $0x10] sm:$0xff]  ;;  %v7018_v57 = vld [vmem:[#allocation10 + $0x2e8] sm:$0xff] }
 0x552   : > { %4910 = vmatmul.f32.gmra.mxu1 %v4760_v61  ;;  %v5494_v15 = vadd.f32 %v5493_v44, %v5463_v46  ;;  %5342 = vmatmul.f32.gmra.mxu3 %v5192_v13  ;;  %v399_v61 = vld [vmem:[#allocation2 + $0x18] sm:$0xff]  ;;  %v5550_v24 = vrot.slane %v398_v43, 6 }
 0x553   : > { %v5025_v22 = vpop.f32.mrf.mxu2  ;;  %7023 = vmatpush.msra.mxu1 %v7018_v57  ;;  %v7017_v57 = vld [vmem:[#allocation10 + $0x2e0] sm:$0xff] }
 0x554   : > { %v5093_v25 = vadd.f32 %v5025_v22, %v4931_v18  ;;  %v6013_v18 = vrot.slane %v403_v7, 2  ;;  %v7180_v22 = vld [vmem:[#allocation10 + $0x368] sm:$0xff]  ;;  %v5551_v48 = vsel %vm1958_vm1, %v5548_v12, %v5550_v24  ;;  %v406_v7 = vld [vmem:[#allocation2 + $0x50] sm:$0xff] }
 0x555   : > { %v4596_v36 = vpop.f32.mrf.mxu0  ;;  %v5295_v23 = vpop.f32.mrf.mxu3  ;;  %7185 = vmatpush.msra.mxu2 %v7180_v22  ;;  %v7179_v22 = vld [vmem:[#allocation10 + $0x360] sm:$0xff]  ;;  %7024 = vmatpush.msra.mxu1 %v7017_v57 }
 0x556   : > { %v4662_v62 = vadd.f32 %v4596_v36, %v10353_v21  ;;  %v5363_v5 = vadd.f32 %v5295_v23, %v5093_v25  ;;  %v6011_v21 = vrot.slane %v402_v9, 2  ;;  %v8358_v25 = vld [vmem:[#allocation2 + $0x490] sm:$0xff]  ;;  %v10567_v23 = vld [vmem:[#allocation2 + $0x48] sm:$0xff] }
 0x557   : > { %v4866_v14 = vpop.f32.mrf.mxu1  ;;  %v6303_v32 = vrot.slane %v8358_v25, 6  ;;  %v8360_v25 = vld [vmem:[#allocation2 + $0x4d0] sm:$0xff]  ;;  %7186 = vmatpush.msra.mxu2 %v7179_v22  ;;  %v7480_v22 = vld [vmem:[#allocation10 + $0x3d8] sm:$0xff] }
 0x558   : > { %4643 = vmatmul.f32.gmra.mxu0 %v10424_v37  ;;  %5075 = vmatmul.f32.gmra.mxu2 %v752_v17  ;;  %5395 = vst [vmem:[%s9109_s17 + $0x1d0] sm:$0xff] %v5363_v5  ;;  %v5426_v29 = vadd.f32 %v5425_v53, %v5363_v5  ;;  %v5464_v63 = vmul.f32 %v5363_v5, %v5363_v5  ;;  %v8357_v37 = vld [vmem:[#allocation2 + $0x488] sm:$0xff] }
 0x559   : > { %v4932_v38 = vadd.f32 %v4866_v14, %v4662_v62  ;;  %v6301_v17 = vrot.slane %v8357_v37, 6  ;;  %v6012_v58 = vsel %vm1506_vm0, %v6010_v45, %v6011_v21  ;;  %v6014_v56 = vsel %vm1506_vm0, %v6011_v21, %v6013_v18  ;;  %v404_v62 = vld [vmem:[#allocation2 + $0x40] sm:$0xff]  ;;  %v409_v5 = vld [vmem:[#allocation2 + $0x68] sm:$0xff]  ;;  %v410_v14 = vld [vmem:[#allocation2 + $0x70] sm:$0xff]  ;;  %7489 = vmatpush.msra.mxu3 %v7480_v22 }
 0x55a   : > { %4913 = vmatmul.f32.gmra.mxu1 %v4762_v35  ;;  %v5495_v44 = vadd.f32 %v5494_v15, %v5464_v63  ;;  %5345 = vmatmul.f32.gmra.mxu3 %v5194_v39  ;;  %v5553_v63 = vrot.slane %v10567_v23, 6  ;;  %v6015_v0 = vrot.slane %v409_v5, 2  ;;  %v5555_v18 = vrot.slane %v406_v7, 6  ;;  %v10580_v23 = vld [vmem:[#allocation2 + $0x88] sm:$0xff]  ;;  %v419_v7 = vld [vmem:[#allocation2 + $0xb8] sm:$0xff]  ;;  %v7015_v22 = vld [vmem:[#allocation10 + $0x2d0] sm:$0xff] }
 0x55b   : > { %v5028_v8 = vpop.f32.mrf.mxu2  ;;  %v6302_v13 = vsel %vm1958_vm1, %v6300_v30, %v6301_v17  ;;  %v6304_v12 = vsel %vm1958_vm1, %v6301_v17, %v6303_v32  ;;  %v6308_v32 = vrot.slane %v8360_v25, 6  ;;  %v417_v5 = vld [vmem:[#allocation2 + $0xa8] sm:$0xff]  ;;  %v7016_v25 = vld [vmem:[#allocation10 + $0x2d8] sm:$0xff] }
 0x55c   : > { %v5094_v52 = vadd.f32 %v5028_v8, %v4932_v38  ;;  %v6016_v38 = vrot.slane %v410_v14, 2  ;;  %v418_v14 = vld [vmem:[#allocation2 + $0xb0] sm:$0xff]  ;;  %7025 = vmatpush.msra.mxu1 %v7016_v25  ;;  %v428_v25 = vld [vmem:[#allocation2 + $0x100] sm:$0xff] }
 0x55d   : > { %v4599_v49 = vpop.f32.mrf.mxu0  ;;  %v5298_v59 = vpop.f32.mrf.mxu3 }
 0x55e   : > { %v4663_v42 = vadd.f32 %v4599_v49, %v10363_v20  ;;  %v5364_v19 = vadd.f32 %v5298_v59, %v5094_v52  ;;  %v8359_v49 = vld [vmem:[#allocation2 + $0x4c8] sm:$0xff]  ;;  %7026 = vmatpush.msra.mxu1 %v7015_v22 }
 0x55f   : > { %v4869_v40 = vpop.f32.mrf.mxu1 }
 0x560   : > { %5691 = vmatmul.f32.vlgmr.msrb.gmra.mxu0 %v5549_v55  ;;  %6155 = vmatmul.f32.vlgmr.msrb.gmra.mxu2 %v6012_v58  ;;  %5396 = vst [vmem:[%s9109_s17 + $0x1f0] sm:$0xff] %v5364_v19  ;;  %v5427_v53 = vadd.f32 %v5426_v29, %v5364_v19  ;;  %v5465_v46 = vmul.f32 %v5364_v19, %v5364_v19  ;;  %v5552_v29 = vrot.slane %v404_v62, 6  ;;  %v6306_v55 = vrot.slane %v8359_v49, 6  ;;  %v411_v19 = vld [vmem:[#allocation2 + $0x78] sm:$0xff]  ;;  %v412_v62 = vld [vmem:[#allocation2 + $0x80] sm:$0xff] }
 0x561   : > { %v4933_v15 = vadd.f32 %v4869_v40, %v4663_v42  ;;  %v6017_v42 = vsel %vm1506_vm0, %v6015_v0, %v6016_v38  ;;  %v6020_v0 = vrot.slane %v417_v5, 2 }
 0x562   : > { %5853 = vmatmul.f32.vlgmr.msrb.gmra.mxu1 %v399_v61  ;;  %v5496_v51 = vadd.f32 %v5495_v44, %v5465_v46  ;;  %6445 = vmatmul.f32.vlgmr.msrb.gmra.mxu3 %v6302_v13  ;;  %v544_v44 = vld [vmem:[#allocation2 + $0x4c0] sm:$0xff]  ;;  %v5554_v58 = vsel %vm1958_vm1, %v5552_v29, %v5553_v63  ;;  %v407_v13 = vld [vmem:[#allocation2 + $0x58] sm:$0xff]  ;;  %v5557_v29 = vrot.slane %v412_v62, 6 }
 0x563   : > { %v5031_v20 = vpop.f32.mrf.mxu2  ;;  %v6305_v37 = vrot.slane %v544_v44, 6  ;;  %v552_v44 = vld [vmem:[#allocation2 + $0x500] sm:$0xff] }
 0x564   : > { %v5095_v60 = vadd.f32 %v5031_v20, %v4933_v15  ;;  %v6018_v15 = vrot.slane %v411_v19, 2 }
 0x565   : > { %v4602_v36 = vpop.f32.mrf.mxu0  ;;  %v5301_v9 = vpop.f32.mrf.mxu3 }
 0x566   : > { %v4664_v6 = vadd.f32 %v4602_v36, %v10372_v4  ;;  %v5365_v35 = vadd.f32 %v5301_v9, %v5095_v60 }
 0x567   : > { %v4872_v39 = vpop.f32.mrf.mxu1 }
 0x568   : > { %5694 = vmatmul.f32.gmra.mxu0 %v5551_v48  ;;  %6158 = vmatmul.f32.gmra.mxu2 %v6014_v56  ;;  %5397 = vst [vmem:[%s9109_s17 + $0x210] sm:$0xff] %v5365_v35  ;;  %v5428_v45 = vadd.f32 %v5427_v53, %v5365_v35  ;;  %v5466_v21 = vmul.f32 %v5365_v35, %v5365_v35 }
 0x569   : > { %v4934_v4 = vadd.f32 %v4872_v39, %v4664_v6  ;;  %v6307_v53 = vsel %vm1958_vm1, %v6305_v37, %v6306_v55  ;;  %v5556_v48 = vsel %vm1958_vm1, %v5553_v63, %v5555_v18  ;;  %v6019_v56 = vsel %vm1506_vm0, %v6016_v38, %v6018_v15  ;;  %v8361_v37 = vld [vmem:[#allocation2 + $0x508] sm:$0xff] }
 0x56a   : > { %5856 = vmatmul.f32.gmra.mxu1 %v400_v50  ;;  %v5497_v8 = vadd.f32 %v5496_v51, %v5466_v21  ;;  %6448 = vmatmul.f32.gmra.mxu3 %v6304_v12  ;;  %v408_v50 = vld [vmem:[#allocation2 + $0x60] sm:$0xff]  ;;  %v6309_v12 = vsel %vm1958_vm1, %v6306_v55, %v6308_v32  ;;  %v5558_v63 = vrot.slane %v10580_v23, 6  ;;  %v6021_v38 = vrot.slane %v418_v14, 2 }
 0x56b   : > { %v5034_v52 = vpop.f32.mrf.mxu2  ;;  %v6311_v49 = vrot.slane %v8361_v37, 6  ;;  %v6023_v18 = vrot.slane %v419_v7, 2  ;;  %v423_v7 = vld [vmem:[#allocation2 + $0xd8] sm:$0xff] }
 0x56c   : > { %v5096_v30 = vadd.f32 %v5034_v52, %v4934_v4 }
 0x56d   : > { %v4605_v17 = vpop.f32.mrf.mxu0  ;;  %v5304_v43 = vpop.f32.mrf.mxu3 }
 0x56e   : > { %v4665_v59 = vadd.f32 %v4605_v17, %v10382_v2  ;;  %v5366_v40 = vadd.f32 %v5304_v43, %v5096_v30  ;;  %v6310_v30 = vrot.slane %v552_v44, 6  ;;  %v5559_v17 = vsel %vm1958_vm1, %v5557_v29, %v5558_v63  ;;  %v414_v43 = vld [vmem:[#allocation2 + $0x90] sm:$0xff] }
 0x56f   : > { %v4875_v61 = vpop.f32.mrf.mxu1 }
 0x570   : > { %5697 = vmatmul.f32.gmra.mxu0 %v5554_v58  ;;  %6161 = vmatmul.f32.gmra.mxu2 %v6017_v42  ;;  %5398 = vst [vmem:[%s9109_s17 + $0x230] sm:$0xff] %v5366_v40  ;;  %v5429_v46 = vadd.f32 %v5428_v45, %v5366_v40  ;;  %v5467_v24 = vmul.f32 %v5366_v40, %v5366_v40 }
 0x571   : > { %v4935_v51 = vadd.f32 %v4875_v61, %v4665_v59  ;;  %v6022_v58 = vsel %vm1506_vm0, %v6020_v0, %v6021_v38  ;;  %v415_v61 = vld [vmem:[#allocation2 + $0x98] sm:$0xff]  ;;  %v560_v0 = vld [vmem:[#allocation2 + $0x540] sm:$0xff] }
 0x572   : > { %5859 = vmatmul.f32.gmra.mxu1 %v407_v13  ;;  %v5498_v20 = vadd.f32 %v5497_v8, %v5467_v24  ;;  %6451 = vmatmul.f32.gmra.mxu3 %v6307_v53  ;;  %v6312_v13 = vsel %vm1958_vm1, %v6310_v30, %v6311_v49  ;;  %v5560_v24 = vrot.slane %v414_v43, 6 }
 0x573   : > { %v5037_v2 = vpop.f32.mrf.mxu2 }
 0x574   : > { %v5097_v60 = vadd.f32 %v5037_v2, %v4935_v51  ;;  %v6714_v2 = vld [vmem:[#allocation10 + $0x258] sm:$0xff]  ;;  %v5561_v57 = vsel %vm1958_vm1, %v5558_v63, %v5560_v24 }
 0x575   : > { %v4608_v36 = vpop.f32.mrf.mxu0  ;;  %v5307_v9 = vpop.f32.mrf.mxu3  ;;  %6723 = vmatpush.msra.mxu0 %v6714_v2 }
 0x576   : > { %v4666_v6 = vadd.f32 %v4608_v36, %v10391_v47  ;;  %v5367_v35 = vadd.f32 %v5307_v9, %v5097_v60  ;;  %v6313_v60 = vrot.slane %v8362_v41, 6  ;;  %v6024_v36 = vsel %vm1506_vm0, %v6021_v38, %v6023_v18  ;;  %v426_v9 = vld [vmem:[#allocation2 + $0xf0] sm:$0xff] }
 0x577   : > { %v4878_v39 = vpop.f32.mrf.mxu1  ;;  %v7177_v18 = vld [vmem:[#allocation10 + $0x350] sm:$0xff] }
 0x578   : > { %5700 = vmatmul.f32.gmra.mxu0 %v5556_v48  ;;  %6164 = vmatmul.f32.gmra.mxu2 %v6019_v56  ;;  %5399 = vst [vmem:[%s9109_s17 + $0x250] sm:$0xff] %v5367_v35  ;;  %v5430_v45 = vadd.f32 %v5429_v46, %v5367_v35  ;;  %v5468_v21 = vmul.f32 %v5367_v35, %v5367_v35  ;;  %v420_v48 = vld [vmem:[#allocation2 + $0xc0] sm:$0xff]  ;;  %v10593_v56 = vld [vmem:[#allocation2 + $0xc8] sm:$0xff] }
 0x579   : > { %v4936_v47 = vadd.f32 %v4878_v39, %v4666_v6  ;;  %v425_v6 = vld [vmem:[#allocation2 + $0xe8] sm:$0xff]  ;;  %v416_v35 = vld [vmem:[#allocation2 + $0xa0] sm:$0xff]  ;;  %v6314_v39 = vsel %vm1958_vm1, %v6311_v49, %v6313_v60 }
 0x57a   : > { %5862 = vmatmul.f32.gmra.mxu1 %v408_v50  ;;  %v5499_v4 = vadd.f32 %v5498_v20, %v5468_v21  ;;  %6454 = vmatmul.f32.gmra.mxu3 %v6309_v12  ;;  %v7178_v20 = vld [vmem:[#allocation10 + $0x358] sm:$0xff]  ;;  %v5562_v50 = vrot.slane %v420_v48, 6  ;;  %v5563_v12 = vrot.slane %v10593_v56, 6  ;;  %v6026_v21 = vrot.slane %v426_v9, 2  ;;  %v433_v48 = vld [vmem:[#allocation2 + $0x128] sm:$0xff]  ;;  %v10609_v56 = vld [vmem:[#allocation2 + $0x130] sm:$0xff] }
 0x57b   : > { %v5040_v8 = vpop.f32.mrf.mxu2  ;;  %7187 = vmatpush.msra.mxu2 %v7178_v20  ;;  %v8364_v20 = vld [vmem:[#allocation2 + $0x550] sm:$0xff]  ;;  %v8365_v9 = vld [vmem:[%s9109_s17] sm:$0xff] }
 0x57c   : > { %v5098_v52 = vadd.f32 %v5040_v8, %v4936_v47  ;;  %v8363_v8 = vld [vmem:[#allocation2 + $0x548] sm:$0xff]  ;;  %v5564_v37 = vsel %vm1958_vm1, %v5562_v50, %v5563_v12  ;;  %v6318_v2 = vrot.slane %v8364_v20, 6 }
 0x57d   : > { %v4611_v55 = vpop.f32.mrf.mxu0  ;;  %v5310_v59 = vpop.f32.mrf.mxu3  ;;  %7188 = vmatpush.msra.mxu2 %v7177_v18 }
 0x57e   : > { %v4667_v42 = vadd.f32 %v4611_v55, %v10401_v33  ;;  %v5368_v19 = vadd.f32 %v5310_v59, %v5098_v52  ;;  %v6316_v52 = vrot.slane %v8363_v8, 6 }
 0x57f   : > { %v4881_v40 = vpop.f32.mrf.mxu1 }
 0x580   : > { %5703 = vmatmul.f32.gmra.mxu0 %v5559_v17  ;;  %6167 = vmatmul.f32.gmra.mxu2 %v6022_v58  ;;  %5400 = vst [vmem:[%s9109_s17 + $0x270] sm:$0xff] %v5368_v19  ;;  %v5431_v53 = vadd.f32 %v5430_v45, %v5368_v19  ;;  %v5469_v46 = vmul.f32 %v5368_v19, %v5368_v19  ;;  %v6025_v45 = vrot.slane %v425_v6, 2  ;;  %v422_v58 = vld [vmem:[#allocation2 + $0xd0] sm:$0xff]  ;;  %v424_v6 = vld [vmem:[#allocation2 + $0xe0] sm:$0xff] }
 0x581   : > { %v4937_v15 = vadd.f32 %v4881_v40, %v4667_v42  ;;  %v427_v42 = vld [vmem:[#allocation2 + $0xf8] sm:$0xff] }
 0x582   : > { %5865 = vmatmul.f32.gmra.mxu1 %v415_v61  ;;  %v5500_v51 = vadd.f32 %v5499_v4, %v5469_v46  ;;  %6457 = vmatmul.f32.gmra.mxu3 %v6312_v13  ;;  %v6315_v4 = vrot.slane %v560_v0, 6  ;;  %v6027_v49 = vsel %vm1506_vm0, %v6025_v45, %v6026_v21  ;;  %v5565_v13 = vrot.slane %v422_v58, 6  ;;  %v568_v45 = vld [vmem:[#allocation2 + $0x580] sm:$0xff] }
 0x583   : > { %v5043_v33 = vpop.f32.mrf.mxu2  ;;  %v8370_v58 = vld [vmem:[%s9109_s17 + $0x80] sm:$0xff] }
 0x584   : > { %v5099_v16 = vadd.f32 %v5043_v33, %v4937_v15  ;;  %v6317_v19 = vsel %vm1958_vm1, %v6315_v4, %v6316_v52  ;;  %v6713_v15 = vld [vmem:[#allocation10 + $0x250] sm:$0xff]  ;;  %v5566_v41 = vsel %vm1958_vm1, %v5563_v12, %v5565_v13  ;;  %v431_v13 = vld [vmem:[#allocation2 + $0x118] sm:$0xff] }
 0x585   : > { %v4614_v32 = vpop.f32.mrf.mxu0  ;;  %v5313_v23 = vpop.f32.mrf.mxu3  ;;  %6724 = vmatpush.msra.mxu0 %v6713_v15 }
 0x586   : > { %v4668_v62 = vadd.f32 %v4614_v32, %v10410_v34  ;;  %v5369_v5 = vadd.f32 %v5313_v23, %v5099_v16  ;;  %v10606_v32 = vld [vmem:[#allocation2 + $0x108] sm:$0xff] }
 0x587   : > { %v4884_v14 = vpop.f32.mrf.mxu1  ;;  %v5568_v50 = vrot.slane %v10606_v32, 6 }
 0x588   : > { %5706 = vmatmul.f32.gmra.mxu0 %v5561_v57  ;;  %6170 = vmatmul.f32.gmra.mxu2 %v6024_v36  ;;  %5401 = vst [vmem:[%s9109_s17 + $0x290] sm:$0xff] %v5369_v5  ;;  %v5432_v29 = vadd.f32 %v5431_v53, %v5369_v5  ;;  %v5470_v63 = vmul.f32 %v5369_v5, %v5369_v5  ;;  %v6028_v53 = vrot.slane %v427_v42, 2  ;;  %v8366_v5 = vld [vmem:[%s9109_s17 + $0x20] sm:$0xff] }
 0x589   : > { %v4938_v34 = vadd.f32 %v4884_v14, %v4668_v62  ;;  %v1352_v14 = vadd.f32 %v8366_v5, %v8365_v9  ;;  %v436_v9 = vld [vmem:[#allocation2 + $0x140] sm:$0xff]  ;;  %v10633_v5 = vld [vmem:[#allocation2 + $0x148] sm:$0xff] }
 0x58a   : > { %5868 = vmatmul.f32.gmra.mxu1 %v416_v35  ;;  %v5501_v38 = vadd.f32 %v5500_v51, %v5470_v63  ;;  %6460 = vmatmul.f32.gmra.mxu3 %v6314_v39  ;;  %v7479_v51 = vld [vmem:[#allocation10 + $0x3d0] sm:$0xff]  ;;  %v6029_v60 = vsel %vm1506_vm0, %v6026_v21, %v6028_v53  ;;  %v6319_v35 = vsel %vm1958_vm1, %v6316_v52, %v6318_v2  ;;  %v5567_v39 = vrot.slane %v428_v25, 6  ;;  %v8367_v21 = vld [vmem:[%s9109_s17 + $0x40] sm:$0xff] }
 0x58b   : > { %v5046_v44 = vpop.f32.mrf.mxu2  ;;  %7490 = vmatpush.msra.mxu3 %v7479_v51  ;;  %v6031_v63 = vrot.slane %v10609_v56, 2  ;;  %v1353_v0 = vadd.f32 %v8367_v21, %v1352_v14  ;;  %v6320_v52 = vrot.slane %v568_v45, 6  ;;  %v8371_v53 = vld [vmem:[%s9109_s17 + $0xa0] sm:$0xff]  ;;  %v7014_v56 = vld [vmem:[#allocation10 + $0x2c8] sm:$0xff] }
 0x58c   : > { %v5100_v47 = vadd.f32 %v5046_v44, %v4938_v34  ;;  %v8373_v25 = vld [vmem:[%s9109_s17 + $0xe0] sm:$0xff]  ;;  %7027 = vmatpush.msra.mxu1 %v7014_v56 }
 0x58d   : > { %v4617_v30 = vpop.f32.mrf.mxu0  ;;  %v5316_v17 = vpop.f32.mrf.mxu3  ;;  %v8375_v14 = vld [vmem:[%s9109_s17 + $0x100] sm:$0xff] }
 0x58e   : > { %v4669_v55 = vadd.f32 %v4617_v30, %v10420_v31  ;;  %v5370_v59 = vadd.f32 %v5316_v17, %v5100_v47  ;;  %v8368_v47 = vld [vmem:[%s9109_s17 + $0x60] sm:$0xff]  ;;  %v10619_v30 = vld [vmem:[#allocation2 + $0x588] sm:$0xff] }
 0x58f   : > { %v4887_v43 = vpop.f32.mrf.mxu1  ;;  %v1354_v4 = vadd.f32 %v8368_v47, %v1353_v0  ;;  %v8376_v0 = vld [vmem:[%s9109_s17 + $0x120] sm:$0xff] }
 0x590   : > { %5709 = vmatmul.f32.gmra.mxu0 %v5564_v37  ;;  %6173 = vmatmul.f32.gmra.mxu2 %v6027_v49  ;;  %5402 = vst [vmem:[%s9109_s17 + $0x2b0] sm:$0xff] %v5370_v59  ;;  %v5433_v40 = vadd.f32 %v5432_v29, %v5370_v59  ;;  %v5471_v61 = vmul.f32 %v5370_v59, %v5370_v59  ;;  %v6030_v29 = vrot.slane %v433_v48, 2  ;;  %v6321_v37 = vrot.slane %v10619_v30, 6  ;;  %v8377_v30 = vld [vmem:[%s9109_s17 + $0x140] sm:$0xff] }
 0x591   : > { %v4939_v46 = vadd.f32 %v4887_v43, %v4669_v55  ;;  %v5569_v55 = vsel %vm1958_vm1, %v5567_v39, %v5568_v50  ;;  %v1355_v42 = vadd.f32 %v8370_v58, %v1354_v4  ;;  %v7175_v56 = vld [vmem:[#allocation10 + $0x340] sm:$0xff] }
 0x592   : > { %5871 = vmatmul.f32.gmra.mxu1 %v423_v7  ;;  %v5502_v24 = vadd.f32 %v5501_v38, %v5471_v61  ;;  %6463 = vmatmul.f32.gmra.mxu3 %v6317_v19  ;;  %v6032_v17 = vsel %vm1506_vm0, %v6030_v29, %v6031_v63  ;;  %v430_v7 = vld [vmem:[#allocation2 + $0x110] sm:$0xff]  ;;  %v435_v19 = vld [vmem:[#allocation2 + $0x138] sm:$0xff] }
 0x593   : > { %v5049_v31 = vpop.f32.mrf.mxu2  ;;  %v5570_v15 = vrot.slane %v430_v7, 6  ;;  %v6033_v51 = vrot.slane %v435_v19, 2  ;;  %v10637_v29 = vld [vmem:[#allocation2 + $0x170] sm:$0xff]  ;;  %v8379_v7 = vld [vmem:[#allocation2 + $0x5c8] sm:$0xff] }
 0x594   : > { %v5101_v33 = vadd.f32 %v5049_v31, %v4939_v46  ;;  %v1356_v46 = vadd.f32 %v8371_v53, %v1355_v42  ;;  %v6326_v19 = vrot.slane %v8379_v7, 6  ;;  %v8380_v53 = vld [vmem:[%s9109_s17 + $0x180] sm:$0xff] }
 0x595   : > { %v4620_v16 = vpop.f32.mrf.mxu0  ;;  %v5319_v36 = vpop.f32.mrf.mxu3 }
 0x596   : > { %v4670_v57 = vadd.f32 %v4620_v16, %v10430_v1  ;;  %v5371_v62 = vadd.f32 %v5319_v36, %v5101_v33  ;;  %v7176_v16 = vld [vmem:[#allocation10 + $0x348] sm:$0xff]  ;;  %v8374_v36 = vld [vmem:[#allocation2 + $0x590] sm:$0xff] }
 0x597   : > { %v4890_v23 = vpop.f32.mrf.mxu1  ;;  %v6323_v48 = vrot.slane %v8374_v36, 6  ;;  %7189 = vmatpush.msra.mxu2 %v7176_v16 }
 0x598   : > { %5712 = vmatmul.f32.gmra.mxu0 %v5566_v41  ;;  %6176 = vmatmul.f32.gmra.mxu2 %v6029_v60  ;;  %5403 = vst [vmem:[%s9109_s17 + $0x2d0] sm:$0xff] %v5371_v62  ;;  %v5434_v1 = vadd.f32 %v5433_v40, %v5371_v62  ;;  %v5472_v12 = vmul.f32 %v5371_v62, %v5371_v62  ;;  %v6712_v41 = vld [vmem:[#allocation10 + $0x248] sm:$0xff] }
 0x599   : > { %v4940_v34 = vadd.f32 %v4890_v23, %v4670_v57  ;;  %v7478_v60 = vld [vmem:[#allocation10 + $0x3c8] sm:$0xff]  ;;  %6725 = vmatpush.msra.mxu0 %v6712_v41  ;;  %v5571_v23 = vsel %vm1958_vm1, %v5568_v50, %v5570_v15  ;;  %v432_v50 = vld [vmem:[#allocation2 + $0x120] sm:$0xff]  ;;  %v443_v15 = vld [vmem:[#allocation2 + $0x178] sm:$0xff]  ;;  %7190 = vmatpush.msra.mxu2 %v7175_v56 }
 0x59a   : > { %5874 = vmatmul.f32.gmra.mxu1 %v424_v6  ;;  %v5503_v38 = vadd.f32 %v5502_v24, %v5472_v12  ;;  %6466 = vmatmul.f32.gmra.mxu3 %v6319_v35  ;;  %v6322_v24 = vsel %vm1958_vm1, %v6320_v52, %v6321_v37  ;;  %v6034_v6 = vsel %vm1506_vm0, %v6031_v63, %v6033_v51  ;;  %v441_v12 = vld [vmem:[#allocation2 + $0x168] sm:$0xff]  ;;  %v576_v52 = vld [vmem:[#allocation2 + $0x5c0] sm:$0xff] }
 0x59b   : > { %v5052_v44 = vpop.f32.mrf.mxu2  ;;  %7491 = vmatpush.msra.mxu3 %v7478_v60  ;;  %v6035_v4 = vrot.slane %v441_v12, 2 }
 0x59c   : > { %v5102_v8 = vadd.f32 %v5052_v44, %v4940_v34  ;;  %v6324_v34 = vsel %vm1958_vm1, %v6321_v37, %v6323_v48  ;;  %v5573_v44 = vrot.slane %v10633_v5, 6  ;;  %v8378_v37 = vld [vmem:[%s9109_s17 + $0x160] sm:$0xff] }
 0x59d   : > { %v4623_v49 = vpop.f32.mrf.mxu0  ;;  %v5322_v43 = vpop.f32.mrf.mxu3 }
 0x59e   : > { %v4671_v59 = vadd.f32 %v4623_v49, %v10436_v11  ;;  %v5372_v40 = vadd.f32 %v5322_v43, %v5102_v8  ;;  %v8372_v11 = vld [vmem:[%s9109_s17 + $0xc0] sm:$0xff]  ;;  %v6036_v8 = vrot.slane %v10637_v29, 2  ;;  %v6325_v43 = vrot.slane %v576_v52, 6  ;;  %v8387_v52 = vld [vmem:[#allocation2 + $0x188] sm:$0xff] }
 0x59f   : > { %v4893_v61 = vpop.f32.mrf.mxu1  ;;  %v1357_v33 = vadd.f32 %v8372_v11, %v1356_v46 }
 0x5a0   : > { %5715 = vmatmul.f32.gmra.mxu0 %v5569_v55  ;;  %6179 = vmatmul.f32.gmra.mxu2 %v6032_v17  ;;  %5404 = vst [vmem:[%s9109_s17 + $0x2f0] sm:$0xff] %v5372_v40  ;;  %v5435_v31 = vadd.f32 %v5434_v1, %v5372_v40  ;;  %v5473_v18 = vmul.f32 %v5372_v40, %v5372_v40 }
 0x5a1   : > { %v4941_v20 = vadd.f32 %v4893_v61, %v4671_v59  ;;  %v1358_v32 = vadd.f32 %v8373_v25, %v1357_v33  ;;  %v439_v33 = vld [vmem:[#allocation2 + $0x158] sm:$0xff]  ;;  %v6038_v25 = vrot.slane %v443_v15, 2 }
 0x5a2   : > { %5877 = vmatmul.f32.gmra.mxu1 %v431_v13  ;;  %v5504_v2 = vadd.f32 %v5503_v38, %v5473_v18  ;;  %6469 = vmatmul.f32.gmra.mxu3 %v6322_v24  ;;  %v5572_v38 = vrot.slane %v436_v9, 6  ;;  %v6037_v13 = vsel %vm1506_vm0, %v6035_v4, %v6036_v8  ;;  %v438_v18 = vld [vmem:[#allocation2 + $0x150] sm:$0xff] }
 0x5a3   : > { %v5055_v22 = vpop.f32.mrf.mxu2  ;;  %v1359_v35 = vadd.f32 %v8375_v14, %v1358_v32  ;;  %v5575_v60 = vrot.slane %v438_v18, 6  ;;  %v8384_v14 = vld [vmem:[#allocation2 + $0x5d0] sm:$0xff]  ;;  %v6039_v29 = vsel %vm1506_vm0, %v6036_v8, %v6038_v25 }
 0x5a4   : > { %v5103_v57 = vadd.f32 %v5055_v22, %v4941_v20  ;;  %v5574_v61 = vsel %vm1958_vm1, %v5572_v38, %v5573_v44  ;;  %v8381_v20 = vld [vmem:[%s9109_s17 + $0x1a0] sm:$0xff]  ;;  %v6327_v22 = vsel %vm1958_vm1, %v6325_v43, %v6326_v19 }
 0x5a5   : > { %v4626_v62 = vpop.f32.mrf.mxu0  ;;  %v5325_v1 = vpop.f32.mrf.mxu3  ;;  %v1360_v63 = vadd.f32 %v8376_v0, %v1359_v35  ;;  %v6328_v35 = vrot.slane %v8384_v14, 6  ;;  %v5576_v12 = vsel %vm1958_vm1, %v5573_v44, %v5575_v60  ;;  %v8394_v60 = vld [vmem:[%s9109_s17 + $0x2a0] sm:$0xff] }
 0x5a6   : > { %v4672_v39 = vadd.f32 %v4626_v62, %v10442_v26  ;;  %v5373_v45 = vadd.f32 %v5325_v1, %v5103_v57  ;;  %v6711_v62 = vld [vmem:[#allocation10 + $0x240] sm:$0xff] }
 0x5a7   : > { %v4896_v21 = vpop.f32.mrf.mxu1  ;;  %v1361_v49 = vadd.f32 %v8377_v30, %v1360_v63  ;;  %6726 = vmatpush.msra.mxu0 %v6711_v62  ;;  %v6329_v44 = vsel %vm1958_vm1, %v6326_v19, %v6328_v35  ;;  %v5578_v30 = vrot.slane %v8387_v52, 6  ;;  %v8396_v62 = vld [vmem:[%s9109_s17 + $0x2c0] sm:$0xff] }
 0x5a8   : > { %5718 = vmatmul.f32.gmra.mxu0 %v5571_v23  ;;  %6182 = vmatmul.f32.gmra.mxu2 %v6034_v6  ;;  %5405 = vst [vmem:[%s9109_s17 + $0x310] sm:$0xff] %v5373_v45  ;;  %v5436_v26 = vadd.f32 %v5435_v31, %v5373_v45  ;;  %v5474_v47 = vmul.f32 %v5373_v45, %v5373_v45  ;;  %v7477_v23 = vld [vmem:[#allocation10 + $0x3c0] sm:$0xff] }
 0x5a9   : > { %v4942_v55 = vadd.f32 %v4896_v21, %v4672_v39  ;;  %v1362_v42 = vadd.f32 %v8378_v37, %v1361_v49  ;;  %v8383_v6 = vld [vmem:[%s9109_s17 + $0x1e0] sm:$0xff]  ;;  %7492 = vmatpush.msra.mxu3 %v7477_v23 }
 0x5aa   : > { %5880 = vmatmul.f32.gmra.mxu1 %v432_v50  ;;  %v5505_v17 = vadd.f32 %v5504_v2, %v5474_v47  ;;  %6472 = vmatmul.f32.gmra.mxu3 %v6324_v34  ;;  %v7013_v39 = vld [vmem:[#allocation10 + $0x2c0] sm:$0xff] }
 0x5ab   : > { %v5058_v58 = vpop.f32.mrf.mxu2  ;;  %v1363_v46 = vadd.f32 %v8380_v53, %v1362_v42  ;;  %v444_v45 = vld [vmem:[#allocation2 + $0x180] sm:$0xff]  ;;  %7028 = vmatpush.msra.mxu1 %v7013_v39 }
 0x5ac   : > { %v5104_v59 = vadd.f32 %v5058_v58, %v4942_v55  ;;  %v8385_v21 = vld [vmem:[%s9109_s17 + $0x200] sm:$0xff]  ;;  %v5577_v8 = vrot.slane %v444_v45, 6  ;;  %v8389_v58 = vld [vmem:[#allocation2 + $0x1b0] sm:$0xff] }
 0x5ad   : > { %v4629_v40 = vpop.f32.mrf.mxu0  ;;  %v5328_v31 = vpop.f32.mrf.mxu3  ;;  %v1364_v2 = vadd.f32 %v8381_v20, %v1363_v46  ;;  %v8386_v47 = vld [vmem:[%s9109_s17 + $0x220] sm:$0xff]  ;;  %v6041_v37 = vrot.slane %v8389_v58, 2  ;;  %v10683_v58 = vld [vmem:[#allocation2 + $0x1f0] sm:$0xff] }
 0x5ae   : > { %v4673_v24 = vadd.f32 %v4629_v40, %v10448_v10  ;;  %v5374_v51 = vadd.f32 %v5328_v31, %v5104_v59  ;;  %v8382_v10 = vld [vmem:[%s9109_s17 + $0x1c0] sm:$0xff]  ;;  %v5579_v15 = vsel %vm1958_vm1, %v5577_v8, %v5578_v30 }
 0x5af   : > { %v4899_v11 = vpop.f32.mrf.mxu1  ;;  %v1365_v32 = vadd.f32 %v8382_v10, %v1364_v2  ;;  %v584_v42 = vld [vmem:[#allocation2 + $0x600] sm:$0xff] }
 0x5b0   : > { %5721 = vmatmul.f32.gmra.mxu0 %v5574_v61  ;;  %6185 = vmatmul.f32.gmra.mxu2 %v6037_v13  ;;  %5406 = vst [vmem:[%s9109_s17 + $0x330] sm:$0xff] %v5374_v51  ;;  %v5437_v16 = vadd.f32 %v5436_v26, %v5374_v51  ;;  %v5475_v41 = vmul.f32 %v5374_v51, %v5374_v51  ;;  %v440_v26 = vld [vmem:[#allocation2 + $0x160] sm:$0xff]  ;;  %v6330_v46 = vrot.slane %v584_v42, 6 }
 0x5b1   : > { %v4943_v57 = vadd.f32 %v4899_v11, %v4673_v24  ;;  %v1366_v9 = vadd.f32 %v8383_v6, %v1365_v32  ;;  %v8390_v59 = vld [vmem:[%s9109_s17 + $0x240] sm:$0xff]  ;;  %v8392_v24 = vld [vmem:[#allocation2 + $0x608] sm:$0xff]  ;;  %v8397_v6 = vld [vmem:[#allocation2 + $0x198] sm:$0xff] }
 0x5b2   : > { %5883 = vmatmul.f32.gmra.mxu1 %v439_v33  ;;  %v5506_v36 = vadd.f32 %v5505_v17, %v5475_v41  ;;  %6475 = vmatmul.f32.gmra.mxu3 %v6327_v22  ;;  %v8388_v17 = vld [vmem:[#allocation2 + $0x1a8] sm:$0xff]  ;;  %v8391_v61 = vld [vmem:[%s9109_s17 + $0x260] sm:$0xff]  ;;  %v6331_v31 = vrot.slane %v8392_v24, 6  ;;  %v451_v22 = vld [vmem:[#allocation2 + $0x1b8] sm:$0xff] }
 0x5b3   : > { %v5061_v48 = vpop.f32.mrf.mxu2  ;;  %v1367_v50 = vadd.f32 %v8385_v21, %v1366_v9  ;;  %v8393_v11 = vld [vmem:[%s9109_s17 + $0x280] sm:$0xff]  ;;  %v6043_v56 = vrot.slane %v451_v22, 2 }
 0x5b4   : > { %v5105_v5 = vadd.f32 %v5061_v48, %v4943_v57  ;;  %v6332_v10 = vsel %vm1958_vm1, %v6330_v46, %v6331_v31  ;;  %v8398_v14 = vld [vmem:[%s9109_s17 + $0x2e0] sm:$0xff] }
 0x5b5   : > { %v4632_v1 = vpop.f32.mrf.mxu0  ;;  %v5331_v63 = vpop.f32.mrf.mxu3  ;;  %v1368_v4 = vadd.f32 %v8386_v47, %v1367_v50  ;;  %v6044_v21 = vsel %vm1506_vm0, %v6041_v37, %v6043_v56  ;;  %v452_v50 = vld [vmem:[#allocation2 + $0x1c0] sm:$0xff]  ;;  %v7012_v56 = vld [vmem:[#allocation10 + $0x2b8] sm:$0xff] }
 0x5b6   : > { %v4674_v0 = vadd.f32 %v4632_v1, %v10454_v54  ;;  %v5375_v34 = vadd.f32 %v5331_v63, %v5105_v5  ;;  %v6040_v54 = vrot.slane %v8388_v17, 2  ;;  %v8399_v1 = vld [vmem:[#allocation2 + $0x610] sm:$0xff]  ;;  %v5582_v52 = vrot.slane %v452_v50, 6  ;;  %v592_v42 = vld [vmem:[#allocation2 + $0x640] sm:$0xff]  ;;  %7029 = vmatpush.msra.mxu1 %v7012_v56 }
 0x5b7   : > { %v4902_v38 = vpop.f32.mrf.mxu1  ;;  %v1369_v43 = vadd.f32 %v8390_v59, %v1368_v4  ;;  %v8401_v4 = vld [vmem:[%s9109_s17 + $0x320] sm:$0xff]  ;;  %v6335_v24 = vrot.slane %v592_v42, 6 }
 0x5b8   : > { %5724 = vmatmul.f32.gmra.mxu0 %v5576_v12  ;;  %6188 = vmatmul.f32.gmra.mxu2 %v6039_v29  ;;  %5407 = vst [vmem:[%s9109_s17 + $0x350] sm:$0xff] %v5375_v34  ;;  %v5438_v49 = vadd.f32 %v5437_v16, %v5375_v34  ;;  %v5476_v55 = vmul.f32 %v5375_v34, %v5375_v34  ;;  %v6333_v12 = vrot.slane %v8399_v1, 6  ;;  %v8405_v59 = vld [vmem:[%s9109_s17 + $0x340] sm:$0xff] }
 0x5b9   : > { %v4944_v7 = vadd.f32 %v4902_v38, %v4674_v0  ;;  %v1370_v13 = vadd.f32 %v8391_v61, %v1369_v43  ;;  %v6042_v51 = vsel %vm1506_vm0, %v6040_v54, %v6041_v37  ;;  %v8400_v0 = vld [vmem:[%s9109_s17 + $0x300] sm:$0xff]  ;;  %v6046_v37 = vrot.slane %v10683_v58, 2  ;;  %v10717_v58 = vld [vmem:[#allocation2 + $0x208] sm:$0xff] }
 0x5ba   : > { %5886 = vmatmul.f32.gmra.mxu1 %v440_v26  ;;  %v5507_v40 = vadd.f32 %v5506_v36, %v5476_v55  ;;  %6478 = vmatmul.f32.gmra.mxu3 %v6329_v44  ;;  %v8395_v36 = vld [vmem:[#allocation2 + $0x190] sm:$0xff]  ;;  %v6334_v8 = vsel %vm1958_vm1, %v6331_v31, %v6333_v12  ;;  %v10688_v31 = vld [vmem:[#allocation2 + $0x648] sm:$0xff] }
 0x5bb   : > { %v5064_v19 = vpop.f32.mrf.mxu2  ;;  %v1371_v33 = vadd.f32 %v8393_v11, %v1370_v13  ;;  %v5580_v48 = vrot.slane %v8395_v36, 6  ;;  %v8407_v13 = vld [vmem:[%s9109_s17 + $0x360] sm:$0xff] }
 0x5bc   : > { %v5106_v53 = vadd.f32 %v5064_v19, %v4944_v7 }
 0x5bd   : > { %v4635_v18 = vpop.f32.mrf.mxu0  ;;  %v5334_v2 = vpop.f32.mrf.mxu3  ;;  %v1372_v25 = vadd.f32 %v8394_v60, %v1371_v33  ;;  %v5581_v45 = vsel %vm1958_vm1, %v5578_v30, %v5580_v48  ;;  %v10679_v30 = vld [vmem:[#allocation2 + $0x1c8] sm:$0xff]  ;;  %v8409_v33 = vld [vmem:[%s9109_s17 + $0x380] sm:$0xff] }
 0x5be   : > { %v4675_v20 = vadd.f32 %v4635_v18, %v10460_v27  ;;  %v5376_v16 = vadd.f32 %v5334_v2, %v5106_v53  ;;  %v6336_v18 = vrot.slane %v10688_v31, 6 }
 0x5bf   : > { %v4905_v41 = vpop.f32.mrf.mxu1  ;;  %v1373_v27 = vadd.f32 %v8396_v62, %v1372_v25  ;;  %v7174_v25 = vld [vmem:[#allocation10 + $0x338] sm:$0xff] }
 0x5c0   : > { %5727 = vmatmul.f32.gmra.mxu0 %v5579_v15  ;;  %6191 = vmatmul.f32.gmra.mxu2 %v6042_v51  ;;  %5408 = vst [vmem:[%s9109_s17 + $0x370] sm:$0xff] %v5376_v16  ;;  %v5439_v32 = vadd.f32 %v5438_v49, %v5376_v16  ;;  %v5477_v57 = vmul.f32 %v5376_v16, %v5376_v16  ;;  %v5583_v49 = vrot.slane %v10679_v30, 6  ;;  %v459_v16 = vld [vmem:[#allocation2 + $0x1f8] sm:$0xff] }
 0x5c1   : > { %v4945_v23 = vadd.f32 %v4905_v41, %v4675_v20  ;;  %v1374_v35 = vadd.f32 %v8398_v14, %v1373_v27  ;;  %v6337_v48 = vsel %vm1958_vm1, %v6335_v24, %v6336_v18  ;;  %v8411_v27 = vld [vmem:[#allocation2 + $0x1d0] sm:$0xff]  ;;  %7191 = vmatpush.msra.mxu2 %v7174_v25 }
 0x5c2   : > { %5889 = vmatmul.f32.gmra.mxu1 %v8397_v6  ;;  %v5508_v9 = vadd.f32 %v5507_v40, %v5477_v57  ;;  %6481 = vmatmul.f32.gmra.mxu3 %v6332_v10  ;;  %v8406_v40 = vld [vmem:[#allocation2 + $0x1a0] sm:$0xff]  ;;  %v5584_v51 = vsel %vm1958_vm1, %v5582_v52, %v5583_v49  ;;  %v6710_v10 = vld [vmem:[#allocation10 + $0x238] sm:$0xff]  ;;  %v6048_v6 = vrot.slane %v459_v16, 2 }
 0x5c3   : > { %v5067_v5 = vpop.f32.mrf.mxu2  ;;  %v1375_v63 = vadd.f32 %v8400_v0, %v1374_v35  ;;  %v8410_v57 = vld [vmem:[%s9109_s17 + $0x3a0] sm:$0xff]  ;;  %6727 = vmatpush.msra.mxu0 %v6710_v10 }
 0x5c4   : > { %v5107_v39 = vadd.f32 %v5067_v5, %v4945_v23  ;;  %v5585_v23 = vrot.slane %v8411_v27, 6  ;;  %v8412_v5 = vld [vmem:[%s9109_s17 + $0x3c0] sm:$0xff] }
 0x5c5   : > { %v4638_v29 = vpop.f32.mrf.mxu0  ;;  %v5337_v38 = vpop.f32.mrf.mxu3  ;;  %v1376_v44 = vadd.f32 %v8401_v4, %v1375_v63  ;;  %v8415_v63 = vld [vmem:[#allocation2 + $0x650] sm:$0xff]  ;;  %v6049_v4 = vsel %vm1506_vm0, %v6046_v37, %v6048_v6  ;;  %v11387_v10 = vld [vmem:[#allocation34_spill] sm:$0xff] }
 0x5c6   : > { %v4676_v34 = vadd.f32 %v4638_v29, %v10466_v28  ;;  %v5377_v26 = vadd.f32 %v5337_v38, %v5107_v39  ;;  %v8403_v28 = vld [vmem:[#allocation2 + $0x1e8] sm:$0xff]  ;;  %v8413_v39 = vld [vmem:[#allocation2 + $0x1d8] sm:$0xff]  ;;  %v6709_v29 = vld [vmem:[#allocation10 + $0x230] sm:$0xff] }
 0x5c7   : > { %v4908_v47 = vpop.f32.mrf.mxu1  ;;  %v6045_v54 = vrot.slane %v8403_v28, 2  ;;  %v1377_v43 = vadd.f32 %v8405_v59, %v1376_v44  ;;  %6728 = vmatpush.msra.mxu0 %v6709_v29  ;;  %v7011_v38 = vld [vmem:[#allocation10 + $0x2b0] sm:$0xff]  ;;  %v460_v44 = vld [vmem:[#allocation2 + $0x200] sm:$0xff] }
 0x5c8   : > { %5730 = vmatmul.f32.gmra.mxu0 %v5581_v45  ;;  %6194 = vmatmul.f32.gmra.mxu2 %v6044_v21  ;;  %5409 = vst [vmem:[%s9109_s17 + $0x390] sm:$0xff] %v5377_v26  ;;  %v5440_v55 = vadd.f32 %v5439_v32, %v5377_v26  ;;  %v5478_v17 = vmul.f32 %v5377_v26, %v5377_v26  ;;  %v7476_v32 = vld [vmem:[#allocation10 + $0x3b8] sm:$0xff]  ;;  %v7475_v45 = vld [vmem:[#allocation10 + $0x3b0] sm:$0xff]  ;;  %v8414_v21 = vld [vmem:[%s9109_s17 + $0x3e0] sm:$0xff] }
 0x5c9   : > { %v4946_v7 = vadd.f32 %v4908_v47, %v4676_v34  ;;  %v1378_v53 = vadd.f32 %v8407_v13, %v1377_v43  ;;  %v6047_v11 = vsel %vm1506_vm0, %v6045_v54, %v6046_v37  ;;  %7493 = vmatpush.msra.mxu3 %v7476_v32  ;;  %v6338_v34 = vrot.slane %v8415_v63, 6  ;;  %7030 = vmatpush.msra.mxu1 %v7011_v38  ;;  %v8421_v6 = vld [vmem:[#allocation2 + $0x210] sm:$0xff]  ;;  %v7010_v38 = vld [vmem:[#allocation10 + $0x2a8] sm:$0xff] }
 0x5ca   : > { %5892 = vmatmul.f32.gmra.mxu1 %v8406_v40  ;;  %v5509_v19 = vadd.f32 %v5508_v9, %v5478_v17  ;;  %6484 = vmatmul.f32.gmra.mxu3 %v6334_v8  ;;  %v7173_v9 = vld [vmem:[#allocation10 + $0x330] sm:$0xff]  ;;  %v5586_v47 = vsel %vm1958_vm1, %v5583_v49, %v5585_v23  ;;  %v11385_v8 = vld [vmem:[#allocation75_spill] sm:$0xff]  ;;  %v5587_v49 = vrot.slane %v460_v44, 6  ;;  %v5588_v37 = vrot.slane %v10717_v58, 6 }
 0x5cb   : > { %v5070_v61 = vpop.f32.mrf.mxu2  ;;  %v1379_v20 = vadd.f32 %v8409_v33, %v1378_v53  ;;  %7192 = vmatpush.msra.mxu2 %v7173_v9  ;;  %7494 = vmatpush.msra.mxu3 %v7475_v45  ;;  %v3322_v52 = vrot.slane %v11385_v8, 4  ;;  %v6339_v30 = vsel %vm1958_vm1, %v6336_v18, %v6338_v34  ;;  %v8417_v40 = vld [vmem:[#allocation2 + $0x228] sm:$0xff]  ;;  %v600_v53 = vld [vmem:[#allocation2 + $0x680] sm:$0xff]  ;;  %v5590_v9 = vrot.slane %v8421_v6, 6  ;;  %v8423_v63 = vld [vmem:[#allocation2 + $0x690] sm:$0xff] }
 0x5cc   : > { %v5108_v46 = vadd.f32 %v5070_v61, %v4946_v7  ;;  %v8418_v61 = vld [vmem:[#allocation2 + $0x230] sm:$0xff]  ;;  %v6340_v33 = vrot.slane %v600_v53, 6  ;;  %v5589_v16 = vsel %vm1958_vm1, %v5587_v49, %v5588_v37  ;;  %v6708_v45 = vld [vmem:[#allocation10 + $0x228] sm:$0xff]  ;;  %v6343_v34 = vrot.slane %v8423_v63, 6  ;;  %7031 = vmatpush.msra.mxu1 %v7010_v38  ;;  %v608_v53 = vld [vmem:[#allocation2 + $0x6c0] sm:$0xff] }
 0x5cd   : > { %v4641_v15 = vpop.f32.mrf.mxu0  ;;  %v5340_v22 = vpop.f32.mrf.mxu3  ;;  %v1380_v36 = vadd.f32 %v8410_v57, %v1379_v20  ;;  %v6051_v13 = vrot.slane %v8418_v61, 2  ;;  %v8420_v20 = vld [vmem:[#allocation2 + $0x688] sm:$0xff]  ;;  %v467_v57 = vld [vmem:[#allocation2 + $0x238] sm:$0xff]  ;;  %6729 = vmatpush.msra.mxu0 %v6708_v45  ;;  %v8426_v61 = vld [vmem:[#allocation2 + $0x270] sm:$0xff] }
 0x5ce   : > { %v4677_v2 = vadd.f32 %v4641_v15, %v10472_v3  ;;  %v5378_v41 = vadd.f32 %v5340_v22, %v5108_v46  ;;  %v3323_v46 = vadd.f32 %v3322_v52, %v11385_v8  ;;  %v8419_v15 = vld [vmem:[#allocation2 + $0x1e0] sm:$0xff]  ;;  %v8431_v45 = vld [vmem:[#allocation2 + $0x6d0] sm:$0xff] }
 0x5cf   : > { %v4911_v60 = vpop.f32.mrf.mxu1  ;;  %v1381_v14 = vadd.f32 %v8412_v5, %v1380_v36  ;;  %v6053_v5 = vrot.slane %v467_v57, 2  ;;  %v468_v8 = vld [vmem:[#allocation2 + $0x240] sm:$0xff]  ;;  %v11390_v38 = vld [vmem:[#allocation40_spill] sm:$0xff] }
 0x5d0   : > { %5733 = vmatmul.f32.gmra.mxu0 %v5584_v51  ;;  %6197 = vmatmul.f32.gmra.mxu2 %v6047_v11  ;;  %5410 = vst [vmem:[%s9109_s17 + $0x3b0] sm:$0xff] %v5378_v41  ;;  %v5441_v62 = vadd.f32 %v5440_v55, %v5378_v41  ;;  %v5479_v3 = vmul.f32 %v5378_v41, %v5378_v41  ;;  %v11386_v55 = vld [vmem:[#allocation78_spill] sm:$0xff]  ;;  %v5592_v58 = vrot.slane %v468_v8, 6 }
 0x5d1   : > { %v4947_v35 = vadd.f32 %v4911_v60, %v4677_v2  ;;  %v1382_v50 = vadd.f32 %v8414_v21, %v1381_v14  ;;  %v6341_v2 = vrot.slane %v8420_v20, 6  ;;  %v3324_v60 = vrot.slane %v3323_v46, 2  ;;  %v7474_v21 = vld [vmem:[#allocation10 + $0x3a8] sm:$0xff] }
 0x5d2   : > { %5895 = vmatmul.f32.gmra.mxu1 %v8413_v39  ;;  %v5510_v1 = vadd.f32 %v5509_v19, %v5479_v3  ;;  %6487 = vmatmul.f32.gmra.mxu3 %v6337_v48  ;;  %v6050_v19 = vrot.slane %v8417_v40, 2  ;;  %v7172_v3 = vld [vmem:[#allocation10 + $0x328] sm:$0xff]  ;;  %v8422_v39 = vld [vmem:[#allocation2 + $0x218] sm:$0xff]  ;;  %v6054_v44 = vsel %vm1506_vm0, %v6051_v13, %v6053_v5 }
 0x5d3   : > { %v5073_v12 = vpop.f32.mrf.mxu2  ;;  %v1383_v59 = vrot.slane %v1382_v50, 4  ;;  %7193 = vmatpush.msra.mxu2 %v7172_v3  ;;  %v3325_v14 = vadd.f32 %v3324_v60, %v3323_v46  ;;  %7495 = vmatpush.msra.mxu3 %v7474_v21  ;;  %v6344_v49 = vsel %vm1958_vm1, %v6341_v2, %v6343_v34  ;;  %v8425_v40 = vld [vmem:[#allocation2 + $0x268] sm:$0xff]  ;;  %v6348_v21 = vrot.slane %v8431_v45, 6 }
 0x5d4   : > { %v5109_v0 = vadd.f32 %v5073_v12, %v4947_v35  ;;  %v6052_v41 = vsel %vm1506_vm0, %v6050_v19, %v6051_v13  ;;  %v6055_v19 = vrot.slane %v8425_v40, 2  ;;  %v6056_v13 = vrot.slane %v8426_v61, 2  ;;  %v8428_v20 = vld [vmem:[#allocation2 + $0x6c8] sm:$0xff] }
 0x5d5   : > { %v4644_v26 = vpop.f32.mrf.mxu0  ;;  %v5343_v28 = vpop.f32.mrf.mxu3  ;;  %v1384_v51 = vadd.f32 %v1383_v59, %v1382_v50  ;;  %v3326_v52 = vrot.slane %v3325_v14, 1  ;;  %v8436_v61 = vld [vmem:[#allocation2 + $0x708] sm:$0xff] }
 0x5d6   : > { %v4678_v17 = vadd.f32 %v4644_v26, %v11386_v55  ;;  %v5379_v54 = vadd.f32 %v5343_v28, %v5109_v0  ;;  %v11388_v55 = vld [vmem:[#allocation36_spill] sm:$0xff]  ;;  %v6057_v60 = vsel %vm1506_vm0, %v6055_v19, %v6056_v13 }
 0x5d7   : > { %v4914_v42 = vpop.f32.mrf.mxu1  ;;  %v1385_v56 = vrot.slane %v1384_v51, 2  ;;  %v3327_v46 = vadd.f32 %v3326_v52, %v3325_v14  ;;  %v8430_v14 = vld [vmem:[#allocation2 + $0x258] sm:$0xff] }
 0x5d8   : > { %5736 = vmatmul.f32.gmra.mxu0 %v5586_v47  ;;  %6200 = vmatmul.f32.gmra.mxu2 %v6049_v4  ;;  %5411 = vst [vmem:[%s9109_s17 + $0x3d0] sm:$0xff] %v5379_v54  ;;  %v5442_v43 = vadd.f32 %v5441_v62, %v5379_v54  ;;  %v5480_v7 = vmul.f32 %v5379_v54, %v5379_v54 }
 0x5d9   : > { %v4948_v24 = vadd.f32 %v4914_v42, %v4678_v17  ;;  %v6342_v62 = vsel %vm1958_vm1, %v6340_v33, %v6341_v2  ;;  %v1386_v50 = vadd.f32 %v1385_v56, %v1384_v51  ;;  %v5591_v4 = vsel %vm1958_vm1, %v5588_v37, %v5590_v9  ;;  %v8424_v37 = vld [vmem:[#allocation2 + $0x248] sm:$0xff] }
 0x5da   : > { %5898 = vmatmul.f32.gmra.mxu1 %v8419_v15  ;;  %v5511_v31 = vadd.f32 %v5510_v1, %v5480_v7  ;;  %6490 = vmatmul.f32.gmra.mxu3 %v6339_v30  ;;  %v5593_v7 = vrot.slane %v8424_v37, 6  ;;  %v8427_v15 = vld [vmem:[#allocation2 + $0x220] sm:$0xff]  ;;  %v6345_v33 = vrot.slane %v608_v53, 6  ;;  %v6346_v2 = vrot.slane %v8428_v20, 6 }
 0x5db   : > { %v5076_v18 = vpop.f32.mrf.mxu2  ;;  %v1387_v30 = vrot.slane %v1386_v50, 1  ;;  %v8435_v37 = vld [vmem:[#allocation2 + $0x260] sm:$0xff] }
 0x5dc   : > { %v5110_v11 = vadd.f32 %v5076_v18, %v4948_v24  ;;  %v6347_v3 = vsel %vm1958_vm1, %v6345_v33, %v6346_v2  ;;  %v6349_v52 = vsel %vm1958_vm1, %v6346_v2, %v6348_v21  ;;  %v7170_v2 = vld [vmem:[#allocation10 + $0x318] sm:$0xff] }
 0x5dd   : > { %v5692_v22 = vpop.f32.mrf.mxu0  ;;  %v5346_v25 = vpop.f32.mrf.mxu3  ;;  %v1388_v51 = vadd.f32 %v1387_v30, %v1386_v50  ;;  %v7009_v50 = vld [vmem:[#allocation10 + $0x2a0] sm:$0xff]  ;;  %v8434_v30 = vld [vmem:[#allocation2 + $0x2b0] sm:$0xff] }
 0x5de   : > { %v5788_v32 = vadd.f32 %v5692_v22, %v11387_v10  ;;  %v5380_v36 = vadd.f32 %v5346_v25, %v5110_v11  ;;  %v11389_v10 = vld [vmem:[#allocation38_spill] sm:$0xff]  ;;  %7032 = vmatpush.msra.mxu1 %v7009_v50  ;;  %v8440_v50 = vld [vmem:[#allocation2 + $0x2c8] sm:$0xff] }
 0x5df   : > { %v5854_v48 = vpop.f32.mrf.mxu1  ;;  %v7769_v25 = vsel %vm7768_vm3, %v1388_v51, %v3327_v46  ;;  %v483_v51 = vld [vmem:[#allocation2 + $0x2b8] sm:$0xff] }
 0x5e0   : > { %5739 = vmatmul.f32.gmra.mxu0 %v5589_v16  ;;  %6203 = vmatmul.f32.gmra.mxu2 %v6052_v41  ;;  %5412 = vst [vmem:[%s9109_s17 + $0x3f0] sm:$0xff] %v5380_v36  ;;  %v5443_v27 = vadd.f32 %v5442_v43, %v5380_v36  ;;  %v5481_v23 = vmul.f32 %v5380_v36, %v5380_v36  ;;  %v475_v36 = vld [vmem:[#allocation2 + $0x278] sm:$0xff] }
 0x5e1   : > { %v5950_v35 = vadd.f32 %v5854_v48, %v5788_v32  ;;  %v5594_v41 = vsel %vm1958_vm1, %v5592_v58, %v5593_v7  ;;  %v6058_v9 = vrot.slane %v475_v36, 2  ;;  %v616_v58 = vld [vmem:[#allocation2 + $0x700] sm:$0xff] }
 0x5e2   : > { %5901 = vmatmul.f32.gmra.mxu1 %v8422_v39  ;;  %v5444_v1 = vrot.slane %v5443_v27, 4  ;;  %v10727_v12 = vadd.f32 %v5511_v31, %v5481_v23  ;;  %6493 = vmatmul.f32.gmra.mxu3 %v6342_v62  ;;  %v8429_v23 = vld [vmem:[#allocation2 + $0x250] sm:$0xff]  ;;  %v6707_v39 = vld [vmem:[#allocation10 + $0x220] sm:$0xff]  ;;  %v6350_v19 = vrot.slane %v616_v58, 6 }
 0x5e3   : > { %v6156_v29 = vpop.f32.mrf.mxu2  ;;  %v5595_v6 = vrot.slane %v8429_v23, 6  ;;  %6730 = vmatpush.msra.mxu0 %v6707_v39  ;;  %v6059_v34 = vsel %vm1506_vm0, %v6056_v13, %v6058_v9  ;;  %v6351_v13 = vrot.slane %v8436_v61, 6  ;;  %v484_v39 = vld [vmem:[#allocation2 + $0x2c0] sm:$0xff] }
 0x5e4   : > { %v6252_v0 = vadd.f32 %v6156_v29, %v5950_v35  ;;  %v5445_v26 = vadd.f32 %v5444_v1, %v5443_v27  ;;  %v7171_v27 = vld [vmem:[#allocation10 + $0x320] sm:$0xff]  ;;  %v5602_v21 = vrot.slane %v484_v39, 6 }
 0x5e5   : > { %v5695_v47 = vpop.f32.mrf.mxu0  ;;  %v6446_v28 = vpop.f32.mrf.mxu3  ;;  %7194 = vmatpush.msra.mxu2 %v7171_v27  ;;  %v7473_v1 = vld [vmem:[#allocation10 + $0x3a0] sm:$0xff]  ;;  %v5596_v63 = vsel %vm1958_vm1, %v5593_v7, %v5595_v6  ;;  %v6352_v20 = vsel %vm1958_vm1, %v6350_v19, %v6351_v13  ;;  %v7008_v27 = vld [vmem:[#allocation10 + $0x298] sm:$0xff] }
 0x5e6   : > { %v5789_v17 = vadd.f32 %v5695_v47, %v11388_v55  ;;  %v5446_v54 = vrot.slane %v5445_v26, 2  ;;  %v10732_v42 = vadd.f32 %v6446_v28, %v6252_v0  ;;  %7496 = vmatpush.msra.mxu3 %v7473_v1  ;;  %7033 = vmatpush.msra.mxu1 %v7008_v27  ;;  %v11393_v58 = vld [vmem:[#allocation46_spill] sm:$0xff] }
 0x5e7   : > { %v5857_v59 = vpop.f32.mrf.mxu1  ;;  %7195 = vmatpush.msra.mxu2 %v7170_v2  ;;  %v8447_v2 = vld [vmem:[#allocation2 + $0x750] sm:$0xff] }
 0x5e8   : > { %5742 = vmatmul.f32.gmra.mxu0 %v5591_v4  ;;  %6206 = vmatmul.f32.gmra.mxu2 %v6054_v44  ;;  %v5447_v43 = vadd.f32 %v5446_v54, %v5445_v26  ;;  %v5951_v24 = vadd.f32 %v5857_v59, %v5789_v17  ;;  %v476_v4 = vld [vmem:[#allocation2 + $0x280] sm:$0xff]  ;;  %v8432_v17 = vld [vmem:[#allocation2 + $0x288] sm:$0xff] }
 0x5e9   : > { %v5597_v55 = vrot.slane %v476_v4, 6  ;;  %v5598_v28 = vrot.slane %v8432_v17, 6  ;;  %v8433_v54 = vld [vmem:[#allocation2 + $0x2a8] sm:$0xff] }
 0x5ea   : > { %5904 = vmatmul.f32.gmra.mxu1 %v8427_v15  ;;  %v5448_v31 = vrot.slane %v5447_v43, 1  ;;  %6496 = vmatmul.f32.gmra.mxu3 %v6344_v49  ;;  %v6060_v59 = vrot.slane %v8433_v54, 2  ;;  %v6061_v49 = vrot.slane %v8434_v30, 2  ;;  %v11391_v15 = vld [vmem:[#allocation42_spill] sm:$0xff] }
 0x5eb   : > { %v6159_v18 = vpop.f32.mrf.mxu2  ;;  %v5599_v46 = vsel %vm1958_vm1, %v5597_v55, %v5598_v28 }
 0x5ec   : > { %v6253_v11 = vadd.f32 %v6159_v18, %v5951_v24  ;;  %v5449_v22 = vadd.f32 %v5448_v31, %v5447_v43  ;;  %v6062_v24 = vsel %vm1506_vm0, %v6060_v59, %v6061_v49 }
 0x5ed   : > { %v5698_v16 = vpop.f32.mrf.mxu0  ;;  %v6449_v57 = vpop.f32.mrf.mxu3 }
 0x5ee   : > { %v5790_v32 = vadd.f32 %v5698_v16, %v11389_v10  ;;  %v10739_v48 = vsel %vm1958_vm1, %v7769_v25, %v5449_v22  ;;  %v10741_v56 = vadd.f32 %v6449_v57, %v6253_v11  ;;  %v8437_v22 = vld [vmem:[#allocation2 + $0x290] sm:$0xff]  ;;  %v8438_v25 = vld [vmem:[#allocation2 + $0x298] sm:$0xff] }
 0x5ef   : > { %v5860_v62 = vpop.f32.mrf.mxu1  ;;  %v5600_v16 = vrot.slane %v8437_v22, 6  ;;  %v7472_v57 = vld [vmem:[#allocation10 + $0x398] sm:$0xff]  ;;  %v6358_v22 = vrot.slane %v8447_v2, 6 }
 0x5f0   : > { %5745 = vmatmul.f32.gmra.mxu0 %v5594_v41  ;;  %6209 = vmatmul.f32.gmra.mxu2 %v6057_v60  ;;  %v5952_v5 = vadd.f32 %v5860_v62, %v5790_v32  ;;  %v6063_v41 = vrot.slane %v483_v51, 2  ;;  %v6706_v32 = vld [vmem:[#allocation10 + $0x218] sm:$0xff]  ;;  %v8439_v62 = vld [vmem:[#allocation2 + $0x710] sm:$0xff] }
 0x5f1   : > { %6731 = vmatpush.msra.mxu0 %v6706_v32  ;;  %7497 = vmatpush.msra.mxu3 %v7472_v57  ;;  %v5601_v6 = vsel %vm1958_vm1, %v5598_v28, %v5600_v16  ;;  %v8444_v28 = vld [vmem:[#allocation2 + $0x748] sm:$0xff]  ;;  %v6705_v51 = vld [vmem:[#allocation10 + $0x210] sm:$0xff] }
 0x5f2   : > { %5907 = vmatmul.f32.gmra.mxu1 %v8430_v14  ;;  %6499 = vmatmul.f32.gmra.mxu3 %v6347_v3  ;;  %v6353_v3 = vrot.slane %v8439_v62, 6  ;;  %v6064_v9 = vsel %vm1506_vm0, %v6061_v49, %v6063_v41  ;;  %v6356_v54 = vrot.slane %v8444_v28, 6  ;;  %v7007_v16 = vld [vmem:[#allocation10 + $0x290] sm:$0xff] }
 0x5f3   : > { %v6162_v35 = vpop.f32.mrf.mxu2  ;;  %6732 = vmatpush.msra.mxu0 %v6705_v51  ;;  %7034 = vmatpush.msra.mxu1 %v7007_v16 }
 0x5f4   : > { %v6254_v29 = vadd.f32 %v6162_v35, %v5952_v5  ;;  %v11392_v5 = vld [vmem:[#allocation44_spill] sm:$0xff]  ;;  %v6354_v45 = vsel %vm1958_vm1, %v6351_v13, %v6353_v3  ;;  %v6359_v27 = vsel %vm1958_vm1, %v6356_v54, %v6358_v22  ;;  %v500_v22 = vld [vmem:[#allocation2 + $0x340] sm:$0xff] }
 0x5f5   : > { %v5701_v0 = vpop.f32.mrf.mxu0  ;;  %v6452_v47 = vpop.f32.mrf.mxu3  ;;  %v7169_v13 = vld [vmem:[#allocation10 + $0x310] sm:$0xff] }
 0x5f6   : > { %v5791_v26 = vadd.f32 %v5701_v0, %v11390_v38  ;;  %v10747_v44 = vadd.f32 %v6452_v47, %v6254_v29  ;;  %v5603_v0 = vrot.slane %v8440_v50, 6  ;;  %v8442_v38 = vld [vmem:[#allocation2 + $0x2f0] sm:$0xff]  ;;  %v624_v47 = vld [vmem:[#allocation2 + $0x740] sm:$0xff]  ;;  %7196 = vmatpush.msra.mxu2 %v7169_v13  ;;  %v7470_v13 = vld [vmem:[#allocation10 + $0x388] sm:$0xff] }
 0x5f7   : > { %v5863_v8 = vpop.f32.mrf.mxu1  ;;  %v6355_v17 = vrot.slane %v624_v47, 6 }
 0x5f8   : > { %5748 = vmatmul.f32.gmra.mxu0 %v5596_v63  ;;  %6212 = vmatmul.f32.gmra.mxu2 %v6059_v34  ;;  %v5953_v43 = vadd.f32 %v5863_v8, %v5791_v26  ;;  %v8441_v63 = vld [vmem:[#allocation2 + $0x2e8] sm:$0xff]  ;;  %v6066_v26 = vrot.slane %v8442_v38, 2  ;;  %v8443_v8 = vld [vmem:[#allocation2 + $0x2a0] sm:$0xff]  ;;  %v5604_v30 = vsel %vm1958_vm1, %v5602_v21, %v5603_v0 }
 0x5f9   : > { %v6065_v34 = vrot.slane %v8441_v63, 2  ;;  %v6357_v61 = vsel %vm1958_vm1, %v6355_v17, %v6356_v54  ;;  %v8451_v21 = vld [vmem:[#allocation2 + $0x2e0] sm:$0xff]  ;;  %v499_v17 = vld [vmem:[#allocation2 + $0x338] sm:$0xff] }
 0x5fa   : > { %5910 = vmatmul.f32.gmra.mxu1 %v8435_v37  ;;  %6502 = vmatmul.f32.gmra.mxu3 %v6349_v52 }
 0x5fb   : > { %v6165_v7 = vpop.f32.mrf.mxu2  ;;  %v6067_v49 = vsel %vm1506_vm0, %v6065_v34, %v6066_v26  ;;  %v8452_v34 = vld [vmem:[#allocation2 + $0x788] sm:$0xff] }
 0x5fc   : > { %v6255_v40 = vadd.f32 %v6165_v7, %v5953_v43  ;;  %v491_v7 = vld [vmem:[#allocation2 + $0x2f8] sm:$0xff]  ;;  %v6361_v38 = vrot.slane %v8452_v34, 6 }
 0x5fd   : > { %v5704_v53 = vpop.f32.mrf.mxu0  ;;  %v6455_v18 = vpop.f32.mrf.mxu3 }
 0x5fe   : > { %v5792_v31 = vadd.f32 %v5704_v53, %v11391_v15  ;;  %v10753_v11 = vadd.f32 %v6455_v18, %v6255_v40  ;;  %v8445_v53 = vld [vmem:[#allocation2 + $0x2d0] sm:$0xff] }
 0x5ff   : > { %v5866_v33 = vpop.f32.mrf.mxu1 }
 0x600   : > { %5751 = vmatmul.f32.gmra.mxu0 %v5599_v46  ;;  %6215 = vmatmul.f32.gmra.mxu2 %v6062_v24  ;;  %v5954_v60 = vadd.f32 %v5866_v33, %v5792_v31  ;;  %v5605_v46 = vrot.slane %v8445_v53, 6  ;;  %v6068_v24 = vrot.slane %v491_v7, 2  ;;  %v8446_v31 = vld [vmem:[#allocation2 + $0x2d8] sm:$0xff]  ;;  %v7471_v33 = vld [vmem:[#allocation10 + $0x390] sm:$0xff] }
 0x601   : > { %7498 = vmatpush.msra.mxu3 %v7471_v33  ;;  %v8454_v7 = vld [vmem:[#allocation2 + $0x318] sm:$0xff]  ;;  %v11396_v33 = vld [vmem:[#allocation52_spill] sm:$0xff] }
 0x602   : > { %5913 = vmatmul.f32.gmra.mxu1 %v8438_v25  ;;  %6505 = vmatmul.f32.gmra.mxu3 %v6352_v20  ;;  %v6069_v25 = vsel %vm1506_vm0, %v6066_v26, %v6068_v24 }
 0x603   : > { %v6168_v10 = vpop.f32.mrf.mxu2  ;;  %7499 = vmatpush.msra.mxu3 %v7470_v13 }
 0x604   : > { %v6256_v36 = vadd.f32 %v6168_v10, %v5954_v60  ;;  %v5606_v60 = vsel %vm1958_vm1, %v5603_v0, %v5605_v46  ;;  %v11394_v10 = vld [vmem:[#allocation48_spill] sm:$0xff] }
 0x605   : > { %v5707_v23 = vpop.f32.mrf.mxu0  ;;  %v6458_v35 = vpop.f32.mrf.mxu3  ;;  %v8455_v46 = vld [vmem:[#allocation2 + $0x790] sm:$0xff] }
 0x606   : > { %v5793_v14 = vadd.f32 %v5707_v23, %v11392_v5  ;;  %v10759_v1 = vadd.f32 %v6458_v35, %v6256_v36  ;;  %v492_v36 = vld [vmem:[#allocation2 + $0x300] sm:$0xff]  ;;  %v8449_v5 = vld [vmem:[#allocation2 + $0x328] sm:$0xff]  ;;  %v8450_v35 = vld [vmem:[#allocation2 + $0x330] sm:$0xff]  ;;  %v6363_v24 = vrot.slane %v8455_v46, 6 }
 0x607   : > { %v5869_v29 = vpop.f32.mrf.mxu1  ;;  %v5607_v23 = vrot.slane %v492_v36, 6  ;;  %v6071_v39 = vrot.slane %v8450_v35, 2  ;;  %v11398_v46 = vld [vmem:[#allocation56_spill] sm:$0xff] }
 0x608   : > { %5754 = vmatmul.f32.gmra.mxu0 %v5601_v6  ;;  %6218 = vmatmul.f32.gmra.mxu2 %v6064_v9  ;;  %v5955_v4 = vadd.f32 %v5869_v29, %v5793_v14  ;;  %v8448_v6 = vld [vmem:[#allocation2 + $0x308] sm:$0xff]  ;;  %v6070_v14 = vrot.slane %v8449_v5, 2  ;;  %v632_v29 = vld [vmem:[#allocation2 + $0x780] sm:$0xff] }
 0x609   : > { %v5608_v9 = vrot.slane %v8448_v6, 6  ;;  %v6360_v63 = vrot.slane %v632_v29, 6 }
 0x60a   : > { %5916 = vmatmul.f32.gmra.mxu1 %v8443_v8  ;;  %6508 = vmatmul.f32.gmra.mxu3 %v6354_v45  ;;  %v11395_v8 = vld [vmem:[#allocation50_spill] sm:$0xff] }
 0x60b   : > { %v6171_v52 = vpop.f32.mrf.mxu2  ;;  %v5609_v47 = vsel %vm1958_vm1, %v5607_v23, %v5608_v9  ;;  %v640_v23 = vld [vmem:[#allocation2 + $0x7c0] sm:$0xff] }
 0x60c   : > { %v6257_v55 = vadd.f32 %v6171_v52, %v5955_v4  ;;  %v6072_v4 = vsel %vm1506_vm0, %v6070_v14, %v6071_v39  ;;  %v6365_v35 = vrot.slane %v640_v23, 6 }
 0x60d   : > { %v5710_v59 = vpop.f32.mrf.mxu0  ;;  %v6461_v37 = vpop.f32.mrf.mxu3 }
 0x60e   : > { %v5794_v43 = vadd.f32 %v5710_v59, %v11393_v58  ;;  %v10765_v40 = vadd.f32 %v6461_v37, %v6257_v55  ;;  %v6362_v59 = vsel %vm1958_vm1, %v6360_v63, %v6361_v38 }
 0x60f   : > { %v5872_v19 = vpop.f32.mrf.mxu1 }
 0x610   : > { %5757 = vmatmul.f32.gmra.mxu0 %v5604_v30  ;;  %6221 = vmatmul.f32.gmra.mxu2 %v6067_v49  ;;  %v5956_v15 = vadd.f32 %v5872_v19, %v5794_v43  ;;  %v7168_v30 = vld [vmem:[#allocation10 + $0x308] sm:$0xff]  ;;  %v8453_v49 = vld [vmem:[#allocation2 + $0x310] sm:$0xff]  ;;  %v6073_v43 = vrot.slane %v499_v17, 2 }
 0x611   : > { %v5610_v58 = vrot.slane %v8453_v49, 6  ;;  %7197 = vmatpush.msra.mxu2 %v7168_v30  ;;  %v6703_v49 = vld [vmem:[#allocation10 + $0x200] sm:$0xff] }
 0x612   : > { %5919 = vmatmul.f32.gmra.mxu1 %v8446_v31  ;;  %6511 = vmatmul.f32.gmra.mxu3 %v6357_v61  ;;  %v6704_v61 = vld [vmem:[#allocation10 + $0x208] sm:$0xff]  ;;  %v6074_v51 = vsel %vm1506_vm0, %v6071_v39, %v6073_v43 }
 0x613   : > { %v6174_v18 = vpop.f32.mrf.mxu2  ;;  %6733 = vmatpush.msra.mxu0 %v6704_v61  ;;  %v8460_v39 = vld [vmem:[#allocation2 + $0x7c8] sm:$0xff] }
 0x614   : > { %v6258_v20 = vadd.f32 %v6174_v18, %v5956_v15  ;;  %v7006_v15 = vld [vmem:[#allocation10 + $0x288] sm:$0xff]  ;;  %v5611_v18 = vsel %vm1958_vm1, %v5608_v9, %v5610_v58  ;;  %v8459_v9 = vld [vmem:[#allocation2 + $0x320] sm:$0xff]  ;;  %v6366_v29 = vrot.slane %v8460_v39, 6 }
 0x615   : > { %v5713_v41 = vpop.f32.mrf.mxu0  ;;  %v6464_v57 = vpop.f32.mrf.mxu3  ;;  %7035 = vmatpush.msra.mxu1 %v7006_v15  ;;  %v7469_v58 = vld [vmem:[#allocation10 + $0x380] sm:$0xff]  ;;  %6734 = vmatpush.msra.mxu0 %v6703_v49 }
 0x616   : > { %v5795_v32 = vadd.f32 %v5713_v41, %v11394_v10  ;;  %v10771_v62 = vadd.f32 %v6464_v57, %v6258_v20  ;;  %v8456_v10 = vld [vmem:[#allocation2 + $0x348] sm:$0xff]  ;;  %7500 = vmatpush.msra.mxu3 %v7469_v58  ;;  %v11399_v39 = vld [vmem:[#allocation58_spill] sm:$0xff] }
 0x617   : > { %v5875_v3 = vpop.f32.mrf.mxu1  ;;  %v8457_v57 = vld [vmem:[#allocation2 + $0x368] sm:$0xff] }
 0x618   : > { %5760 = vmatmul.f32.gmra.mxu0 %v5606_v60  ;;  %6224 = vmatmul.f32.gmra.mxu2 %v6069_v25  ;;  %v5957_v45 = vadd.f32 %v5875_v3, %v5795_v32  ;;  %v6364_v60 = vsel %vm1958_vm1, %v6361_v38, %v6363_v24  ;;  %v5612_v25 = vrot.slane %v500_v22, 6  ;;  %v5613_v32 = vrot.slane %v8456_v10, 6  ;;  %v8458_v3 = vld [vmem:[#allocation2 + $0x370] sm:$0xff]  ;;  %v507_v38 = vld [vmem:[#allocation2 + $0x378] sm:$0xff] }
 0x619   : > { %v6075_v36 = vrot.slane %v8457_v57, 2  ;;  %v6078_v17 = vrot.slane %v507_v38, 2  ;;  %v11400_v58 = vld [vmem:[#allocation60_spill] sm:$0xff] }
 0x61a   : > { %5922 = vmatmul.f32.gmra.mxu1 %v8451_v21  ;;  %6514 = vmatmul.f32.gmra.mxu3 %v6359_v27  ;;  %v6076_v27 = vrot.slane %v8458_v3, 2  ;;  %v5614_v21 = vsel %vm1958_vm1, %v5612_v25, %v5613_v32  ;;  %v8466_v25 = vld [vmem:[#allocation2 + $0x3b0] sm:$0xff] }
 0x61b   : > { %v6177_v50 = vpop.f32.mrf.mxu2  ;;  %v6081_v10 = vrot.slane %v8466_v25, 2 }
 0x61c   : > { %v6259_v0 = vadd.f32 %v6177_v50, %v5957_v45  ;;  %v6077_v50 = vsel %vm1506_vm0, %v6075_v36, %v6076_v27  ;;  %v8467_v36 = vld [vmem:[#allocation2 + $0x360] sm:$0xff] }
 0x61d   : > { %v5716_v26 = vpop.f32.mrf.mxu0  ;;  %v6467_v55 = vpop.f32.mrf.mxu3 }
 0x61e   : > { %v5796_v52 = vadd.f32 %v5716_v26, %v11395_v8  ;;  %v10777_v28 = vadd.f32 %v6467_v55, %v6259_v0  ;;  %v11397_v0 = vld [vmem:[#allocation54_spill] sm:$0xff] }
 0x61f   : > { %v5878_v54 = vpop.f32.mrf.mxu1  ;;  %v7167_v8 = vld [vmem:[#allocation10 + $0x300] sm:$0xff] }
 0x620   : > { %5763 = vmatmul.f32.gmra.mxu0 %v5609_v47  ;;  %6227 = vmatmul.f32.gmra.mxu2 %v6072_v4  ;;  %v5958_v37 = vadd.f32 %v5878_v54, %v5796_v52  ;;  %v6367_v4 = vsel %vm1958_vm1, %v6365_v35, %v6366_v29  ;;  %v8461_v52 = vld [vmem:[#allocation2 + $0x350] sm:$0xff] }
 0x621   : > { %v5615_v55 = vrot.slane %v8461_v52, 6  ;;  %7198 = vmatpush.msra.mxu2 %v7167_v8  ;;  %v8470_v8 = vld [vmem:[#allocation2 + $0x398] sm:$0xff] }
 0x622   : > { %5925 = vmatmul.f32.gmra.mxu1 %v8454_v7  ;;  %6517 = vmatmul.f32.gmra.mxu3 %v6362_v59  ;;  %v8462_v59 = vld [vmem:[#allocation2 + $0x358] sm:$0xff] }
 0x623   : > { %v6180_v19 = vpop.f32.mrf.mxu2  ;;  %v5616_v13 = vsel %vm1958_vm1, %v5613_v32, %v5615_v55  ;;  %v648_v32 = vld [vmem:[#allocation2 + $0x800] sm:$0xff] }
 0x624   : > { %v6260_v53 = vadd.f32 %v6180_v19, %v5958_v37  ;;  %v8463_v37 = vld [vmem:[#allocation2 + $0x7d0] sm:$0xff]  ;;  %v7005_v19 = vld [vmem:[#allocation10 + $0x280] sm:$0xff]  ;;  %v6370_v23 = vrot.slane %v648_v32, 6 }
 0x625   : > { %v5719_v31 = vpop.f32.mrf.mxu0  ;;  %v6470_v2 = vpop.f32.mrf.mxu3  ;;  %v6368_v7 = vrot.slane %v8463_v37, 6  ;;  %7036 = vmatpush.msra.mxu1 %v7005_v19 }
 0x626   : > { %v5797_v20 = vadd.f32 %v5719_v31, %v11396_v33  ;;  %v10783_v16 = vadd.f32 %v6470_v2, %v6260_v53  ;;  %v6079_v53 = vsel %vm1506_vm0, %v6076_v27, %v6078_v17  ;;  %v508_v31 = vld [vmem:[#allocation2 + $0x380] sm:$0xff]  ;;  %v8464_v2 = vld [vmem:[#allocation2 + $0x388] sm:$0xff]  ;;  %v8471_v17 = vld [vmem:[#allocation2 + $0x810] sm:$0xff] }
 0x627   : > { %v5881_v41 = vpop.f32.mrf.mxu1  ;;  %v6369_v33 = vsel %vm1958_vm1, %v6366_v29, %v6368_v7  ;;  %v5618_v22 = vrot.slane %v8464_v2, 6  ;;  %v516_v7 = vld [vmem:[#allocation2 + $0x3c0] sm:$0xff] }
 0x628   : > { %5766 = vmatmul.f32.gmra.mxu0 %v5611_v18  ;;  %6230 = vmatmul.f32.gmra.mxu2 %v6074_v51  ;;  %v5959_v6 = vadd.f32 %v5881_v41, %v5797_v20  ;;  %v5617_v20 = vrot.slane %v508_v31, 6  ;;  %v8465_v41 = vld [vmem:[#allocation2 + $0x3a8] sm:$0xff] }
 0x62a   : > { %5928 = vmatmul.f32.gmra.mxu1 %v8459_v9  ;;  %6520 = vmatmul.f32.gmra.mxu3 %v6364_v60  ;;  %v6080_v60 = vrot.slane %v8465_v41, 2 }
 0x62b   : > { %v6183_v5 = vpop.f32.mrf.mxu2 }
 0x62c   : > { %v6261_v14 = vadd.f32 %v6183_v5, %v5959_v6  ;;  %v8468_v6 = vld [vmem:[#allocation2 + $0x808] sm:$0xff]  ;;  %v6082_v35 = vsel %vm1506_vm0, %v6080_v60, %v6081_v10 }
 0x62d   : > { %v5722_v45 = vpop.f32.mrf.mxu0  ;;  %v6473_v34 = vpop.f32.mrf.mxu3  ;;  %v6371_v9 = vrot.slane %v8468_v6, 6 }
 0x62e   : > { %v5798_v63 = vadd.f32 %v5722_v45, %v11397_v0  ;;  %v10789_v26 = vadd.f32 %v6473_v34, %v6261_v14  ;;  %v5619_v14 = vsel %vm1958_vm1, %v5617_v20, %v5618_v22  ;;  %v8469_v34 = vld [vmem:[#allocation2 + $0x390] sm:$0xff]  ;;  %v656_v20 = vld [vmem:[#allocation2 + $0x840] sm:$0xff] }
 0x62f   : > { %v5884_v47 = vpop.f32.mrf.mxu1  ;;  %v5620_v38 = vrot.slane %v8469_v34, 6  ;;  %v6375_v25 = vrot.slane %v656_v20, 6 }
 0x630   : > { %5769 = vmatmul.f32.gmra.mxu0 %v5614_v21  ;;  %6233 = vmatmul.f32.gmra.mxu2 %v6077_v50  ;;  %v5960_v54 = vadd.f32 %v5884_v47, %v5798_v63  ;;  %v515_v21 = vld [vmem:[#allocation2 + $0x3b8] sm:$0xff]  ;;  %v6372_v63 = vsel %vm1958_vm1, %v6370_v23, %v6371_v9 }
 0x631   : > { %v6083_v47 = vrot.slane %v515_v21, 2 }
 0x632   : > { %5931 = vmatmul.f32.gmra.mxu1 %v8462_v59  ;;  %6523 = vmatmul.f32.gmra.mxu3 %v6367_v4 }
 0x633   : > { %v6186_v30 = vpop.f32.mrf.mxu2  ;;  %v6084_v49 = vsel %vm1506_vm0, %v6081_v10, %v6083_v47  ;;  %v8476_v10 = vld [vmem:[#allocation2 + $0x848] sm:$0xff] }
 0x634   : > { %v6262_v43 = vadd.f32 %v6186_v30, %v5960_v54  ;;  %v6373_v54 = vrot.slane %v8471_v17, 6  ;;  %v5621_v30 = vsel %vm1958_vm1, %v5618_v22, %v5620_v38  ;;  %v8475_v22 = vld [vmem:[#allocation2 + $0x3a0] sm:$0xff]  ;;  %v6376_v32 = vrot.slane %v8476_v10, 6  ;;  %v8479_v38 = vld [vmem:[#allocation2 + $0x850] sm:$0xff] }
 0x635   : > { %v5725_v61 = vpop.f32.mrf.mxu0  ;;  %v6476_v15 = vpop.f32.mrf.mxu3  ;;  %v6378_v47 = vrot.slane %v8479_v38, 6  ;;  %v11404_v38 = vld [vmem:[#allocation68_spill] sm:$0xff] }
 0x636   : > { %v5799_v24 = vadd.f32 %v5725_v61, %v11398_v46  ;;  %v10795_v18 = vadd.f32 %v6476_v15, %v6262_v43  ;;  %v8472_v46 = vld [vmem:[#allocation2 + $0x3c8] sm:$0xff] }
 0x637   : > { %v5887_v51 = vpop.f32.mrf.mxu1  ;;  %v8473_v15 = vld [vmem:[#allocation2 + $0x3e8] sm:$0xff] }
 0x638   : > { %5772 = vmatmul.f32.gmra.mxu0 %v5616_v13  ;;  %6236 = vmatmul.f32.gmra.mxu2 %v6079_v53  ;;  %v5961_v57 = vadd.f32 %v5887_v51, %v5799_v24  ;;  %v6374_v13 = vsel %vm1958_vm1, %v6371_v9, %v6373_v54  ;;  %v5622_v53 = vrot.slane %v516_v7, 6  ;;  %v5623_v24 = vrot.slane %v8472_v46, 6  ;;  %v8474_v51 = vld [vmem:[#allocation2 + $0x3f0] sm:$0xff]  ;;  %v523_v9 = vld [vmem:[#allocation2 + $0x3f8] sm:$0xff]  ;;  %v8481_v7 = vld [vmem:[#allocation2 + $0x4a8] sm:$0xff] }
 0x639   : > { %v6085_v31 = vrot.slane %v8473_v15, 2  ;;  %v8483_v46 = vld [vmem:[#allocation2 + $0x908] sm:$0xff] }
 0x63a   : > { %5934 = vmatmul.f32.gmra.mxu1 %v8467_v36  ;;  %6526 = vmatmul.f32.gmra.mxu3 %v6369_v33  ;;  %v6086_v33 = vrot.slane %v8474_v51, 2  ;;  %v5624_v36 = vsel %vm1958_vm1, %v5622_v53, %v5623_v24  ;;  %v8482_v53 = vld [vmem:[#allocation2 + $0x3e0] sm:$0xff]  ;;  %v8484_v51 = vld [vmem:[#allocation2 + $0x930] sm:$0xff] }
 0x63b   : > { %v6189_v3 = vpop.f32.mrf.mxu2 }
 0x63c   : > { %v6263_v27 = vadd.f32 %v6189_v3, %v5961_v57  ;;  %v6087_v3 = vsel %vm1506_vm0, %v6085_v31, %v6086_v33 }
 0x63d   : > { %v5728_v5 = vpop.f32.mrf.mxu0  ;;  %v6479_v45 = vpop.f32.mrf.mxu3 }
 0x63e   : > { %v5800_v29 = vadd.f32 %v5728_v5, %v11399_v39  ;;  %v10801_v50 = vadd.f32 %v6479_v45, %v6263_v27  ;;  %v11401_v27 = vld [vmem:[#allocation62_spill] sm:$0xff]  ;;  %v8477_v39 = vld [vmem:[#allocation2 + $0x3d0] sm:$0xff]  ;;  %v6088_v45 = vrot.slane %v523_v9, 2 }
 0x63f   : > { %v5890_v0 = vpop.f32.mrf.mxu1 }
 0x640   : > { %5775 = vmatmul.f32.gmra.mxu0 %v5619_v14  ;;  %6239 = vmatmul.f32.gmra.mxu2 %v6082_v35  ;;  %v5962_v4 = vadd.f32 %v5890_v0, %v5800_v29  ;;  %v6377_v35 = vsel %vm1958_vm1, %v6375_v25, %v6376_v32  ;;  %v5625_v29 = vrot.slane %v8477_v39, 6  ;;  %v8478_v0 = vld [vmem:[#allocation2 + $0x3d8] sm:$0xff] }
 0x641   : > { %v11403_v25 = vld [vmem:[#allocation66_spill] sm:$0xff] }
 0x642   : > { %5937 = vmatmul.f32.gmra.mxu1 %v8470_v8  ;;  %6529 = vmatmul.f32.gmra.mxu3 %v6372_v63  ;;  %v5626_v8 = vsel %vm1958_vm1, %v5623_v24, %v5625_v29  ;;  %v6893_v24 = vrot.slane %v8483_v46, 6  ;;  %v8487_v29 = vld [vmem:[#allocation2 + $0x910] sm:$0xff] }
 0x643   : > { %v6192_v52 = vpop.f32.mrf.mxu2 }
 0x644   : > { %v6264_v55 = vadd.f32 %v6192_v52, %v5962_v4  ;;  %v6089_v52 = vsel %vm1506_vm0, %v6086_v33, %v6088_v45  ;;  %v7357_v33 = vrot.slane %v8484_v51, 2  ;;  %v6895_v45 = vrot.slane %v8487_v29, 6  ;;  %v8493_v51 = vld [vmem:[#allocation2 + $0x970] sm:$0xff] }
 0x645   : > { %v5731_v59 = vpop.f32.mrf.mxu0  ;;  %v6482_v37 = vpop.f32.mrf.mxu3 }
 0x646   : > { %v5801_v43 = vadd.f32 %v5731_v59, %v11400_v58  ;;  %v10807_v19 = vadd.f32 %v6482_v37, %v6264_v55  ;;  %v11402_v55 = vld [vmem:[#allocation64_spill] sm:$0xff]  ;;  %v676_v58 = vld [vmem:[#allocation2 + $0x900] sm:$0xff] }
 0x647   : > { %v5893_v61 = vpop.f32.mrf.mxu1  ;;  %v6892_v31 = vrot.slane %v676_v58, 6 }
 0x648   : > { %5778 = vmatmul.f32.gmra.mxu0 %v5621_v30  ;;  %6242 = vmatmul.f32.gmra.mxu2 %v6084_v49  ;;  %v5963_v2 = vadd.f32 %v5893_v61, %v5801_v43  ;;  %v6379_v49 = vsel %vm1958_vm1, %v6376_v32, %v6378_v47  ;;  %v8480_v43 = vld [vmem:[#allocation2 + $0x4b0] sm:$0xff]  ;;  %v6590_v61 = vrot.slane %v8481_v7, 2 }
 0x649   : > { %v6591_v37 = vrot.slane %v8480_v43, 2  ;;  %v8490_v43 = vld [vmem:[#allocation2 + $0x4f0] sm:$0xff] }
 0x64a   : > { %5940 = vmatmul.f32.gmra.mxu1 %v8475_v22  ;;  %6532 = vmatmul.f32.gmra.mxu3 %v6374_v13  ;;  %v6596_v7 = vrot.slane %v8490_v43, 2 }
 0x64b   : > { %v6195_v41 = vpop.f32.mrf.mxu2 }
 0x64c   : > { %v6265_v60 = vadd.f32 %v6195_v41, %v5963_v2  ;;  %v8485_v2 = vld [vmem:[#allocation2 + $0x928] sm:$0xff] }
 0x64d   : > { %v5734_v57 = vpop.f32.mrf.mxu0  ;;  %v6485_v6 = vpop.f32.mrf.mxu3  ;;  %v7356_v22 = vrot.slane %v8485_v2, 2 }
 0x64e   : > { %v5802_v23 = vadd.f32 %v5734_v57, %v11401_v27  ;;  %v10813_v5 = vadd.f32 %v6485_v6, %v6265_v60  ;;  %v6592_v60 = vsel %vm1506_vm0, %v6590_v61, %v6591_v37  ;;  %v543_v57 = vld [vmem:[#allocation2 + $0x4b8] sm:$0xff]  ;;  %v6894_v27 = vsel %vm1958_vm1, %v6892_v31, %v6893_v24  ;;  %v8492_v31 = vld [vmem:[#allocation2 + $0x968] sm:$0xff] }
 0x64f   : > { %v5896_v14 = vpop.f32.mrf.mxu1  ;;  %v7358_v6 = vsel %vm1506_vm0, %v7356_v22, %v7357_v33  ;;  %v6593_v9 = vrot.slane %v543_v57, 2  ;;  %v11405_v22 = vld [vmem:[#allocation70_spill] sm:$0xff] }
 0x650   : > { %5781 = vmatmul.f32.gmra.mxu0 %v5624_v36  ;;  %6245 = vmatmul.f32.gmra.mxu2 %v6087_v3  ;;  %v5964_v21 = vadd.f32 %v5896_v14, %v5802_v23  ;;  %v8486_v23 = vld [vmem:[#allocation2 + $0x918] sm:$0xff] }
 0x651   : > { %v683_v14 = vld [vmem:[#allocation2 + $0x938] sm:$0xff] }
 0x652   : > { %5943 = vmatmul.f32.gmra.mxu1 %v8478_v0  ;;  %6535 = vmatmul.f32.gmra.mxu3 %v6377_v35  ;;  %v7359_v0 = vrot.slane %v683_v14, 2 }
 0x653   : > { %v6198_v63 = vpop.f32.mrf.mxu2 }
 0x654   : > { %v6266_v34 = vadd.f32 %v6198_v63, %v5964_v21 }
 0x655   : > { %v5737_v4 = vpop.f32.mrf.mxu0  ;;  %v6488_v54 = vpop.f32.mrf.mxu3 }
 0x656   : > { %v5803_v17 = vadd.f32 %v5737_v4, %v11402_v55  ;;  %v10819_v59 = vadd.f32 %v6488_v54, %v6266_v34  ;;  %v6594_v34 = vsel %vm1506_vm0, %v6591_v37, %v6593_v9  ;;  %v6896_v55 = vsel %vm1958_vm1, %v6893_v24, %v6895_v45 }
 0x657   : > { %v5899_v30 = vpop.f32.mrf.mxu1  ;;  %v7360_v54 = vsel %vm1506_vm0, %v7357_v33, %v7359_v0  ;;  %v7361_v24 = vrot.slane %v8492_v31, 2  ;;  %v8500_v31 = vld [vmem:[#allocation2 + $0x9a8] sm:$0xff] }
 0x658   : > { %5784 = vmatmul.f32.gmra.mxu0 %v5626_v8  ;;  %6248 = vmatmul.f32.gmra.mxu2 %v6089_v52  ;;  %v5965_v13 = vadd.f32 %v5899_v30, %v5803_v17  ;;  %v8488_v17 = vld [vmem:[#allocation2 + $0x920] sm:$0xff] }
 0x659   : > { %v684_v30 = vld [vmem:[#allocation2 + $0x940] sm:$0xff] }
 0x65a   : > { %5946 = vmatmul.f32.gmra.mxu1 %v8482_v53  ;;  %6538 = vmatmul.f32.gmra.mxu3 %v6379_v49  ;;  %v8489_v49 = vld [vmem:[#allocation2 + $0x4e8] sm:$0xff] }
 0x65b   : > { %v6201_v15 = vpop.f32.mrf.mxu2  ;;  %v6595_v58 = vrot.slane %v8489_v49, 2  ;;  %v8491_v53 = vld [vmem:[#allocation2 + $0x948] sm:$0xff] }
 0x65c   : > { %v6267_v20 = vadd.f32 %v6201_v15, %v5965_v13  ;;  %v6897_v13 = vrot.slane %v684_v30, 6  ;;  %v6898_v46 = vrot.slane %v8491_v53, 6  ;;  %v8497_v30 = vld [vmem:[#allocation2 + $0x528] sm:$0xff] }
 0x65d   : > { %v5740_v41 = vpop.f32.mrf.mxu0  ;;  %v6491_v32 = vpop.f32.mrf.mxu3  ;;  %v6597_v33 = vsel %vm1506_vm0, %v6595_v58, %v6596_v7  ;;  %v6600_v49 = vrot.slane %v8497_v30, 2  ;;  %v8498_v58 = vld [vmem:[#allocation2 + $0x530] sm:$0xff]  ;;  %v700_v30 = vld [vmem:[#allocation2 + $0x9c0] sm:$0xff] }
 0x65e   : > { %v5804_v10 = vadd.f32 %v5740_v41, %v11403_v25  ;;  %v10824_v36 = vadd.f32 %v6491_v32, %v6267_v20  ;;  %v7362_v20 = vrot.slane %v8493_v51, 2  ;;  %v551_v25 = vld [vmem:[#allocation2 + $0x4f8] sm:$0xff]  ;;  %v6899_v57 = vsel %vm1958_vm1, %v6897_v13, %v6898_v46  ;;  %v8499_v13 = vld [vmem:[#allocation2 + $0x988] sm:$0xff] }
 0x65f   : > { %v5902_v3 = vpop.f32.mrf.mxu1  ;;  %v6601_v43 = vrot.slane %v8498_v58, 2  ;;  %v6903_v53 = vrot.slane %v8499_v13, 6  ;;  %v6907_v13 = vrot.slane %v700_v30, 6 }
 0x660   : > { %6735 = vmatmul.f32.vlgmr.msra.gmra.mxu0 %v6592_v60  ;;  %7199 = vmatmul.f32.vlgmr.msra.gmra.mxu2 %v8486_v23  ;;  %v5966_v35 = vadd.f32 %v5902_v3, %v5804_v10  ;;  %v8494_v3 = vld [vmem:[#allocation2 + $0x958] sm:$0xff]  ;;  %v6598_v23 = vrot.slane %v551_v25, 2 }
 0x662   : > { %7037 = vmatmul.f32.vlgmr.msra.gmra.mxu1 %v6894_v27  ;;  %7501 = vmatmul.f32.vlgmr.msra.gmra.mxu3 %v7358_v6  ;;  %v7363_v27 = vsel %vm1506_vm0, %v7361_v24, %v7362_v20  ;;  %v691_v6 = vld [vmem:[#allocation2 + $0x978] sm:$0xff]  ;;  %v6599_v0 = vsel %vm1506_vm0, %v6596_v7, %v6598_v23  ;;  %v8501_v24 = vld [vmem:[#allocation2 + $0x9b0] sm:$0xff] }
 0x663   : > { %v6204_v39 = vpop.f32.mrf.mxu2  ;;  %v7364_v45 = vrot.slane %v691_v6, 2  ;;  %v7367_v51 = vrot.slane %v8501_v24, 2  ;;  %v699_v6 = vld [vmem:[#allocation2 + $0x9b8] sm:$0xff]  ;;  %v8508_v24 = vld [vmem:[#allocation2 + $0x9e8] sm:$0xff] }
 0x664   : > { %v6268_v21 = vadd.f32 %v6204_v39, %v5966_v35  ;;  %v8495_v35 = vld [vmem:[#allocation2 + $0x950] sm:$0xff] }
 0x665   : > { %v5743_v63 = vpop.f32.mrf.mxu0  ;;  %v6494_v4 = vpop.f32.mrf.mxu3  ;;  %v6900_v39 = vrot.slane %v8495_v35, 6  ;;  %v8503_v35 = vld [vmem:[#allocation2 + $0x990] sm:$0xff] }
 0x666   : > { %v5805_v47 = vadd.f32 %v5743_v63, %v11404_v38  ;;  %v10830_v8 = vadd.f32 %v6494_v4, %v6268_v21  ;;  %v11406_v63 = vld [vmem:[#allocation72_spill] sm:$0xff] }
 0x667   : > { %v5905_v52 = vpop.f32.mrf.mxu1 }
 0x668   : > { %6738 = vmatmul.f32.gmra.mxu0 %v6594_v34  ;;  %7202 = vmatmul.f32.gmra.mxu2 %v8488_v17  ;;  %v5967_v61 = vadd.f32 %v5905_v52, %v5805_v47  ;;  %v6901_v52 = vsel %vm1958_vm1, %v6898_v46, %v6900_v39  ;;  %v7365_v17 = vsel %vm1506_vm0, %v7362_v20, %v7364_v45  ;;  %v7366_v46 = vrot.slane %v8500_v31, 2 }
 0x669   : > { %v6602_v20 = vsel %vm1506_vm0, %v6600_v49, %v6601_v43  ;;  %v6905_v39 = vrot.slane %v8503_v35, 6  ;;  %v7369_v45 = vrot.slane %v699_v6, 2  ;;  %v8505_v49 = vld [vmem:[#allocation2 + $0x568] sm:$0xff] }
 0x66a   : > { %7040 = vmatmul.f32.gmra.mxu1 %v6896_v55  ;;  %7504 = vmatmul.f32.gmra.mxu3 %v7360_v54  ;;  %v8496_v55 = vld [vmem:[#allocation2 + $0x960] sm:$0xff]  ;;  %v6605_v58 = vrot.slane %v8505_v49, 2 }
 0x66b   : > { %v6207_v37 = vpop.f32.mrf.mxu2  ;;  %v692_v54 = vld [vmem:[#allocation2 + $0x980] sm:$0xff] }
 0x66c   : > { %v6269_v15 = vadd.f32 %v6207_v37, %v5967_v61  ;;  %v6902_v37 = vrot.slane %v692_v54, 6  ;;  %v7370_v54 = vsel %vm1506_vm0, %v7367_v51, %v7369_v45  ;;  %v8512_v49 = vld [vmem:[#allocation2 + $0x9e0] sm:$0xff] }
 0x66d   : > { %v5746_v2 = vpop.f32.mrf.mxu0  ;;  %v6497_v60 = vpop.f32.mrf.mxu3 }
 0x66e   : > { %v5806_v41 = vadd.f32 %v5746_v2, %v11405_v22  ;;  %v10836_v10 = vadd.f32 %v6497_v60, %v6269_v15  ;;  %v559_v60 = vld [vmem:[#allocation2 + $0x538] sm:$0xff] }
 0x66f   : > { %v5908_v32 = vpop.f32.mrf.mxu1  ;;  %v6603_v23 = vrot.slane %v559_v60, 2 }
 0x670   : > { %6741 = vmatmul.f32.gmra.mxu0 %v6597_v33  ;;  %7205 = vmatmul.f32.gmra.mxu2 %v8494_v3  ;;  %v5968_v9 = vadd.f32 %v5908_v32, %v5806_v41  ;;  %v11407_v33 = vld [vmem:[#allocation74_spill] sm:$0xff] }
 0x671   : > { %v8502_v3 = vld [vmem:[#allocation2 + $0x998] sm:$0xff] }
 0x672   : > { %7043 = vmatmul.f32.gmra.mxu1 %v6899_v57  ;;  %7507 = vmatmul.f32.gmra.mxu3 %v7363_v27  ;;  %v6904_v57 = vsel %vm1958_vm1, %v6902_v37, %v6903_v53  ;;  %v7368_v27 = vsel %vm1506_vm0, %v7366_v46, %v7367_v51 }
 0x673   : > { %v6210_v14 = vpop.f32.mrf.mxu2 }
 0x674   : > { %v6270_v29 = vadd.f32 %v6210_v14, %v5968_v9 }
 0x675   : > { %v5749_v21 = vpop.f32.mrf.mxu0  ;;  %v6500_v38 = vpop.f32.mrf.mxu3 }
 0x676   : > { %v5807_v34 = vadd.f32 %v5749_v21, %v11406_v63  ;;  %v10842_v47 = vadd.f32 %v6500_v38, %v6270_v29  ;;  %v11408_v63 = vld [vmem:[#allocation77_spill] sm:$0xff] }
 0x677   : > { %v5911_v4 = vpop.f32.mrf.mxu1 }
 0x678   : > { %6744 = vmatmul.f32.gmra.mxu0 %v6599_v0  ;;  %7208 = vmatmul.f32.gmra.mxu2 %v8496_v55  ;;  %v5969_v61 = vadd.f32 %v5911_v4, %v5807_v34  ;;  %v6604_v0 = vsel %vm1506_vm0, %v6601_v43, %v6603_v23  ;;  %v6906_v55 = vsel %vm1958_vm1, %v6903_v53, %v6905_v39  ;;  %v7371_v53 = vrot.slane %v8508_v24, 2  ;;  %v8510_v23 = vld [vmem:[#allocation2 + $0x9d8] sm:$0xff] }
 0x67a   : > { %7046 = vmatmul.f32.gmra.mxu1 %v6901_v52  ;;  %7510 = vmatmul.f32.gmra.mxu3 %v7365_v17  ;;  %v8504_v17 = vld [vmem:[#allocation2 + $0x9a0] sm:$0xff] }
 0x67b   : > { %v6213_v7 = vpop.f32.mrf.mxu2 }
 0x67c   : > { %v6271_v15 = vadd.f32 %v6213_v7, %v5969_v61  ;;  %v8506_v61 = vld [vmem:[#allocation2 + $0x570] sm:$0xff] }
 0x67d   : > { %v5752_v2 = vpop.f32.mrf.mxu0  ;;  %v6503_v41 = vpop.f32.mrf.mxu3  ;;  %v6606_v7 = vrot.slane %v8506_v61, 2  ;;  %v708_v61 = vld [vmem:[#allocation2 + $0xa00] sm:$0xff] }
 0x67e   : > { %v5808_v22 = vadd.f32 %v5752_v2, %v11407_v33  ;;  %v10848_v25 = vadd.f32 %v6503_v41, %v6271_v15  ;;  %v8507_v15 = vld [vmem:[#allocation2 + $0x9c8] sm:$0xff]  ;;  %v8509_v2 = vld [vmem:[#allocation2 + $0x9f0] sm:$0xff]  ;;  %v6912_v24 = vrot.slane %v708_v61, 6 }
 0x67f   : > { %v5914_v32 = vpop.f32.mrf.mxu1  ;;  %v6908_v31 = vrot.slane %v8507_v15, 6  ;;  %v6607_v51 = vsel %vm1506_vm0, %v6605_v58, %v6606_v7 }
 0x680   : > { %6747 = vmatmul.f32.gmra.mxu0 %v6602_v20  ;;  %7211 = vmatmul.f32.gmra.mxu2 %v8502_v3  ;;  %v5970_v9 = vadd.f32 %v5914_v32, %v5808_v22  ;;  %v7372_v20 = vrot.slane %v8509_v2, 2  ;;  %v11409_v22 = vld [vmem:[#allocation80_spill] sm:$0xff]  ;;  %v567_v32 = vld [vmem:[#allocation2 + $0x578] sm:$0xff] }
 0x682   : > { %7049 = vmatmul.f32.gmra.mxu1 %v6904_v57  ;;  %7513 = vmatmul.f32.gmra.mxu3 %v7368_v27  ;;  %v6909_v27 = vsel %vm1958_vm1, %v6907_v13, %v6908_v31  ;;  %v7373_v6 = vsel %vm1506_vm0, %v7371_v53, %v7372_v20  ;;  %v8514_v13 = vld [vmem:[#allocation2 + $0x5b0] sm:$0xff]  ;;  %v8515_v53 = vld [vmem:[#allocation2 + $0xa08] sm:$0xff] }
 0x683   : > { %v6216_v14 = vpop.f32.mrf.mxu2  ;;  %v6611_v15 = vrot.slane %v8514_v13, 2  ;;  %v6913_v2 = vrot.slane %v8515_v53, 6  ;;  %v8520_v13 = vld [vmem:[#allocation2 + $0xa20] sm:$0xff] }
 0x684   : > { %v6272_v29 = vadd.f32 %v6216_v14, %v5970_v9  ;;  %v6608_v9 = vrot.slane %v567_v32, 2  ;;  %v707_v14 = vld [vmem:[#allocation2 + $0x9f8] sm:$0xff] }
 0x685   : > { %v5755_v21 = vpop.f32.mrf.mxu0  ;;  %v6506_v38 = vpop.f32.mrf.mxu3  ;;  %v11411_v32 = vld [vmem:[#allocation86_spill] sm:$0xff] }
 0x686   : > { %v5809_v34 = vadd.f32 %v5755_v21, %v11408_v63  ;;  %v10854_v4 = vadd.f32 %v6506_v38, %v6272_v29  ;;  %v8511_v29 = vld [vmem:[#allocation2 + $0x9d0] sm:$0xff]  ;;  %v11410_v38 = vld [vmem:[#allocation83_spill] sm:$0xff] }
 0x687   : > { %v5917_v52 = vpop.f32.mrf.mxu1  ;;  %v6910_v45 = vrot.slane %v8511_v29, 6 }
 0x688   : > { %6750 = vmatmul.f32.gmra.mxu0 %v6604_v0  ;;  %7214 = vmatmul.f32.gmra.mxu2 %v8504_v17  ;;  %v5971_v37 = vadd.f32 %v5917_v52, %v5809_v34  ;;  %v7374_v0 = vrot.slane %v707_v14, 2  ;;  %v6609_v34 = vsel %vm1506_vm0, %v6606_v7, %v6608_v9  ;;  %v6914_v14 = vsel %vm1958_vm1, %v6912_v24, %v6913_v2  ;;  %v8521_v24 = vld [vmem:[#allocation2 + $0x5e8] sm:$0xff] }
 0x689   : > { %v6911_v30 = vsel %vm1958_vm1, %v6908_v31, %v6910_v45  ;;  %v715_v45 = vld [vmem:[#allocation2 + $0xa38] sm:$0xff]  ;;  %v6615_v53 = vrot.slane %v8521_v24, 2 }
 0x68a   : > { %7052 = vmatmul.f32.gmra.mxu1 %v6906_v55  ;;  %7516 = vmatmul.f32.gmra.mxu3 %v7370_v54  ;;  %v7375_v58 = vsel %vm1506_vm0, %v7372_v20, %v7374_v0 }
 0x68b   : > { %v6219_v43 = vpop.f32.mrf.mxu2 }
 0x68c   : > { %v6273_v46 = vadd.f32 %v6219_v43, %v5971_v37  ;;  %v8513_v37 = vld [vmem:[#allocation2 + $0x5a8] sm:$0xff] }
 0x68d   : > { %v5758_v33 = vpop.f32.mrf.mxu0  ;;  %v6509_v60 = vpop.f32.mrf.mxu3  ;;  %v6610_v43 = vrot.slane %v8513_v37, 2 }
 0x68e   : > { %v5810_v41 = vadd.f32 %v5758_v33, %v11409_v22  ;;  %v10860_v57 = vadd.f32 %v6509_v60, %v6273_v46  ;;  %v8517_v22 = vld [vmem:[#allocation2 + $0xa30] sm:$0xff] }
 0x68f   : > { %v5920_v3 = vpop.f32.mrf.mxu1  ;;  %v6612_v20 = vsel %vm1506_vm0, %v6610_v43, %v6611_v15 }
 0x690   : > { %6753 = vmatmul.f32.gmra.mxu0 %v6607_v51  ;;  %7217 = vmatmul.f32.gmra.mxu2 %v8510_v23  ;;  %v5972_v35 = vadd.f32 %v5920_v3, %v5810_v41  ;;  %v8516_v51 = vld [vmem:[#allocation2 + $0xa28] sm:$0xff]  ;;  %v7377_v41 = vrot.slane %v8517_v22, 2  ;;  %v575_v23 = vld [vmem:[#allocation2 + $0x5b8] sm:$0xff] }
 0x691   : > { %v7376_v31 = vrot.slane %v8516_v51, 2  ;;  %v6613_v29 = vrot.slane %v575_v23, 2 }
 0x692   : > { %7055 = vmatmul.f32.gmra.mxu1 %v6909_v27  ;;  %7519 = vmatmul.f32.gmra.mxu3 %v7373_v6 }
 0x693   : > { %v6222_v39 = vpop.f32.mrf.mxu2 }
 0x694   : > { %v6274_v21 = vadd.f32 %v6222_v39, %v5972_v35  ;;  %v8518_v35 = vld [vmem:[#allocation2 + $0xa18] sm:$0xff]  ;;  %v7378_v39 = vsel %vm1506_vm0, %v7376_v31, %v7377_v41 }
 0x695   : > { %v5761_v63 = vpop.f32.mrf.mxu0  ;;  %v6512_v55 = vpop.f32.mrf.mxu3 }
 0x696   : > { %v5811_v52 = vadd.f32 %v5761_v63, %v11410_v38  ;;  %v10866_v17 = vadd.f32 %v6512_v55, %v6274_v21  ;;  %v8519_v63 = vld [vmem:[#allocation2 + $0xa10] sm:$0xff] }
 0x697   : > { %v5923_v54 = vpop.f32.mrf.mxu1 }
 0x698   : > { %6756 = vmatmul.f32.gmra.mxu0 %v6609_v34  ;;  %7220 = vmatmul.f32.gmra.mxu2 %v8512_v49  ;;  %v5973_v46 = vadd.f32 %v5923_v54, %v5811_v52  ;;  %v6915_v34 = vrot.slane %v8519_v63, 6  ;;  %v7379_v52 = vrot.slane %v715_v45, 2  ;;  %v6614_v54 = vsel %vm1506_vm0, %v6611_v15, %v6613_v29  ;;  %v583_v29 = vld [vmem:[#allocation2 + $0x5f8] sm:$0xff] }
 0x699   : > { %v8526_v63 = vld [vmem:[#allocation2 + $0xa58] sm:$0xff] }
 0x69a   : > { %7058 = vmatmul.f32.gmra.mxu1 %v6911_v30  ;;  %7522 = vmatmul.f32.gmra.mxu3 %v7375_v58  ;;  %v11412_v30 = vld [vmem:[#allocation89_spill] sm:$0xff]  ;;  %v6916_v43 = vsel %vm1958_vm1, %v6913_v2, %v6915_v34 }
 0x69b   : > { %v6225_v7 = vpop.f32.mrf.mxu2 }
 0x69c   : > { %v6275_v33 = vadd.f32 %v6225_v7, %v5973_v46  ;;  %v7380_v46 = vsel %vm1506_vm0, %v7377_v41, %v7379_v52  ;;  %v716_v7 = vld [vmem:[#allocation2 + $0xa40] sm:$0xff]  ;;  %v723_v52 = vld [vmem:[#allocation2 + $0xa78] sm:$0xff] }
 0x69d   : > { %v5764_v60 = vpop.f32.mrf.mxu0  ;;  %v6515_v27 = vpop.f32.mrf.mxu3  ;;  %v6917_v22 = vrot.slane %v716_v7, 6 }
 0x69e   : > { %v5812_v3 = vadd.f32 %v5764_v60, %v11411_v32  ;;  %v10872_v6 = vadd.f32 %v6515_v27, %v6275_v33  ;;  %v8522_v33 = vld [vmem:[#allocation2 + $0x5f0] sm:$0xff]  ;;  %v8523_v60 = vld [vmem:[#allocation2 + $0xa48] sm:$0xff] }
 0x69f   : > { %v5926_v9 = vpop.f32.mrf.mxu1  ;;  %v6616_v51 = vrot.slane %v8522_v33, 2  ;;  %v8525_v27 = vld [vmem:[#allocation2 + $0xa70] sm:$0xff] }
 0x6a0   : > { %6759 = vmatmul.f32.gmra.mxu0 %v6612_v20  ;;  %7223 = vmatmul.f32.gmra.mxu2 %v8518_v35  ;;  %v5974_v21 = vadd.f32 %v5926_v9, %v5812_v3  ;;  %v6918_v20 = vrot.slane %v8523_v60, 6  ;;  %v8524_v3 = vld [vmem:[#allocation2 + $0xa68] sm:$0xff]  ;;  %v7382_v23 = vrot.slane %v8525_v27, 2  ;;  %v724_v60 = vld [vmem:[#allocation2 + $0xa80] sm:$0xff] }
 0x6a1   : > { %v7381_v2 = vrot.slane %v8524_v3, 2  ;;  %v6617_v41 = vsel %vm1506_vm0, %v6615_v53, %v6616_v51 }
 0x6a2   : > { %7061 = vmatmul.f32.gmra.mxu1 %v6914_v14  ;;  %7525 = vmatmul.f32.gmra.mxu3 %v7378_v39  ;;  %v11413_v14 = vld [vmem:[#allocation92_spill] sm:$0xff] }
 0x6a3   : > { %v6228_v0 = vpop.f32.mrf.mxu2  ;;  %v7383_v34 = vsel %vm1506_vm0, %v7381_v2, %v7382_v23  ;;  %v8530_v2 = vld [vmem:[#allocation2 + $0x630] sm:$0xff] }
 0x6a4   : > { %v6276_v38 = vadd.f32 %v6228_v0, %v5974_v21  ;;  %v6919_v0 = vsel %vm1958_vm1, %v6917_v22, %v6918_v20  ;;  %v6621_v27 = vrot.slane %v8530_v2, 2 }
 0x6a5   : > { %v5767_v55 = vpop.f32.mrf.mxu0  ;;  %v6518_v58 = vpop.f32.mrf.mxu3 }
 0x6a6   : > { %v5813_v49 = vadd.f32 %v5767_v55, %v11412_v30  ;;  %v10878_v61 = vadd.f32 %v6518_v58, %v6276_v38  ;;  %v6618_v38 = vrot.slane %v583_v29, 2  ;;  %v8527_v30 = vld [vmem:[#allocation2 + $0xa50] sm:$0xff]  ;;  %v8532_v29 = vld [vmem:[#allocation2 + $0xaa8] sm:$0xff] }
 0x6a7   : > { %v5929_v37 = vpop.f32.mrf.mxu1 }
 0x6a8   : > { %6762 = vmatmul.f32.gmra.mxu0 %v6614_v54  ;;  %7226 = vmatmul.f32.gmra.mxu2 %v8520_v13  ;;  %v5975_v31 = vadd.f32 %v5929_v37, %v5813_v49  ;;  %v6920_v49 = vrot.slane %v8527_v30, 6  ;;  %v7384_v37 = vrot.slane %v723_v52, 2  ;;  %v6619_v13 = vsel %vm1506_vm0, %v6616_v51, %v6618_v38 }
 0x6aa   : > { %7064 = vmatmul.f32.gmra.mxu1 %v6916_v43  ;;  %7528 = vmatmul.f32.gmra.mxu3 %v7380_v46  ;;  %v11414_v46 = vld [vmem:[#allocation95_spill] sm:$0xff]  ;;  %v7385_v22 = vsel %vm1506_vm0, %v7382_v23, %v7384_v37 }
 0x6ab   : > { %v6231_v15 = vpop.f32.mrf.mxu2 }
 0x6ac   : > { %v6277_v32 = vadd.f32 %v6231_v15, %v5975_v31  ;;  %v6921_v31 = vsel %vm1958_vm1, %v6918_v20, %v6920_v49  ;;  %v8528_v15 = vld [vmem:[#allocation2 + $0xa60] sm:$0xff]  ;;  %v7386_v20 = vrot.slane %v8532_v29, 2 }
 0x6ad   : > { %v5770_v9 = vpop.f32.mrf.mxu0  ;;  %v6521_v39 = vpop.f32.mrf.mxu3  ;;  %v732_v29 = vld [vmem:[#allocation2 + $0xac0] sm:$0xff] }
 0x6ae   : > { %v5814_v35 = vadd.f32 %v5770_v9, %v11413_v14  ;;  %v10884_v45 = vadd.f32 %v6521_v39, %v6277_v32  ;;  %v8529_v32 = vld [vmem:[#allocation2 + $0x628] sm:$0xff] }
 0x6af   : > { %v5932_v21 = vpop.f32.mrf.mxu1  ;;  %v6620_v3 = vrot.slane %v8529_v32, 2  ;;  %v8531_v14 = vld [vmem:[#allocation2 + $0xa88] sm:$0xff]  ;;  %v11416_v32 = vld [vmem:[#allocation101_spill] sm:$0xff] }
 0x6b0   : > { %6765 = vmatmul.f32.gmra.mxu0 %v6617_v41  ;;  %7229 = vmatmul.f32.gmra.mxu2 %v8526_v63  ;;  %v5976_v55 = vadd.f32 %v5932_v21, %v5814_v35  ;;  %v6922_v41 = vrot.slane %v724_v60, 6  ;;  %v6923_v35 = vrot.slane %v8531_v14, 6  ;;  %v8533_v21 = vld [vmem:[#allocation2 + $0xab0] sm:$0xff]  ;;  %v8536_v14 = vld [vmem:[#allocation2 + $0xaa0] sm:$0xff] }
 0x6b1   : > { %v6622_v23 = vsel %vm1506_vm0, %v6620_v3, %v6621_v27 }
 0x6b2   : > { %7067 = vmatmul.f32.gmra.mxu1 %v6919_v0  ;;  %7531 = vmatmul.f32.gmra.mxu3 %v7383_v34  ;;  %v7387_v0 = vrot.slane %v8533_v21, 2  ;;  %v11415_v34 = vld [vmem:[#allocation98_spill] sm:$0xff]  ;;  %v6924_v49 = vsel %vm1958_vm1, %v6922_v41, %v6923_v35 }
 0x6b3   : > { %v6234_v54 = vpop.f32.mrf.mxu2 }
 0x6b4   : > { %v6278_v58 = vadd.f32 %v6234_v54, %v5976_v55  ;;  %v591_v55 = vld [vmem:[#allocation2 + $0x638] sm:$0xff]  ;;  %v7388_v37 = vsel %vm1506_vm0, %v7386_v20, %v7387_v0  ;;  %v8537_v20 = vld [vmem:[#allocation2 + $0x668] sm:$0xff] }
 0x6b5   : > { %v5773_v43 = vpop.f32.mrf.mxu0  ;;  %v6524_v24 = vpop.f32.mrf.mxu3  ;;  %v6625_v21 = vrot.slane %v8537_v20, 2 }
 0x6b6   : > { %v5815_v7 = vadd.f32 %v5773_v43, %v11414_v46  ;;  %v10890_v53 = vadd.f32 %v6524_v24, %v6278_v58  ;;  %v8534_v58 = vld [vmem:[#allocation2 + $0xa98] sm:$0xff]  ;;  %v6623_v43 = vrot.slane %v591_v55, 2  ;;  %v8535_v24 = vld [vmem:[#allocation2 + $0xa90] sm:$0xff] }
 0x6b7   : > { %v5935_v33 = vpop.f32.mrf.mxu1 }
 0x6b8   : > { %6768 = vmatmul.f32.gmra.mxu0 %v6619_v13  ;;  %7232 = vmatmul.f32.gmra.mxu2 %v8528_v15  ;;  %v5977_v9 = vadd.f32 %v5935_v33, %v5815_v7  ;;  %v731_v13 = vld [vmem:[#allocation2 + $0xab8] sm:$0xff]  ;;  %v6925_v33 = vrot.slane %v8535_v24, 6  ;;  %v6624_v60 = vsel %vm1506_vm0, %v6621_v27, %v6623_v43 }
 0x6b9   : > { %v7389_v15 = vrot.slane %v731_v13, 2  ;;  %v11417_v13 = vld [vmem:[#allocation104_spill] sm:$0xff]  ;;  %v599_v24 = vld [vmem:[#allocation2 + $0x678] sm:$0xff] }
 0x6ba   : > { %7070 = vmatmul.f32.gmra.mxu1 %v6921_v31  ;;  %7534 = vmatmul.f32.gmra.mxu3 %v7385_v22  ;;  %v6926_v41 = vsel %vm1958_vm1, %v6923_v35, %v6925_v33 }
 0x6bb   : > { %v6237_v51 = vpop.f32.mrf.mxu2 }
 0x6bc   : > { %v6279_v39 = vadd.f32 %v6237_v51, %v5977_v9 }
 0x6bd   : > { %v5776_v63 = vpop.f32.mrf.mxu0  ;;  %v6527_v52 = vpop.f32.mrf.mxu3 }
 0x6be   : > { %v5816_v38 = vadd.f32 %v5776_v63, %v11415_v34  ;;  %v10896_v54 = vadd.f32 %v6527_v52, %v6279_v39  ;;  %v7390_v39 = vsel %vm1506_vm0, %v7387_v0, %v7389_v15  ;;  %v8538_v63 = vld [vmem:[#allocation2 + $0x670] sm:$0xff]  ;;  %v8539_v52 = vld [vmem:[#allocation2 + $0xac8] sm:$0xff] }
 0x6bf   : > { %v5938_v30 = vpop.f32.mrf.mxu1  ;;  %v6928_v55 = vrot.slane %v8539_v52, 6 }
 0x6c0   : > { %6771 = vmatmul.f32.gmra.mxu0 %v6622_v23  ;;  %7235 = vmatmul.f32.gmra.mxu2 %v8534_v58  ;;  %v5978_v46 = vadd.f32 %v5938_v30, %v5816_v38  ;;  %v6626_v23 = vrot.slane %v8538_v63, 2  ;;  %v6927_v38 = vrot.slane %v732_v29, 6  ;;  %v8541_v58 = vld [vmem:[#allocation2 + $0xaf0] sm:$0xff]  ;;  %v11418_v63 = vld [vmem:[#allocation107_spill] sm:$0xff] }
 0x6c2   : > { %7073 = vmatmul.f32.gmra.mxu1 %v6924_v49  ;;  %7537 = vmatmul.f32.gmra.mxu3 %v7388_v37  ;;  %v8540_v49 = vld [vmem:[#allocation2 + $0xae8] sm:$0xff]  ;;  %v7392_v37 = vrot.slane %v8541_v58, 2  ;;  %v6627_v0 = vsel %vm1506_vm0, %v6625_v21, %v6626_v23  ;;  %v6929_v15 = vsel %vm1958_vm1, %v6927_v38, %v6928_v55  ;;  %v740_v58 = vld [vmem:[#allocation2 + $0xb00] sm:$0xff] }
 0x6c3   : > { %v6240_v7 = vpop.f32.mrf.mxu2  ;;  %v7391_v35 = vrot.slane %v8540_v49, 2  ;;  %v8544_v49 = vld [vmem:[#allocation2 + $0xae0] sm:$0xff] }
 0x6c4   : > { %v6280_v31 = vadd.f32 %v6240_v7, %v5978_v46 }
 0x6c5   : > { %v5779_v22 = vpop.f32.mrf.mxu0  ;;  %v6530_v2 = vpop.f32.mrf.mxu3 }
 0x6c6   : > { %v5817_v3 = vadd.f32 %v5779_v22, %v11416_v32  ;;  %v10902_v9 = vadd.f32 %v6530_v2, %v6280_v31  ;;  %v8542_v22 = vld [vmem:[#allocation2 + $0xad8] sm:$0xff]  ;;  %v6628_v32 = vrot.slane %v599_v24, 2  ;;  %v6932_v24 = vrot.slane %v740_v58, 6 }
 0x6c7   : > { %v5941_v51 = vpop.f32.mrf.mxu1 }
 0x6c8   : > { %6774 = vmatmul.f32.gmra.mxu0 %v6624_v60  ;;  %7238 = vmatmul.f32.gmra.mxu2 %v8536_v14  ;;  %v5979_v34 = vadd.f32 %v5941_v51, %v5817_v3  ;;  %v7393_v60 = vsel %vm1506_vm0, %v7391_v35, %v7392_v37  ;;  %v739_v3 = vld [vmem:[#allocation2 + $0xaf8] sm:$0xff]  ;;  %v6629_v21 = vsel %vm1506_vm0, %v6626_v23, %v6628_v32  ;;  %v8549_v32 = vld [vmem:[#allocation2 + $0xb30] sm:$0xff] }
 0x6c9   : > { %v7394_v29 = vrot.slane %v739_v3, 2  ;;  %v7397_v3 = vrot.slane %v8549_v32, 2  ;;  %v8553_v32 = vld [vmem:[#allocation2 + $0x6e8] sm:$0xff] }
 0x6ca   : > { %7076 = vmatmul.f32.gmra.mxu1 %v6926_v41  ;;  %7540 = vmatmul.f32.gmra.mxu3 %v7390_v39  ;;  %v8543_v41 = vld [vmem:[#allocation2 + $0xad0] sm:$0xff] }
 0x6cb   : > { %v6243_v27 = vpop.f32.mrf.mxu2  ;;  %v6930_v14 = vrot.slane %v8543_v41, 6  ;;  %v7395_v35 = vsel %vm1506_vm0, %v7392_v37, %v7394_v29 }
 0x6cc   : > { %v6281_v30 = vadd.f32 %v6243_v27, %v5979_v34 }
 0x6cd   : > { %v5782_v43 = vpop.f32.mrf.mxu0  ;;  %v6533_v7 = vpop.f32.mrf.mxu3 }
 0x6ce   : > { %v5818_v46 = vadd.f32 %v5782_v43, %v11417_v13  ;;  %v10908_v33 = vadd.f32 %v6533_v7, %v6281_v30  ;;  %v6931_v30 = vsel %vm1958_vm1, %v6928_v55, %v6930_v14  ;;  %v8545_v43 = vld [vmem:[#allocation2 + $0x6a8] sm:$0xff]  ;;  %v8546_v13 = vld [vmem:[#allocation2 + $0x6b0] sm:$0xff]  ;;  %v607_v14 = vld [vmem:[#allocation2 + $0x6b8] sm:$0xff] }
 0x6cf   : > { %v5944_v31 = vpop.f32.mrf.mxu1 }
 0x6d0   : > { %6777 = vmatmul.f32.gmra.mxu0 %v6627_v0  ;;  %7241 = vmatmul.f32.gmra.mxu2 %v8542_v22  ;;  %v5980_v2 = vadd.f32 %v5944_v31, %v5818_v46  ;;  %v6630_v0 = vrot.slane %v8545_v43, 2  ;;  %v6631_v46 = vrot.slane %v8546_v13, 2  ;;  %v8547_v31 = vld [vmem:[#allocation2 + $0xb08] sm:$0xff] }
 0x6d2   : > { %7079 = vmatmul.f32.gmra.mxu1 %v6929_v15  ;;  %7543 = vmatmul.f32.gmra.mxu3 %v7393_v60  ;;  %v6933_v15 = vrot.slane %v8547_v31, 6  ;;  %v8548_v60 = vld [vmem:[#allocation2 + $0xb28] sm:$0xff]  ;;  %v6632_v37 = vsel %vm1506_vm0, %v6630_v0, %v6631_v46 }
 0x6d3   : > { %v6246_v51 = vpop.f32.mrf.mxu2  ;;  %v7396_v55 = vrot.slane %v8548_v60, 2 }
 0x6d4   : > { %v6282_v39 = vadd.f32 %v6246_v51, %v5980_v2 }
 0x6d5   : > { %v5785_v20 = vpop.f32.mrf.mxu0  ;;  %v6536_v27 = vpop.f32.mrf.mxu3 }
 0x6d6   : > { %v5819_v34 = vadd.f32 %v5785_v20, %v11418_v63  ;;  %v10914_v38 = vadd.f32 %v6536_v27, %v6282_v39  ;;  %v6934_v20 = vsel %vm1958_vm1, %v6932_v24, %v6933_v15  ;;  %v7398_v63 = vsel %vm1506_vm0, %v7396_v55, %v7397_v3  ;;  %v747_v27 = vld [vmem:[#allocation2 + $0xb38] sm:$0xff]  ;;  %v748_v55 = vld [vmem:[#allocation2 + $0xb40] sm:$0xff] }
 0x6d7   : > { %v5947_v52 = vpop.f32.mrf.mxu1  ;;  %v7399_v58 = vrot.slane %v747_v27, 2 }
 0x6d8   : > { %6780 = vmatmul.f32.gmra.mxu0 %v6629_v21  ;;  %7244 = vmatmul.f32.gmra.mxu2 %v8544_v49  ;;  %v5981_v7 = vadd.f32 %v5947_v52, %v5819_v34  ;;  %v8550_v21 = vld [vmem:[#allocation2 + $0xb18] sm:$0xff]  ;;  %v6633_v34 = vrot.slane %v607_v14, 2  ;;  %v8551_v49 = vld [vmem:[#allocation2 + $0xb10] sm:$0xff]  ;;  %v8555_v14 = vld [vmem:[#allocation2 + $0xb48] sm:$0xff] }
 0x6d9   : > { %v7400_v60 = vsel %vm1506_vm0, %v7397_v3, %v7399_v58 }
 0x6da   : > { %7082 = vmatmul.f32.gmra.mxu1 %v6931_v30  ;;  %7546 = vmatmul.f32.gmra.mxu3 %v7395_v35  ;;  %v6634_v0 = vsel %vm1506_vm0, %v6631_v46, %v6633_v34  ;;  %v6937_v46 = vrot.slane %v748_v55, 6 }
 0x6db   : > { %v6249_v23 = vpop.f32.mrf.mxu2 }
 0x6dc   : > { %v6283_v22 = vadd.f32 %v6249_v23, %v5981_v7 }
 0x6dd   : > { %v6736_v2 = vpop.f32.mrf.mxu0  ;;  %v6539_v51 = vpop.f32.mrf.mxu3 }
 0x6de   : > { %v6832_v41 = vadd.f32 %v6736_v2, %v10732_v42  ;;  %v10920_v39 = vadd.f32 %v6539_v51, %v6283_v22  ;;  %v6935_v42 = vrot.slane %v8551_v49, 6  ;;  %v8552_v22 = vld [vmem:[#allocation2 + $0xb20] sm:$0xff]  ;;  %v6635_v2 = vrot.slane %v8553_v32, 2  ;;  %v615_v49 = vld [vmem:[#allocation2 + $0x6f8] sm:$0xff]  ;;  %v8559_v32 = vld [vmem:[#allocation2 + $0xb50] sm:$0xff] }
 0x6df   : > { %v7038_v29 = vpop.f32.mrf.mxu1 }
 0x6e0   : > { %6783 = vmatmul.f32.gmra.mxu0 %v6632_v37  ;;  %7247 = vmatmul.f32.gmra.mxu2 %v8550_v21  ;;  %v7134_v52 = vadd.f32 %v7038_v29, %v6832_v41  ;;  %v6936_v31 = vsel %vm1958_vm1, %v6933_v15, %v6935_v42  ;;  %v8554_v37 = vld [vmem:[#allocation2 + $0x6f0] sm:$0xff]  ;;  %v6938_v29 = vrot.slane %v8555_v14, 6  ;;  %v8556_v15 = vld [vmem:[#allocation2 + $0xb68] sm:$0xff] }
 0x6e1   : > { %v6636_v51 = vrot.slane %v8554_v37, 2  ;;  %v7401_v21 = vrot.slane %v8556_v15, 2 }
 0x6e2   : > { %7085 = vmatmul.f32.gmra.mxu1 %v6934_v20  ;;  %7549 = vmatmul.f32.gmra.mxu3 %v7398_v63  ;;  %v8557_v63 = vld [vmem:[#allocation2 + $0xb70] sm:$0xff]  ;;  %v6939_v58 = vsel %vm1958_vm1, %v6937_v46, %v6938_v29 }
 0x6e3   : > { %v7200_v30 = vpop.f32.mrf.mxu2  ;;  %v7402_v34 = vrot.slane %v8557_v63, 2  ;;  %v6637_v27 = vsel %vm1506_vm0, %v6635_v2, %v6636_v51  ;;  %v6940_v2 = vrot.slane %v8559_v32, 6  ;;  %v8560_v63 = vld [vmem:[#allocation2 + $0xb60] sm:$0xff]  ;;  %v759_v32 = vld [vmem:[#allocation2 + $0xb98] sm:$0xff] }
 0x6e4   : > { %v7296_v35 = vadd.f32 %v7200_v30, %v7134_v52 }
 0x6e5   : > { %v6739_v43 = vpop.f32.mrf.mxu0  ;;  %v7502_v7 = vpop.f32.mrf.mxu3 }
 0x6e6   : > { %v6833_v13 = vadd.f32 %v6739_v43, %v10741_v56  ;;  %v7598_v23 = vadd.f32 %v7502_v7, %v7296_v35  ;;  %v8558_v43 = vld [vmem:[#allocation2 + $0xb58] sm:$0xff] }
 0x6e7   : > { %v7041_v24 = vpop.f32.mrf.mxu1 }
 0x6e8   : > { %6786 = vmatmul.f32.gmra.mxu0 %v6634_v0  ;;  %7250 = vmatmul.f32.gmra.mxu2 %v8552_v22  ;;  %7630 = vst [vmem:[%s9109_s17 + $0x18] sm:$0xff] %v7598_v23  ;;  %v7135_v41 = vadd.f32 %v7041_v24, %v6833_v13  ;;  %v7403_v0 = vsel %vm1506_vm0, %v7401_v21, %v7402_v34  ;;  %v755_v22 = vld [vmem:[#allocation2 + $0xb78] sm:$0xff] }
 0x6e9   : > { %v7699_v13 = vmul.f32 %v7598_v23, %v7598_v23  ;;  %v6941_v21 = vsel %vm1958_vm1, %v6938_v29, %v6940_v2 }
 0x6ea   : > { %7088 = vmatmul.f32.gmra.mxu1 %v6936_v31  ;;  %7552 = vmatmul.f32.gmra.mxu3 %v7400_v60  ;;  %v6638_v31 = vrot.slane %v615_v49, 2 }
 0x6eb   : > { %v7203_v56 = vpop.f32.mrf.mxu2 }
 0x6ec   : > { %v7297_v20 = vadd.f32 %v7203_v56, %v7135_v41  ;;  %v7404_v41 = vrot.slane %v755_v22, 2  ;;  %v6639_v46 = vsel %vm1506_vm0, %v6636_v51, %v6638_v31  ;;  %v8562_v51 = vld [vmem:[#allocation2 + $0x730] sm:$0xff] }
 0x6ed   : > { %v6742_v3 = vpop.f32.mrf.mxu0  ;;  %v7505_v30 = vpop.f32.mrf.mxu3 }
 0x6ee   : > { %v6834_v52 = vadd.f32 %v6742_v3, %v10747_v44  ;;  %v7599_v42 = vadd.f32 %v7505_v30, %v7297_v20  ;;  %v7405_v3 = vsel %vm1506_vm0, %v7402_v34, %v7404_v41  ;;  %v623_v41 = vld [vmem:[#allocation2 + $0x738] sm:$0xff] }
 0x6ef   : > { %v7044_v35 = vpop.f32.mrf.mxu1 }
 0x6f0   : > { %6789 = vmatmul.f32.gmra.mxu0 %v6637_v27  ;;  %7253 = vmatmul.f32.gmra.mxu2 %v8558_v43  ;;  %7631 = vst [vmem:[%s9109_s17 + $0x38] sm:$0xff] %v7599_v42  ;;  %v7662_v7 = vadd.f32 %v7599_v42, %v7598_v23  ;;  %v7700_v24 = vmul.f32 %v7599_v42, %v7599_v42  ;;  %v756_v27 = vld [vmem:[#allocation2 + $0xb80] sm:$0xff]  ;;  %v8561_v42 = vld [vmem:[#allocation2 + $0x728] sm:$0xff]  ;;  %v762_v43 = vld [vmem:[#allocation2 + $0xbb0] sm:$0xff] }
 0x6f1   : > { %v7136_v60 = vadd.f32 %v7044_v35, %v6834_v52  ;;  %v757_v52 = vld [vmem:[#allocation2 + $0xb88] sm:$0xff]  ;;  %v6640_v35 = vrot.slane %v8561_v42, 2 }
 0x6f2   : > { %7091 = vmatmul.f32.gmra.mxu1 %v6939_v58  ;;  %v7731_v44 = vadd.f32 %v7700_v24, %v7699_v13  ;;  %7555 = vmatmul.f32.gmra.mxu3 %v7403_v0  ;;  %v6641_v58 = vrot.slane %v8562_v51, 2  ;;  %v6942_v24 = vrot.slane %v756_v27, 6  ;;  %v6943_v31 = vrot.slane %v757_v52, 6 }
 0x6f3   : > { %v7206_v55 = vpop.f32.mrf.mxu2 }
 0x6f4   : > { %v7298_v37 = vadd.f32 %v7206_v55, %v7136_v60  ;;  %v7407_v60 = vrot.slane %v762_v43, 2 }
 0x6f5   : > { %v6745_v56 = vpop.f32.mrf.mxu0  ;;  %v7508_v20 = vpop.f32.mrf.mxu3 }
 0x6f6   : > { %v6835_v14 = vadd.f32 %v6745_v56, %v10753_v11  ;;  %v7600_v23 = vadd.f32 %v7508_v20, %v7298_v37  ;;  %v761_v11 = vld [vmem:[#allocation2 + $0xba8] sm:$0xff]  ;;  %v758_v20 = vld [vmem:[#allocation2 + $0xb90] sm:$0xff] }
 0x6f7   : > { %v7047_v15 = vpop.f32.mrf.mxu1  ;;  %v7406_v34 = vrot.slane %v761_v11, 2  ;;  %v6945_v52 = vrot.slane %v758_v20, 6  ;;  %v760_v11 = vld [vmem:[#allocation2 + $0xba0] sm:$0xff] }
 0x6f8   : > { %6792 = vmatmul.f32.gmra.mxu0 %v6639_v46  ;;  %7256 = vmatmul.f32.gmra.mxu2 %v8560_v63  ;;  %7632 = vst [vmem:[%s9109_s17 + $0x58] sm:$0xff] %v7600_v23  ;;  %v7663_v30 = vadd.f32 %v7662_v7, %v7600_v23  ;;  %v7701_v49 = vmul.f32 %v7600_v23, %v7600_v23  ;;  %v763_v63 = vld [vmem:[#allocation2 + $0xbb8] sm:$0xff] }
 0x6f9   : > { %v7137_v0 = vadd.f32 %v7047_v15, %v6835_v14  ;;  %v6642_v7 = vsel %vm1506_vm0, %v6640_v35, %v6641_v58  ;;  %v7408_v14 = vsel %vm1506_vm0, %v7406_v34, %v7407_v60  ;;  %v7409_v42 = vrot.slane %v763_v63, 2  ;;  %v765_v34 = vld [vmem:[#allocation2 + $0xbc8] sm:$0xff]  ;;  %v767_v63 = vld [vmem:[#allocation2 + $0xbd8] sm:$0xff] }
 0x6fa   : > { %7094 = vmatmul.f32.gmra.mxu1 %v6941_v21  ;;  %v7732_v13 = vadd.f32 %v7731_v44, %v7701_v49  ;;  %7558 = vmatmul.f32.gmra.mxu3 %v7405_v3  ;;  %v6944_v44 = vsel %vm1958_vm1, %v6942_v24, %v6943_v31  ;;  %v6643_v21 = vrot.slane %v623_v41, 2  ;;  %v6946_v24 = vsel %vm1958_vm1, %v6943_v31, %v6945_v52  ;;  %v769_v41 = vld [vmem:[#allocation2 + $0xbe8] sm:$0xff]  ;;  %v631_v52 = vld [vmem:[#allocation2 + $0x778] sm:$0xff] }
 0x6fb   : > { %v7209_v29 = vpop.f32.mrf.mxu2 }
 0x6fc   : > { %v7299_v22 = vadd.f32 %v7209_v29, %v7137_v0  ;;  %v6644_v51 = vsel %vm1506_vm0, %v6641_v58, %v6643_v21  ;;  %v8564_v58 = vld [vmem:[#allocation2 + $0x770] sm:$0xff] }
 0x6fd   : > { %v6748_v55 = vpop.f32.mrf.mxu0  ;;  %v7511_v37 = vpop.f32.mrf.mxu3 }
 0x6fe   : > { %v6836_v2 = vadd.f32 %v6748_v55, %v10759_v1  ;;  %v7601_v56 = vadd.f32 %v7511_v37, %v7299_v22  ;;  %v764_v22 = vld [vmem:[#allocation2 + $0xbc0] sm:$0xff]  ;;  %v6646_v37 = vrot.slane %v8564_v58, 2 }
 0x6ff   : > { %v7050_v46 = vpop.f32.mrf.mxu1 }
 0x700   : > { %6795 = vmatmul.f32.gmra.mxu0 %v6642_v7  ;;  %7259 = vmatmul.f32.gmra.mxu2 %v759_v32  ;;  %7633 = vst [vmem:[%s9109_s17 + $0x78] sm:$0xff] %v7601_v56  ;;  %v7664_v23 = vadd.f32 %v7663_v30, %v7601_v56  ;;  %v7702_v15 = vmul.f32 %v7601_v56, %v7601_v56  ;;  %v8563_v32 = vld [vmem:[#allocation2 + $0x768] sm:$0xff] }
 0x701   : > { %v7138_v3 = vadd.f32 %v7050_v46, %v6836_v2  ;;  %v6645_v2 = vrot.slane %v8563_v32, 2 }
 0x702   : > { %7097 = vmatmul.f32.gmra.mxu1 %v6944_v44  ;;  %v7733_v27 = vadd.f32 %v7732_v13, %v7702_v15  ;;  %7561 = vmatmul.f32.gmra.mxu3 %v7408_v14  ;;  %v7410_v13 = vsel %vm1506_vm0, %v7407_v60, %v7409_v42  ;;  %v6947_v44 = vrot.slane %v764_v22, 6  ;;  %v6948_v14 = vrot.slane %v765_v34, 6 }
 0x703   : > { %v7212_v1 = vpop.f32.mrf.mxu2  ;;  %v7411_v60 = vrot.slane %v769_v41, 2 }
 0x704   : > { %v7300_v49 = vadd.f32 %v7212_v1, %v7138_v3 }
 0x705   : > { %v6751_v35 = vpop.f32.mrf.mxu0  ;;  %v7514_v0 = vpop.f32.mrf.mxu3 }
 0x706   : > { %v6837_v43 = vadd.f32 %v6751_v35, %v10765_v40  ;;  %v7602_v30 = vadd.f32 %v7514_v0, %v7300_v49  ;;  %v770_v40 = vld [vmem:[#allocation2 + $0xbf0] sm:$0xff]  ;;  %v6648_v0 = vrot.slane %v631_v52, 2 }
 0x707   : > { %v7053_v29 = vpop.f32.mrf.mxu1  ;;  %v7412_v15 = vrot.slane %v770_v40, 2 }
 0x708   : > { %6798 = vmatmul.f32.gmra.mxu0 %v6644_v51  ;;  %7262 = vmatmul.f32.gmra.mxu2 %v760_v11  ;;  %7634 = vst [vmem:[%s9109_s17 + $0x98] sm:$0xff] %v7602_v30  ;;  %v7665_v55 = vadd.f32 %v7664_v23, %v7602_v30  ;;  %v7703_v7 = vmul.f32 %v7602_v30, %v7602_v30  ;;  %v766_v51 = vld [vmem:[#allocation2 + $0xbd0] sm:$0xff]  ;;  %v771_v30 = vld [vmem:[#allocation2 + $0xbf8] sm:$0xff] }
 0x709   : > { %v7139_v56 = vadd.f32 %v7053_v29, %v6837_v43  ;;  %v6647_v23 = vsel %vm1506_vm0, %v6645_v2, %v6646_v37  ;;  %v7413_v35 = vsel %vm1506_vm0, %v7411_v60, %v7412_v15  ;;  %v7414_v34 = vrot.slane %v771_v30, 2  ;;  %v768_v2 = vld [vmem:[#allocation2 + $0xbe0] sm:$0xff] }
 0x70a   : > { %7100 = vmatmul.f32.gmra.mxu1 %v6946_v24  ;;  %v7734_v46 = vadd.f32 %v7733_v27, %v7703_v7  ;;  %7564 = vmatmul.f32.gmra.mxu3 %v7410_v13  ;;  %v6949_v27 = vsel %vm1958_vm1, %v6947_v44, %v6948_v14  ;;  %v6950_v13 = vrot.slane %v766_v51, 6  ;;  %v6649_v32 = vsel %vm1506_vm0, %v6646_v37, %v6648_v0  ;;  %v773_v44 = vld [vmem:[#allocation2 + $0xc08] sm:$0xff]  ;;  %v8566_v37 = vld [vmem:[#allocation2 + $0x7b0] sm:$0xff] }
 0x70b   : > { %v7215_v31 = vpop.f32.mrf.mxu2 }
 0x70c   : > { %v7301_v20 = vadd.f32 %v7215_v31, %v7139_v56  ;;  %v6951_v56 = vsel %vm1958_vm1, %v6948_v14, %v6950_v13  ;;  %v772_v31 = vld [vmem:[#allocation2 + $0xc00] sm:$0xff] }
 0x70d   : > { %v6754_v21 = vpop.f32.mrf.mxu0  ;;  %v7517_v1 = vpop.f32.mrf.mxu3 }
 0x70e   : > { %v6838_v3 = vadd.f32 %v6754_v21, %v10771_v62  ;;  %v7603_v49 = vadd.f32 %v7517_v1, %v7301_v20  ;;  %v8565_v21 = vld [vmem:[#allocation2 + $0x7a8] sm:$0xff] }
 0x70f   : > { %v7056_v42 = vpop.f32.mrf.mxu1 }
 0x710   : > { %6801 = vmatmul.f32.gmra.mxu0 %v6647_v23  ;;  %7265 = vmatmul.f32.gmra.mxu2 %v767_v63  ;;  %7635 = vst [vmem:[%s9109_s17 + $0xb8] sm:$0xff] %v7603_v49  ;;  %v7666_v11 = vadd.f32 %v7665_v55, %v7603_v49  ;;  %v7704_v43 = vmul.f32 %v7603_v49, %v7603_v49  ;;  %v6650_v23 = vrot.slane %v8565_v21, 2  ;;  %v6651_v63 = vrot.slane %v8566_v37, 2 }
 0x711   : > { %v7140_v29 = vadd.f32 %v7056_v42, %v6838_v3  ;;  %v777_v3 = vld [vmem:[#allocation2 + $0xc28] sm:$0xff]  ;;  %v6952_v49 = vrot.slane %v772_v31, 6  ;;  %v6953_v42 = vrot.slane %v773_v44, 6 }
 0x712   : > { %7103 = vmatmul.f32.gmra.mxu1 %v6949_v27  ;;  %v7735_v24 = vadd.f32 %v7734_v46, %v7704_v43  ;;  %7567 = vmatmul.f32.gmra.mxu3 %v7413_v35  ;;  %v7415_v46 = vsel %vm1506_vm0, %v7412_v15, %v7414_v34  ;;  %v7416_v15 = vrot.slane %v777_v3, 2  ;;  %v775_v43 = vld [vmem:[#allocation2 + $0xc18] sm:$0xff]  ;;  %v774_v34 = vld [vmem:[#allocation2 + $0xc10] sm:$0xff] }
 0x713   : > { %v7218_v62 = vpop.f32.mrf.mxu2 }
 0x714   : > { %v7302_v22 = vadd.f32 %v7218_v62, %v7140_v29  ;;  %v639_v29 = vld [vmem:[#allocation2 + $0x7b8] sm:$0xff] }
 0x715   : > { %v6757_v7 = vpop.f32.mrf.mxu0  ;;  %v7520_v41 = vpop.f32.mrf.mxu3 }
 0x716   : > { %v6839_v58 = vadd.f32 %v6757_v7, %v10777_v28  ;;  %v7604_v55 = vadd.f32 %v7520_v41, %v7302_v22  ;;  %v778_v28 = vld [vmem:[#allocation2 + $0xc30] sm:$0xff] }
 0x717   : > { %v7059_v40 = vpop.f32.mrf.mxu1  ;;  %v7417_v35 = vrot.slane %v778_v28, 2 }
 0x718   : > { %6804 = vmatmul.f32.gmra.mxu0 %v6649_v32  ;;  %7268 = vmatmul.f32.gmra.mxu2 %v768_v2  ;;  %7636 = vst [vmem:[%s9109_s17 + $0xd8] sm:$0xff] %v7604_v55  ;;  %v7667_v20 = vadd.f32 %v7666_v11, %v7604_v55  ;;  %v7705_v60 = vmul.f32 %v7604_v55, %v7604_v55  ;;  %v6653_v2 = vrot.slane %v639_v29, 2 }
 0x719   : > { %v7141_v1 = vadd.f32 %v7059_v40, %v6839_v58  ;;  %v6652_v11 = vsel %vm1506_vm0, %v6650_v23, %v6651_v63  ;;  %v7418_v22 = vsel %vm1506_vm0, %v7416_v15, %v7417_v35  ;;  %v779_v58 = vld [vmem:[#allocation2 + $0xc38] sm:$0xff]  ;;  %v6955_v40 = vrot.slane %v774_v34, 6 }
 0x71a   : > { %7106 = vmatmul.f32.gmra.mxu1 %v6951_v56  ;;  %v7736_v52 = vadd.f32 %v7735_v24, %v7705_v60  ;;  %7570 = vmatmul.f32.gmra.mxu3 %v7415_v46  ;;  %v6954_v24 = vsel %vm1958_vm1, %v6952_v49, %v6953_v42  ;;  %v7419_v46 = vrot.slane %v779_v58, 2  ;;  %v6654_v44 = vsel %vm1506_vm0, %v6651_v63, %v6653_v2  ;;  %v776_v60 = vld [vmem:[#allocation2 + $0xc20] sm:$0xff]  ;;  %v8568_v63 = vld [vmem:[#allocation2 + $0x7f0] sm:$0xff]  ;;  %v783_v34 = vld [vmem:[#allocation2 + $0xc58] sm:$0xff] }
 0x71b   : > { %v7221_v14 = vpop.f32.mrf.mxu2  ;;  %v6956_v3 = vsel %vm1958_vm1, %v6953_v42, %v6955_v40  ;;  %v647_v2 = vld [vmem:[#allocation2 + $0x7f8] sm:$0xff]  ;;  %v782_v40 = vld [vmem:[#allocation2 + $0xc50] sm:$0xff] }
 0x71c   : > { %v7303_v27 = vadd.f32 %v7221_v14, %v7141_v1  ;;  %v7420_v28 = vsel %vm1506_vm0, %v7417_v35, %v7419_v46  ;;  %v780_v1 = vld [vmem:[#allocation2 + $0xc40] sm:$0xff] }
 0x71d   : > { %v6760_v51 = vpop.f32.mrf.mxu0  ;;  %v7523_v30 = vpop.f32.mrf.mxu3 }
 0x71e   : > { %v6840_v0 = vadd.f32 %v6760_v51, %v10783_v16  ;;  %v7605_v62 = vadd.f32 %v7523_v30, %v7303_v27  ;;  %v8567_v27 = vld [vmem:[#allocation2 + $0x7e8] sm:$0xff]  ;;  %v6656_v51 = vrot.slane %v8568_v63, 2  ;;  %v6957_v30 = vrot.slane %v780_v1, 6  ;;  %v784_v1 = vld [vmem:[#allocation2 + $0xc60] sm:$0xff] }
 0x71f   : > { %v7062_v13 = vpop.f32.mrf.mxu1  ;;  %v6655_v15 = vrot.slane %v8567_v27, 2 }
 0x720   : > { %6807 = vmatmul.f32.gmra.mxu0 %v6652_v11  ;;  %7271 = vmatmul.f32.gmra.mxu2 %v775_v43  ;;  %7637 = vst [vmem:[%s9109_s17 + $0xf8] sm:$0xff] %v7605_v62  ;;  %v7668_v7 = vadd.f32 %v7667_v20, %v7605_v62  ;;  %v7706_v32 = vmul.f32 %v7605_v62, %v7605_v62  ;;  %v785_v11 = vld [vmem:[#allocation2 + $0xc68] sm:$0xff] }
 0x721   : > { %v7142_v41 = vadd.f32 %v7062_v13, %v6840_v0  ;;  %v7421_v35 = vrot.slane %v785_v11, 2  ;;  %v788_v11 = vld [vmem:[#allocation2 + $0xc80] sm:$0xff] }
 0x722   : > { %7109 = vmatmul.f32.gmra.mxu1 %v6954_v24  ;;  %v7737_v55 = vadd.f32 %v7736_v52, %v7706_v32  ;;  %7573 = vmatmul.f32.gmra.mxu3 %v7418_v22  ;;  %v781_v52 = vld [vmem:[#allocation2 + $0xc48] sm:$0xff]  ;;  %v6657_v22 = vsel %vm1506_vm0, %v6655_v15, %v6656_v51 }
 0x723   : > { %v7224_v16 = vpop.f32.mrf.mxu2  ;;  %v6958_v29 = vrot.slane %v781_v52, 6 }
 0x724   : > { %v7304_v56 = vadd.f32 %v7224_v16, %v7142_v41 }
 0x725   : > { %v6763_v31 = vpop.f32.mrf.mxu0  ;;  %v7526_v23 = vpop.f32.mrf.mxu3 }
 0x726   : > { %v6841_v21 = vadd.f32 %v6763_v31, %v10789_v26  ;;  %v7606_v20 = vadd.f32 %v7526_v23, %v7304_v56  ;;  %v786_v26 = vld [vmem:[#allocation2 + $0xc70] sm:$0xff]  ;;  %v6658_v31 = vrot.slane %v647_v2, 2  ;;  %v6960_v23 = vrot.slane %v782_v40, 6 }
 0x727   : > { %v7065_v37 = vpop.f32.mrf.mxu1  ;;  %v7422_v13 = vrot.slane %v786_v26, 2  ;;  %v789_v26 = vld [vmem:[#allocation2 + $0xc88] sm:$0xff] }
 0x728   : > { %6810 = vmatmul.f32.gmra.mxu0 %v6654_v44  ;;  %7274 = vmatmul.f32.gmra.mxu2 %v776_v60  ;;  %7638 = vst [vmem:[%s9109_s17 + $0x118] sm:$0xff] %v7606_v20  ;;  %v7669_v14 = vadd.f32 %v7668_v7, %v7606_v20  ;;  %v7707_v49 = vmul.f32 %v7606_v20, %v7606_v20  ;;  %v787_v44 = vld [vmem:[#allocation2 + $0xc78] sm:$0xff] }
 0x729   : > { %v7143_v43 = vadd.f32 %v7065_v37, %v6841_v21  ;;  %v7423_v16 = vsel %vm1506_vm0, %v7421_v35, %v7422_v13  ;;  %v7424_v37 = vrot.slane %v787_v44, 2  ;;  %v6961_v15 = vsel %vm1958_vm1, %v6958_v29, %v6960_v23  ;;  %v793_v35 = vld [vmem:[#allocation2 + $0xca8] sm:$0xff] }
 0x72a   : > { %7112 = vmatmul.f32.gmra.mxu1 %v6956_v3  ;;  %v7738_v0 = vadd.f32 %v7737_v55, %v7707_v49  ;;  %7576 = vmatmul.f32.gmra.mxu3 %v7420_v28  ;;  %v6959_v55 = vsel %vm1958_vm1, %v6957_v30, %v6958_v29  ;;  %v6659_v28 = vsel %vm1506_vm0, %v6656_v51, %v6658_v31  ;;  %v8570_v51 = vld [vmem:[#allocation2 + $0x830] sm:$0xff] }
 0x72b   : > { %v7227_v42 = vpop.f32.mrf.mxu2  ;;  %v7425_v63 = vsel %vm1506_vm0, %v7422_v13, %v7424_v37  ;;  %v7426_v13 = vrot.slane %v793_v35, 2  ;;  %v795_v37 = vld [vmem:[#allocation2 + $0xcb8] sm:$0xff] }
 0x72c   : > { %v7305_v62 = vadd.f32 %v7227_v42, %v7143_v43  ;;  %v8569_v42 = vld [vmem:[#allocation2 + $0x828] sm:$0xff] }
 0x72d   : > { %v6766_v24 = vpop.f32.mrf.mxu0  ;;  %v7529_v32 = vpop.f32.mrf.mxu3  ;;  %v6660_v30 = vrot.slane %v8569_v42, 2 }
 0x72e   : > { %v6842_v7 = vadd.f32 %v6766_v24, %v10795_v18  ;;  %v7607_v58 = vadd.f32 %v7529_v32, %v7305_v62  ;;  %v6661_v62 = vrot.slane %v8570_v51, 2  ;;  %v797_v51 = vld [vmem:[#allocation2 + $0xcc8] sm:$0xff] }
 0x72f   : > { %v7068_v41 = vpop.f32.mrf.mxu1 }
 0x730   : > { %6813 = vmatmul.f32.gmra.mxu0 %v6657_v22  ;;  %7277 = vmatmul.f32.gmra.mxu2 %v783_v34  ;;  %7639 = vst [vmem:[%s9109_s17 + $0x138] sm:$0xff] %v7607_v58  ;;  %v7670_v56 = vadd.f32 %v7669_v14, %v7607_v58  ;;  %v7708_v46 = vmul.f32 %v7607_v58, %v7607_v58  ;;  %v6962_v34 = vrot.slane %v788_v11, 6 }
 0x731   : > { %v7144_v60 = vadd.f32 %v7068_v41, %v6842_v7  ;;  %v6963_v7 = vrot.slane %v789_v26, 6  ;;  %v6662_v41 = vsel %vm1506_vm0, %v6660_v30, %v6661_v62  ;;  %v796_v30 = vld [vmem:[#allocation2 + $0xcc0] sm:$0xff] }
 0x732   : > { %7115 = vmatmul.f32.gmra.mxu1 %v6959_v55  ;;  %v7739_v21 = vadd.f32 %v7738_v0, %v7708_v46  ;;  %7579 = vmatmul.f32.gmra.mxu3 %v7423_v16  ;;  %v791_v55 = vld [vmem:[#allocation2 + $0xc98] sm:$0xff] }
 0x733   : > { %v7230_v18 = vpop.f32.mrf.mxu2  ;;  %v6964_v44 = vsel %vm1958_vm1, %v6962_v34, %v6963_v7  ;;  %v801_v34 = vld [vmem:[#allocation2 + $0xce8] sm:$0xff] }
 0x734   : > { %v7306_v20 = vadd.f32 %v7230_v18, %v7144_v60 }
 0x735   : > { %v6769_v3 = vpop.f32.mrf.mxu0  ;;  %v7532_v49 = vpop.f32.mrf.mxu3 }
 0x736   : > { %v6843_v52 = vadd.f32 %v6769_v3, %v10801_v50  ;;  %v7608_v14 = vadd.f32 %v7532_v49, %v7306_v20  ;;  %v794_v50 = vld [vmem:[#allocation2 + $0xcb0] sm:$0xff]  ;;  %v7429_v49 = vrot.slane %v795_v37, 2 }
 0x737   : > { %v7071_v27 = vpop.f32.mrf.mxu1  ;;  %v7427_v2 = vrot.slane %v794_v50, 2  ;;  %v798_v37 = vld [vmem:[#allocation2 + $0xcd0] sm:$0xff] }
 0x738   : > { %6816 = vmatmul.f32.gmra.mxu0 %v6659_v28  ;;  %7280 = vmatmul.f32.gmra.mxu2 %v784_v1  ;;  %7640 = vst [vmem:[%s9109_s17 + $0x158] sm:$0xff] %v7608_v14  ;;  %v7671_v43 = vadd.f32 %v7670_v56, %v7608_v14  ;;  %v7709_v0 = vmul.f32 %v7608_v14, %v7608_v14  ;;  %v655_v56 = vld [vmem:[#allocation2 + $0x838] sm:$0xff] }
 0x739   : > { %v7145_v24 = vadd.f32 %v7071_v27, %v6843_v52  ;;  %v7428_v60 = vsel %vm1506_vm0, %v7426_v13, %v7427_v2  ;;  %v6663_v20 = vrot.slane %v655_v56, 2  ;;  %v7430_v42 = vsel %vm1506_vm0, %v7427_v2, %v7429_v49 }
 0x73a   : > { %7118 = vmatmul.f32.gmra.mxu1 %v6961_v15  ;;  %v7740_v22 = vadd.f32 %v7739_v21, %v7709_v0  ;;  %7582 = vmatmul.f32.gmra.mxu3 %v7425_v63  ;;  %v790_v21 = vld [vmem:[#allocation2 + $0xc90] sm:$0xff]  ;;  %v792_v15 = vld [vmem:[#allocation2 + $0xca0] sm:$0xff]  ;;  %v7431_v2 = vrot.slane %v801_v34, 2 }
 0x73b   : > { %v7233_v29 = vpop.f32.mrf.mxu2  ;;  %v6965_v1 = vrot.slane %v790_v21, 6  ;;  %v6664_v27 = vsel %vm1506_vm0, %v6661_v62, %v6663_v20  ;;  %v8572_v62 = vld [vmem:[#allocation2 + $0x870] sm:$0xff] }
 0x73c   : > { %v7307_v32 = vadd.f32 %v7233_v29, %v7145_v24  ;;  %v8571_v24 = vld [vmem:[#allocation2 + $0x868] sm:$0xff]  ;;  %v6666_v29 = vrot.slane %v8572_v62, 2 }
 0x73d   : > { %v6772_v58 = vpop.f32.mrf.mxu0  ;;  %v7535_v40 = vpop.f32.mrf.mxu3  ;;  %v6966_v0 = vsel %vm1958_vm1, %v6963_v7, %v6965_v1  ;;  %v803_v1 = vld [vmem:[#allocation2 + $0xcf8] sm:$0xff] }
 0x73e   : > { %v6844_v16 = vadd.f32 %v6772_v58, %v10807_v19  ;;  %v7609_v46 = vadd.f32 %v7535_v40, %v7307_v32  ;;  %v6967_v58 = vrot.slane %v796_v30, 6 }
 0x73f   : > { %v7074_v31 = vpop.f32.mrf.mxu1 }
 0x740   : > { %6819 = vmatmul.f32.gmra.mxu0 %v6662_v41  ;;  %7283 = vmatmul.f32.gmra.mxu2 %v791_v55  ;;  %7641 = vst [vmem:[%s9109_s17 + $0x178] sm:$0xff] %v7609_v46  ;;  %v7672_v18 = vadd.f32 %v7671_v43, %v7609_v46  ;;  %v7710_v23 = vmul.f32 %v7609_v46, %v7609_v46  ;;  %v6968_v41 = vrot.slane %v797_v51, 6  ;;  %v799_v46 = vld [vmem:[#allocation2 + $0xcd8] sm:$0xff] }
 0x741   : > { %v7146_v3 = vadd.f32 %v7074_v31, %v6844_v16 }
 0x742   : > { %7121 = vmatmul.f32.gmra.mxu1 %v6964_v44  ;;  %v7741_v28 = vadd.f32 %v7740_v22, %v7710_v23  ;;  %7585 = vmatmul.f32.gmra.mxu3 %v7428_v60  ;;  %v6665_v22 = vrot.slane %v8571_v24, 2  ;;  %v663_v60 = vld [vmem:[#allocation2 + $0x878] sm:$0xff]  ;;  %v6969_v23 = vsel %vm1958_vm1, %v6967_v58, %v6968_v41 }
 0x743   : > { %v7236_v19 = vpop.f32.mrf.mxu2  ;;  %v8573_v58 = vld [vmem:[#allocation2 + $0x498] sm:$0xff] }
 0x744   : > { %v7308_v52 = vadd.f32 %v7236_v19, %v7146_v3  ;;  %v6667_v56 = vsel %vm1506_vm0, %v6665_v22, %v6666_v29  ;;  %v6668_v19 = vrot.slane %v663_v60, 2 }
 0x745   : > { %v6775_v14 = vpop.f32.mrf.mxu0  ;;  %v7538_v11 = vpop.f32.mrf.mxu3 }
 0x746   : > { %v6845_v63 = vadd.f32 %v6775_v14, %v10813_v5  ;;  %v7610_v26 = vadd.f32 %v7538_v11, %v7308_v52  ;;  %v802_v5 = vld [vmem:[#allocation2 + $0xcf0] sm:$0xff]  ;;  %v6970_v14 = vrot.slane %v798_v37, 6  ;;  %v6669_v11 = vsel %vm1506_vm0, %v6666_v29, %v6668_v19  ;;  %v8576_v37 = vld [vmem:[#allocation2 + $0x4e0] sm:$0xff] }
 0x747   : > { %v7077_v43 = vpop.f32.mrf.mxu1  ;;  %v7432_v16 = vrot.slane %v802_v5, 2 }
 0x748   : > { %6822 = vmatmul.f32.gmra.mxu0 %v6664_v27  ;;  %7286 = vmatmul.f32.gmra.mxu2 %v792_v15  ;;  %7642 = vst [vmem:[%s9109_s17 + $0x198] sm:$0xff] %v7610_v26  ;;  %v7673_v35 = vadd.f32 %v7672_v18, %v7610_v26  ;;  %v7711_v50 = vmul.f32 %v7610_v26, %v7610_v26  ;;  %v7434_v15 = vrot.slane %v803_v1, 2  ;;  %v800_v26 = vld [vmem:[#allocation2 + $0xce0] sm:$0xff] }
 0x749   : > { %v7147_v32 = vadd.f32 %v7077_v43, %v6845_v63  ;;  %v7433_v20 = vsel %vm1506_vm0, %v7431_v2, %v7432_v16  ;;  %v6971_v51 = vsel %vm1958_vm1, %v6968_v41, %v6970_v14  ;;  %v8574_v41 = vld [vmem:[#allocation2 + $0x4a0] sm:$0xff]  ;;  %v8577_v14 = vld [vmem:[#allocation2 + $0x518] sm:$0xff] }
 0x74a   : > { %7124 = vmatmul.f32.gmra.mxu1 %v6966_v0  ;;  %v7742_v13 = vadd.f32 %v7741_v28, %v7711_v50  ;;  %7588 = vmatmul.f32.gmra.mxu3 %v7430_v42 }
 0x74b   : > { %v7239_v7 = vpop.f32.mrf.mxu2 }
 0x74c   : > { %v7309_v55 = vadd.f32 %v7239_v7, %v7147_v32 }
 0x74d   : > { %v6778_v40 = vpop.f32.mrf.mxu0  ;;  %v7541_v44 = vpop.f32.mrf.mxu3 }
 0x74e   : > { %v6846_v31 = vadd.f32 %v6778_v40, %v10819_v59  ;;  %v7611_v21 = vadd.f32 %v7541_v44, %v7309_v55  ;;  %v7788_v55 = vadd.f32 %v8574_v41, %v8573_v58  ;;  %v8575_v44 = vld [vmem:[#allocation2 + $0x4d8] sm:$0xff] }
 0x74f   : > { %v7080_v18 = vpop.f32.mrf.mxu1 }
 0x750   : > { %6825 = vmatmul.f32.gmra.mxu0 %v6667_v56  ;;  %7289 = vmatmul.f32.gmra.mxu2 %v799_v46  ;;  %7643 = vst [vmem:[%s9109_s17 + $0x1b8] sm:$0xff] %v7611_v21  ;;  %v7674_v3 = vadd.f32 %v7673_v35, %v7611_v21  ;;  %v7712_v28 = vmul.f32 %v7611_v21, %v7611_v21 }
 0x751   : > { %v7148_v52 = vadd.f32 %v7080_v18, %v6846_v31  ;;  %v7435_v35 = vsel %vm1506_vm0, %v7432_v16, %v7434_v15  ;;  %v7789_v60 = vadd.f32 %v8575_v44, %v7788_v55 }
 0x752   : > { %7127 = vmatmul.f32.gmra.mxu1 %v6969_v23  ;;  %v7743_v49 = vadd.f32 %v7742_v13, %v7712_v28  ;;  %7591 = vmatmul.f32.gmra.mxu3 %v7433_v20 }
 0x753   : > { %v7242_v59 = vpop.f32.mrf.mxu2 }
 0x754   : > { %v7310_v27 = vadd.f32 %v7242_v59, %v7148_v52 }
 0x755   : > { %v6781_v63 = vpop.f32.mrf.mxu0  ;;  %v7544_v0 = vpop.f32.mrf.mxu3 }
 0x756   : > { %v6847_v43 = vadd.f32 %v6781_v63, %v10824_v36  ;;  %v7612_v42 = vadd.f32 %v7544_v0, %v7310_v27 }
 0x757   : > { %v7083_v30 = vpop.f32.mrf.mxu1 }
 0x758   : > { %6828 = vmatmul.f32.gmra.mxu0 %v6669_v11  ;;  %7292 = vmatmul.f32.gmra.mxu2 %v800_v26  ;;  %7644 = vst [vmem:[%s9109_s17 + $0x1d8] sm:$0xff] %v7612_v42  ;;  %v7675_v50 = vadd.f32 %v7674_v3, %v7612_v42  ;;  %v7713_v24 = vmul.f32 %v7612_v42, %v7612_v42 }
 0x759   : > { %v7149_v22 = vadd.f32 %v7083_v30, %v6847_v43  ;;  %v7790_v3 = vadd.f32 %v8576_v37, %v7789_v60  ;;  %v8578_v43 = vld [vmem:[#allocation2 + $0x520] sm:$0xff] }
 0x75a   : > { %7130 = vmatmul.f32.gmra.mxu1 %v6971_v51  ;;  %v7744_v62 = vadd.f32 %v7743_v49, %v7713_v24  ;;  %7594 = vmatmul.f32.gmra.mxu3 %v7435_v35 }
 0x75b   : > { %v7245_v29 = vpop.f32.mrf.mxu2  ;;  %v7791_v27 = vadd.f32 %v8577_v14, %v7790_v3 }
 0x75c   : > { %v7311_v34 = vadd.f32 %v7245_v29, %v7149_v22  ;;  %v8579_v22 = vld [vmem:[#allocation2 + $0x558] sm:$0xff] }
 0x75d   : > { %v6784_v36 = vpop.f32.mrf.mxu0  ;;  %v7547_v32 = vpop.f32.mrf.mxu3  ;;  %v7792_v0 = vadd.f32 %v8578_v43, %v7791_v27  ;;  %v8584_v27 = vld [vmem:[#allocation2 + $0x5e0] sm:$0xff] }
 0x75e   : > { %v6848_v5 = vadd.f32 %v6784_v36, %v10830_v8  ;;  %v7613_v13 = vadd.f32 %v7547_v32, %v7311_v34  ;;  %v8580_v32 = vld [vmem:[#allocation2 + $0x560] sm:$0xff] }
 0x75f   : > { %v7086_v7 = vpop.f32.mrf.mxu1 }
 0x760   : > { %7645 = vst [vmem:[%s9109_s17 + $0x1f8] sm:$0xff] %v7613_v13  ;;  %v7676_v2 = vadd.f32 %v7675_v50, %v7613_v13  ;;  %v7714_v16 = vmul.f32 %v7613_v13, %v7613_v13  ;;  %v7150_v40 = vadd.f32 %v7086_v7, %v6848_v5 }
 0x762   : > { %v7745_v56 = vadd.f32 %v7744_v62, %v7714_v16  ;;  %v7793_v62 = vadd.f32 %v8579_v22, %v7792_v0  ;;  %v8586_v22 = vld [vmem:[#allocation2 + $0x620] sm:$0xff] }
 0x763   : > { %v7248_v46 = vpop.f32.mrf.mxu2 }
 0x764   : > { %v7312_v31 = vadd.f32 %v7248_v46, %v7150_v40  ;;  %v7794_v13 = vadd.f32 %v8580_v32, %v7793_v62  ;;  %v8581_v40 = vld [vmem:[#allocation2 + $0x598] sm:$0xff] }
 0x765   : > { %v6787_v21 = vpop.f32.mrf.mxu0  ;;  %v7550_v8 = vpop.f32.mrf.mxu3 }
 0x766   : > { %v6849_v18 = vadd.f32 %v6787_v21, %v10836_v10  ;;  %v7614_v23 = vadd.f32 %v7550_v8, %v7312_v31  ;;  %v8582_v21 = vld [vmem:[#allocation2 + $0x5a0] sm:$0xff] }
 0x767   : > { %v7089_v20 = vpop.f32.mrf.mxu1 }
 0x768   : > { %7646 = vst [vmem:[%s9109_s17 + $0x218] sm:$0xff] %v7614_v23  ;;  %v7677_v28 = vadd.f32 %v7676_v2, %v7614_v23  ;;  %v7715_v19 = vmul.f32 %v7614_v23, %v7614_v23  ;;  %v7151_v1 = vadd.f32 %v7089_v20, %v6849_v18 }
 0x76a   : > { %v7746_v52 = vadd.f32 %v7745_v56, %v7715_v19  ;;  %v7795_v56 = vadd.f32 %v8581_v40, %v7794_v13  ;;  %v8583_v19 = vld [vmem:[#allocation2 + $0x5d8] sm:$0xff] }
 0x76b   : > { %v7251_v49 = vpop.f32.mrf.mxu2  ;;  %v8587_v13 = vld [vmem:[#allocation2 + $0x658] sm:$0xff] }
 0x76c   : > { %v7313_v59 = vadd.f32 %v7251_v49, %v7151_v1  ;;  %v7796_v18 = vadd.f32 %v8582_v21, %v7795_v56  ;;  %v8589_v56 = vld [vmem:[%s9109_s17] sm:$0xff] }
 0x76d   : > { %v6790_v15 = vpop.f32.mrf.mxu0  ;;  %v7553_v11 = vpop.f32.mrf.mxu3 }
 0x76e   : > { %v6850_v63 = vadd.f32 %v6790_v15, %v10842_v47  ;;  %v7615_v10 = vadd.f32 %v7553_v11, %v7313_v59  ;;  %v7797_v1 = vadd.f32 %v8583_v19, %v7796_v18  ;;  %v8593_v19 = vld [vmem:[%s9109_s17 + $0x80] sm:$0xff] }
 0x76f   : > { %v7092_v26 = vpop.f32.mrf.mxu1 }
 0x770   : > { %7647 = vst [vmem:[%s9109_s17 + $0x238] sm:$0xff] %v7615_v10  ;;  %v7678_v42 = vadd.f32 %v7677_v28, %v7615_v10  ;;  %v7716_v30 = vmul.f32 %v7615_v10, %v7615_v10  ;;  %v7152_v51 = vadd.f32 %v7092_v26, %v6850_v63  ;;  %v7798_v15 = vadd.f32 %v8584_v27, %v7797_v1  ;;  %v8595_v27 = vld [vmem:[%s9109_s17 + $0xa0] sm:$0xff] }
 0x771   : > { %v1393_v1 = vmul.f32 %v8593_v19, %v8593_v19 }
 0x772   : > { %v7747_v35 = vadd.f32 %v7746_v52, %v7716_v30 }
 0x773   : > { %v7254_v50 = vpop.f32.mrf.mxu2 }
 0x774   : > { %v7314_v24 = vadd.f32 %v7254_v50, %v7152_v51 }
 0x775   : > { %v6793_v29 = vpop.f32.mrf.mxu0  ;;  %v7556_v36 = vpop.f32.mrf.mxu3 }
 0x776   : > { %v6851_v34 = vadd.f32 %v6793_v29, %v10848_v25  ;;  %v7616_v47 = vadd.f32 %v7556_v36, %v7314_v24 }
 0x777   : > { %v7095_v5 = vpop.f32.mrf.mxu1 }
 0x778   : > { %7648 = vst [vmem:[%s9109_s17 + $0x258] sm:$0xff] %v7616_v47  ;;  %v7679_v7 = vadd.f32 %v7678_v42, %v7616_v47  ;;  %v7717_v58 = vmul.f32 %v7616_v47, %v7616_v47  ;;  %v7153_v41 = vadd.f32 %v7095_v5, %v6851_v34  ;;  %v8585_v42 = vld [vmem:[#allocation2 + $0x618] sm:$0xff] }
 0x779   : > { %v7799_v30 = vadd.f32 %v8585_v42, %v7798_v15  ;;  %v1394_v15 = vmul.f32 %v8595_v27, %v8595_v27 }
 0x77a   : > { %v7748_v55 = vadd.f32 %v7747_v35, %v7717_v58 }
 0x77b   : > { %v7257_v2 = vpop.f32.mrf.mxu2  ;;  %v7800_v62 = vadd.f32 %v8586_v22, %v7799_v30  ;;  %v8597_v30 = vld [vmem:[#allocation2 + $0x6a0] sm:$0xff] }
 0x77c   : > { %v7315_v16 = vadd.f32 %v7257_v2, %v7153_v41 }
 0x77d   : > { %v6796_v46 = vpop.f32.mrf.mxu0  ;;  %v7559_v44 = vpop.f32.mrf.mxu3 }
 0x77e   : > { %v6852_v31 = vadd.f32 %v6796_v46, %v10854_v4  ;;  %v7617_v25 = vadd.f32 %v7559_v44, %v7315_v16  ;;  %v1389_v46 = vmul.f32 %v8589_v56, %v8589_v56 }
 0x77f   : > { %v7098_v60 = vpop.f32.mrf.mxu1 }
 0x780   : > { %7649 = vst [vmem:[%s9109_s17 + $0x278] sm:$0xff] %v7617_v25  ;;  %v7680_v8 = vadd.f32 %v7679_v7, %v7617_v25  ;;  %v7718_v23 = vmul.f32 %v7617_v25, %v7617_v25  ;;  %v7154_v20 = vadd.f32 %v7098_v60, %v6852_v31  ;;  %v7801_v7 = vadd.f32 %v8587_v13, %v7800_v62  ;;  %v8590_v31 = vld [vmem:[%s9109_s17 + $0x40] sm:$0xff] }
 0x781   : > { %v1391_v44 = vmul.f32 %v8590_v31, %v8590_v31  ;;  %v8591_v25 = vld [vmem:[#allocation2 + $0x660] sm:$0xff] }
 0x782   : > { %v7749_v37 = vadd.f32 %v7748_v55, %v7718_v23  ;;  %v7802_v60 = vadd.f32 %v8591_v25, %v7801_v7  ;;  %v8592_v23 = vld [vmem:[%s9109_s17 + $0x60] sm:$0xff] }
 0x783   : > { %v7260_v3 = vpop.f32.mrf.mxu2 }
 0x784   : > { %v7316_v28 = vadd.f32 %v7260_v3, %v7154_v20  ;;  %v1392_v20 = vmul.f32 %v8592_v23, %v8592_v23 }
 0x785   : > { %v6799_v52 = vpop.f32.mrf.mxu0  ;;  %v7562_v59 = vpop.f32.mrf.mxu3 }
 0x786   : > { %v6853_v49 = vadd.f32 %v6799_v52, %v10860_v57  ;;  %v7618_v4 = vadd.f32 %v7562_v59, %v7316_v28 }
 0x787   : > { %v7101_v14 = vpop.f32.mrf.mxu1 }
 0x788   : > { %7650 = vst [vmem:[%s9109_s17 + $0x298] sm:$0xff] %v7618_v4  ;;  %v7681_v63 = vadd.f32 %v7680_v8, %v7618_v4  ;;  %v7719_v11 = vmul.f32 %v7618_v4, %v7618_v4  ;;  %v7155_v10 = vadd.f32 %v7101_v14, %v6853_v49  ;;  %v8594_v49 = vld [vmem:[#allocation2 + $0x698] sm:$0xff] }
 0x789   : > { %v7803_v59 = vadd.f32 %v8594_v49, %v7802_v60 }
 0x78a   : > { %v7750_v26 = vadd.f32 %v7749_v37, %v7719_v11 }
 0x78b   : > { %v7263_v43 = vpop.f32.mrf.mxu2 }
 0x78c   : > { %v7317_v0 = vadd.f32 %v7263_v43, %v7155_v10 }
 0x78d   : > { %v6802_v51 = vpop.f32.mrf.mxu0  ;;  %v7565_v57 = vpop.f32.mrf.mxu3 }
 0x78e   : > { %v6854_v35 = vadd.f32 %v6802_v51, %v10866_v17  ;;  %v7619_v50 = vadd.f32 %v7565_v57, %v7317_v0  ;;  %v8588_v17 = vld [vmem:[%s9109_s17 + $0x20] sm:$0xff]  ;;  %v7804_v51 = vadd.f32 %v8597_v30, %v7803_v59 }
 0x78f   : > { %v7104_v24 = vpop.f32.mrf.mxu1  ;;  %v1390_v41 = vmul.f32 %v8588_v17, %v8588_v17  ;;  %v8596_v0 = vld [vmem:[%s9109_s17 + $0xc0] sm:$0xff] }
 0x790   : > { %7651 = vst [vmem:[%s9109_s17 + $0x2b8] sm:$0xff] %v7619_v50  ;;  %v7682_v29 = vadd.f32 %v7681_v63, %v7619_v50  ;;  %v7720_v34 = vmul.f32 %v7619_v50, %v7619_v50  ;;  %v7156_v36 = vadd.f32 %v7104_v24, %v6854_v35  ;;  %v1395_v42 = vmul.f32 %v8596_v0, %v8596_v0  ;;  %v8598_v24 = vld [vmem:[%s9109_s17 + $0xe0] sm:$0xff] }
 0x791   : > { %v1421_v8 = vadd.f32 %v1390_v41, %v1389_v46  ;;  %v1396_v22 = vmul.f32 %v8598_v24, %v8598_v24  ;;  %v8601_v17 = vld [vmem:[%s9109_s17 + $0x120] sm:$0xff] }
 0x792   : > { %v7751_v47 = vadd.f32 %v7750_v26, %v7720_v34  ;;  %v1398_v41 = vmul.f32 %v8601_v17, %v8601_v17  ;;  %v8602_v46 = vld [vmem:[%s9109_s17 + $0x140] sm:$0xff] }
 0x793   : > { %v7266_v5 = vpop.f32.mrf.mxu2  ;;  %v1422_v28 = vadd.f32 %v1421_v8, %v1391_v44  ;;  %v1399_v31 = vmul.f32 %v8602_v46, %v8602_v46  ;;  %v8603_v44 = vld [vmem:[#allocation2 + $0x6e0] sm:$0xff] }
 0x794   : > { %v7318_v32 = vadd.f32 %v7266_v5, %v7156_v36  ;;  %v8599_v36 = vld [vmem:[%s9109_s17 + $0x100] sm:$0xff] }
 0x795   : > { %v6805_v58 = vpop.f32.mrf.mxu0  ;;  %v7568_v2 = vpop.f32.mrf.mxu3  ;;  %v1423_v14 = vadd.f32 %v1422_v28, %v1392_v20  ;;  %v8604_v8 = vld [vmem:[%s9109_s17 + $0x160] sm:$0xff] }
 0x796   : > { %v6855_v55 = vadd.f32 %v6805_v58, %v10872_v6  ;;  %v7620_v16 = vadd.f32 %v7568_v2, %v7318_v32  ;;  %v8600_v32 = vld [vmem:[#allocation2 + $0x6d8] sm:$0xff]  ;;  %v1400_v23 = vmul.f32 %v8604_v8, %v8604_v8  ;;  %v8609_v0 = vld [vmem:[#allocation2 + $0x720] sm:$0xff] }
 0x797   : > { %v7107_v40 = vpop.f32.mrf.mxu1  ;;  %v1424_v43 = vadd.f32 %v1423_v14, %v1393_v1  ;;  %v7805_v13 = vadd.f32 %v8600_v32, %v7804_v51  ;;  %v8606_v1 = vld [vmem:[#allocation2 + $0x718] sm:$0xff] }
 0x798   : > { %7652 = vst [vmem:[%s9109_s17 + $0x2d8] sm:$0xff] %v7620_v16  ;;  %v7683_v21 = vadd.f32 %v7682_v29, %v7620_v16  ;;  %v7721_v18 = vmul.f32 %v7620_v16, %v7620_v16  ;;  %v7157_v37 = vadd.f32 %v7107_v40, %v6855_v55 }
 0x799   : > { %v1425_v50 = vadd.f32 %v1424_v43, %v1394_v15  ;;  %v7806_v25 = vadd.f32 %v8603_v44, %v7805_v13  ;;  %v8613_v13 = vld [vmem:[%s9109_s17 + $0x220] sm:$0xff] }
 0x79a   : > { %v7752_v3 = vadd.f32 %v7751_v47, %v7721_v18  ;;  %v1397_v47 = vmul.f32 %v8599_v36, %v8599_v36 }
 0x79b   : > { %v7269_v6 = vpop.f32.mrf.mxu2 }
 0x79c   : > { %v7319_v52 = vadd.f32 %v7269_v6, %v7157_v37  ;;  %v8605_v6 = vld [vmem:[%s9109_s17 + $0x180] sm:$0xff] }
 0x79d   : > { %v6808_v4 = vpop.f32.mrf.mxu0  ;;  %v7571_v11 = vpop.f32.mrf.mxu3  ;;  %v1401_v28 = vmul.f32 %v8605_v6, %v8605_v6  ;;  %v8619_v6 = vld [vmem:[%s9109_s17 + $0x280] sm:$0xff] }
 0x79e   : > { %v6856_v63 = vadd.f32 %v6808_v4, %v10878_v61  ;;  %v7621_v10 = vadd.f32 %v7571_v11, %v7319_v52  ;;  %v1426_v61 = vadd.f32 %v1425_v50, %v1395_v42  ;;  %v7807_v52 = vadd.f32 %v8606_v1, %v7806_v25  ;;  %v8607_v4 = vld [vmem:[%s9109_s17 + $0x1a0] sm:$0xff]  ;;  %v8616_v25 = vld [vmem:[#allocation2 + $0x798] sm:$0xff] }
 0x79f   : > { %v7110_v26 = vpop.f32.mrf.mxu1  ;;  %v1402_v14 = vmul.f32 %v8607_v4, %v8607_v4  ;;  %v8621_v4 = vld [vmem:[%s9109_s17 + $0x2a0] sm:$0xff] }
 0x7a0   : > { %7653 = vst [vmem:[%s9109_s17 + $0x2f8] sm:$0xff] %v7621_v10  ;;  %v7684_v35 = vadd.f32 %v7683_v21, %v7621_v10  ;;  %v7722_v57 = vmul.f32 %v7621_v10, %v7621_v10  ;;  %v7158_v62 = vadd.f32 %v7110_v26, %v6856_v63  ;;  %v1427_v58 = vadd.f32 %v1426_v61, %v1396_v22  ;;  %v8608_v26 = vld [vmem:[%s9109_s17 + $0x1c0] sm:$0xff] }
 0x7a1   : > { %v1403_v43 = vmul.f32 %v8608_v26, %v8608_v26  ;;  %v7808_v42 = vadd.f32 %v8609_v0, %v7807_v52  ;;  %v8620_v52 = vld [vmem:[#allocation2 + $0x7d8] sm:$0xff]  ;;  %v8623_v0 = vld [vmem:[%s9109_s17 + $0x2c0] sm:$0xff] }
 0x7a2   : > { %v7753_v29 = vadd.f32 %v7752_v3, %v7722_v57  ;;  %v1428_v56 = vadd.f32 %v1427_v58, %v1397_v47  ;;  %v8610_v57 = vld [vmem:[%s9109_s17 + $0x1e0] sm:$0xff]  ;;  %v8612_v47 = vld [vmem:[#allocation2 + $0x758] sm:$0xff] }
 0x7a3   : > { %v7272_v34 = vpop.f32.mrf.mxu2  ;;  %v1404_v50 = vmul.f32 %v8610_v57, %v8610_v57 }
 0x7a4   : > { %v7320_v5 = vadd.f32 %v7272_v34, %v7158_v62  ;;  %v1429_v18 = vadd.f32 %v1428_v56, %v1398_v41  ;;  %v8615_v56 = vld [vmem:[%s9109_s17 + $0x240] sm:$0xff] }
 0x7a5   : > { %v6811_v7 = vpop.f32.mrf.mxu0  ;;  %v7574_v2 = vpop.f32.mrf.mxu3  ;;  %v1407_v46 = vmul.f32 %v8615_v56, %v8615_v56  ;;  %v8630_v56 = vld [vmem:[#allocation2 + $0x860] sm:$0xff] }
 0x7a6   : > { %v6857_v55 = vadd.f32 %v6811_v7, %v10884_v45  ;;  %v7622_v16 = vadd.f32 %v7574_v2, %v7320_v5  ;;  %v1430_v45 = vadd.f32 %v1429_v18, %v1399_v31  ;;  %v7809_v5 = vadd.f32 %v8612_v47, %v7808_v42  ;;  %v8614_v2 = vld [vmem:[#allocation2 + $0x760] sm:$0xff] }
 0x7a7   : > { %v7113_v40 = vpop.f32.mrf.mxu1  ;;  %v1406_v7 = vmul.f32 %v8613_v13, %v8613_v13  ;;  %v8617_v18 = vld [vmem:[%s9109_s17 + $0x260] sm:$0xff]  ;;  %v1411_v42 = vmul.f32 %v8623_v0, %v8623_v0  ;;  %v8628_v13 = vld [vmem:[#allocation2 + $0x858] sm:$0xff] }
 0x7a8   : > { %7654 = vst [vmem:[%s9109_s17 + $0x318] sm:$0xff] %v7622_v16  ;;  %v7685_v60 = vadd.f32 %v7684_v35, %v7622_v16  ;;  %v7723_v21 = vmul.f32 %v7622_v16, %v7622_v16  ;;  %v7159_v20 = vadd.f32 %v7113_v40, %v6857_v55  ;;  %v1431_v59 = vadd.f32 %v1430_v45, %v1400_v23 }
 0x7a9   : > { %v7810_v16 = vadd.f32 %v8614_v2, %v7809_v5  ;;  %v1408_v8 = vmul.f32 %v8617_v18, %v8617_v18 }
 0x7aa   : > { %v7754_v37 = vadd.f32 %v7753_v29, %v7723_v21  ;;  %v1432_v10 = vadd.f32 %v1431_v59, %v1401_v28  ;;  %v8611_v29 = vld [vmem:[%s9109_s17 + $0x200] sm:$0xff]  ;;  %v1409_v28 = vmul.f32 %v8619_v6, %v8619_v6 }
 0x7ab   : > { %v7275_v3 = vpop.f32.mrf.mxu2  ;;  %v1405_v34 = vmul.f32 %v8611_v29, %v8611_v29  ;;  %v8626_v29 = vld [vmem:[#allocation2 + $0x820] sm:$0xff] }
 0x7ac   : > { %v7321_v19 = vadd.f32 %v7275_v3, %v7159_v20  ;;  %v1433_v35 = vadd.f32 %v1432_v10, %v1402_v14  ;;  %v1410_v14 = vmul.f32 %v8621_v4, %v8621_v4  ;;  %v8622_v10 = vld [vmem:[#allocation2 + $0x7e0] sm:$0xff] }
 0x7ad   : > { %v6814_v49 = vpop.f32.mrf.mxu0  ;;  %v7577_v15 = vpop.f32.mrf.mxu3  ;;  %v8633_v6 = vld [vmem:[%s9109_s17 + $0x380] sm:$0xff] }
 0x7ae   : > { %v6858_v27 = vadd.f32 %v6814_v49, %v10890_v53  ;;  %v7623_v63 = vadd.f32 %v7577_v15, %v7321_v19  ;;  %v1434_v53 = vadd.f32 %v1433_v35, %v1403_v43  ;;  %v8624_v35 = vld [vmem:[#allocation2 + $0x818] sm:$0xff]  ;;  %v8634_v4 = vld [vmem:[%s9109_s17 + $0x3a0] sm:$0xff] }
 0x7af   : > { %v7116_v11 = vpop.f32.mrf.mxu1 }
 0x7b0   : > { %7655 = vst [vmem:[%s9109_s17 + $0x338] sm:$0xff] %v7623_v63  ;;  %v7686_v30 = vadd.f32 %v7685_v60, %v7623_v63  ;;  %v7724_v51 = vmul.f32 %v7623_v63, %v7623_v63  ;;  %v7160_v24 = vadd.f32 %v7116_v11, %v6858_v27  ;;  %v1435_v32 = vadd.f32 %v1434_v53, %v1404_v50 }
 0x7b1   : > { %v7811_v60 = vadd.f32 %v8616_v25, %v7810_v16 }
 0x7b2   : > { %v7755_v22 = vadd.f32 %v7754_v37, %v7724_v51  ;;  %v1436_v40 = vadd.f32 %v1435_v32, %v1405_v34  ;;  %v8618_v37 = vld [vmem:[#allocation2 + $0x7a0] sm:$0xff] }
 0x7b3   : > { %v7278_v62 = vpop.f32.mrf.mxu2  ;;  %v7812_v3 = vadd.f32 %v8618_v37, %v7811_v60 }
 0x7b4   : > { %v7322_v61 = vadd.f32 %v7278_v62, %v7160_v24  ;;  %v1437_v21 = vadd.f32 %v1436_v40, %v1406_v7  ;;  %v8625_v24 = vld [vmem:[%s9109_s17 + $0x2e0] sm:$0xff] }
 0x7b5   : > { %v6817_v36 = vpop.f32.mrf.mxu0  ;;  %v7580_v17 = vpop.f32.mrf.mxu3  ;;  %v7813_v49 = vadd.f32 %v8620_v52, %v7812_v3  ;;  %v8944_v52 = vmov 0.0  }
 0x7b6   : > { %v6859_v58 = vadd.f32 %v6817_v36, %v10896_v54  ;;  %v7624_v41 = vadd.f32 %v7580_v17, %v7322_v61  ;;  %v1438_v45 = vadd.f32 %v1437_v21, %v1407_v46  ;;  %v8627_v36 = vld [vmem:[%s9109_s17 + $0x300] sm:$0xff]  ;;  %7783 = vst [vmem:[%s9114_s9] sm:$0x1] %v8944_v52 }
 0x7b7   : > { %v7119_v55 = vpop.f32.mrf.mxu1  ;;  %v7814_v26 = vadd.f32 %v8622_v10, %v7813_v49  ;;  %v1413_v47 = vmul.f32 %v8627_v36, %v8627_v36  ;;  %v8629_v17 = vld [vmem:[%s9109_s17 + $0x320] sm:$0xff] }
 0x7b8   : > { %7656 = vst [vmem:[%s9109_s17 + $0x358] sm:$0xff] %v7624_v41  ;;  %v7687_v31 = vadd.f32 %v7686_v30, %v7624_v41  ;;  %v7725_v44 = vmul.f32 %v7624_v41, %v7624_v41  ;;  %v7161_v23 = vadd.f32 %v7119_v55, %v6859_v58  ;;  %v1439_v59 = vadd.f32 %v1438_v45, %v1408_v8 }
 0x7b9   : > { %v7815_v57 = vadd.f32 %v8624_v35, %v7814_v26  ;;  %v1414_v41 = vmul.f32 %v8629_v17, %v8629_v17 }
 0x7ba   : > { %v7756_v54 = vadd.f32 %v7755_v22, %v7725_v44  ;;  %v1440_v43 = vadd.f32 %v1439_v59, %v1409_v28  ;;  %v1412_v22 = vmul.f32 %v8625_v24, %v8625_v24  ;;  %v8631_v44 = vld [vmem:[%s9109_s17 + $0x340] sm:$0xff]  ;;  %v1417_v28 = vmul.f32 %v8633_v6, %v8633_v6 }
 0x7bb   : > { %v7281_v20 = vpop.f32.mrf.mxu2  ;;  %v7816_v34 = vadd.f32 %v8626_v29, %v7815_v57  ;;  %v1415_v25 = vmul.f32 %v8631_v44, %v8631_v44  ;;  %v8636_v57 = vld [vmem:[%s9109_s17 + $0x3e0] sm:$0xff] }
 0x7bc   : > { %v7323_v19 = vadd.f32 %v7281_v20, %v7161_v23  ;;  %v1441_v50 = vadd.f32 %v1440_v43, %v1410_v14  ;;  %v8632_v23 = vld [vmem:[%s9109_s17 + $0x360] sm:$0xff]  ;;  %v1418_v14 = vmul.f32 %v8634_v4, %v8634_v4 }
 0x7bd   : > { %v6820_v1 = vpop.f32.mrf.mxu0  ;;  %v7583_v15 = vpop.f32.mrf.mxu3  ;;  %v7817_v7 = vadd.f32 %v8628_v13, %v7816_v34  ;;  %v8635_v43 = vld [vmem:[%s9109_s17 + $0x3c0] sm:$0xff] }
 0x7be   : > { %v6860_v27 = vadd.f32 %v6820_v1, %v10902_v9  ;;  %v7625_v63 = vadd.f32 %v7583_v15, %v7323_v19  ;;  %v1442_v61 = vadd.f32 %v1441_v50, %v1411_v42  ;;  %v1419_v0 = vmul.f32 %v8635_v43, %v8635_v43  ;;  %v7787_v29 = vld [vmem:[%s9114_s9] sm:$0x1] }
 0x7bf   : > { %v7122_v11 = vpop.f32.mrf.mxu1  ;;  %v7818_v46 = vadd.f32 %v8630_v56, %v7817_v7  ;;  %v1420_v50 = vmul.f32 %v8636_v57, %v8636_v57 }
 0x7c0   : > { %7657 = vst [vmem:[%s9109_s17 + $0x378] sm:$0xff] %v7625_v63  ;;  %v7688_v30 = vadd.f32 %v7687_v31, %v7625_v63  ;;  %v7726_v51 = vmul.f32 %v7625_v63, %v7625_v63  ;;  %v7162_v62 = vadd.f32 %v7122_v11, %v6860_v27  ;;  %v1443_v58 = vadd.f32 %v1442_v61, %v1412_v22 }
 0x7c1   : > { %v7819_v18 = vrot.slane %v7818_v46, 4 }
 0x7c2   : > { %v7757_v9 = vadd.f32 %v7756_v54, %v7726_v51  ;;  %v1444_v31 = vadd.f32 %v1443_v58, %v1413_v47  ;;  %v1416_v54 = vmul.f32 %v8632_v23, %v8632_v23 }
 0x7c3   : > { %v7284_v53 = vpop.f32.mrf.mxu2  ;;  %v7820_v3 = vadd.f32 %v7819_v18, %v7818_v46 }
 0x7c4   : > { %v7324_v5 = vadd.f32 %v7284_v53, %v7162_v62  ;;  %v1445_v8 = vadd.f32 %v1444_v31, %v1414_v41 }
 0x7c5   : > { %v6823_v32 = vpop.f32.mrf.mxu0  ;;  %v7586_v2 = vpop.f32.mrf.mxu3  ;;  %v7821_v49 = vrot.slane %v7820_v3, 2 }
 0x7c6   : > { %v6861_v55 = vadd.f32 %v6823_v32, %v10908_v33  ;;  %v7626_v16 = vadd.f32 %v7586_v2, %v7324_v5  ;;  %v1446_v45 = vadd.f32 %v1445_v8, %v1415_v25 }
 0x7c7   : > { %v7125_v40 = vpop.f32.mrf.mxu1  ;;  %v7822_v10 = vadd.f32 %v7821_v49, %v7820_v3 }
 0x7c8   : > { %7658 = vst [vmem:[%s9109_s17 + $0x398] sm:$0xff] %v7626_v16  ;;  %v7689_v60 = vadd.f32 %v7688_v30, %v7626_v16  ;;  %v7727_v21 = vmul.f32 %v7626_v16, %v7626_v16  ;;  %v7163_v20 = vadd.f32 %v7125_v40, %v6861_v55  ;;  %v1447_v59 = vadd.f32 %v1446_v45, %v1416_v54  ;;  %v11419_v55 = vld [vmem:[#allocation108_spill] sm:$0xff] }
 0x7c9   : > { %v7823_v51 = vrot.slane %v7822_v10, 1  ;;  %v3391_v2 = vrot.slane %v11419_v55, 4 }
 0x7ca   : > { %v7758_v33 = vadd.f32 %v7757_v9, %v7727_v21  ;;  %v1448_v26 = vadd.f32 %v1447_v59, %v1417_v28 }
 0x7cb   : > { %v7287_v37 = vpop.f32.mrf.mxu2  ;;  %v7824_v62 = vadd.f32 %v7823_v51, %v7822_v10  ;;  %v3392_v44 = vadd.f32 %v3391_v2, %v11419_v55 }
 0x7cc   : > { %v7325_v19 = vadd.f32 %v7287_v37, %v7163_v20  ;;  %v1449_v35 = vadd.f32 %v1448_v26, %v1418_v14 }
 0x7cd   : > { %v6826_v1 = vpop.f32.mrf.mxu0  ;;  %v7589_v15 = vpop.f32.mrf.mxu3  ;;  %v7825_v61 = vadd.f32 %v7824_v62, %v7787_v29 }
 0x7ce   : > { %v6862_v27 = vadd.f32 %v6826_v1, %v10914_v38  ;;  %v7627_v63 = vadd.f32 %v7589_v15, %v7325_v19  ;;  %v1450_v9 = vadd.f32 %v1449_v35, %v1419_v0 }
 0x7cf   : > { %v7128_v11 = vpop.f32.mrf.mxu1  ;;  %7826 = vst [vmem:[%s9114_s9] sm:$0x1] %v7825_v61 }
 0x7d0   : > { %7659 = vst [vmem:[%s9109_s17 + $0x3b8] sm:$0xff] %v7627_v63  ;;  %v7690_v42 = vadd.f32 %v7689_v60, %v7627_v63  ;;  %v7728_v30 = vmul.f32 %v7627_v63, %v7627_v63  ;;  %v7164_v24 = vadd.f32 %v7128_v11, %v6862_v27  ;;  %v1451_v36 = vadd.f32 %v1450_v9, %v1420_v50 }
 0x7d2   : > { %v7759_v22 = vadd.f32 %v7758_v33, %v7728_v30  ;;  %v1452_v17 = vrot.slane %v1451_v36, 4 }
 0x7d3   : > { %v7290_v38 = vpop.f32.mrf.mxu2 }
 0x7d4   : > { %v7326_v53 = vadd.f32 %v7290_v38, %v7164_v24  ;;  %v1453_v46 = vadd.f32 %v1452_v17, %v1451_v36 }
 0x7d5   : > { %v6829_v34 = vpop.f32.mrf.mxu0  ;;  %v7592_v5 = vpop.f32.mrf.mxu3 }
 0x7d6   : > { %v6863_v47 = vadd.f32 %v6829_v34, %v10920_v39  ;;  %v7628_v32 = vadd.f32 %v7592_v5, %v7326_v53  ;;  %v5513_v39 = vrot.slane %v10727_v12, 4  ;;  %v1454_v8 = vrot.slane %v1453_v46, 2 }
 0x7d7   : > { %v7131_v13 = vpop.f32.mrf.mxu1 }
 0x7d8   : > { %7660 = vst [vmem:[%s9109_s17 + $0x3d8] sm:$0xff] %v7628_v32  ;;  %v7691_v7 = vadd.f32 %v7690_v42, %v7628_v32  ;;  %v7729_v58 = vmul.f32 %v7628_v32, %v7628_v32  ;;  %v7165_v41 = vadd.f32 %v7131_v13, %v6863_v47  ;;  %v5514_v60 = vadd.f32 %v5513_v39, %v10727_v12 }
 0x7da   : > { %v7760_v16 = vadd.f32 %v7759_v22, %v7729_v58 }
 0x7db   : > { %v7293_v40 = vpop.f32.mrf.mxu2 }
 0x7dc   : > { %v7327_v56 = vadd.f32 %v7293_v40, %v7165_v41 }
 0x7dd   : > { %v7595_v31 = vpop.f32.mrf.mxu3 }
 0x7de   : > { %v7629_v25 = vadd.f32 %v7595_v31, %v7327_v56 }
 0x7e0   : > { %7661 = vst [vmem:[%s9109_s17 + $0x3f8] sm:$0xff] %v7629_v25  ;;  %v7692_v21 = vadd.f32 %v7691_v7, %v7629_v25  ;;  %v7730_v18 = vmul.f32 %v7629_v25, %v7629_v25 }
 0x7e1   : > { %8808 = shalt.err (!%p8805_p13)
}
 0x7e2   : > { %s8945_s2 = smov 512   ;;  %s8946_s17 = smov 32   ;;  %v3393_v12 = vrot.slane %v3392_v44, 2  ;;  %v7693_v23 = vrot.slane %v7692_v21, 4  ;;  %v7761_v54 = vadd.f32 %v7760_v16, %v7730_v18  ;;  %v5515_v20 = vrot.slane %v5514_v60, 2 }
 0x7e3   : > { %8111 = dma.vmem_to_hbm [thread:$0]  (%p9030_p4), %s7853_s15, 16384, %s7855_s21, %s7828_s22, %s8945_s2, %s8945_s2, %s8946_s17   ;;  %v1455_v3 = vadd.f32 %v1454_v8, %v1453_v46  ;;  %vm7771_vm4 = vcmask 1042432   ;;  %vm7774_vm5 = vcmask 1044480   ;;  %vm7777_vm6 = vcmask 1046528  }
 0x7e4   : > { %v7694_v33 = vadd.f32 %v7693_v23, %v7692_v21  ;;  %v7762_v37 = vrot.slane %v7761_v54, 4  ;;  %v3394_v45 = vadd.f32 %v3393_v12, %v3392_v44  ;;  %v5516_v19 = vadd.f32 %v5515_v20, %v5514_v60  ;;  %s8089_s28 = sshll.u32 %s8925_s27, 3  ;;  %s7880_s22 = scalar_lea.hbm %s11163_s7, %s8925_s27 }
 0x7e5   : > { %v1456_v49 = vrot.slane %v1455_v3, 1  ;;  %s7867_s14 = scalar_lea.hbm %s11162_s6, %s8089_s28  ;;  %s7832_s23 = sand.u32 1, %s9018_s30  }
 0x7e6   : > { %v7695_v6 = vrot.slane %v7694_v33, 2  ;;  %v7763_v28 = vadd.f32 %v7762_v37, %v7761_v54  ;;  %v3395_v59 = vrot.slane %v3394_v45, 1  ;;  %v5517_v27 = vrot.slane %v5516_v19, 1  ;;  %s7869_s16 = sshll.u32 %s9111_s26, 4  ;;  %s7871_s19 = sshll.u32 %s7867_s14, 4  ;;  %s7870_s16 = int_to_ptr.vmem [resolvable:$true] %s7869_s16  ;;  %s7872_s19 = int_to_ptr.hbm [resolvable:$true] %s7871_s19 }
 0x7e7   : > { %v1457_v11 = vadd.f32 %v1456_v49, %v1455_v3  ;;  %s7882_s18 = sshll.u32 %s9114_s9, 4  ;;  %s11101_s20 = sshll.u32 %s7880_s22, 4  ;;  %s11103_s18 = int_to_ptr.vmem [resolvable:$true] %s7882_s18  ;;  %s7885_s20 = int_to_ptr.hbm [resolvable:$true] %s11101_s20 }
 0x7e8   : > { %v7696_v1 = vadd.f32 %v7695_v6, %v7694_v33  ;;  %v7764_v52 = vrot.slane %v7763_v28, 2  ;;  %v3396_v10 = vadd.f32 %v3395_v59, %v3394_v45  ;;  %v5518_v43 = vadd.f32 %v5517_v27, %v5516_v19  ;;  %s7833_s27 = scalar_lea.sflag [#allocation14], %s7832_s23  ;;  %s8823_s30 = sshra.s32 %s7872_s19, 4  ;;  %s8824_s30 = int_to_ptr.hbm [resolvable:$true] %s8823_s30 }
 0x7e9   : > { %s8825_s10 = scalar_lea.hbm %s8824_s30, 8  ;;  %s8829_s2 = scalar_lea.hbm %s11162_s6, 16 }
 0x7ea   : > { %v7697_v4 = vrot.slane %v7696_v1, 1  ;;  %v7765_v14 = vadd.f32 %v7764_v52, %v7763_v28  ;;  %p8826_p0 = scmp.ne.s32.totalorder %s8824_s30, %s8825_s10  ;;  %p8830_p3 = scmp.lt.s32.totalorder %s8824_s30, %s11162_s6 }
 0x7eb   : > { %p8831_p5 = scmp.lt.s32.totalorder %s8829_s2, %s8825_s10 }
 0x7ec   : > { %v7698_v15 = vadd.f32 %v7697_v4, %v7696_v1  ;;  %v7766_v63 = vrot.slane %v7765_v14, 1  ;;  %p8827_p1 = pnand %p8826_p0, %p9030_p4 }
 0x7ed   : > { %p8832_p6 = por %p8831_p5, %p8830_p3 }
 0x7ee   : > { %v7772_v26 = vsel %vm7771_vm4, %v10739_v48, %v7698_v15  ;;  %v7767_v42 = vadd.f32 %v7766_v63, %v7765_v14  ;;  %p8828_p2 = pneg %p8827_p1 }
 0x7ef   : > { %v7773_v0 = vsel %vm3425_vm2, %v7772_v26, %v1457_v11 }
 0x7f0   : > { %v7775_v30 = vsel %vm7774_vm5, %v7773_v0, %v3396_v10  ;;  %p8833_p7 = pnand %p8832_p6, %p8828_p2 }
 0x7f1   : > { %v7776_v51 = vsel %vm1506_vm0, %v7775_v30, %v5518_v43 }
 0x7f2   : > { %v7778_v48 = vsel %vm7777_vm6, %v7776_v51, %v7767_v42 }
 0x7f3   : > { %7786 = vst [vmem:[%s9111_s26] sm:$0xff] %v7778_v48 }
 0x7f4   : > { %8836 = shalt.err (!%p8833_p7)
}
 0x7f5   : > { %8112 = dma.vmem_to_hbm [thread:$0]  (%p9030_p4), %s7870_s16, 128, %s7872_s19, %s7833_s27  }
 0x7f6   : > { %s8851_s26 = sshra.s32 %s7885_s20, 4  ;;  %s8857_s15 = scalar_lea.hbm %s11163_s7, 2  ;;  %s8852_s26 = int_to_ptr.hbm [resolvable:$true] %s8851_s26 }
 0x7f7   : > { %s8853_s8 = scalar_lea.hbm %s8852_s26, 1  ;;  %p8858_p12 = scmp.lt.s32.totalorder %s8852_s26, %s11163_s7 }
 0x7f8   : > { %p8854_p9 = scmp.ne.s32.totalorder %s8852_s26, %s8853_s8  ;;  %p8859_p13 = scmp.lt.s32.totalorder %s8857_s15, %s8853_s8 }
 0x7fa   : > { %p8855_p10 = pnand %p8854_p9, %p9030_p4  ;;  %p8860_p0 = por %p8859_p13, %p8858_p12 }
 0x7fc   : > { %p8856_p11 = pneg %p8855_p10 }
 0x7fe   : > { %p8861_p1 = pnand %p8860_p0, %p8856_p11 }
 0x800   : > { %8864 = shalt.err (!%p8861_p1)
}
 0x801   : > { %8113 = dma.vmem_to_hbm [thread:$0]  (%p9030_p4), %s11103_s18, 16, %s7885_s20, %s7833_s27  }
 0x802 PF: > { %p8148_p2 = scmp.ge.s32.totalorder %s8933_s29, 2  ;;  %s7896_s16 = sand.u32 1, %s8913_s24  }
 0x803   : > { %s7897_s19 = scalar_lea.sflag [#allocation6], %s7896_s16 }
 0x804   : > { %p8131_p3 = pnand %p8148_p2, %p9039_p8 }
 0x806   : > { %p8132_p5 = pneg %p8131_p3 }
 0x808   : > { %8904 = dma.done.wait (%p8132_p5), %s7897_s19, 16384  }
 0x809   : > { %8906 = vsyncadd (%p8132_p5), %s7897_s19, 4294950912  ;;  %s11421_s30 = sadd.s32 4294967294, %s8933_s29  }
 0x80a   : > { %s7906_s10 = sand.u32 1, %s11421_s30  }
 0x80b   : > { %s7907_s11 = scalar_lea.sflag [#allocation14], %s7906_s10 }
 0x80c   : > { %8908 = dma.done.wait (%p8132_p5), %s7907_s11, 144  }
 0x80d   : > { %8910 = vsyncadd (%p8132_p5), %s7907_s11, 4294967152  ;;  %s27_s29 = sadd.s32 1, %s8933_s29   ;;  %s11422_s18 = sld [smem:[#allocation28_spill]] }
 0x80e   : > { %p24_p4 = scmp.ge.s32.totalorder %s27_s29, 4   ;;  %s11423_s26 = sld [smem:[#allocation32_spill]] }
 0x80f   : > { %s11424_s27 = sld [smem:[#allocation29_spill]]  ;;  %s11426_s24 = smov %s8917_s25 }
 0x810   : > { %s11425_s28 = sld [smem:[#allocation30_spill]]  ;;  %26 = sbr.rel (!%p24_p4) target bundleno = 11 (0xb), region = 165 }
 0x813   : > { %s11427_s25 = smov %s11422_s18 }
 0x815   :  { %7922 = vsyncpa [#allocation5], 1 }
 0x816   :  { %7924 = vsyncpa [#allocation5 + $0x1], 1 }
 0x817   :  { %7925 = vsyncpa [#allocation8], 1 }
 0x818   :  { %7926 = vsyncpa [#allocation11], 1 }
 0x819   :  { %7927 = vsyncpa [#allocation6], 1 }
 0x81a   :  { %7929 = vsyncpa [#allocation6 + $0x1], 1 }
 0x81b   :  { %7930 = vsyncpa [#allocation14], 1 }
 0x81c   :  { %7932 = vsyncpa [#allocation14 + $0x1], 1 }
 0x81d   :  { %7933 = vsyncmov [#allocation3] }
 0x820   :  { %s7934_s20 = vpop.sfrf %7933 }
 0x821   :  { %p8092_p8 = scmp.ne.s32.totalorder %s7934_s20, 0 }
 0x823   :  { %7938 = shalt.err (%p8092_p8)  }
 0x824   :  { %7940 = vsyncmov [#allocation3 + $0x1] }
 0x827   :  { %s7941_s12 = vpop.sfrf %7940 }
 0x828   :  { %p8093_p6 = scmp.ne.s32.totalorder %s7941_s12, 0 }
 0x82a   :  { %7945 = shalt.err (%p8093_p6)  }

</bundles_post_ra>
